<compile_context>
chip_gen: v6e
topology: v6e:2x2x1
jax: 0.10.0
libtpu: 0.0.40
codegen_flags: <defaults>
</compile_context>

<pallas_src>
import functools

import jax
import jax.numpy as jnp
import numpy as np
from jax.experimental import pallas as pl
from jax.experimental.pallas import tpu as pltpu


BN_EPS = 1e-5
LAYER_STRIDE_PAD = [(1, 0), (2, 1), (2, 1), (2, 1), (2, 1)]


def _round_up(x, m):
    return (x + m - 1) // m * m


def _pick_mxu_tile():
    """256x256 output tiles on v6e/v7x (2x256 MXU); 128 on v5e and older."""
    try:
        kind = jax.devices()[0].device_kind.lower()
    except Exception:
        return 128
    for old in ("v2", "v3", "v4", "v5"):
        if old in kind:
            return 128
    return 256


# ----------------------------------------------------------------------------
# Pallas kernels
# ----------------------------------------------------------------------------
def _mm_kernel(a_ref, b_ref, o_ref, *rest, act, with_sums):
    """Batched (per-phase) tiled matmul with fused epilogue.

    grid = (phase, M-blocks, N-blocks, K-blocks).  Accumulates over K in a
    f32 VMEM scratch.  Epilogue (last K step only): optional tanh, the single
    store of the output tile, and (for BN layers) per-channel sum and
    sum-of-squares so BatchNorm statistics need no extra pass over the output.
    """
    if with_sums:
        sums_ref, acc_ref = rest
    else:
        (acc_ref,) = rest

    k = pl.program_id(3)

    @pl.when(k == 0)
    def _():
        acc_ref[...] = jnp.zeros_like(acc_ref)

    acc_ref[...] += jnp.dot(a_ref[...], b_ref[...],
                            preferred_element_type=jnp.float32)

    @pl.when(k == pl.num_programs(3) - 1)
    def _():
        acc = acc_ref[...]
        if act == "tanh":
            o_ref[...] = jnp.tanh(acc).astype(o_ref.dtype)
        else:
            o_ref[...] = acc.astype(o_ref.dtype)
        if with_sums:
            s1 = jnp.sum(acc, axis=0, keepdims=True)
            s2 = jnp.sum(acc * acc, axis=0, keepdims=True)
            sums_ref[...] = jnp.concatenate([s1, s2], axis=0)


def _bn_act_kernel(x_ref, scale_ref, shift_ref, o_ref, *, act):
    """Per-channel scale/shift + activation; output block = sub-pixel slot."""
    y = x_ref[...] * scale_ref[0] + shift_ref[0]
    if act == "relu":
        y = jnp.maximum(y, 0.0)
    elif act == "tanh":
        y = jnp.tanh(y)
    o_ref[...] = y.astype(o_ref.dtype)


# ----------------------------------------------------------------------------
# Pallas wrappers
# ----------------------------------------------------------------------------
def pallas_batched_matmul(a, b, *, act=None, with_sums=False, mxu_tile=256):
    """a: (P, M, K) @ b: (P, K, Cout) -> f32 (P, Mp, Np) [+ sums (P, MI, 2, Np)]."""
    P, M, K = a.shape
    Cout = b.shape[2]

    # Per-problem tile selection (no blanket 128x512 padding).
    tk = 512 if K >= 512 else _round_up(K, 128)
    Kp = _round_up(K, tk)
    tn = min(_round_up(Cout, 128), mxu_tile)
    Np = _round_up(Cout, tn)
    tm = _round_up(M, 8) if M <= mxu_tile else mxu_tile
    Mp = _round_up(M, tm)

    if (Mp, Kp) != (M, K):
        a = jnp.pad(a, ((0, 0), (0, Mp - M), (0, Kp - K)))
    if (Kp, Np) != (K, Cout):
        b = jnp.pad(b, ((0, 0), (0, Kp - K), (0, Np - Cout)))

    mi, nj, kk = Mp // tm, Np // tn, Kp // tk

    kernel = functools.partial(_mm_kernel, act=act, with_sums=with_sums)
    out_spec = pl.BlockSpec((None, tm, tn), lambda p, i, j, k: (p, i, j))
    if with_sums:
        out_shape = (jax.ShapeDtypeStruct((P, Mp, Np), jnp.float32),
                     jax.ShapeDtypeStruct((P, mi, 2, Np), jnp.float32))
        out_specs = (out_spec,
                     pl.BlockSpec((None, None, 2, tn),
                                  lambda p, i, j, k: (p, i, 0, j)))
    else:
        out_shape = jax.ShapeDtypeStruct((P, Mp, Np), jnp.float32)
        out_specs = out_spec

    return pl.pallas_call(
        kernel,
        out_shape=out_shape,
        grid_spec=pltpu.PrefetchScalarGridSpec(
            num_scalar_prefetch=0,
            grid=(P, mi, nj, kk),
            in_specs=[
                pl.BlockSpec((None, tm, tk), lambda p, i, j, k: (p, i, k)),
                pl.BlockSpec((None, tk, tn), lambda p, i, j, k: (p, k, j)),
            ],
            out_specs=out_specs,
            scratch_shapes=[pltpu.VMEM((tm, tn), jnp.float32)],
        ),
        compiler_params=pltpu.CompilerParams(
            dimension_semantics=("parallel", "parallel", "parallel",
                                 "arbitrary")),
    )(a, b)


def pallas_bn_act_interleave(conv, scale, shift, N, Hp, Wp, C, S, act):
    """conv: (S*S, N*Hp*Wp, C) phase-separated conv output (no padding).

    Applies y = x*scale + shift + activation and writes each phase into its
    interleaved sub-pixel slot; the (N, Hp*S, Wp*S, C) result is a pure
    reshape of the kernel output (no XLA transpose pass).
    """
    rows = N * Hp
    x4 = conv.reshape(S * S, rows, Wp, C)

    # Large blocks for this mem-bound pass: as many (n, h)-rows as fit ~4 MiB.
    R = rows
    while R % 2 == 0 and R * Wp * C * 4 > (4 << 20):
        R //= 2

    out = pl.pallas_call(
        functools.partial(_bn_act_kernel, act=act),
        out_shape=jax.ShapeDtypeStruct((rows, S, Wp, S * C), jnp.float32),
        grid_spec=pltpu.PrefetchScalarGridSpec(
            num_scalar_prefetch=0,
            grid=(rows // R, S, S),
            in_specs=[
                pl.BlockSpec((None, R, Wp, C),
                             lambda i, ph, pw: (ph * S + pw, i, 0, 0)),
                pl.BlockSpec((1, C), lambda i, ph, pw: (0, 0)),
                pl.BlockSpec((1, C), lambda i, ph, pw: (0, 0)),
            ],
            out_specs=pl.BlockSpec((R, None, Wp, C),
                                   lambda i, ph, pw: (i, ph, 0, pw)),
        ),
        compiler_params=pltpu.CompilerParams(
            dimension_semantics=("parallel", "parallel", "parallel")),
    )(x4, scale.reshape(1, C), shift.reshape(1, C))
    return out.reshape(N, Hp * S, Wp * S, C)


# ----------------------------------------------------------------------------
# Polyphase lowering of ConvTranspose2d(k=4, s=2, p=1)
# ----------------------------------------------------------------------------
# Output pixel (2m+ph, 2n+pw) only touches a 2x2 input neighbourhood and 2x2
# of the 16 kernel taps, so the deconv splits into 4 dense matmuls (K=4*Cin).
_PHASE_KSEL = ((3, 1), (2, 0))     # _PHASE_KSEL[phase][tap] -> kernel index


def _phase_patches(x):
    """x: (N, H, W, C) -> (4, N*H*W, 4*C); phase index p = 2*ph + pw."""
    N, H, W, C = x.shape
    xp = jnp.pad(x, ((0, 0), (1, 1), (1, 1), (0, 0)))
    phases = []
    for ph in range(2):
        for pw in range(2):
            taps = [xp[:, ph + dh:ph + dh + H, pw + dw:pw + dw + W, :]
                    for dh in (0, 1) for dw in (0, 1)]
            phases.append(jnp.stack(taps, axis=3).reshape(N * H * W, 4 * C))
    return jnp.stack(phases, axis=0)


def _phase_weights(w):
    """w: ConvTranspose2d weight (Cin, Cout, 4, 4) -> (4, 4*Cin, Cout)."""
    cin, cout = w.shape[0], w.shape[1]
    mats = []
    for ph in range(2):
        for pw in range(2):
            taps = jnp.stack(
                [jnp.stack([w[:, :, _PHASE_KSEL[ph][dh], _PHASE_KSEL[pw][dw]]
                            for dw in (0, 1)], axis=0)
                 for dh in (0, 1)], axis=0)              # (dh, dw, Cin, Cout)
            mats.append(taps.reshape(4 * cin, cout))
    return jnp.stack(mats, axis=0)


# ----------------------------------------------------------------------------
# One ConvTranspose2d (+BN+ReLU / +Tanh) layer
# ----------------------------------------------------------------------------
def conv_transpose_layer(x, w, stride, padding, bn, act, mxu_tile):
    N, Hin, Win, Cin = x.shape
    Cout = w.shape[1]
    k = 4

    if stride == 1:
        # Generic stride-1 ConvTranspose: pad by k-1-p, regular conv with
        # flipped weights (im2col in XLA glue, contraction on the MXU).
        pad = k - 1 - padding
        Hout = Hin + k - 1 - 2 * padding
        Wout = Win + k - 1 - 2 * padding
        xp = jnp.pad(x, ((0, 0), (pad, pad), (pad, pad), (0, 0)))
        cols = [xp[:, kh:kh + Hout, kw:kw + Wout, :]
                for kh in range(k) for kw in range(k)]
        patches = jnp.stack(cols, axis=3).reshape(1, N * Hout * Wout,
                                                  k * k * Cin)
        wmat = jnp.transpose(jnp.flip(w, (2, 3)),
                             (2, 3, 0, 1)).reshape(1, k * k * Cin, Cout)
        Hp, Wp, S = Hout, Wout, 1
    else:
        assert stride == 2 and padding == 1
        patches = _phase_patches(x)           # (4, N*Hin*Win, 4*Cin)
        wmat = _phase_weights(w)              # (4, 4*Cin, Cout)
        Hp, Wp, S = Hin, Win, 2

    M = patches.shape[1]
    P = S * S

    if bn is None:
        # Final layer: tanh fused into the matmul epilogue.
        conv = pallas_batched_matmul(patches, wmat, act=act,
                                     with_sums=False, mxu_tile=mxu_tile)
        conv = conv[:, :M, :Cout]
        if S == 1:
            return conv.reshape(N, Hp, Wp, Cout)
        y = conv.reshape(S, S, N, Hp, Wp, Cout)      # tiny (3-channel) tensor
        return jnp.transpose(y, (2, 3, 0, 4, 1, 5)).reshape(
            N, Hp * S, Wp * S, Cout)

    gamma, beta, eps = bn
    conv, sums = pallas_batched_matmul(patches, wmat, act=None,
                                       with_sums=True, mxu_tile=mxu_tile)
    # BatchNorm batch statistics from the fused epilogue sums
    # (biased variance, matching nn.BatchNorm2d training-mode normalization).
    s = jnp.sum(sums, axis=(0, 1))[:, :Cout]          # (2, Cout)
    count = jnp.float32(P * M)
    mean = s[0] / count
    var = jnp.maximum(s[1] / count - mean * mean, 0.0)
    scale = gamma * jax.lax.rsqrt(var + eps)
    shift = beta - mean * scale

    conv = conv[:, :M, :Cout]
    if S == 2 and Cout % 128 != 0:
        # Fallback for non-128-multiple channels (never hit with NGF=128).
        y = jnp.maximum(conv * scale + shift, 0.0)
        y = y.reshape(S, S, N, Hp, Wp, Cout)
        return jnp.transpose(y, (2, 3, 0, 4, 1, 5)).reshape(
            N, Hp * S, Wp * S, Cout)
    return pallas_bn_act_interleave(conv, scale, shift, N, Hp, Wp, Cout, S,
                                    act)


# ----------------------------------------------------------------------------
# PP2PGenerator forward
# ----------------------------------------------------------------------------
def pp2p_forward(x_nchw, params, *, mxu_tile):
    x = jnp.transpose(x_nchw, (0, 2, 3, 1))           # NCHW -> NHWC
    for li, (w, bn) in enumerate(params):
        s, p = LAYER_STRIDE_PAD[li]
        if bn is not None:
            x = conv_transpose_layer(x, w, s, p, (bn[0], bn[1], BN_EPS),
                                     "relu", mxu_tile)
        else:
            x = conv_transpose_layer(x, w, s, p, None, "tanh", mxu_tile)
    return jnp.transpose(x, (0, 3, 1, 2))             # NHWC -> NCHW


def init_params(key):
    NGF = 128
    chans = [3, NGF * 8, NGF * 4, NGF * 2, NGF, 3]
    params = []
    for li in range(5):
        key, kw, kg, kb = jax.random.split(key, 4)
        cin, cout = chans[li], chans[li + 1]
        w = jax.random.normal(kw, (cin, cout, 4, 4), jnp.float32) * 0.05
        if li < 4:
            gamma = 1.0 + 0.1 * jax.random.normal(kg, (cout,), jnp.float32)
            beta = 0.1 * jax.random.normal(kb, (cout,), jnp.float32)
            bn = (gamma, beta)
        else:
            bn = None
        params.append((w, bn))
    return params


# Pure-JAX reference (lax conv) for correctness check.
def ref_forward(x_nchw, params):
    x = jnp.transpose(x_nchw, (0, 2, 3, 1))
    for li, (w, bn) in enumerate(params):
        s, p = LAYER_STRIDE_PAD[li]
        wf = jnp.flip(w, (2, 3))
        w_hwio = jnp.transpose(wf, (2, 3, 0, 1))
        y = jax.lax.conv_general_dilated(
            x, w_hwio, window_strides=(1, 1),
            padding=[(3 - p, 3 - p), (3 - p, 3 - p)],
            lhs_dilation=(s, s),
            dimension_numbers=("NHWC", "HWIO", "NHWC"))
        if bn is not None:
            gamma, beta = bn
            mean = y.mean(axis=(0, 1, 2))
            var = y.var(axis=(0, 1, 2))
            y = (y - mean) / jnp.sqrt(var + BN_EPS) * gamma + beta
            y = jnp.maximum(y, 0.0)
        else:
            y = jnp.tanh(y)
        x = y
    return jnp.transpose(x, (0, 3, 1, 2))


if __name__ == "__main__":
    key = jax.random.PRNGKey(0)
    k_x, k_p = jax.random.split(key)
    params = init_params(k_p)

    # DCGAN-style latent "image": (N, 3, 1, 1) -> (N, 3, 64, 64)
    x = jax.random.normal(k_x, (2, 3, 1, 1), jnp.float32)

    fwd = jax.jit(functools.partial(pp2p_forward, mxu_tile=_pick_mxu_tile()))
    out = jax.block_until_ready(fwd(x, params))
    assert out.shape == (2, 3, 64, 64), out.shape

    ref = jax.block_until_ready(jax.jit(ref_forward)(x, params))
    np.testing.assert_allclose(np.asarray(out), np.asarray(ref),
                               rtol=5e-3, atol=5e-3)

    print("KERNEL_OK")
</pallas_src>

<mosaic_0001>
module attributes {stable_mosaic.version = 11 : i64} {
  func.func @_mm_kernel(%arg0: i32, %arg1: i32, %arg2: i32, %arg3: i32, %arg4: memref<1x32x128xf32, #tpu.memory_space<vmem>>, %arg5: memref<1x128x256xf32, #tpu.memory_space<vmem>>, %arg6: memref<1x32x256xf32, #tpu.memory_space<vmem>>, %arg7: memref<1x1x2x256xf32, #tpu.memory_space<vmem>>, %arg8: memref<32x256xf32, #tpu.memory_space<vmem>>) attributes {dimension_semantics = [#tpu.dimension_semantics<parallel>, #tpu.dimension_semantics<parallel>, #tpu.dimension_semantics<parallel>, #tpu.dimension_semantics<arbitrary>], iteration_bounds = array<i64: 1, 1, 4, 1>, scalar_prefetch = 0 : i64, scratch_operands = 1 : i64, tpu.core_type = #tpu.core_type<tc>, window_params = [{transform_indices = @transform_0, window_bounds = array<i64: 1, 32, 128>}, {transform_indices = @transform_1, window_bounds = array<i64: 1, 128, 256>}, {transform_indices = @transform_2, window_bounds = array<i64: 1, 32, 256>}, {transform_indices = @transform_3, window_bounds = array<i64: 1, 1, 2, 256>}]} {
    %c0_i32 = arith.constant 0 : i32
    %0 = arith.cmpi eq, %arg3, %c0_i32 : i32
    %1 = arith.extui %0 : i1 to i32
    %c0_i32_0 = arith.constant 0 : i32
    %2 = arith.cmpi ne, %1, %c0_i32_0 : i32
    scf.if %2 {
      %cst_12 = arith.constant 0.000000e+00 : f32
      %14 = vector.broadcast %cst_12 : f32 to vector<32x256xf32>
      %c0_13 = arith.constant 0 : index
      %c0_14 = arith.constant 0 : index
      %15 = vector.load %arg8[%c0_13, %c0_14] : memref<32x256xf32, #tpu.memory_space<vmem>>, vector<32x256xf32>
      tpu.vector_store %arg8[%c0_13, %c0_14], %14 {strides = array<i32>} : memref<32x256xf32, #tpu.memory_space<vmem>>, vector<32x256xf32>,
    } else {
    }
    %c0 = arith.constant 0 : index
    %c0_1 = arith.constant 0 : index
    %3 = vector.load %arg8[%c0, %c0_1] : memref<32x256xf32, #tpu.memory_space<vmem>>, vector<32x256xf32>
    %c0_2 = arith.constant 0 : index
    %c0_3 = arith.constant 0 : index
    %c0_4 = arith.constant 0 : index
    %4 = vector.load %arg4[%c0_2, %c0_3, %c0_4] : memref<1x32x128xf32, #tpu.memory_space<vmem>>, vector<1x32x128xf32>
    %5 = vector.shape_cast %4 : vector<1x32x128xf32> to vector<32x128xf32>
    %c0_5 = arith.constant 0 : index
    %c0_6 = arith.constant 0 : index
    %c0_7 = arith.constant 0 : index
    %6 = vector.load %arg5[%c0_5, %c0_6, %c0_7] : memref<1x128x256xf32, #tpu.memory_space<vmem>>, vector<1x128x256xf32>
    %7 = vector.shape_cast %6 : vector<1x128x256xf32> to vector<128x256xf32>
    %cst = arith.constant dense<0.000000e+00> : vector<32x256xf32>
    %8 = tpu.matmul %5, %7, %cst {dimension_numbers = #tpu.dot_dimension_numbers<[1], [0], [0], [1], [0, 0, 1, 1], [], []>} : vector<32x128xf32>, vector<128x256xf32>, vector<32x256xf32> -> vector<32x256xf32>
    %9 = arith.addf %3, %8 : vector<32x256xf32>
    %c0_8 = arith.constant 0 : index
    %c0_9 = arith.constant 0 : index
    %10 = vector.load %arg8[%c0_8, %c0_9] : memref<32x256xf32, #tpu.memory_space<vmem>>, vector<32x256xf32>
    tpu.vector_store %arg8[%c0_8, %c0_9], %9 {strides = array<i32>} : memref<32x256xf32, #tpu.memory_space<vmem>>, vector<32x256xf32>,
    %c0_i32_10 = arith.constant 0 : i32
    %11 = arith.cmpi eq, %arg3, %c0_i32_10 : i32
    %12 = arith.extui %11 : i1 to i32
    %c0_i32_11 = arith.constant 0 : i32
    %13 = arith.cmpi ne, %12, %c0_i32_11 : i32
    scf.if %13 {
      %c0_12 = arith.constant 0 : index
      %c0_13 = arith.constant 0 : index
      %14 = vector.load %arg8[%c0_12, %c0_13] : memref<32x256xf32, #tpu.memory_space<vmem>>, vector<32x256xf32>
      %c0_14 = arith.constant 0 : index
      %c0_15 = arith.constant 0 : index
      %c0_16 = arith.constant 0 : index
      %15 = vector.load %arg6[%c0_14, %c0_15, %c0_16] : memref<1x32x256xf32, #tpu.memory_space<vmem>>, vector<1x32x256xf32>
      %16 = vector.shape_cast %15 : vector<1x32x256xf32> to vector<32x256xf32>
      %17 = vector.shape_cast %14 : vector<32x256xf32> to vector<1x32x256xf32>
      tpu.vector_store %arg6[%c0_14, %c0_15, %c0_16], %17 {strides = array<i32>} : memref<1x32x256xf32, #tpu.memory_space<vmem>>, vector<1x32x256xf32>,
      %cst_17 = arith.constant dense<0.000000e+00> : vector<256xf32>
      %18 = vector.multi_reduction <add>, %14, %cst_17 [0] : vector<32x256xf32> to vector<256xf32>
      %19 = vector.shape_cast %18 : vector<256xf32> to vector<1x256xf32>
      %20 = arith.mulf %14, %14 : vector<32x256xf32>
      %cst_18 = arith.constant dense<0.000000e+00> : vector<256xf32>
      %21 = vector.multi_reduction <add>, %20, %cst_18 [0] : vector<32x256xf32> to vector<256xf32>
      %22 = vector.shape_cast %21 : vector<256xf32> to vector<1x256xf32>
      %23 = tpu.concatenate %19, %22 in 0 : vector<1x256xf32>, vector<1x256xf32> -> vector<2x256xf32>
      %c0_19 = arith.constant 0 : index
      %c0_20 = arith.constant 0 : index
      %c0_21 = arith.constant 0 : index
      %c0_22 = arith.constant 0 : index
      %24 = vector.load %arg7[%c0_19, %c0_20, %c0_21, %c0_22] : memref<1x1x2x256xf32, #tpu.memory_space<vmem>>, vector<1x1x2x256xf32>
      %25 = vector.shape_cast %24 : vector<1x1x2x256xf32> to vector<2x256xf32>
      %26 = vector.shape_cast %23 : vector<2x256xf32> to vector<1x1x2x256xf32>
      tpu.vector_store %arg7[%c0_19, %c0_20, %c0_21, %c0_22], %26 {strides = array<i32>} : memref<1x1x2x256xf32, #tpu.memory_space<vmem>>, vector<1x1x2x256xf32>,
    } else {
    }
    return
  }
  func.func @transform_0(%arg0: i32, %arg1: i32, %arg2: i32, %arg3: i32) -> (i32, i32, i32) {
    %c0_i32 = arith.constant 0 : i32
    return %arg0, %arg1, %arg3 : i32, i32, i32
  }
  func.func @transform_1(%arg0: i32, %arg1: i32, %arg2: i32, %arg3: i32) -> (i32, i32, i32) {
    %c0_i32 = arith.constant 0 : i32
    return %arg0, %arg3, %arg2 : i32, i32, i32
  }
  func.func @transform_2(%arg0: i32, %arg1: i32, %arg2: i32, %arg3: i32) -> (i32, i32, i32) {
    %c0_i32 = arith.constant 0 : i32
    return %arg0, %arg1, %arg2 : i32, i32, i32
  }
  func.func @transform_3(%arg0: i32, %arg1: i32, %arg2: i32, %arg3: i32) -> (i32, i32, i32, i32) {
    %c0_i32 = arith.constant 0 : i32
    %c0_i32_0 = arith.constant 0 : i32
    return %arg0, %arg1, %c0_i32, %arg2 : i32, i32, i32, i32
  }
}

module attributes {stable_mosaic.version = 11 : i64} {
  func.func @_bn_act_kernel(%arg0: i32, %arg1: i32, %arg2: i32, %arg3: memref<1x8x4x1024xf32, #tpu.memory_space<vmem>>, %arg4: memref<1x1024xf32, #tpu.memory_space<vmem>>, %arg5: memref<1x1024xf32, #tpu.memory_space<vmem>>, %arg6: memref<8x1x4x1024xf32, #tpu.memory_space<vmem>>) attributes {dimension_semantics = [#tpu.dimension_semantics<parallel>, #tpu.dimension_semantics<parallel>, #tpu.dimension_semantics<parallel>], iteration_bounds = array<i64: 1, 1, 1>, scalar_prefetch = 0 : i64, scratch_operands = 0 : i64, tpu.core_type = #tpu.core_type<tc>, window_params = [{transform_indices = @transform_0, window_bounds = array<i64: 1, 8, 4, 1024>}, {pipeline_mode = #tpu.pipeline_mode<synchronous>, transform_indices = @transform_1, window_bounds = array<i64: 1, 1024>}, {pipeline_mode = #tpu.pipeline_mode<synchronous>, transform_indices = @transform_2, window_bounds = array<i64: 1, 1024>}, {transform_indices = @transform_3, window_bounds = array<i64: 8, 1, 4, 1024>}]} {
    %c0 = arith.constant 0 : index
    %c0_0 = arith.constant 0 : index
    %c0_1 = arith.constant 0 : index
    %c0_2 = arith.constant 0 : index
    %0 = vector.load %arg3[%c0, %c0_0, %c0_1, %c0_2] : memref<1x8x4x1024xf32, #tpu.memory_space<vmem>>, vector<1x8x4x1024xf32>
    %1 = vector.shape_cast %0 : vector<1x8x4x1024xf32> to vector<8x4x1024xf32>
    %c0_3 = arith.constant 0 : index
    %c0_4 = arith.constant 0 : index
    %2 = vector.load %arg4[%c0_3, %c0_4] : memref<1x1024xf32, #tpu.memory_space<vmem>>, vector<1x1024xf32>
    %3 = vector.shape_cast %2 : vector<1x1024xf32> to vector<1024xf32>
    %4 = vector.shape_cast %3 : vector<1024xf32> to vector<1x1x1024xf32>
    %5 = vector.broadcast %4 : vector<1x1x1024xf32> to vector<8x4x1024xf32>
    %6 = arith.mulf %1, %5 : vector<8x4x1024xf32>
    %c0_5 = arith.constant 0 : index
    %c0_6 = arith.constant 0 : index
    %7 = vector.load %arg5[%c0_5, %c0_6] : memref<1x1024xf32, #tpu.memory_space<vmem>>, vector<1x1024xf32>
    %8 = vector.shape_cast %7 : vector<1x1024xf32> to vector<1024xf32>
    %9 = vector.shape_cast %8 : vector<1024xf32> to vector<1x1x1024xf32>
    %10 = vector.broadcast %9 : vector<1x1x1024xf32> to vector<8x4x1024xf32>
    %11 = arith.addf %6, %10 : vector<8x4x1024xf32>
    %cst = arith.constant 0.000000e+00 : f32
    %12 = vector.broadcast %cst : f32 to vector<8x4x1024xf32>
    %13 = arith.maximumf %11, %12 : vector<8x4x1024xf32>
    %c0_7 = arith.constant 0 : index
    %c0_8 = arith.constant 0 : index
    %c0_9 = arith.constant 0 : index
    %c0_10 = arith.constant 0 : index
    %14 = vector.load %arg6[%c0_7, %c0_8, %c0_9, %c0_10] : memref<8x1x4x1024xf32, #tpu.memory_space<vmem>>, vector<8x1x4x1024xf32>
    %15 = vector.shape_cast %14 : vector<8x1x4x1024xf32> to vector<8x4x1024xf32>
    %16 = vector.shape_cast %13 : vector<8x4x1024xf32> to vector<8x1x4x1024xf32>
    tpu.vector_store %arg6[%c0_7, %c0_8, %c0_9, %c0_10], %16 {strides = array<i32>} : memref<8x1x4x1024xf32, #tpu.memory_space<vmem>>, vector<8x1x4x1024xf32>,
    return
  }
  func.func @transform_0(%arg0: i32, %arg1: i32, %arg2: i32) -> (i32, i32, i32, i32) {
    %c1_i32 = arith.constant 1 : i32
    %0 = arith.muli %arg1, %c1_i32 : i32
    %1 = arith.addi %0, %arg2 : i32
    %c0_i32 = arith.constant 0 : i32
    %c0_i32_0 = arith.constant 0 : i32
    %c0_i32_1 = arith.constant 0 : i32
    return %1, %arg0, %c0_i32, %c0_i32_0 : i32, i32, i32, i32
  }
  func.func @transform_1(%arg0: i32, %arg1: i32, %arg2: i32) -> (i32, i32) {
    %c0_i32 = arith.constant 0 : i32
    %c0_i32_0 = arith.constant 0 : i32
    %c0_i32_1 = arith.constant 0 : i32
    return %c0_i32, %c0_i32_0 : i32, i32
  }
  func.func @transform_2(%arg0: i32, %arg1: i32, %arg2: i32) -> (i32, i32) {
    %c0_i32 = arith.constant 0 : i32
    %c0_i32_0 = arith.constant 0 : i32
    %c0_i32_1 = arith.constant 0 : i32
    return %c0_i32, %c0_i32_0 : i32, i32
  }
  func.func @transform_3(%arg0: i32, %arg1: i32, %arg2: i32) -> (i32, i32, i32, i32) {
    %c0_i32 = arith.constant 0 : i32
    %c0_i32_0 = arith.constant 0 : i32
    return %arg0, %arg1, %c0_i32, %arg2 : i32, i32, i32, i32
  }
}

module attributes {stable_mosaic.version = 11 : i64} {
  func.func @_mm_kernel(%arg0: i32, %arg1: i32, %arg2: i32, %arg3: i32, %arg4: memref<1x32x512xf32, #tpu.memory_space<vmem>>, %arg5: memref<1x512x256xf32, #tpu.memory_space<vmem>>, %arg6: memref<1x32x256xf32, #tpu.memory_space<vmem>>, %arg7: memref<1x1x2x256xf32, #tpu.memory_space<vmem>>, %arg8: memref<32x256xf32, #tpu.memory_space<vmem>>) attributes {dimension_semantics = [#tpu.dimension_semantics<parallel>, #tpu.dimension_semantics<parallel>, #tpu.dimension_semantics<parallel>, #tpu.dimension_semantics<arbitrary>], iteration_bounds = array<i64: 4, 1, 2, 8>, scalar_prefetch = 0 : i64, scratch_operands = 1 : i64, tpu.core_type = #tpu.core_type<tc>, window_params = [{transform_indices = @transform_0, window_bounds = array<i64: 1, 32, 512>}, {transform_indices = @transform_1, window_bounds = array<i64: 1, 512, 256>}, {transform_indices = @transform_2, window_bounds = array<i64: 1, 32, 256>}, {transform_indices = @transform_3, window_bounds = array<i64: 1, 1, 2, 256>}]} {
    %c0_i32 = arith.constant 0 : i32
    %0 = arith.cmpi eq, %arg3, %c0_i32 : i32
    %1 = arith.extui %0 : i1 to i32
    %c0_i32_0 = arith.constant 0 : i32
    %2 = arith.cmpi ne, %1, %c0_i32_0 : i32
    scf.if %2 {
      %cst_11 = arith.constant 0.000000e+00 : f32
      %14 = vector.broadcast %cst_11 : f32 to vector<32x256xf32>
      %c0_12 = arith.constant 0 : index
      %c0_13 = arith.constant 0 : index
      %15 = vector.load %arg8[%c0_12, %c0_13] : memref<32x256xf32, #tpu.memory_space<vmem>>, vector<32x256xf32>
      tpu.vector_store %arg8[%c0_12, %c0_13], %14 {strides = array<i32>} : memref<32x256xf32, #tpu.memory_space<vmem>>, vector<32x256xf32>,
    } else {
    }
    %c0 = arith.constant 0 : index
    %c0_1 = arith.constant 0 : index
    %3 = vector.load %arg8[%c0, %c0_1] : memref<32x256xf32, #tpu.memory_space<vmem>>, vector<32x256xf32>
    %c0_2 = arith.constant 0 : index
    %c0_3 = arith.constant 0 : index
    %c0_4 = arith.constant 0 : index
    %4 = vector.load %arg4[%c0_2, %c0_3, %c0_4] : memref<1x32x512xf32, #tpu.memory_space<vmem>>, vector<1x32x512xf32>
    %5 = vector.shape_cast %4 : vector<1x32x512xf32> to vector<32x512xf32>
    %c0_5 = arith.constant 0 : index
    %c0_6 = arith.constant 0 : index
    %c0_7 = arith.constant 0 : index
    %6 = vector.load %arg5[%c0_5, %c0_6, %c0_7] : memref<1x512x256xf32, #tpu.memory_space<vmem>>, vector<1x512x256xf32>
    %7 = vector.shape_cast %6 : vector<1x512x256xf32> to vector<512x256xf32>
    %cst = arith.constant dense<0.000000e+00> : vector<32x256xf32>
    %8 = tpu.matmul %5, %7, %cst {dimension_numbers = #tpu.dot_dimension_numbers<[1], [0], [0], [1], [0, 0, 1, 1], [], []>} : vector<32x512xf32>, vector<512x256xf32>, vector<32x256xf32> -> vector<32x256xf32>
    %9 = arith.addf %3, %8 : vector<32x256xf32>
    %c0_8 = arith.constant 0 : index
    %c0_9 = arith.constant 0 : index
    %10 = vector.load %arg8[%c0_8, %c0_9] : memref<32x256xf32, #tpu.memory_space<vmem>>, vector<32x256xf32>
    tpu.vector_store %arg8[%c0_8, %c0_9], %9 {strides = array<i32>} : memref<32x256xf32, #tpu.memory_space<vmem>>, vector<32x256xf32>,
    %c7_i32 = arith.constant 7 : i32
    %11 = arith.cmpi eq, %arg3, %c7_i32 : i32
    %12 = arith.extui %11 : i1 to i32
    %c0_i32_10 = arith.constant 0 : i32
    %13 = arith.cmpi ne, %12, %c0_i32_10 : i32
    scf.if %13 {
      %c0_11 = arith.constant 0 : index
      %c0_12 = arith.constant 0 : index
      %14 = vector.load %arg8[%c0_11, %c0_12] : memref<32x256xf32, #tpu.memory_space<vmem>>, vector<32x256xf32>
      %c0_13 = arith.constant 0 : index
      %c0_14 = arith.constant 0 : index
      %c0_15 = arith.constant 0 : index
      %15 = vector.load %arg6[%c0_13, %c0_14, %c0_15] : memref<1x32x256xf32, #tpu.memory_space<vmem>>, vector<1x32x256xf32>
      %16 = vector.shape_cast %15 : vector<1x32x256xf32> to vector<32x256xf32>
      %17 = vector.shape_cast %14 : vector<32x256xf32> to vector<1x32x256xf32>
      tpu.vector_store %arg6[%c0_13, %c0_14, %c0_15], %17 {strides = array<i32>} : memref<1x32x256xf32, #tpu.memory_space<vmem>>, vector<1x32x256xf32>,
      %cst_16 = arith.constant dense<0.000000e+00> : vector<256xf32>
      %18 = vector.multi_reduction <add>, %14, %cst_16 [0] : vector<32x256xf32> to vector<256xf32>
      %19 = vector.shape_cast %18 : vector<256xf32> to vector<1x256xf32>
      %20 = arith.mulf %14, %14 : vector<32x256xf32>
      %cst_17 = arith.constant dense<0.000000e+00> : vector<256xf32>
      %21 = vector.multi_reduction <add>, %20, %cst_17 [0] : vector<32x256xf32> to vector<256xf32>
      %22 = vector.shape_cast %21 : vector<256xf32> to vector<1x256xf32>
      %23 = tpu.concatenate %19, %22 in 0 : vector<1x256xf32>, vector<1x256xf32> -> vector<2x256xf32>
      %c0_18 = arith.constant 0 : index
      %c0_19 = arith.constant 0 : index
      %c0_20 = arith.constant 0 : index
      %c0_21 = arith.constant 0 : index
      %24 = vector.load %arg7[%c0_18, %c0_19, %c0_20, %c0_21] : memref<1x1x2x256xf32, #tpu.memory_space<vmem>>, vector<1x1x2x256xf32>
      %25 = vector.shape_cast %24 : vector<1x1x2x256xf32> to vector<2x256xf32>
      %26 = vector.shape_cast %23 : vector<2x256xf32> to vector<1x1x2x256xf32>
      tpu.vector_store %arg7[%c0_18, %c0_19, %c0_20, %c0_21], %26 {strides = array<i32>} : memref<1x1x2x256xf32, #tpu.memory_space<vmem>>, vector<1x1x2x256xf32>,
    } else {
    }
    return
  }
  func.func @transform_0(%arg0: i32, %arg1: i32, %arg2: i32, %arg3: i32) -> (i32, i32, i32) {
    %c0_i32 = arith.constant 0 : i32
    return %arg0, %arg1, %arg3 : i32, i32, i32
  }
  func.func @transform_1(%arg0: i32, %arg1: i32, %arg2: i32, %arg3: i32) -> (i32, i32, i32) {
    %c0_i32 = arith.constant 0 : i32
    return %arg0, %arg3, %arg2 : i32, i32, i32
  }
  func.func @transform_2(%arg0: i32, %arg1: i32, %arg2: i32, %arg3: i32) -> (i32, i32, i32) {
    %c0_i32 = arith.constant 0 : i32
    return %arg0, %arg1, %arg2 : i32, i32, i32
  }
  func.func @transform_3(%arg0: i32, %arg1: i32, %arg2: i32, %arg3: i32) -> (i32, i32, i32, i32) {
    %c0_i32 = arith.constant 0 : i32
    %c0_i32_0 = arith.constant 0 : i32
    return %arg0, %arg1, %c0_i32, %arg2 : i32, i32, i32, i32
  }
}

module attributes {stable_mosaic.version = 11 : i64} {
  func.func @_bn_act_kernel(%arg0: i32, %arg1: i32, %arg2: i32, %arg3: memref<1x8x4x512xf32, #tpu.memory_space<vmem>>, %arg4: memref<1x512xf32, #tpu.memory_space<vmem>>, %arg5: memref<1x512xf32, #tpu.memory_space<vmem>>, %arg6: memref<8x1x4x512xf32, #tpu.memory_space<vmem>>) attributes {dimension_semantics = [#tpu.dimension_semantics<parallel>, #tpu.dimension_semantics<parallel>, #tpu.dimension_semantics<parallel>], iteration_bounds = array<i64: 1, 2, 2>, scalar_prefetch = 0 : i64, scratch_operands = 0 : i64, tpu.core_type = #tpu.core_type<tc>, window_params = [{transform_indices = @transform_0, window_bounds = array<i64: 1, 8, 4, 512>}, {pipeline_mode = #tpu.pipeline_mode<synchronous>, transform_indices = @transform_1, window_bounds = array<i64: 1, 512>}, {pipeline_mode = #tpu.pipeline_mode<synchronous>, transform_indices = @transform_2, window_bounds = array<i64: 1, 512>}, {transform_indices = @transform_3, window_bounds = array<i64: 8, 1, 4, 512>}]} {
    %c0 = arith.constant 0 : index
    %c0_0 = arith.constant 0 : index
    %c0_1 = arith.constant 0 : index
    %c0_2 = arith.constant 0 : index
    %0 = vector.load %arg3[%c0, %c0_0, %c0_1, %c0_2] : memref<1x8x4x512xf32, #tpu.memory_space<vmem>>, vector<1x8x4x512xf32>
    %1 = vector.shape_cast %0 : vector<1x8x4x512xf32> to vector<8x4x512xf32>
    %c0_3 = arith.constant 0 : index
    %c0_4 = arith.constant 0 : index
    %2 = vector.load %arg4[%c0_3, %c0_4] : memref<1x512xf32, #tpu.memory_space<vmem>>, vector<1x512xf32>
    %3 = vector.shape_cast %2 : vector<1x512xf32> to vector<512xf32>
    %4 = vector.shape_cast %3 : vector<512xf32> to vector<1x1x512xf32>
    %5 = vector.broadcast %4 : vector<1x1x512xf32> to vector<8x4x512xf32>
    %6 = arith.mulf %1, %5 : vector<8x4x512xf32>
    %c0_5 = arith.constant 0 : index
    %c0_6 = arith.constant 0 : index
    %7 = vector.load %arg5[%c0_5, %c0_6] : memref<1x512xf32, #tpu.memory_space<vmem>>, vector<1x512xf32>
    %8 = vector.shape_cast %7 : vector<1x512xf32> to vector<512xf32>
    %9 = vector.shape_cast %8 : vector<512xf32> to vector<1x1x512xf32>
    %10 = vector.broadcast %9 : vector<1x1x512xf32> to vector<8x4x512xf32>
    %11 = arith.addf %6, %10 : vector<8x4x512xf32>
    %cst = arith.constant 0.000000e+00 : f32
    %12 = vector.broadcast %cst : f32 to vector<8x4x512xf32>
    %13 = arith.maximumf %11, %12 : vector<8x4x512xf32>
    %c0_7 = arith.constant 0 : index
    %c0_8 = arith.constant 0 : index
    %c0_9 = arith.constant 0 : index
    %c0_10 = arith.constant 0 : index
    %14 = vector.load %arg6[%c0_7, %c0_8, %c0_9, %c0_10] : memref<8x1x4x512xf32, #tpu.memory_space<vmem>>, vector<8x1x4x512xf32>
    %15 = vector.shape_cast %14 : vector<8x1x4x512xf32> to vector<8x4x512xf32>
    %16 = vector.shape_cast %13 : vector<8x4x512xf32> to vector<8x1x4x512xf32>
    tpu.vector_store %arg6[%c0_7, %c0_8, %c0_9, %c0_10], %16 {strides = array<i32>} : memref<8x1x4x512xf32, #tpu.memory_space<vmem>>, vector<8x1x4x512xf32>,
    return
  }
  func.func @transform_0(%arg0: i32, %arg1: i32, %arg2: i32) -> (i32, i32, i32, i32) {
    %c2_i32 = arith.constant 2 : i32
    %0 = arith.muli %arg1, %c2_i32 : i32
    %1 = arith.addi %0, %arg2 : i32
    %c0_i32 = arith.constant 0 : i32
    %c0_i32_0 = arith.constant 0 : i32
    %c0_i32_1 = arith.constant 0 : i32
    return %1, %arg0, %c0_i32, %c0_i32_0 : i32, i32, i32, i32
  }
  func.func @transform_1(%arg0: i32, %arg1: i32, %arg2: i32) -> (i32, i32) {
    %c0_i32 = arith.constant 0 : i32
    %c0_i32_0 = arith.constant 0 : i32
    %c0_i32_1 = arith.constant 0 : i32
    return %c0_i32, %c0_i32_0 : i32, i32
  }
  func.func @transform_2(%arg0: i32, %arg1: i32, %arg2: i32) -> (i32, i32) {
    %c0_i32 = arith.constant 0 : i32
    %c0_i32_0 = arith.constant 0 : i32
    %c0_i32_1 = arith.constant 0 : i32
    return %c0_i32, %c0_i32_0 : i32, i32
  }
  func.func @transform_3(%arg0: i32, %arg1: i32, %arg2: i32) -> (i32, i32, i32, i32) {
    %c0_i32 = arith.constant 0 : i32
    %c0_i32_0 = arith.constant 0 : i32
    return %arg0, %arg1, %c0_i32, %arg2 : i32, i32, i32, i32
  }
}

module attributes {stable_mosaic.version = 11 : i64} {
  func.func @_mm_kernel(%arg0: i32, %arg1: i32, %arg2: i32, %arg3: i32, %arg4: memref<1x128x512xf32, #tpu.memory_space<vmem>>, %arg5: memref<1x512x256xf32, #tpu.memory_space<vmem>>, %arg6: memref<1x128x256xf32, #tpu.memory_space<vmem>>, %arg7: memref<1x1x2x256xf32, #tpu.memory_space<vmem>>, %arg8: memref<128x256xf32, #tpu.memory_space<vmem>>) attributes {dimension_semantics = [#tpu.dimension_semantics<parallel>, #tpu.dimension_semantics<parallel>, #tpu.dimension_semantics<parallel>, #tpu.dimension_semantics<arbitrary>], iteration_bounds = array<i64: 4, 1, 1, 4>, scalar_prefetch = 0 : i64, scratch_operands = 1 : i64, tpu.core_type = #tpu.core_type<tc>, window_params = [{transform_indices = @transform_0, window_bounds = array<i64: 1, 128, 512>}, {transform_indices = @transform_1, window_bounds = array<i64: 1, 512, 256>}, {transform_indices = @transform_2, window_bounds = array<i64: 1, 128, 256>}, {transform_indices = @transform_3, window_bounds = array<i64: 1, 1, 2, 256>}]} {
    %c0_i32 = arith.constant 0 : i32
    %0 = arith.cmpi eq, %arg3, %c0_i32 : i32
    %1 = arith.extui %0 : i1 to i32
    %c0_i32_0 = arith.constant 0 : i32
    %2 = arith.cmpi ne, %1, %c0_i32_0 : i32
    scf.if %2 {
      %cst_11 = arith.constant 0.000000e+00 : f32
      %14 = vector.broadcast %cst_11 : f32 to vector<128x256xf32>
      %c0_12 = arith.constant 0 : index
      %c0_13 = arith.constant 0 : index
      %15 = vector.load %arg8[%c0_12, %c0_13] : memref<128x256xf32, #tpu.memory_space<vmem>>, vector<128x256xf32>
      tpu.vector_store %arg8[%c0_12, %c0_13], %14 {strides = array<i32>} : memref<128x256xf32, #tpu.memory_space<vmem>>, vector<128x256xf32>,
    } else {
    }
    %c0 = arith.constant 0 : index
    %c0_1 = arith.constant 0 : index
    %3 = vector.load %arg8[%c0, %c0_1] : memref<128x256xf32, #tpu.memory_space<vmem>>, vector<128x256xf32>
    %c0_2 = arith.constant 0 : index
    %c0_3 = arith.constant 0 : index
    %c0_4 = arith.constant 0 : index
    %4 = vector.load %arg4[%c0_2, %c0_3, %c0_4] : memref<1x128x512xf32, #tpu.memory_space<vmem>>, vector<1x128x512xf32>
    %5 = vector.shape_cast %4 : vector<1x128x512xf32> to vector<128x512xf32>
    %c0_5 = arith.constant 0 : index
    %c0_6 = arith.constant 0 : index
    %c0_7 = arith.constant 0 : index
    %6 = vector.load %arg5[%c0_5, %c0_6, %c0_7] : memref<1x512x256xf32, #tpu.memory_space<vmem>>, vector<1x512x256xf32>
    %7 = vector.shape_cast %6 : vector<1x512x256xf32> to vector<512x256xf32>
    %cst = arith.constant dense<0.000000e+00> : vector<128x256xf32>
    %8 = tpu.matmul %5, %7, %cst {dimension_numbers = #tpu.dot_dimension_numbers<[1], [0], [0], [1], [0, 0, 1, 1], [], []>} : vector<128x512xf32>, vector<512x256xf32>, vector<128x256xf32> -> vector<128x256xf32>
    %9 = arith.addf %3, %8 : vector<128x256xf32>
    %c0_8 = arith.constant 0 : index
    %c0_9 = arith.constant 0 : index
    %10 = vector.load %arg8[%c0_8, %c0_9] : memref<128x256xf32, #tpu.memory_space<vmem>>, vector<128x256xf32>
    tpu.vector_store %arg8[%c0_8, %c0_9], %9 {strides = array<i32>} : memref<128x256xf32, #tpu.memory_space<vmem>>, vector<128x256xf32>,
    %c3_i32 = arith.constant 3 : i32
    %11 = arith.cmpi eq, %arg3, %c3_i32 : i32
    %12 = arith.extui %11 : i1 to i32
    %c0_i32_10 = arith.constant 0 : i32
    %13 = arith.cmpi ne, %12, %c0_i32_10 : i32
    scf.if %13 {
      %c0_11 = arith.constant 0 : index
      %c0_12 = arith.constant 0 : index
      %14 = vector.load %arg8[%c0_11, %c0_12] : memref<128x256xf32, #tpu.memory_space<vmem>>, vector<128x256xf32>
      %c0_13 = arith.constant 0 : index
      %c0_14 = arith.constant 0 : index
      %c0_15 = arith.constant 0 : index
      %15 = vector.load %arg6[%c0_13, %c0_14, %c0_15] : memref<1x128x256xf32, #tpu.memory_space<vmem>>, vector<1x128x256xf32>
      %16 = vector.shape_cast %15 : vector<1x128x256xf32> to vector<128x256xf32>
      %17 = vector.shape_cast %14 : vector<128x256xf32> to vector<1x128x256xf32>
      tpu.vector_store %arg6[%c0_13, %c0_14, %c0_15], %17 {strides = array<i32>} : memref<1x128x256xf32, #tpu.memory_space<vmem>>, vector<1x128x256xf32>,
      %cst_16 = arith.constant dense<0.000000e+00> : vector<256xf32>
      %18 = vector.multi_reduction <add>, %14, %cst_16 [0] : vector<128x256xf32> to vector<256xf32>
      %19 = vector.shape_cast %18 : vector<256xf32> to vector<1x256xf32>
      %20 = arith.mulf %14, %14 : vector<128x256xf32>
      %cst_17 = arith.constant dense<0.000000e+00> : vector<256xf32>
      %21 = vector.multi_reduction <add>, %20, %cst_17 [0] : vector<128x256xf32> to vector<256xf32>
      %22 = vector.shape_cast %21 : vector<256xf32> to vector<1x256xf32>
      %23 = tpu.concatenate %19, %22 in 0 : vector<1x256xf32>, vector<1x256xf32> -> vector<2x256xf32>
      %c0_18 = arith.constant 0 : index
      %c0_19 = arith.constant 0 : index
      %c0_20 = arith.constant 0 : index
      %c0_21 = arith.constant 0 : index
      %24 = vector.load %arg7[%c0_18, %c0_19, %c0_20, %c0_21] : memref<1x1x2x256xf32, #tpu.memory_space<vmem>>, vector<1x1x2x256xf32>
      %25 = vector.shape_cast %24 : vector<1x1x2x256xf32> to vector<2x256xf32>
      %26 = vector.shape_cast %23 : vector<2x256xf32> to vector<1x1x2x256xf32>
      tpu.vector_store %arg7[%c0_18, %c0_19, %c0_20, %c0_21], %26 {strides = array<i32>} : memref<1x1x2x256xf32, #tpu.memory_space<vmem>>, vector<1x1x2x256xf32>,
    } else {
    }
    return
  }
  func.func @transform_0(%arg0: i32, %arg1: i32, %arg2: i32, %arg3: i32) -> (i32, i32, i32) {
    %c0_i32 = arith.constant 0 : i32
    return %arg0, %arg1, %arg3 : i32, i32, i32
  }
  func.func @transform_1(%arg0: i32, %arg1: i32, %arg2: i32, %arg3: i32) -> (i32, i32, i32) {
    %c0_i32 = arith.constant 0 : i32
    return %arg0, %arg3, %arg2 : i32, i32, i32
  }
  func.func @transform_2(%arg0: i32, %arg1: i32, %arg2: i32, %arg3: i32) -> (i32, i32, i32) {
    %c0_i32 = arith.constant 0 : i32
    return %arg0, %arg1, %arg2 : i32, i32, i32
  }
  func.func @transform_3(%arg0: i32, %arg1: i32, %arg2: i32, %arg3: i32) -> (i32, i32, i32, i32) {
    %c0_i32 = arith.constant 0 : i32
    %c0_i32_0 = arith.constant 0 : i32
    return %arg0, %arg1, %c0_i32, %arg2 : i32, i32, i32, i32
  }
}

module attributes {stable_mosaic.version = 11 : i64} {
  func.func @_bn_act_kernel(%arg0: i32, %arg1: i32, %arg2: i32, %arg3: memref<1x16x8x256xf32, #tpu.memory_space<vmem>>, %arg4: memref<1x256xf32, #tpu.memory_space<vmem>>, %arg5: memref<1x256xf32, #tpu.memory_space<vmem>>, %arg6: memref<16x1x8x256xf32, #tpu.memory_space<vmem>>) attributes {dimension_semantics = [#tpu.dimension_semantics<parallel>, #tpu.dimension_semantics<parallel>, #tpu.dimension_semantics<parallel>], iteration_bounds = array<i64: 1, 2, 2>, scalar_prefetch = 0 : i64, scratch_operands = 0 : i64, tpu.core_type = #tpu.core_type<tc>, window_params = [{transform_indices = @transform_0, window_bounds = array<i64: 1, 16, 8, 256>}, {pipeline_mode = #tpu.pipeline_mode<synchronous>, transform_indices = @transform_1, window_bounds = array<i64: 1, 256>}, {pipeline_mode = #tpu.pipeline_mode<synchronous>, transform_indices = @transform_2, window_bounds = array<i64: 1, 256>}, {transform_indices = @transform_3, window_bounds = array<i64: 16, 1, 8, 256>}]} {
    %c0 = arith.constant 0 : index
    %c0_0 = arith.constant 0 : index
    %c0_1 = arith.constant 0 : index
    %c0_2 = arith.constant 0 : index
    %0 = vector.load %arg3[%c0, %c0_0, %c0_1, %c0_2] : memref<1x16x8x256xf32, #tpu.memory_space<vmem>>, vector<1x16x8x256xf32>
    %1 = vector.shape_cast %0 : vector<1x16x8x256xf32> to vector<16x8x256xf32>
    %c0_3 = arith.constant 0 : index
    %c0_4 = arith.constant 0 : index
    %2 = vector.load %arg4[%c0_3, %c0_4] : memref<1x256xf32, #tpu.memory_space<vmem>>, vector<1x256xf32>
    %3 = vector.shape_cast %2 : vector<1x256xf32> to vector<256xf32>
    %4 = vector.shape_cast %3 : vector<256xf32> to vector<1x1x256xf32>
    %5 = vector.broadcast %4 : vector<1x1x256xf32> to vector<16x8x256xf32>
    %6 = arith.mulf %1, %5 : vector<16x8x256xf32>
    %c0_5 = arith.constant 0 : index
    %c0_6 = arith.constant 0 : index
    %7 = vector.load %arg5[%c0_5, %c0_6] : memref<1x256xf32, #tpu.memory_space<vmem>>, vector<1x256xf32>
    %8 = vector.shape_cast %7 : vector<1x256xf32> to vector<256xf32>
    %9 = vector.shape_cast %8 : vector<256xf32> to vector<1x1x256xf32>
    %10 = vector.broadcast %9 : vector<1x1x256xf32> to vector<16x8x256xf32>
    %11 = arith.addf %6, %10 : vector<16x8x256xf32>
    %cst = arith.constant 0.000000e+00 : f32
    %12 = vector.broadcast %cst : f32 to vector<16x8x256xf32>
    %13 = arith.maximumf %11, %12 : vector<16x8x256xf32>
    %c0_7 = arith.constant 0 : index
    %c0_8 = arith.constant 0 : index
    %c0_9 = arith.constant 0 : index
    %c0_10 = arith.constant 0 : index
    %14 = vector.load %arg6[%c0_7, %c0_8, %c0_9, %c0_10] : memref<16x1x8x256xf32, #tpu.memory_space<vmem>>, vector<16x1x8x256xf32>
    %15 = vector.shape_cast %14 : vector<16x1x8x256xf32> to vector<16x8x256xf32>
    %16 = vector.shape_cast %13 : vector<16x8x256xf32> to vector<16x1x8x256xf32>
    tpu.vector_store %arg6[%c0_7, %c0_8, %c0_9, %c0_10], %16 {strides = array<i32>} : memref<16x1x8x256xf32, #tpu.memory_space<vmem>>, vector<16x1x8x256xf32>,
    return
  }
  func.func @transform_0(%arg0: i32, %arg1: i32, %arg2: i32) -> (i32, i32, i32, i32) {
    %c2_i32 = arith.constant 2 : i32
    %0 = arith.muli %arg1, %c2_i32 : i32
    %1 = arith.addi %0, %arg2 : i32
    %c0_i32 = arith.constant 0 : i32
    %c0_i32_0 = arith.constant 0 : i32
    %c0_i32_1 = arith.constant 0 : i32
    return %1, %arg0, %c0_i32, %c0_i32_0 : i32, i32, i32, i32
  }
  func.func @transform_1(%arg0: i32, %arg1: i32, %arg2: i32) -> (i32, i32) {
    %c0_i32 = arith.constant 0 : i32
    %c0_i32_0 = arith.constant 0 : i32
    %c0_i32_1 = arith.constant 0 : i32
    return %c0_i32, %c0_i32_0 : i32, i32
  }
  func.func @transform_2(%arg0: i32, %arg1: i32, %arg2: i32) -> (i32, i32) {
    %c0_i32 = arith.constant 0 : i32
    %c0_i32_0 = arith.constant 0 : i32
    %c0_i32_1 = arith.constant 0 : i32
    return %c0_i32, %c0_i32_0 : i32, i32
  }
  func.func @transform_3(%arg0: i32, %arg1: i32, %arg2: i32) -> (i32, i32, i32, i32) {
    %c0_i32 = arith.constant 0 : i32
    %c0_i32_0 = arith.constant 0 : i32
    return %arg0, %arg1, %c0_i32, %arg2 : i32, i32, i32, i32
  }
}

module attributes {stable_mosaic.version = 11 : i64} {
  func.func @_mm_kernel(%arg0: i32, %arg1: i32, %arg2: i32, %arg3: i32, %arg4: memref<1x256x512xf32, #tpu.memory_space<vmem>>, %arg5: memref<1x512x128xf32, #tpu.memory_space<vmem>>, %arg6: memref<1x256x128xf32, #tpu.memory_space<vmem>>, %arg7: memref<1x1x2x128xf32, #tpu.memory_space<vmem>>, %arg8: memref<256x128xf32, #tpu.memory_space<vmem>>) attributes {dimension_semantics = [#tpu.dimension_semantics<parallel>, #tpu.dimension_semantics<parallel>, #tpu.dimension_semantics<parallel>, #tpu.dimension_semantics<arbitrary>], iteration_bounds = array<i64: 4, 2, 1, 2>, scalar_prefetch = 0 : i64, scratch_operands = 1 : i64, tpu.core_type = #tpu.core_type<tc>, window_params = [{transform_indices = @transform_0, window_bounds = array<i64: 1, 256, 512>}, {transform_indices = @transform_1, window_bounds = array<i64: 1, 512, 128>}, {transform_indices = @transform_2, window_bounds = array<i64: 1, 256, 128>}, {transform_indices = @transform_3, window_bounds = array<i64: 1, 1, 2, 128>}]} {
    %c0_i32 = arith.constant 0 : i32
    %0 = arith.cmpi eq, %arg3, %c0_i32 : i32
    %1 = arith.extui %0 : i1 to i32
    %c0_i32_0 = arith.constant 0 : i32
    %2 = arith.cmpi ne, %1, %c0_i32_0 : i32
    scf.if %2 {
      %cst_11 = arith.constant 0.000000e+00 : f32
      %14 = vector.broadcast %cst_11 : f32 to vector<256x128xf32>
      %c0_12 = arith.constant 0 : index
      %c0_13 = arith.constant 0 : index
      %15 = vector.load %arg8[%c0_12, %c0_13] : memref<256x128xf32, #tpu.memory_space<vmem>>, vector<256x128xf32>
      tpu.vector_store %arg8[%c0_12, %c0_13], %14 {strides = array<i32>} : memref<256x128xf32, #tpu.memory_space<vmem>>, vector<256x128xf32>,
    } else {
    }
    %c0 = arith.constant 0 : index
    %c0_1 = arith.constant 0 : index
    %3 = vector.load %arg8[%c0, %c0_1] : memref<256x128xf32, #tpu.memory_space<vmem>>, vector<256x128xf32>
    %c0_2 = arith.constant 0 : index
    %c0_3 = arith.constant 0 : index
    %c0_4 = arith.constant 0 : index
    %4 = vector.load %arg4[%c0_2, %c0_3, %c0_4] : memref<1x256x512xf32, #tpu.memory_space<vmem>>, vector<1x256x512xf32>
    %5 = vector.shape_cast %4 : vector<1x256x512xf32> to vector<256x512xf32>
    %c0_5 = arith.constant 0 : index
    %c0_6 = arith.constant 0 : index
    %c0_7 = arith.constant 0 : index
    %6 = vector.load %arg5[%c0_5, %c0_6, %c0_7] : memref<1x512x128xf32, #tpu.memory_space<vmem>>, vector<1x512x128xf32>
    %7 = vector.shape_cast %6 : vector<1x512x128xf32> to vector<512x128xf32>
    %cst = arith.constant dense<0.000000e+00> : vector<256x128xf32>
    %8 = tpu.matmul %5, %7, %cst {dimension_numbers = #tpu.dot_dimension_numbers<[1], [0], [0], [1], [0, 0, 1, 1], [], []>} : vector<256x512xf32>, vector<512x128xf32>, vector<256x128xf32> -> vector<256x128xf32>
    %9 = arith.addf %3, %8 : vector<256x128xf32>
    %c0_8 = arith.constant 0 : index
    %c0_9 = arith.constant 0 : index
    %10 = vector.load %arg8[%c0_8, %c0_9] : memref<256x128xf32, #tpu.memory_space<vmem>>, vector<256x128xf32>
    tpu.vector_store %arg8[%c0_8, %c0_9], %9 {strides = array<i32>} : memref<256x128xf32, #tpu.memory_space<vmem>>, vector<256x128xf32>,
    %c1_i32 = arith.constant 1 : i32
    %11 = arith.cmpi eq, %arg3, %c1_i32 : i32
    %12 = arith.extui %11 : i1 to i32
    %c0_i32_10 = arith.constant 0 : i32
    %13 = arith.cmpi ne, %12, %c0_i32_10 : i32
    scf.if %13 {
      %c0_11 = arith.constant 0 : index
      %c0_12 = arith.constant 0 : index
      %14 = vector.load %arg8[%c0_11, %c0_12] : memref<256x128xf32, #tpu.memory_space<vmem>>, vector<256x128xf32>
      %c0_13 = arith.constant 0 : index
      %c0_14 = arith.constant 0 : index
      %c0_15 = arith.constant 0 : index
      %15 = vector.load %arg6[%c0_13, %c0_14, %c0_15] : memref<1x256x128xf32, #tpu.memory_space<vmem>>, vector<1x256x128xf32>
      %16 = vector.shape_cast %15 : vector<1x256x128xf32> to vector<256x128xf32>
      %17 = vector.shape_cast %14 : vector<256x128xf32> to vector<1x256x128xf32>
      tpu.vector_store %arg6[%c0_13, %c0_14, %c0_15], %17 {strides = array<i32>} : memref<1x256x128xf32, #tpu.memory_space<vmem>>, vector<1x256x128xf32>,
      %cst_16 = arith.constant dense<0.000000e+00> : vector<128xf32>
      %18 = vector.multi_reduction <add>, %14, %cst_16 [0] : vector<256x128xf32> to vector<128xf32>
      %19 = vector.shape_cast %18 : vector<128xf32> to vector<1x128xf32>
      %20 = arith.mulf %14, %14 : vector<256x128xf32>
      %cst_17 = arith.constant dense<0.000000e+00> : vector<128xf32>
      %21 = vector.multi_reduction <add>, %20, %cst_17 [0] : vector<256x128xf32> to vector<128xf32>
      %22 = vector.shape_cast %21 : vector<128xf32> to vector<1x128xf32>
      %23 = tpu.concatenate %19, %22 in 0 : vector<1x128xf32>, vector<1x128xf32> -> vector<2x128xf32>
      %c0_18 = arith.constant 0 : index
      %c0_19 = arith.constant 0 : index
      %c0_20 = arith.constant 0 : index
      %c0_21 = arith.constant 0 : index
      %24 = vector.load %arg7[%c0_18, %c0_19, %c0_20, %c0_21] : memref<1x1x2x128xf32, #tpu.memory_space<vmem>>, vector<1x1x2x128xf32>
      %25 = vector.shape_cast %24 : vector<1x1x2x128xf32> to vector<2x128xf32>
      %26 = vector.shape_cast %23 : vector<2x128xf32> to vector<1x1x2x128xf32>
      tpu.vector_store %arg7[%c0_18, %c0_19, %c0_20, %c0_21], %26 {strides = array<i32>} : memref<1x1x2x128xf32, #tpu.memory_space<vmem>>, vector<1x1x2x128xf32>,
    } else {
    }
    return
  }
  func.func @transform_0(%arg0: i32, %arg1: i32, %arg2: i32, %arg3: i32) -> (i32, i32, i32) {
    %c0_i32 = arith.constant 0 : i32
    return %arg0, %arg1, %arg3 : i32, i32, i32
  }
  func.func @transform_1(%arg0: i32, %arg1: i32, %arg2: i32, %arg3: i32) -> (i32, i32, i32) {
    %c0_i32 = arith.constant 0 : i32
    return %arg0, %arg3, %arg2 : i32, i32, i32
  }
  func.func @transform_2(%arg0: i32, %arg1: i32, %arg2: i32, %arg3: i32) -> (i32, i32, i32) {
    %c0_i32 = arith.constant 0 : i32
    return %arg0, %arg1, %arg2 : i32, i32, i32
  }
  func.func @transform_3(%arg0: i32, %arg1: i32, %arg2: i32, %arg3: i32) -> (i32, i32, i32, i32) {
    %c0_i32 = arith.constant 0 : i32
    %c0_i32_0 = arith.constant 0 : i32
    return %arg0, %arg1, %c0_i32, %arg2 : i32, i32, i32, i32
  }
}

module attributes {stable_mosaic.version = 11 : i64} {
  func.func @_bn_act_kernel(%arg0: i32, %arg1: i32, %arg2: i32, %arg3: memref<1x32x16x128xf32, #tpu.memory_space<vmem>>, %arg4: memref<1x128xf32, #tpu.memory_space<vmem>>, %arg5: memref<1x128xf32, #tpu.memory_space<vmem>>, %arg6: memref<32x1x16x128xf32, #tpu.memory_space<vmem>>) attributes {dimension_semantics = [#tpu.dimension_semantics<parallel>, #tpu.dimension_semantics<parallel>, #tpu.dimension_semantics<parallel>], iteration_bounds = array<i64: 1, 2, 2>, scalar_prefetch = 0 : i64, scratch_operands = 0 : i64, tpu.core_type = #tpu.core_type<tc>, window_params = [{transform_indices = @transform_0, window_bounds = array<i64: 1, 32, 16, 128>}, {pipeline_mode = #tpu.pipeline_mode<synchronous>, transform_indices = @transform_1, window_bounds = array<i64: 1, 128>}, {pipeline_mode = #tpu.pipeline_mode<synchronous>, transform_indices = @transform_2, window_bounds = array<i64: 1, 128>}, {transform_indices = @transform_3, window_bounds = array<i64: 32, 1, 16, 128>}]} {
    %c0 = arith.constant 0 : index
    %c0_0 = arith.constant 0 : index
    %c0_1 = arith.constant 0 : index
    %c0_2 = arith.constant 0 : index
    %0 = vector.load %arg3[%c0, %c0_0, %c0_1, %c0_2] : memref<1x32x16x128xf32, #tpu.memory_space<vmem>>, vector<1x32x16x128xf32>
    %1 = vector.shape_cast %0 : vector<1x32x16x128xf32> to vector<32x16x128xf32>
    %c0_3 = arith.constant 0 : index
    %c0_4 = arith.constant 0 : index
    %2 = vector.load %arg4[%c0_3, %c0_4] : memref<1x128xf32, #tpu.memory_space<vmem>>, vector<1x128xf32>
    %3 = vector.shape_cast %2 : vector<1x128xf32> to vector<128xf32>
    %4 = vector.shape_cast %3 : vector<128xf32> to vector<1x1x128xf32>
    %5 = vector.broadcast %4 : vector<1x1x128xf32> to vector<32x16x128xf32>
    %6 = arith.mulf %1, %5 : vector<32x16x128xf32>
    %c0_5 = arith.constant 0 : index
    %c0_6 = arith.constant 0 : index
    %7 = vector.load %arg5[%c0_5, %c0_6] : memref<1x128xf32, #tpu.memory_space<vmem>>, vector<1x128xf32>
    %8 = vector.shape_cast %7 : vector<1x128xf32> to vector<128xf32>
    %9 = vector.shape_cast %8 : vector<128xf32> to vector<1x1x128xf32>
    %10 = vector.broadcast %9 : vector<1x1x128xf32> to vector<32x16x128xf32>
    %11 = arith.addf %6, %10 : vector<32x16x128xf32>
    %cst = arith.constant 0.000000e+00 : f32
    %12 = vector.broadcast %cst : f32 to vector<32x16x128xf32>
    %13 = arith.maximumf %11, %12 : vector<32x16x128xf32>
    %c0_7 = arith.constant 0 : index
    %c0_8 = arith.constant 0 : index
    %c0_9 = arith.constant 0 : index
    %c0_10 = arith.constant 0 : index
    %14 = vector.load %arg6[%c0_7, %c0_8, %c0_9, %c0_10] : memref<32x1x16x128xf32, #tpu.memory_space<vmem>>, vector<32x1x16x128xf32>
    %15 = vector.shape_cast %14 : vector<32x1x16x128xf32> to vector<32x16x128xf32>
    %16 = vector.shape_cast %13 : vector<32x16x128xf32> to vector<32x1x16x128xf32>
    tpu.vector_store %arg6[%c0_7, %c0_8, %c0_9, %c0_10], %16 {strides = array<i32>} : memref<32x1x16x128xf32, #tpu.memory_space<vmem>>, vector<32x1x16x128xf32>,
    return
  }
  func.func @transform_0(%arg0: i32, %arg1: i32, %arg2: i32) -> (i32, i32, i32, i32) {
    %c2_i32 = arith.constant 2 : i32
    %0 = arith.muli %arg1, %c2_i32 : i32
    %1 = arith.addi %0, %arg2 : i32
    %c0_i32 = arith.constant 0 : i32
    %c0_i32_0 = arith.constant 0 : i32
    %c0_i32_1 = arith.constant 0 : i32
    return %1, %arg0, %c0_i32, %c0_i32_0 : i32, i32, i32, i32
  }
  func.func @transform_1(%arg0: i32, %arg1: i32, %arg2: i32) -> (i32, i32) {
    %c0_i32 = arith.constant 0 : i32
    %c0_i32_0 = arith.constant 0 : i32
    %c0_i32_1 = arith.constant 0 : i32
    return %c0_i32, %c0_i32_0 : i32, i32
  }
  func.func @transform_2(%arg0: i32, %arg1: i32, %arg2: i32) -> (i32, i32) {
    %c0_i32 = arith.constant 0 : i32
    %c0_i32_0 = arith.constant 0 : i32
    %c0_i32_1 = arith.constant 0 : i32
    return %c0_i32, %c0_i32_0 : i32, i32
  }
  func.func @transform_3(%arg0: i32, %arg1: i32, %arg2: i32) -> (i32, i32, i32, i32) {
    %c0_i32 = arith.constant 0 : i32
    %c0_i32_0 = arith.constant 0 : i32
    return %arg0, %arg1, %c0_i32, %arg2 : i32, i32, i32, i32
  }
}

module attributes {stable_mosaic.version = 11 : i64} {
  func.func @_mm_kernel(%arg0: i32, %arg1: i32, %arg2: i32, %arg3: i32, %arg4: memref<1x256x512xf32, #tpu.memory_space<vmem>>, %arg5: memref<1x512x128xf32, #tpu.memory_space<vmem>>, %arg6: memref<1x256x128xf32, #tpu.memory_space<vmem>>, %arg7: memref<256x128xf32, #tpu.memory_space<vmem>>) attributes {dimension_semantics = [#tpu.dimension_semantics<parallel>, #tpu.dimension_semantics<parallel>, #tpu.dimension_semantics<parallel>, #tpu.dimension_semantics<arbitrary>], iteration_bounds = array<i64: 4, 8, 1, 1>, scalar_prefetch = 0 : i64, scratch_operands = 1 : i64, tpu.core_type = #tpu.core_type<tc>, window_params = [{transform_indices = @transform_0, window_bounds = array<i64: 1, 256, 512>}, {transform_indices = @transform_1, window_bounds = array<i64: 1, 512, 128>}, {transform_indices = @transform_2, window_bounds = array<i64: 1, 256, 128>}]} {
    %c0_i32 = arith.constant 0 : i32
    %0 = arith.cmpi eq, %arg3, %c0_i32 : i32
    %1 = arith.extui %0 : i1 to i32
    %c0_i32_0 = arith.constant 0 : i32
    %2 = arith.cmpi ne, %1, %c0_i32_0 : i32
    scf.if %2 {
      %cst_12 = arith.constant 0.000000e+00 : f32
      %14 = vector.broadcast %cst_12 : f32 to vector<256x128xf32>
      %c0_13 = arith.constant 0 : index
      %c0_14 = arith.constant 0 : index
      %15 = vector.load %arg7[%c0_13, %c0_14] : memref<256x128xf32, #tpu.memory_space<vmem>>, vector<256x128xf32>
      tpu.vector_store %arg7[%c0_13, %c0_14], %14 {strides = array<i32>} : memref<256x128xf32, #tpu.memory_space<vmem>>, vector<256x128xf32>,
    } else {
    }
    %c0 = arith.constant 0 : index
    %c0_1 = arith.constant 0 : index
    %3 = vector.load %arg7[%c0, %c0_1] : memref<256x128xf32, #tpu.memory_space<vmem>>, vector<256x128xf32>
    %c0_2 = arith.constant 0 : index
    %c0_3 = arith.constant 0 : index
    %c0_4 = arith.constant 0 : index
    %4 = vector.load %arg4[%c0_2, %c0_3, %c0_4] : memref<1x256x512xf32, #tpu.memory_space<vmem>>, vector<1x256x512xf32>
    %5 = vector.shape_cast %4 : vector<1x256x512xf32> to vector<256x512xf32>
    %c0_5 = arith.constant 0 : index
    %c0_6 = arith.constant 0 : index
    %c0_7 = arith.constant 0 : index
    %6 = vector.load %arg5[%c0_5, %c0_6, %c0_7] : memref<1x512x128xf32, #tpu.memory_space<vmem>>, vector<1x512x128xf32>
    %7 = vector.shape_cast %6 : vector<1x512x128xf32> to vector<512x128xf32>
    %cst = arith.constant dense<0.000000e+00> : vector<256x128xf32>
    %8 = tpu.matmul %5, %7, %cst {dimension_numbers = #tpu.dot_dimension_numbers<[1], [0], [0], [1], [0, 0, 1, 1], [], []>} : vector<256x512xf32>, vector<512x128xf32>, vector<256x128xf32> -> vector<256x128xf32>
    %9 = arith.addf %3, %8 : vector<256x128xf32>
    %c0_8 = arith.constant 0 : index
    %c0_9 = arith.constant 0 : index
    %10 = vector.load %arg7[%c0_8, %c0_9] : memref<256x128xf32, #tpu.memory_space<vmem>>, vector<256x128xf32>
    tpu.vector_store %arg7[%c0_8, %c0_9], %9 {strides = array<i32>} : memref<256x128xf32, #tpu.memory_space<vmem>>, vector<256x128xf32>,
    %c0_i32_10 = arith.constant 0 : i32
    %11 = arith.cmpi eq, %arg3, %c0_i32_10 : i32
    %12 = arith.extui %11 : i1 to i32
    %c0_i32_11 = arith.constant 0 : i32
    %13 = arith.cmpi ne, %12, %c0_i32_11 : i32
    scf.if %13 {
      %c0_12 = arith.constant 0 : index
      %c0_13 = arith.constant 0 : index
      %14 = vector.load %arg7[%c0_12, %c0_13] : memref<256x128xf32, #tpu.memory_space<vmem>>, vector<256x128xf32>
      %15 = math.tanh %14 : vector<256x128xf32>
      %c0_14 = arith.constant 0 : index
      %c0_15 = arith.constant 0 : index
      %c0_16 = arith.constant 0 : index
      %16 = vector.load %arg6[%c0_14, %c0_15, %c0_16] : memref<1x256x128xf32, #tpu.memory_space<vmem>>, vector<1x256x128xf32>
      %17 = vector.shape_cast %16 : vector<1x256x128xf32> to vector<256x128xf32>
      %18 = vector.shape_cast %15 : vector<256x128xf32> to vector<1x256x128xf32>
      tpu.vector_store %arg6[%c0_14, %c0_15, %c0_16], %18 {strides = array<i32>} : memref<1x256x128xf32, #tpu.memory_space<vmem>>, vector<1x256x128xf32>,
    } else {
    }
    return
  }
  func.func @transform_0(%arg0: i32, %arg1: i32, %arg2: i32, %arg3: i32) -> (i32, i32, i32) {
    %c0_i32 = arith.constant 0 : i32
    return %arg0, %arg1, %arg3 : i32, i32, i32
  }
  func.func @transform_1(%arg0: i32, %arg1: i32, %arg2: i32, %arg3: i32) -> (i32, i32, i32) {
    %c0_i32 = arith.constant 0 : i32
    return %arg0, %arg3, %arg2 : i32, i32, i32
  }
  func.func @transform_2(%arg0: i32, %arg1: i32, %arg2: i32, %arg3: i32) -> (i32, i32, i32) {
    %c0_i32 = arith.constant 0 : i32
    return %arg0, %arg1, %arg2 : i32, i32, i32
  }
}

</mosaic_0001>

<bundles_post_ra>
// kernel: pp2p_forward.10
= control target key start
LH: loop header
LB: loop body
LE: loop exit
PB: predicated region body
PF: predicated region fallthrough
CT: control target
= control target key end

     0   :  { %v68_v0 = vlaneseq  ;;  %s586_s1 = inlined_call_operand.vmem [shape: f32[1,1024], index: 1, kind: input, shape index: {}]   ;;  %s587_s2 = inlined_call_operand.vmem [shape: f32[1,1024], index: 2, kind: input, shape index: {}]   ;;  %s588_s0 = inlined_call_operand.vmem [shape: f32[1,8,4,1024], index: 0, kind: input, shape index: {}]   ;;  %s589_s3 = inlined_call_operand.vmem [shape: f32[8,1,4,1024], index: 3, kind: output, shape index: {}]  }
   0x1   :  { %v66_v2 = vld [vmem:[%s586_s1] sm:$0xff]  ;;  %v35_v23 = vld [vmem:[%s588_s0 + $0x8] sm:$0xff]  ;;  %v36_v28 = vld [vmem:[%s588_s0 + $0x10] sm:$0xff] }
   0x2   :  { %v69_v1 = vshrl.u32 %v68_v0, 7  ;;  %v140_v3 = vld [vmem:[%s587_s2] sm:$0xff]  ;;  %v39_v36 = vld [vmem:[%s588_s0 + $0x28] sm:$0xff]  ;;  %v40_v37 = vld [vmem:[%s588_s0 + $0x30] sm:$0xff] }
   0x3   :  { %v34_v16 = vld [vmem:[%s588_s0] sm:$0xff]  ;;  %v37_v40 = vld [vmem:[%s588_s0 + $0x18] sm:$0xff]  ;;  %v43_v57 = vld [vmem:[%s588_s0 + $0x48] sm:$0xff] }
   0x4   :  { %v70_v4 = vsub.s32 0, %v69_v1  ;;  %v74_v5 = vsub.s32 1, %v69_v1  ;;  %v78_v6 = vsub.s32 2, %v69_v1  ;;  %v82_v7 = vsub.s32 3, %v69_v1  ;;  %v38_v31 = vld [vmem:[%s588_s0 + $0x20] sm:$0xff]  ;;  %v41_v47 = vld [vmem:[%s588_s0 + $0x38] sm:$0xff] }
   0x5   :  { %v86_v8 = vsub.s32 4, %v69_v1  ;;  %v90_v9 = vsub.s32 5, %v69_v1  ;;  %v94_v10 = vsub.s32 6, %v69_v1  ;;  %v98_v11 = vsub.s32 7, %v69_v1  ;;  %v42_v52 = vld [vmem:[%s588_s0 + $0x40] sm:$0xff]  ;;  %v44_v62 = vld [vmem:[%s588_s0 + $0x50] sm:$0xff] }
   0x6   :  { %v71_v12 = vrot.slane %v66_v2, %v70_v4  ;;  %v75_v13 = vrot.slane %v66_v2, %v74_v5  ;;  %v145_v14 = vrot.slane %v140_v3, %v70_v4  ;;  %v149_v15 = vrot.slane %v140_v3, %v74_v5  ;;  %v45_v63 = vld [vmem:[%s588_s0 + $0x58] sm:$0xff]  ;;  %v46_v4 = vld [vmem:[%s588_s0 + $0x60] sm:$0xff]  ;;  %v47_v5 = vld [vmem:[%s588_s0 + $0x68] sm:$0xff] }
   0x7   :  { %v79_v17 = vrot.slane %v66_v2, %v78_v6  ;;  %v83_v18 = vrot.slane %v66_v2, %v82_v7  ;;  %v153_v19 = vrot.slane %v140_v3, %v78_v6  ;;  %v157_v20 = vrot.slane %v140_v3, %v82_v7 }
   0x8   :  { %v317_v21 = vcombine.low %v71_v12, %v75_v13  ;;  %v319_v22 = vcombine.low %v145_v14, %v149_v15  ;;  %v87_v24 = vrot.slane %v66_v2, %v86_v8  ;;  %v91_v25 = vrot.slane %v66_v2, %v90_v9  ;;  %v49_v15 = vld [vmem:[%s588_s0 + $0x78] sm:$0xff] }
   0x9   :  { %v324_v26 = vcombine.low %v79_v17, %v83_v18  ;;  %v326_v27 = vcombine.low %v153_v19, %v157_v20  ;;  %v161_v29 = vrot.slane %v140_v3, %v86_v8  ;;  %v165_v30 = vrot.slane %v140_v3, %v90_v9  ;;  %v50_v20 = vld [vmem:[%s588_s0 + $0x80] sm:$0xff] }
   0xa   :  { %v108_v32 = vmul.f32 %v317_v21, %v34_v16  ;;  %v335_v33 = vcombine.low %v87_v24, %v91_v25  ;;  %v95_v34 = vrot.slane %v66_v2, %v94_v10  ;;  %v99_v35 = vrot.slane %v66_v2, %v98_v11 }
   0xb   :  { %v109_v38 = vmul.f32 %v324_v26, %v35_v23  ;;  %v344_v39 = vcombine.low %v161_v29, %v165_v30  ;;  %v169_v41 = vrot.slane %v140_v3, %v94_v10  ;;  %v173_v42 = vrot.slane %v140_v3, %v98_v11  ;;  %v48_v10 = vld [vmem:[%s588_s0 + $0x70] sm:$0xff]  ;;  %v51_v29 = vld [vmem:[%s588_s0 + $0x88] sm:$0xff] }
   0xc   :  { %v182_v43 = vadd.f32 %v319_v22, %v108_v32  ;;  %v110_v44 = vmul.f32 %v335_v33, %v36_v28  ;;  %v351_v45 = vcombine.low %v95_v34, %v99_v35  ;;  %v112_v46 = vmul.f32 %v317_v21, %v38_v31  ;;  %v52_v35 = vld [vmem:[%s588_s0 + $0x90] sm:$0xff] }
   0xd   :  { %v183_v48 = vadd.f32 %v326_v27, %v109_v38  ;;  %v358_v49 = vcombine.low %v169_v41, %v173_v42  ;;  %v113_v50 = vmul.f32 %v324_v26, %v39_v36  ;;  %v114_v51 = vmul.f32 %v335_v33, %v40_v37  ;;  %v53_v36 = vld [vmem:[%s588_s0 + $0x98] sm:$0xff]  ;;  %v54_v42 = vld [vmem:[%s588_s0 + $0xa0] sm:$0xff] }
   0xe   :  { %v214_v53 = vmax.f32 %v182_v43, 0.0  ;;  %v184_v54 = vadd.f32 %v344_v39, %v110_v44  ;;  %v111_v55 = vmul.f32 %v351_v45, %v37_v40  ;;  %v186_v56 = vadd.f32 %v319_v22, %v112_v46  ;;  %v55_v43 = vld [vmem:[%s588_s0 + $0xa8] sm:$0xff] }
   0xf   :  { %v215_v58 = vmax.f32 %v183_v48, 0.0  ;;  %v187_v59 = vadd.f32 %v326_v27, %v113_v50  ;;  %v188_v60 = vadd.f32 %v344_v39, %v114_v51  ;;  %v115_v61 = vmul.f32 %v351_v45, %v41_v47  ;;  %v56_v50 = vld [vmem:[%s588_s0 + $0xb0] sm:$0xff] }
  0x10   :  { %246 = vst [vmem:[%s589_s3] sm:$0xff] %v214_v53  ;;  %v216_v0 = vmax.f32 %v184_v54, 0.0  ;;  %v185_v1 = vadd.f32 %v358_v49, %v111_v55  ;;  %v218_v2 = vmax.f32 %v186_v56, 0.0  ;;  %v116_v3 = vmul.f32 %v317_v21, %v42_v52  ;;  %v57_v55 = vld [vmem:[%s588_s0 + $0xb8] sm:$0xff] }
  0x11   :  { %247 = vst [vmem:[%s589_s3 + $0x8] sm:$0xff] %v215_v58  ;;  %v219_v6 = vmax.f32 %v187_v59, 0.0  ;;  %v220_v7 = vmax.f32 %v188_v60, 0.0  ;;  %v189_v8 = vadd.f32 %v358_v49, %v115_v61  ;;  %v117_v9 = vmul.f32 %v324_v26, %v43_v57  ;;  %v58_v60 = vld [vmem:[%s588_s0 + $0xc0] sm:$0xff] }
  0x12   :  { %248 = vst [vmem:[%s589_s3 + $0x10] sm:$0xff] %v216_v0  ;;  %v217_v11 = vmax.f32 %v185_v1, 0.0  ;;  %250 = vst [vmem:[%s589_s3 + $0x20] sm:$0xff] %v218_v2  ;;  %v190_v12 = vadd.f32 %v319_v22, %v116_v3  ;;  %v118_v13 = vmul.f32 %v335_v33, %v44_v62  ;;  %v119_v14 = vmul.f32 %v351_v45, %v45_v63  ;;  %v59_v1 = vld [vmem:[%s588_s0 + $0xc8] sm:$0xff] }
  0x13   :  { %251 = vst [vmem:[%s589_s3 + $0x28] sm:$0xff] %v219_v6  ;;  %252 = vst [vmem:[%s589_s3 + $0x30] sm:$0xff] %v220_v7  ;;  %v221_v16 = vmax.f32 %v189_v8, 0.0  ;;  %v191_v17 = vadd.f32 %v326_v27, %v117_v9  ;;  %v120_v18 = vmul.f32 %v317_v21, %v46_v4  ;;  %v121_v19 = vmul.f32 %v324_v26, %v47_v5  ;;  %v60_v6 = vld [vmem:[%s588_s0 + $0xd0] sm:$0xff]  ;;  %v61_v7 = vld [vmem:[%s588_s0 + $0xd8] sm:$0xff] }
  0x14   :  { %249 = vst [vmem:[%s589_s3 + $0x18] sm:$0xff] %v217_v11  ;;  %v222_v23 = vmax.f32 %v190_v12, 0.0  ;;  %v192_v24 = vadd.f32 %v344_v39, %v118_v13  ;;  %v193_v25 = vadd.f32 %v358_v49, %v119_v14  ;;  %v122_v28 = vmul.f32 %v335_v33, %v48_v10  ;;  %v62_v12 = vld [vmem:[%s588_s0 + $0xe0] sm:$0xff]  ;;  %v63_v13 = vld [vmem:[%s588_s0 + $0xe8] sm:$0xff] }
  0x15   :  { %253 = vst [vmem:[%s589_s3 + $0x38] sm:$0xff] %v221_v16  ;;  %v223_v30 = vmax.f32 %v191_v17, 0.0  ;;  %v194_v31 = vadd.f32 %v319_v22, %v120_v18  ;;  %v195_v32 = vadd.f32 %v326_v27, %v121_v19  ;;  %v123_v34 = vmul.f32 %v351_v45, %v49_v15  ;;  %v64_v18 = vld [vmem:[%s588_s0 + $0xf0] sm:$0xff] }
  0x16   :  { %254 = vst [vmem:[%s589_s3 + $0x40] sm:$0xff] %v222_v23  ;;  %v224_v37 = vmax.f32 %v192_v24, 0.0  ;;  %v225_v38 = vmax.f32 %v193_v25, 0.0  ;;  %v196_v40 = vadd.f32 %v344_v39, %v122_v28  ;;  %v124_v41 = vmul.f32 %v317_v21, %v50_v20  ;;  %v65_v25 = vld [vmem:[%s588_s0 + $0xf8] sm:$0xff] }
  0x17   :  { %255 = vst [vmem:[%s589_s3 + $0x48] sm:$0xff] %v223_v30  ;;  %v226_v44 = vmax.f32 %v194_v31, 0.0  ;;  %v227_v46 = vmax.f32 %v195_v32, 0.0  ;;  %v197_v47 = vadd.f32 %v358_v49, %v123_v34  ;;  %v125_v48 = vmul.f32 %v324_v26, %v51_v29 }
  0x18   :  { %256 = vst [vmem:[%s589_s3 + $0x50] sm:$0xff] %v224_v37  ;;  %257 = vst [vmem:[%s589_s3 + $0x58] sm:$0xff] %v225_v38  ;;  %v228_v51 = vmax.f32 %v196_v40, 0.0  ;;  %v198_v52 = vadd.f32 %v319_v22, %v124_v41  ;;  %v126_v53 = vmul.f32 %v335_v33, %v52_v35  ;;  %v127_v54 = vmul.f32 %v351_v45, %v53_v36 }
  0x19   :  { %258 = vst [vmem:[%s589_s3 + $0x60] sm:$0xff] %v226_v44  ;;  %259 = vst [vmem:[%s589_s3 + $0x68] sm:$0xff] %v227_v46  ;;  %v229_v56 = vmax.f32 %v197_v47, 0.0  ;;  %v199_v57 = vadd.f32 %v326_v27, %v125_v48  ;;  %v128_v58 = vmul.f32 %v317_v21, %v54_v42  ;;  %v129_v59 = vmul.f32 %v324_v26, %v55_v43 }
  0x1a   :  { %260 = vst [vmem:[%s589_s3 + $0x70] sm:$0xff] %v228_v51  ;;  %v230_v61 = vmax.f32 %v198_v52, 0.0  ;;  %v200_v62 = vadd.f32 %v344_v39, %v126_v53  ;;  %v201_v63 = vadd.f32 %v358_v49, %v127_v54  ;;  %v130_v0 = vmul.f32 %v335_v33, %v56_v50 }
  0x1b   :  { %261 = vst [vmem:[%s589_s3 + $0x78] sm:$0xff] %v229_v56  ;;  %v231_v2 = vmax.f32 %v199_v57, 0.0  ;;  %v202_v3 = vadd.f32 %v319_v22, %v128_v58  ;;  %v203_v4 = vadd.f32 %v326_v27, %v129_v59  ;;  %v131_v5 = vmul.f32 %v351_v45, %v57_v55 }
  0x1c   :  { %262 = vst [vmem:[%s589_s3 + $0x80] sm:$0xff] %v230_v61  ;;  %v232_v8 = vmax.f32 %v200_v62, 0.0  ;;  %v233_v9 = vmax.f32 %v201_v63, 0.0  ;;  %v204_v10 = vadd.f32 %v344_v39, %v130_v0  ;;  %v132_v11 = vmul.f32 %v317_v21, %v58_v60 }
  0x1d   :  { %263 = vst [vmem:[%s589_s3 + $0x88] sm:$0xff] %v231_v2  ;;  %v234_v14 = vmax.f32 %v202_v3, 0.0  ;;  %v235_v15 = vmax.f32 %v203_v4, 0.0  ;;  %v205_v16 = vadd.f32 %v358_v49, %v131_v5  ;;  %v133_v17 = vmul.f32 %v324_v26, %v59_v1 }
  0x1e   :  { %264 = vst [vmem:[%s589_s3 + $0x90] sm:$0xff] %v232_v8  ;;  %265 = vst [vmem:[%s589_s3 + $0x98] sm:$0xff] %v233_v9  ;;  %v236_v19 = vmax.f32 %v204_v10, 0.0  ;;  %v206_v20 = vadd.f32 %v319_v22, %v132_v11  ;;  %v134_v23 = vmul.f32 %v335_v33, %v60_v6  ;;  %v135_v24 = vmul.f32 %v351_v45, %v61_v7 }
  0x1f   :  { %266 = vst [vmem:[%s589_s3 + $0xa0] sm:$0xff] %v234_v14  ;;  %267 = vst [vmem:[%s589_s3 + $0xa8] sm:$0xff] %v235_v15  ;;  %v237_v28 = vmax.f32 %v205_v16, 0.0  ;;  %v207_v29 = vadd.f32 %v326_v27, %v133_v17  ;;  %v136_v30 = vmul.f32 %v317_v21, %v62_v12  ;;  %v137_v31 = vmul.f32 %v324_v26, %v63_v13 }
  0x20   :  { %268 = vst [vmem:[%s589_s3 + $0xb0] sm:$0xff] %v236_v19  ;;  %v238_v32 = vmax.f32 %v206_v20, 0.0  ;;  %v208_v34 = vadd.f32 %v344_v39, %v134_v23  ;;  %v209_v35 = vadd.f32 %v358_v49, %v135_v24  ;;  %v138_v36 = vmul.f32 %v335_v33, %v64_v18 }
  0x21   :  { %269 = vst [vmem:[%s589_s3 + $0xb8] sm:$0xff] %v237_v28  ;;  %v239_v37 = vmax.f32 %v207_v29, 0.0  ;;  %v210_v21 = vadd.f32 %v319_v22, %v136_v30  ;;  %v211_v26 = vadd.f32 %v326_v27, %v137_v31  ;;  %v139_v38 = vmul.f32 %v351_v45, %v65_v25 }
  0x22   :  { %270 = vst [vmem:[%s589_s3 + $0xc0] sm:$0xff] %v238_v32  ;;  %v240_v40 = vmax.f32 %v208_v34, 0.0  ;;  %v241_v41 = vmax.f32 %v209_v35, 0.0  ;;  %v212_v42 = vadd.f32 %v344_v39, %v138_v36 }
  0x23   :  { %271 = vst [vmem:[%s589_s3 + $0xc8] sm:$0xff] %v239_v37  ;;  %v242_v33 = vmax.f32 %v210_v21, 0.0  ;;  %v243_v43 = vmax.f32 %v211_v26, 0.0  ;;  %v213_v22 = vadd.f32 %v358_v49, %v139_v38 }
  0x24   :  { %272 = vst [vmem:[%s589_s3 + $0xd0] sm:$0xff] %v240_v40  ;;  %273 = vst [vmem:[%s589_s3 + $0xd8] sm:$0xff] %v241_v41  ;;  %v244_v27 = vmax.f32 %v212_v42, 0.0 }
  0x25   :  { %274 = vst [vmem:[%s589_s3 + $0xe0] sm:$0xff] %v242_v33  ;;  %275 = vst [vmem:[%s589_s3 + $0xe8] sm:$0xff] %v243_v43  ;;  %v245_v39 = vmax.f32 %v213_v22, 0.0 }
  0x26   :  { %276 = vst [vmem:[%s589_s3 + $0xf0] sm:$0xff] %v244_v27 }
  0x27   :  { %277 = vst [vmem:[%s589_s3 + $0xf8] sm:$0xff] %v245_v39 }

// kernel: pp2p_forward.9
= control target key start
LH: loop header
LB: loop body
LE: loop exit
PB: predicated region body
PF: predicated region fallthrough
CT: control target
= control target key end

     0   :  { %s982_s12 = smov 0   ;;  %s984_s13 = smov 0   ;;  %s1198_s0 = inlined_call_operand.vmem [shape: f32[1,32,128], index: 0, kind: input, shape index: {}]   ;;  %s1199_s1 = inlined_call_operand.vmem [shape: f32[1,128,1024], index: 1, kind: input, shape index: {}]   ;;  %s1200_s2 = inlined_call_operand.vmem [shape: f32[1,32,1024], index: 2, kind: output, shape index: {0}]   ;;  %s1201_s3 = inlined_call_operand.vmem [shape: f32[1,1,2,1024], index: 3, kind: output, shape index: {1}]  }
   0x1   :  { %s986_s14 = smov 0   ;;  %s988_s15 = smov 0  }
   0x2   :  { %s990_s16 = smov 0  }
   0x3 LB: > { %s32_s17 = sadd.s32 1, %s955_s15  ;;  %s827_s18 = sadd.s32 4294967295, %s959_s16   ;;  %s959_s16 = sphi %s990_s16, %s14_s16   ;;  %s955_s15 = sphi %s988_s15, %s1206_s15   ;;  %s951_s14 = sphi %s986_s14, %s1205_s14   ;;  %s947_s13 = sphi %s984_s13, %s1204_s13   ;;  %s943_s12 = sphi %s982_s12, %s1203_s12  }
   0x4   : > { %p34_p0 = scmp.ge.s32.totalorder %s32_s17, 4  ;;  %p88_p1 = scmp.ne.s32.totalorder %s947_s13, %s943_s12 }
   0x5   : > { %p89_p2 = scmp.eq.s32.totalorder %s959_s16, 0  ;;  %p122_p4 = scmp.eq.s32.totalorder %s827_s18, 3 }
   0x6   : > { %s1208_s17 = smov (%p34_p0, %s32_s17), 0  ;;  %s81_s20 = sadd.s32 1, %s947_s13 }
   0x7   : > { %p90_p3 = por %p89_p2, %p88_p1  ;;  %s77_s19 = ssub.s32 %s955_s15, %s1208_s17 }
   0x8   : > { %p79_p5 = scmp.eq.s32.totalorder %s77_s19, 0  ;;  %p1017_p6 = por %p122_p4, %p88_p1 }
   0x9   : > { %p831_p7 = scmp.ge.s32.totalorder %s959_s16, 4 }
   0xa   : > { %s1022_s22 = scalar_select %p79_p5, %s947_s13, %s81_s20  }
   0xb   : > { %190 = sbr.rel (%p831_p7) target bundleno = 36 (0x24), region = 20 }
  0x10   : > { %193 = sbr.rel (!%p90_p3) target bundleno = 36 (0x24), region = 24  ;;  %s195_s23 = sand.u32 (%p90_p3), 1, %s947_s13  }
  0x11   : > { %s846_s24 = sshll.u32 (%p90_p3), %s955_s15, 4  ;;  %s832_s25 = sshll.u32 (%p90_p3), %s195_s23, 8 }
  0x12   : > { %s1030_s28 = scalar_lea.vmem (%p90_p3), %s1199_s1, %s846_s24  ;;  %s1035_s29 = scalar_lea.vmem (%p90_p3), [#allocation3], %s832_s25 }
  0x13   : > { %v218_v0 = vld [vmem:[%s1030_s28] sm:$0xff] (%p90_p3)  ;;  %v220_v1 = vld [vmem:[%s1030_s28 + $0x8] sm:$0xff] (%p90_p3) }
  0x14   : > { %v222_v2 = vld [vmem:[%s1030_s28 + $0x40] sm:$0xff] (%p90_p3)  ;;  %219 = vst [vmem:[%s1035_s29] sm:$0xff] (%p90_p3), %v218_v0  ;;  %221 = vst [vmem:[%s1035_s29 + $0x8] sm:$0xff] (%p90_p3), %v220_v1  ;;  %v224_v3 = vld [vmem:[%s1030_s28 + $0x48] sm:$0xff] (%p90_p3) }
  0x15   : > { %223 = vst [vmem:[%s1035_s29 + $0x10] sm:$0xff] %v222_v2  ;;  %v226_v4 = vld [vmem:[%s1030_s28 + $0x80] sm:$0xff]  ;;  %v228_v5 = vld [vmem:[%s1030_s28 + $0x88] sm:$0xff]  ;;  %225 = vst [vmem:[%s1035_s29 + $0x18] sm:$0xff] %v224_v3 }
  0x16   : > { %227 = vst [vmem:[%s1035_s29 + $0x20] sm:$0xff] %v226_v4  ;;  %229 = vst [vmem:[%s1035_s29 + $0x28] sm:$0xff] %v228_v5  ;;  %v230_v6 = vld [vmem:[%s1030_s28 + $0xc0] sm:$0xff]  ;;  %v232_v7 = vld [vmem:[%s1030_s28 + $0xc8] sm:$0xff] }
  0x17   : > { %v234_v8 = vld [vmem:[%s1030_s28 + $0x100] sm:$0xff]  ;;  %231 = vst [vmem:[%s1035_s29 + $0x30] sm:$0xff] %v230_v6  ;;  %233 = vst [vmem:[%s1035_s29 + $0x38] sm:$0xff] %v232_v7  ;;  %v236_v9 = vld [vmem:[%s1030_s28 + $0x108] sm:$0xff] }
  0x18   : > { %235 = vst [vmem:[%s1035_s29 + $0x40] sm:$0xff] %v234_v8  ;;  %v238_v10 = vld [vmem:[%s1030_s28 + $0x140] sm:$0xff]  ;;  %v240_v11 = vld [vmem:[%s1030_s28 + $0x148] sm:$0xff]  ;;  %237 = vst [vmem:[%s1035_s29 + $0x48] sm:$0xff] %v236_v9 }
  0x19   : > { %239 = vst [vmem:[%s1035_s29 + $0x50] sm:$0xff] %v238_v10  ;;  %241 = vst [vmem:[%s1035_s29 + $0x58] sm:$0xff] %v240_v11  ;;  %v242_v12 = vld [vmem:[%s1030_s28 + $0x180] sm:$0xff]  ;;  %v244_v13 = vld [vmem:[%s1030_s28 + $0x188] sm:$0xff] }
  0x1a   : > { %v246_v14 = vld [vmem:[%s1030_s28 + $0x1c0] sm:$0xff]  ;;  %243 = vst [vmem:[%s1035_s29 + $0x60] sm:$0xff] %v242_v12  ;;  %245 = vst [vmem:[%s1035_s29 + $0x68] sm:$0xff] %v244_v13  ;;  %v248_v15 = vld [vmem:[%s1030_s28 + $0x1c8] sm:$0xff] }
  0x1b   : > { %247 = vst [vmem:[%s1035_s29 + $0x70] sm:$0xff] %v246_v14  ;;  %v250_v16 = vld [vmem:[%s1030_s28 + $0x200] sm:$0xff]  ;;  %v252_v17 = vld [vmem:[%s1030_s28 + $0x208] sm:$0xff]  ;;  %249 = vst [vmem:[%s1035_s29 + $0x78] sm:$0xff] %v248_v15 }
  0x1c   : > { %251 = vst [vmem:[%s1035_s29 + $0x80] sm:$0xff] %v250_v16  ;;  %253 = vst [vmem:[%s1035_s29 + $0x88] sm:$0xff] %v252_v17  ;;  %v254_v18 = vld [vmem:[%s1030_s28 + $0x240] sm:$0xff]  ;;  %v256_v19 = vld [vmem:[%s1030_s28 + $0x248] sm:$0xff] }
  0x1d   : > { %v258_v20 = vld [vmem:[%s1030_s28 + $0x280] sm:$0xff]  ;;  %255 = vst [vmem:[%s1035_s29 + $0x90] sm:$0xff] %v254_v18  ;;  %257 = vst [vmem:[%s1035_s29 + $0x98] sm:$0xff] %v256_v19  ;;  %v260_v21 = vld [vmem:[%s1030_s28 + $0x288] sm:$0xff] }
  0x1e   : > { %259 = vst [vmem:[%s1035_s29 + $0xa0] sm:$0xff] %v258_v20  ;;  %v262_v22 = vld [vmem:[%s1030_s28 + $0x2c0] sm:$0xff]  ;;  %v264_v23 = vld [vmem:[%s1030_s28 + $0x2c8] sm:$0xff]  ;;  %261 = vst [vmem:[%s1035_s29 + $0xa8] sm:$0xff] %v260_v21 }
  0x1f   : > { %263 = vst [vmem:[%s1035_s29 + $0xb0] sm:$0xff] %v262_v22  ;;  %265 = vst [vmem:[%s1035_s29 + $0xb8] sm:$0xff] %v264_v23  ;;  %v266_v24 = vld [vmem:[%s1030_s28 + $0x300] sm:$0xff]  ;;  %v268_v25 = vld [vmem:[%s1030_s28 + $0x308] sm:$0xff] }
  0x20   : > { %v270_v26 = vld [vmem:[%s1030_s28 + $0x340] sm:$0xff]  ;;  %267 = vst [vmem:[%s1035_s29 + $0xc0] sm:$0xff] %v266_v24  ;;  %269 = vst [vmem:[%s1035_s29 + $0xc8] sm:$0xff] %v268_v25  ;;  %v272_v27 = vld [vmem:[%s1030_s28 + $0x348] sm:$0xff] }
  0x21   : > { %271 = vst [vmem:[%s1035_s29 + $0xd0] sm:$0xff] %v270_v26  ;;  %v274_v28 = vld [vmem:[%s1030_s28 + $0x380] sm:$0xff]  ;;  %v276_v29 = vld [vmem:[%s1030_s28 + $0x388] sm:$0xff]  ;;  %273 = vst [vmem:[%s1035_s29 + $0xd8] sm:$0xff] %v272_v27 }
  0x22   : > { %275 = vst [vmem:[%s1035_s29 + $0xe0] sm:$0xff] %v274_v28  ;;  %277 = vst [vmem:[%s1035_s29 + $0xe8] sm:$0xff] %v276_v29  ;;  %v278_v30 = vld [vmem:[%s1030_s28 + $0x3c0] sm:$0xff]  ;;  %v280_v31 = vld [vmem:[%s1030_s28 + $0x3c8] sm:$0xff] }
  0x23   : > { %279 = vst [vmem:[%s1035_s29 + $0xf0] sm:$0xff] %v278_v30  ;;  %281 = vst [vmem:[%s1035_s29 + $0xf8] sm:$0xff] %v280_v31 }
  0x24 PF: > { %p835_p8 = scmp.ge.s32.totalorder %s959_s16, 1  ;;  %p286_p9 = scmp.lt.s32.totalorder %s959_s16, 5 }
  0x26   : > { %p287_p10 = pnand %p835_p8, %p286_p9 }
  0x27   : > { %s293_s30 = sand.u32 (!%p287_p10), 1, %s943_s12   ;;  %s838_s12 = sshll.u32 (!%p287_p10), %s951_s14, 1 }
  0x28   : > { %290 = sbr.rel (%p287_p10) target bundleno = 302 (0x12e), region = 47  ;;  %s836_s4 = sshll.u32 (!%p287_p10), %s293_s30, 8 }
  0x29   : > { %s1105_s5 = scalar_lea.vmem (!%p287_p10), [#allocation3], %s836_s4  ;;  %s837_s20 = sshll.u32 (!%p287_p10), %s293_s30, 6 }
  0x2a   : > { %s1155_s23 = scalar_lea.vmem (!%p287_p10), [#allocation4], %s837_s20  ;;  %p362_p11 = scmp.lt.s32.totalorder (!%p287_p10), %s838_s12, 7 }
  0x2d   : > { %v961_v32 = vmov 0.0   ;;  %v426_v33 = vld [vmem:[%s1105_s5 + $0xf8] sm:$0xff]  ;;  %v425_v34 = vld [vmem:[%s1105_s5 + $0xf0] sm:$0xff]  ;;  %v424_v35 = vld [vmem:[%s1105_s5 + $0xe8] sm:$0xff]  ;;  %s1210_s12 = smov (!%p362_p11, %s838_s12), 7  ;;  %vm595_vm0 = vcmask 1040384  }
  0x2e   : > { %491 = vmatprep.mubr.f32.mxu0 %v961_v32  ;;  %503 = vmatprep.mubr.f32.mxu1 %v961_v32  ;;  %v423_v36 = vld [vmem:[%s1105_s5 + $0xe0] sm:$0xff]  ;;  %v422_v37 = vld [vmem:[%s1105_s5 + $0xd8] sm:$0xff]  ;;  %v421_v38 = vld [vmem:[%s1105_s5 + $0xd0] sm:$0xff]  ;;  %s839_s24 = sshll.u32 %s1210_s12, 1  ;;  %s847_s28 = sshll.u32 (%p1017_p6), %s951_s14, 4 }
  0x2f   : > { %427 = vmatprep.subr.mxu0 %v426_v33  ;;  %848 = vmatprep.subr.mxu1 %v426_v33  ;;  %v420_v39 = vld [vmem:[%s1105_s5 + $0xc8] sm:$0xff]  ;;  %v419_v40 = vld [vmem:[%s1105_s5 + $0xc0] sm:$0xff]  ;;  %v418_v41 = vld [vmem:[%s1105_s5 + $0xb8] sm:$0xff]  ;;  %s369_s27 = scalar_lea.vmem %s1201_s3, %s839_s24  ;;  %s637_s4 = scalar_lea.vmem (%p1017_p6), %s1200_s2, %s847_s28 }
  0x30   : > { %428 = vmatpush1.msra.mxu0 %v425_v34  ;;  %864 = vmatpush1.msra.mxu1 %v425_v34  ;;  %v417_v42 = vld [vmem:[%s1105_s5 + $0xb0] sm:$0xff]  ;;  %v416_v43 = vld [vmem:[%s1105_s5 + $0xa8] sm:$0xff]  ;;  %v415_v44 = vld [vmem:[%s1105_s5 + $0xa0] sm:$0xff] }
  0x31   : > { %429 = vmatprep.subr.mxu0 %v424_v35  ;;  %849 = vmatprep.subr.mxu1 %v424_v35  ;;  %v414_v45 = vld [vmem:[%s1105_s5 + $0x98] sm:$0xff]  ;;  %v413_v46 = vld [vmem:[%s1105_s5 + $0x90] sm:$0xff]  ;;  %v412_v47 = vld [vmem:[%s1105_s5 + $0x88] sm:$0xff] }
  0x32   : > { %430 = vmatpush1.msra.mxu0 %v423_v36  ;;  %865 = vmatpush1.msra.mxu1 %v423_v36  ;;  %v411_v48 = vld [vmem:[%s1105_s5 + $0x80] sm:$0xff]  ;;  %v410_v49 = vld [vmem:[%s1105_s5 + $0x78] sm:$0xff]  ;;  %v409_v50 = vld [vmem:[%s1105_s5 + $0x70] sm:$0xff] }
  0x33   : > { %431 = vmatprep.subr.mxu0 %v422_v37  ;;  %850 = vmatprep.subr.mxu1 %v422_v37  ;;  %v408_v51 = vld [vmem:[%s1105_s5 + $0x68] sm:$0xff]  ;;  %v407_v52 = vld [vmem:[%s1105_s5 + $0x60] sm:$0xff]  ;;  %v406_v53 = vld [vmem:[%s1105_s5 + $0x58] sm:$0xff] }
  0x34   : > { %432 = vmatpush1.msra.mxu0 %v421_v38  ;;  %866 = vmatpush1.msra.mxu1 %v421_v38  ;;  %v405_v54 = vld [vmem:[%s1105_s5 + $0x50] sm:$0xff]  ;;  %v404_v55 = vld [vmem:[%s1105_s5 + $0x48] sm:$0xff]  ;;  %v403_v56 = vld [vmem:[%s1105_s5 + $0x40] sm:$0xff] }
  0x35   : > { %433 = vmatprep.subr.mxu0 %v420_v39  ;;  %851 = vmatprep.subr.mxu1 %v420_v39  ;;  %v402_v57 = vld [vmem:[%s1105_s5 + $0x38] sm:$0xff]  ;;  %v401_v58 = vld [vmem:[%s1105_s5 + $0x30] sm:$0xff]  ;;  %v400_v59 = vld [vmem:[%s1105_s5 + $0x28] sm:$0xff] }
  0x36   : > { %434 = vmatpush1.msra.mxu0 %v419_v40  ;;  %867 = vmatpush1.msra.mxu1 %v419_v40  ;;  %v399_v60 = vld [vmem:[%s1105_s5 + $0x20] sm:$0xff]  ;;  %v398_v61 = vld [vmem:[%s1105_s5 + $0x18] sm:$0xff]  ;;  %v397_v62 = vld [vmem:[%s1105_s5 + $0x10] sm:$0xff] }
  0x37   : > { %435 = vmatprep.subr.mxu0 %v418_v41  ;;  %852 = vmatprep.subr.mxu1 %v418_v41  ;;  %v396_v63 = vld [vmem:[%s1105_s5 + $0x8] sm:$0xff]  ;;  %v395_v0 = vld [vmem:[%s1105_s5] sm:$0xff]  ;;  %v393_v2 = vld [vmem:[%s1198_s0 + $0x10] sm:$0xff] }
  0x38   : > { %436 = vmatpush1.msra.mxu0 %v417_v42  ;;  %868 = vmatpush1.msra.mxu1 %v417_v42  ;;  %v391_v1 = vld [vmem:[%s1198_s0] sm:$0xff]  ;;  %v392_v3 = vld [vmem:[%s1198_s0 + $0x8] sm:$0xff]  ;;  %v394_v4 = vld [vmem:[%s1198_s0 + $0x18] sm:$0xff] }
  0x39   : > { %437 = vmatprep.subr.mxu0 %v416_v43  ;;  %853 = vmatprep.subr.mxu1 %v416_v43 }
  0x3a   : > { %438 = vmatpush1.msra.mxu0 %v415_v44  ;;  %869 = vmatpush1.msra.mxu1 %v415_v44 }
  0x3b   : > { %439 = vmatprep.subr.mxu0 %v414_v45  ;;  %854 = vmatprep.subr.mxu1 %v414_v45 }
  0x3c   : > { %440 = vmatpush1.msra.mxu0 %v413_v46  ;;  %870 = vmatpush1.msra.mxu1 %v413_v46 }
  0x3d   : > { %441 = vmatprep.subr.mxu0 %v412_v47  ;;  %855 = vmatprep.subr.mxu1 %v412_v47 }
  0x3e   : > { %442 = vmatpush1.msra.mxu0 %v411_v48  ;;  %871 = vmatpush1.msra.mxu1 %v411_v48 }
  0x3f   : > { %443 = vmatprep.subr.mxu0 %v410_v49  ;;  %856 = vmatprep.subr.mxu1 %v410_v49 }
  0x40   : > { %444 = vmatpush1.msra.mxu0 %v409_v50  ;;  %872 = vmatpush1.msra.mxu1 %v409_v50 }
  0x41   : > { %445 = vmatprep.subr.mxu0 %v408_v51  ;;  %857 = vmatprep.subr.mxu1 %v408_v51 }
  0x42   : > { %446 = vmatpush1.msra.mxu0 %v407_v52  ;;  %873 = vmatpush1.msra.mxu1 %v407_v52 }
  0x43   : > { %447 = vmatprep.subr.mxu0 %v406_v53  ;;  %858 = vmatprep.subr.mxu1 %v406_v53 }
  0x44   : > { %448 = vmatpush1.msra.mxu0 %v405_v54  ;;  %874 = vmatpush1.msra.mxu1 %v405_v54 }
  0x45   : > { %449 = vmatprep.subr.mxu0 %v404_v55  ;;  %859 = vmatprep.subr.mxu1 %v404_v55 }
  0x46   : > { %450 = vmatpush1.msra.mxu0 %v403_v56  ;;  %875 = vmatpush1.msra.mxu1 %v403_v56 }
  0x47   : > { %451 = vmatprep.subr.mxu0 %v402_v57  ;;  %860 = vmatprep.subr.mxu1 %v402_v57 }
  0x48   : > { %452 = vmatpush1.msra.mxu0 %v401_v58  ;;  %876 = vmatpush1.msra.mxu1 %v401_v58 }
  0x49   : > { %453 = vmatprep.subr.mxu0 %v400_v59  ;;  %861 = vmatprep.subr.mxu1 %v400_v59 }
  0x4a   : > { %454 = vmatpush1.msra.mxu0 %v399_v60  ;;  %877 = vmatpush1.msra.mxu1 %v399_v60 }
  0x4b   : > { %455 = vmatprep.subr.mxu0 %v398_v61  ;;  %862 = vmatprep.subr.mxu1 %v398_v61 }
  0x4c   : > { %456 = vmatpush1.msra.mxu0 %v397_v62  ;;  %878 = vmatpush1.msra.mxu1 %v397_v62 }
  0x4d   : > { %457 = vmatprep.subr.mxu0 %v396_v63  ;;  %863 = vmatprep.subr.mxu1 %v396_v63 }
  0x4e   : > { %458 = vmatpush1.msra.mxu0 %v395_v0  ;;  %879 = vmatpush1.msra.mxu1 %v395_v0 }
  0x4f   : > { %492 = vmatmul.mubr.f32.vlgmr.msra.gmra.mxu0 %v391_v1  ;;  %504 = vmatmul.mubr.f32.vlgmr.msra.gmra.mxu1 %v393_v2 }
  0x50   : > { %497 = vmatprep.mubr.f32.mxu0 %v961_v32  ;;  %509 = vmatprep.mubr.f32.mxu1 %v961_v32 }
  0x53   : > { %498 = vmatmul.mubr.f32.gmra.mxu0 %v392_v3  ;;  %510 = vmatmul.mubr.f32.gmra.mxu1 %v394_v4 }
 0x10f   : > { %v493_v5 = vpop.f32.mrf.mxu0  ;;  %v505_v6 = vpop.f32.mrf.mxu1 }
 0x110   : > { %543 = vst [vmem:[%s1155_s23] sm:$0xff] %v493_v5  ;;  %547 = vst [vmem:[%s1155_s23 + $0x20] sm:$0xff] %v505_v6  ;;  %v569_v11 = vmul.f32 %v493_v5, %v493_v5  ;;  %v573_v15 = vmul.f32 %v505_v6, %v505_v6 }
 0x111   : > { %v495_v7 = vpop.f32.mrf.mxu0  ;;  %v507_v8 = vpop.f32.mrf.mxu1 }
 0x112   : > { %544 = vst [vmem:[%s1155_s23 + $0x8] sm:$0xff] %v495_v7  ;;  %548 = vst [vmem:[%s1155_s23 + $0x28] sm:$0xff] %v507_v8  ;;  %v570_v14 = vmul.f32 %v495_v7, %v495_v7  ;;  %v574_v23 = vmul.f32 %v507_v8, %v507_v8 }
 0x113   : > { %v499_v9 = vpop.f32.mrf.mxu0  ;;  %v511_v10 = vpop.f32.mrf.mxu1 }
 0x114   : > { %545 = vst [vmem:[%s1155_s23 + $0x10] sm:$0xff] %v499_v9  ;;  %v551_v12 = vadd.f32 %v499_v9, %v493_v5  ;;  %v571_v13 = vmul.f32 %v499_v9, %v499_v9  ;;  %549 = vst [vmem:[%s1155_s23 + $0x30] sm:$0xff] %v511_v10  ;;  %v575_v17 = vmul.f32 %v511_v10, %v511_v10 }
 0x115   : > { %v501_v16 = vpop.f32.mrf.mxu0  ;;  %v513_v18 = vpop.f32.mrf.mxu1 }
 0x116   : > { %v577_v19 = vadd.f32 %v571_v13, %v569_v11  ;;  %546 = vst [vmem:[%s1155_s23 + $0x18] sm:$0xff] %v501_v16  ;;  %v560_v20 = vadd.f32 %v501_v16, %v495_v7  ;;  %v572_v21 = vmul.f32 %v501_v16, %v501_v16  ;;  %v552_v22 = vadd.f32 %v551_v12, %v505_v6 }
 0x117   : > { %550 = vst [vmem:[%s1155_s23 + $0x38] sm:$0xff] %v513_v18  ;;  %v576_v28 = vmul.f32 %v513_v18, %v513_v18  ;;  %v650_v60 = vld [vmem:[%s1155_s23] sm:$0xff] (%p1017_p6) }
 0x118   : > { %v586_v24 = vadd.f32 %v572_v21, %v570_v14  ;;  %v553_v25 = vadd.f32 %v552_v22, %v511_v10  ;;  %v578_v26 = vadd.f32 %v577_v19, %v573_v15  ;;  %v561_v27 = vadd.f32 %v560_v20, %v507_v8  ;;  %v658_v0 = vld [vmem:[%s1155_s23 + $0x20] sm:$0xff] (%p1017_p6)  ;;  %651 = vst [vmem:[%s637_s4] sm:$0xff] (%p1017_p6), %v650_v60 }
 0x119   : > { %v652_v61 = vld [vmem:[%s1155_s23 + $0x8] sm:$0xff] (%p1017_p6)  ;;  %659 = vst [vmem:[%s637_s4 + $0x80] sm:$0xff] (%p1017_p6), %v658_v0 }
 0x11a   : > { %v554_v29 = vrot.slane %v553_v25, 4  ;;  %v579_v30 = vadd.f32 %v578_v26, %v575_v17  ;;  %v562_v31 = vadd.f32 %v561_v27, %v513_v18  ;;  %v587_v32 = vadd.f32 %v586_v24, %v574_v23  ;;  %v660_v1 = vld [vmem:[%s1155_s23 + $0x28] sm:$0xff] (%p1017_p6)  ;;  %653 = vst [vmem:[%s637_s4 + $0x8] sm:$0xff] (%p1017_p6), %v652_v61 }
 0x11b   : > { %v654_v62 = vld [vmem:[%s1155_s23 + $0x10] sm:$0xff] (%p1017_p6)  ;;  %661 = vst [vmem:[%s637_s4 + $0x88] sm:$0xff] (%p1017_p6), %v660_v1 }
 0x11c   : > { %v555_v33 = vadd.f32 %v554_v29, %v553_v25  ;;  %v580_v34 = vrot.slane %v579_v30, 4  ;;  %v563_v35 = vrot.slane %v562_v31, 4  ;;  %v588_v36 = vadd.f32 %v587_v32, %v576_v28  ;;  %655 = vst [vmem:[%s637_s4 + $0x40] sm:$0xff] (%p1017_p6), %v654_v62  ;;  %v662_v2 = vld [vmem:[%s1155_s23 + $0x30] sm:$0xff] (%p1017_p6) }
 0x11d   : > { %v656_v63 = vld [vmem:[%s1155_s23 + $0x18] sm:$0xff] (%p1017_p6)  ;;  %663 = vst [vmem:[%s637_s4 + $0xc0] sm:$0xff] (%p1017_p6), %v662_v2 }
 0x11e   : > { %v556_v37 = vrot.slane %v555_v33, 2  ;;  %v581_v38 = vadd.f32 %v580_v34, %v579_v30  ;;  %v564_v39 = vadd.f32 %v563_v35, %v562_v31  ;;  %v589_v40 = vrot.slane %v588_v36, 4  ;;  %657 = vst [vmem:[%s637_s4 + $0x48] sm:$0xff] (%p1017_p6), %v656_v63  ;;  %v664_v3 = vld [vmem:[%s1155_s23 + $0x38] sm:$0xff] (%p1017_p6) }
 0x11f   : > { %665 = vst [vmem:[%s637_s4 + $0xc8] sm:$0xff] (%p1017_p6), %v664_v3 }
 0x120   : > { %v557_v41 = vadd.f32 %v556_v37, %v555_v33  ;;  %v582_v42 = vrot.slane %v581_v38, 2  ;;  %v565_v43 = vrot.slane %v564_v39, 2  ;;  %v590_v44 = vadd.f32 %v589_v40, %v588_v36 }
 0x122   : > { %v583_v45 = vadd.f32 %v582_v42, %v581_v38  ;;  %v566_v46 = vadd.f32 %v565_v43, %v564_v39  ;;  %v591_v47 = vrot.slane %v590_v44, 2  ;;  %v558_v48 = vrot.slane %v557_v41, 1 }
 0x124   : > { %v584_v49 = vrot.slane %v583_v45, 1  ;;  %v567_v50 = vrot.slane %v566_v46, 1  ;;  %v592_v51 = vadd.f32 %v591_v47, %v590_v44  ;;  %v559_v54 = vadd.f32 %v558_v48, %v557_v41 }
 0x126   : > { %v585_v52 = vadd.f32 %v584_v49, %v583_v45  ;;  %v593_v53 = vrot.slane %v592_v51, 1  ;;  %v568_v55 = vadd.f32 %v567_v50, %v566_v46 }
 0x128   : > { %v594_v56 = vadd.f32 %v593_v53, %v592_v51  ;;  %v596_v57 = vsel %vm595_vm0, %v559_v54, %v585_v52 }
 0x129   : > { %629 = sbr.rel (!%p1017_p6) target bundleno = 302 (0x12e), region = 63 }
 0x12a   : > { %v597_v58 = vsel %vm595_vm0, %v568_v55, %v594_v56 }
 0x12b   : > { %v600_v59 = vcombine.low %v596_v57, %v597_v58 }
 0x12d   : > { %840 = vst.sshfl [vmem:[%s369_s27] sm:$0x33 pattern:$0x76325410] %v600_v59 }
 0x12e PF: > { %s14_s16 = sadd.s32 1, %s959_s16   ;;  %s1203_s12 = smov %s947_s13 }
 0x12f   : > { %p11_p12 = scmp.ge.s32.totalorder %s14_s16, 6   ;;  %s1204_s13 = smov %s1022_s22 }
 0x130   : > { %s1205_s14 = smov %s955_s15  ;;  %s1206_s15 = smov %s1208_s17 }
 0x131   :  { %13 = sbr.rel (!%p11_p12) target bundleno = 3 (0x3), region = 132 }

// kernel: pp2p_forward.11
= control target key start
LH: loop header
LB: loop body
LE: loop exit
PB: predicated region body
PF: predicated region fallthrough
CT: control target
= control target key end

     0   :  { %s2165_s0 = inlined_call_operand.vmem [shape: f32[4,32,4096], index: 0, kind: input, shape index: {}]   ;;  %s2166_s1 = inlined_call_operand.vmem [shape: f32[4,4096,512], index: 1, kind: input, shape index: {}]   ;;  %s2167_s2 = inlined_call_operand.vmem [shape: f32[4,32,512], index: 2, kind: output, shape index: {0}]   ;;  %s2168_s3 = inlined_call_operand.vmem [shape: f32[4,1,2,512], index: 3, kind: output, shape index: {1}]  }
   0x1   :  { %2172 = sst [smem:[#allocation10_spill]] %s2165_s0 }
   0x2   :  { %2173 = sst [smem:[#allocation11_spill]] %s2166_s1 }
   0x3   :  { %2174 = sst [smem:[#allocation12_spill]] %s2167_s2 }
   0x4   :  { %2175 = sst [smem:[#allocation13_spill]] %s2168_s3 }
   0x5   :  { %s1517_s12 = smov 0   ;;  %s1519_s13 = smov 0  }
   0x6   :  { %s1521_s14 = smov 0   ;;  %s1523_s15 = smov 0  }
   0x7   :  { %s1525_s16 = smov 0   ;;  %s1527_s17 = smov 0  }
   0x8   :  { %s1529_s18 = smov 0   ;;  %s1531_s19 = smov 0  }
   0x9   :  { %s1533_s20 = smov 0   ;;  %s1535_s21 = smov 0  }
   0xa   :  { %s1537_s22 = smov 0   ;;  %s1539_s23 = smov 0  }
   0xb   :  { %s1541_s24 = smov 0  }
   0xc LB: > { %2176 = sst [smem:[#allocation6_spill]] %s1470_s18  ;;  %s29_s25 = sadd.s32 1, %s1482_s21  ;;  %s1494_s24 = sphi %s1541_s24, %s14_s24   ;;  %s1490_s23 = sphi %s1539_s23, %s2205_s23   ;;  %s1486_s22 = sphi %s1537_s22, %s2204_s22   ;;  %s1482_s21 = sphi %s1535_s21, %s2203_s21   ;;  %s1478_s20 = sphi %s1533_s20, %s2202_s20   ;;  %s1474_s19 = sphi %s1531_s19, %s2201_s19   ;;  %s1470_s18 = sphi %s1529_s18, %s2200_s18   ;;  %s1466_s17 = sphi %s1527_s17, %s2199_s17   ;;  %s1462_s16 = sphi %s1525_s16, %s2198_s16   ;;  %s1458_s15 = sphi %s1523_s15, %s2197_s15   ;;  %s1454_s14 = sphi %s1521_s14, %s2196_s14   ;;  %s1450_s13 = sphi %s1519_s13, %s2195_s13   ;;  %s1446_s12 = sphi %s1517_s12, %s2194_s12  }
   0xd   : > { %p30_p0 = scmp.ge.s32.totalorder %s29_s25, 8  ;;  %s32_s26 = sadd.s32 1, %s1486_s22 }
   0xe   : > { %s1256_s27 = sadd.s32 4294967295, %s1494_s24   ;;  %s40_s28 = sadd.s32 1, %s1490_s23 }
   0xf   : > { %s2207_s25 = smov (%p30_p0, %s29_s25), 0  ;;  %s2209_s26 = smov (!%p30_p0, %s32_s26), %s1486_s22 }
  0x10   : > { %2177 = sst [smem:[#allocation7_spill]] %s2207_s25  ;;  %p58_p1 = scmp.ne.s32.totalorder %s1466_s17, %s1462_s16 }
  0x11   : > { %p34_p2 = scmp.ge.s32.totalorder %s2209_s26, 2  ;;  %p59_p3 = scmp.eq.s32.totalorder %s1494_s24, 0 }
  0x12   : > { %s51_s29 = sadd.s32 1, %s1466_s17  ;;  %p88_p4 = scmp.ne.s32.totalorder %s1458_s15, %s1454_s14 }
  0x13   : > { %s2211_s26 = smov (%p34_p2, %s2209_s26), 0  ;;  %s2213_s28 = smov (!%p34_p2, %s40_s28), %s1490_s23 }
  0x14   : > { %2178 = sst [smem:[#allocation8_spill]] %s2211_s26  ;;  %s47_s30 = ssub.s32 %s1482_s21, %s2207_s25 }
  0x15   : > { %p1600_p5 = por %p59_p3, %p58_p1  ;;  %p42_p6 = scmp.ge.s32.totalorder %s2213_s28, 4 }
  0x16   : > { %p1604_p7 = por %p88_p4, %p59_p3  ;;  %s77_s6 = ssub.s32 %s1486_s22, %s2211_s26 }
  0x17   : > { %s81_s7 = sadd.s32 1, %s1458_s15  ;;  %s2215_s28 = smov (%p42_p6, %s2213_s28), 0 }
  0x18   : > { %2181 = sst [smem:[#allocation9_spill]] %s2215_s28  ;;  %s111_s8 = sadd.s32 1, %s1450_s13 }
  0x19   : > { %p121_p8 = scmp.ne.s32.totalorder %s1450_s13, %s1446_s12  ;;  %s44_s9 = ssub.s32 %s1490_s23, %s2215_s28 }
  0x1a   : > { %p122_p9 = scmp.eq.s32.totalorder %s1256_s27, 63  ;;  %s48_s10 = sor.u32 %s47_s30, %s44_s9 }
  0x1b   : > { %s108_s11 = sor.u32 %s77_s6, %s44_s9  ;;  %p49_p10 = scmp.eq.s32.totalorder %s48_s10, 0 }
  0x1c   : > { %s78_s25 = sor.u32 %s77_s6, %s48_s10  ;;  %p109_p12 = scmp.eq.s32.totalorder %s108_s11, 0 }
  0x1d   : > { %p79_p11 = scmp.eq.s32.totalorder %s78_s25, 0  ;;  %p1627_p13 = por %p122_p9, %p121_p8 }
  0x1e   : > { %s1619_s2 = scalar_select %p49_p10, %s1466_s17, %s51_s29  }
  0x1f   : > { %s1622_s18 = scalar_select %p79_p11, %s1458_s15, %s81_s7  }
  0x20   : > { %s1625_s3 = scalar_select %p109_p12, %s1450_s13, %s111_s8  }
  0x21   : > { %p1259_p0 = scmp.ge.s32.totalorder %s1494_s24, 64 }
  0x23   : > { %174 = sbr.rel (%p1259_p0) target bundleno = 133 (0x85), region = 16 }
  0x28   : > { %177 = sbr.rel (!%p1600_p5) target bundleno = 58 (0x3a), region = 20  ;;  %s179_s25 = sand.u32 (%p1600_p5), 1, %s1466_s17  }
  0x29   : > { %s1261_s27 = sshll.u32 (%p1600_p5), %s1482_s21, 2  ;;  %s1260_s29 = sshll.u32 (%p1600_p5), %s179_s25, 7 }
  0x2a   : > { %s1262_s30 = sshll.u32 (%p1600_p5), %s1490_s23, 7  ;;  %s2183_s0 = sld [smem:[#allocation10_spill]] (%p1600_p5) }
  0x2b   : > { %s187_s6 = sadd.s32 (%p1600_p5), %s1262_s30, %s1261_s27  ;;  %s181_s4 = scalar_lea.vmem (%p1600_p5), [#allocation3], %s1260_s29 }
  0x2c   : > { %s1263_s7 = sshll.u32 (%p1600_p5), %s187_s6, 3 }
  0x30   : > { %s1640_s10 = scalar_lea.vmem %s2183_s0, %s1263_s7 }
  0x31   : > { %v202_v0 = vld [vmem:[%s1640_s10] sm:$0xff]  ;;  %v204_v1 = vld [vmem:[%s1640_s10 + $0x8] sm:$0xff]  ;;  %v206_v2 = vld [vmem:[%s1640_s10 + $0x10] sm:$0xff] }
  0x32   : > { %203 = vst [vmem:[%s181_s4] sm:$0xff] %v202_v0  ;;  %205 = vst [vmem:[%s181_s4 + $0x8] sm:$0xff] %v204_v1  ;;  %v208_v3 = vld [vmem:[%s1640_s10 + $0x18] sm:$0xff]  ;;  %v210_v4 = vld [vmem:[%s1640_s10 + $0x100] sm:$0xff] }
  0x33   : > { %207 = vst [vmem:[%s181_s4 + $0x10] sm:$0xff] %v206_v2  ;;  %v212_v5 = vld [vmem:[%s1640_s10 + $0x108] sm:$0xff]  ;;  %209 = vst [vmem:[%s181_s4 + $0x18] sm:$0xff] %v208_v3  ;;  %v214_v6 = vld [vmem:[%s1640_s10 + $0x110] sm:$0xff] }
  0x34   : > { %211 = vst [vmem:[%s181_s4 + $0x20] sm:$0xff] %v210_v4  ;;  %213 = vst [vmem:[%s181_s4 + $0x28] sm:$0xff] %v212_v5  ;;  %v216_v7 = vld [vmem:[%s1640_s10 + $0x118] sm:$0xff]  ;;  %v218_v8 = vld [vmem:[%s1640_s10 + $0x200] sm:$0xff] }
  0x35   : > { %215 = vst [vmem:[%s181_s4 + $0x30] sm:$0xff] %v214_v6  ;;  %217 = vst [vmem:[%s181_s4 + $0x38] sm:$0xff] %v216_v7  ;;  %v220_v9 = vld [vmem:[%s1640_s10 + $0x208] sm:$0xff]  ;;  %v222_v10 = vld [vmem:[%s1640_s10 + $0x210] sm:$0xff] }
  0x36   : > { %219 = vst [vmem:[%s181_s4 + $0x40] sm:$0xff] %v218_v8  ;;  %v224_v11 = vld [vmem:[%s1640_s10 + $0x218] sm:$0xff]  ;;  %221 = vst [vmem:[%s181_s4 + $0x48] sm:$0xff] %v220_v9  ;;  %v226_v12 = vld [vmem:[%s1640_s10 + $0x300] sm:$0xff] }
  0x37   : > { %223 = vst [vmem:[%s181_s4 + $0x50] sm:$0xff] %v222_v10  ;;  %225 = vst [vmem:[%s181_s4 + $0x58] sm:$0xff] %v224_v11  ;;  %v228_v13 = vld [vmem:[%s1640_s10 + $0x308] sm:$0xff]  ;;  %v230_v14 = vld [vmem:[%s1640_s10 + $0x310] sm:$0xff] }
  0x38   : > { %227 = vst [vmem:[%s181_s4 + $0x60] sm:$0xff] %v226_v12  ;;  %229 = vst [vmem:[%s181_s4 + $0x68] sm:$0xff] %v228_v13  ;;  %v232_v15 = vld [vmem:[%s1640_s10 + $0x318] sm:$0xff] }
  0x39   : > { %231 = vst [vmem:[%s181_s4 + $0x70] sm:$0xff] %v230_v14  ;;  %233 = vst [vmem:[%s181_s4 + $0x78] sm:$0xff] %v232_v15 }
  0x3a PF: > { %239 = sbr.rel (!%p1604_p7) target bundleno = 133 (0x85), region = 43  ;;  %s241_s11 = sand.u32 (%p1604_p7), 1, %s1458_s15  }
  0x3b   : > { %s1266_s25 = sshll.u32 (%p1604_p7), %s1486_s22, 1  ;;  %s1286_s27 = sshll.u32 (%p1604_p7), %s1482_s21, 8 }
  0x3c   : > { %s1264_s29 = sshll.u32 (%p1604_p7), %s241_s11, 10  ;;  %s247_s30 = sadd.s32 (%p1604_p7), %s1286_s27, %s1266_s25 }
  0x3d   : > { %s1268_s6 = sshll.u32 (%p1604_p7), %s1490_s23, 11  ;;  %s2184_s1 = sld [smem:[#allocation11_spill]] (%p1604_p7) }
  0x3e   : > { %s249_s7 = sadd.s32 (%p1604_p7), %s1268_s6, %s247_s30  ;;  %s1672_s5 = scalar_lea.vmem (%p1604_p7), [#allocation4], %s1264_s29 }
  0x3f   : > { %s1269_s8 = sshll.u32 %s249_s7, 3 }
  0x43   : > { %s1667_s10 = scalar_lea.vmem %s2184_s1, %s1269_s8 }
  0x44   : > { %v264_v16 = vld [vmem:[%s1667_s10] sm:$0xff]  ;;  %v266_v17 = vld [vmem:[%s1667_s10 + $0x8] sm:$0xff] }
  0x45   : > { %v268_v18 = vld [vmem:[%s1667_s10 + $0x20] sm:$0xff]  ;;  %265 = vst [vmem:[%s1672_s5] sm:$0xff] %v264_v16  ;;  %267 = vst [vmem:[%s1672_s5 + $0x8] sm:$0xff] %v266_v17  ;;  %v270_v19 = vld [vmem:[%s1667_s10 + $0x28] sm:$0xff] }
  0x46   : > { %269 = vst [vmem:[%s1672_s5 + $0x10] sm:$0xff] %v268_v18  ;;  %v272_v20 = vld [vmem:[%s1667_s10 + $0x40] sm:$0xff]  ;;  %v274_v21 = vld [vmem:[%s1667_s10 + $0x48] sm:$0xff]  ;;  %271 = vst [vmem:[%s1672_s5 + $0x18] sm:$0xff] %v270_v19 }
  0x47   : > { %273 = vst [vmem:[%s1672_s5 + $0x20] sm:$0xff] %v272_v20  ;;  %275 = vst [vmem:[%s1672_s5 + $0x28] sm:$0xff] %v274_v21  ;;  %v276_v22 = vld [vmem:[%s1667_s10 + $0x60] sm:$0xff]  ;;  %v278_v23 = vld [vmem:[%s1667_s10 + $0x68] sm:$0xff] }
  0x48   : > { %v280_v24 = vld [vmem:[%s1667_s10 + $0x80] sm:$0xff]  ;;  %277 = vst [vmem:[%s1672_s5 + $0x30] sm:$0xff] %v276_v22  ;;  %279 = vst [vmem:[%s1672_s5 + $0x38] sm:$0xff] %v278_v23  ;;  %v282_v25 = vld [vmem:[%s1667_s10 + $0x88] sm:$0xff] }
  0x49   : > { %281 = vst [vmem:[%s1672_s5 + $0x40] sm:$0xff] %v280_v24  ;;  %v284_v26 = vld [vmem:[%s1667_s10 + $0xa0] sm:$0xff]  ;;  %v286_v27 = vld [vmem:[%s1667_s10 + $0xa8] sm:$0xff]  ;;  %283 = vst [vmem:[%s1672_s5 + $0x48] sm:$0xff] %v282_v25 }
  0x4a   : > { %285 = vst [vmem:[%s1672_s5 + $0x50] sm:$0xff] %v284_v26  ;;  %287 = vst [vmem:[%s1672_s5 + $0x58] sm:$0xff] %v286_v27  ;;  %v288_v28 = vld [vmem:[%s1667_s10 + $0xc0] sm:$0xff]  ;;  %v290_v29 = vld [vmem:[%s1667_s10 + $0xc8] sm:$0xff] }
  0x4b   : > { %v292_v30 = vld [vmem:[%s1667_s10 + $0xe0] sm:$0xff]  ;;  %289 = vst [vmem:[%s1672_s5 + $0x60] sm:$0xff] %v288_v28  ;;  %291 = vst [vmem:[%s1672_s5 + $0x68] sm:$0xff] %v290_v29  ;;  %v294_v31 = vld [vmem:[%s1667_s10 + $0xe8] sm:$0xff] }
  0x4c   : > { %293 = vst [vmem:[%s1672_s5 + $0x70] sm:$0xff] %v292_v30  ;;  %v296_v32 = vld [vmem:[%s1667_s10 + $0x100] sm:$0xff]  ;;  %v298_v33 = vld [vmem:[%s1667_s10 + $0x108] sm:$0xff]  ;;  %295 = vst [vmem:[%s1672_s5 + $0x78] sm:$0xff] %v294_v31 }
  0x4d   : > { %297 = vst [vmem:[%s1672_s5 + $0x80] sm:$0xff] %v296_v32  ;;  %299 = vst [vmem:[%s1672_s5 + $0x88] sm:$0xff] %v298_v33  ;;  %v300_v34 = vld [vmem:[%s1667_s10 + $0x120] sm:$0xff]  ;;  %v302_v35 = vld [vmem:[%s1667_s10 + $0x128] sm:$0xff] }
  0x4e   : > { %v304_v36 = vld [vmem:[%s1667_s10 + $0x140] sm:$0xff]  ;;  %301 = vst [vmem:[%s1672_s5 + $0x90] sm:$0xff] %v300_v34  ;;  %303 = vst [vmem:[%s1672_s5 + $0x98] sm:$0xff] %v302_v35  ;;  %v306_v37 = vld [vmem:[%s1667_s10 + $0x148] sm:$0xff] }
  0x4f   : > { %305 = vst [vmem:[%s1672_s5 + $0xa0] sm:$0xff] %v304_v36  ;;  %v308_v38 = vld [vmem:[%s1667_s10 + $0x160] sm:$0xff]  ;;  %v310_v39 = vld [vmem:[%s1667_s10 + $0x168] sm:$0xff]  ;;  %307 = vst [vmem:[%s1672_s5 + $0xa8] sm:$0xff] %v306_v37 }
  0x50   : > { %309 = vst [vmem:[%s1672_s5 + $0xb0] sm:$0xff] %v308_v38  ;;  %311 = vst [vmem:[%s1672_s5 + $0xb8] sm:$0xff] %v310_v39  ;;  %v312_v40 = vld [vmem:[%s1667_s10 + $0x180] sm:$0xff]  ;;  %v314_v41 = vld [vmem:[%s1667_s10 + $0x188] sm:$0xff] }
  0x51   : > { %v316_v42 = vld [vmem:[%s1667_s10 + $0x1a0] sm:$0xff]  ;;  %313 = vst [vmem:[%s1672_s5 + $0xc0] sm:$0xff] %v312_v40  ;;  %315 = vst [vmem:[%s1672_s5 + $0xc8] sm:$0xff] %v314_v41  ;;  %v318_v43 = vld [vmem:[%s1667_s10 + $0x1a8] sm:$0xff] }
  0x52   : > { %317 = vst [vmem:[%s1672_s5 + $0xd0] sm:$0xff] %v316_v42  ;;  %v320_v44 = vld [vmem:[%s1667_s10 + $0x1c0] sm:$0xff]  ;;  %v322_v45 = vld [vmem:[%s1667_s10 + $0x1c8] sm:$0xff]  ;;  %319 = vst [vmem:[%s1672_s5 + $0xd8] sm:$0xff] %v318_v43 }
  0x53   : > { %321 = vst [vmem:[%s1672_s5 + $0xe0] sm:$0xff] %v320_v44  ;;  %323 = vst [vmem:[%s1672_s5 + $0xe8] sm:$0xff] %v322_v45  ;;  %v324_v46 = vld [vmem:[%s1667_s10 + $0x1e0] sm:$0xff]  ;;  %v326_v47 = vld [vmem:[%s1667_s10 + $0x1e8] sm:$0xff] }
  0x54   : > { %v328_v48 = vld [vmem:[%s1667_s10 + $0x200] sm:$0xff]  ;;  %325 = vst [vmem:[%s1672_s5 + $0xf0] sm:$0xff] %v324_v46  ;;  %327 = vst [vmem:[%s1672_s5 + $0xf8] sm:$0xff] %v326_v47  ;;  %v330_v49 = vld [vmem:[%s1667_s10 + $0x208] sm:$0xff] }
  0x55   : > { %329 = vst [vmem:[%s1672_s5 + $0x100] sm:$0xff] %v328_v48  ;;  %v332_v50 = vld [vmem:[%s1667_s10 + $0x220] sm:$0xff]  ;;  %v334_v51 = vld [vmem:[%s1667_s10 + $0x228] sm:$0xff]  ;;  %331 = vst [vmem:[%s1672_s5 + $0x108] sm:$0xff] %v330_v49 }
  0x56   : > { %333 = vst [vmem:[%s1672_s5 + $0x110] sm:$0xff] %v332_v50  ;;  %335 = vst [vmem:[%s1672_s5 + $0x118] sm:$0xff] %v334_v51  ;;  %v336_v52 = vld [vmem:[%s1667_s10 + $0x240] sm:$0xff]  ;;  %v338_v53 = vld [vmem:[%s1667_s10 + $0x248] sm:$0xff] }
  0x57   : > { %v340_v54 = vld [vmem:[%s1667_s10 + $0x260] sm:$0xff]  ;;  %337 = vst [vmem:[%s1672_s5 + $0x120] sm:$0xff] %v336_v52  ;;  %339 = vst [vmem:[%s1672_s5 + $0x128] sm:$0xff] %v338_v53  ;;  %v342_v55 = vld [vmem:[%s1667_s10 + $0x268] sm:$0xff] }
  0x58   : > { %341 = vst [vmem:[%s1672_s5 + $0x130] sm:$0xff] %v340_v54  ;;  %v344_v56 = vld [vmem:[%s1667_s10 + $0x280] sm:$0xff]  ;;  %v346_v57 = vld [vmem:[%s1667_s10 + $0x288] sm:$0xff]  ;;  %343 = vst [vmem:[%s1672_s5 + $0x138] sm:$0xff] %v342_v55 }
  0x59   : > { %345 = vst [vmem:[%s1672_s5 + $0x140] sm:$0xff] %v344_v56  ;;  %347 = vst [vmem:[%s1672_s5 + $0x148] sm:$0xff] %v346_v57  ;;  %v348_v58 = vld [vmem:[%s1667_s10 + $0x2a0] sm:$0xff]  ;;  %v350_v59 = vld [vmem:[%s1667_s10 + $0x2a8] sm:$0xff] }
  0x5a   : > { %v352_v60 = vld [vmem:[%s1667_s10 + $0x2c0] sm:$0xff]  ;;  %349 = vst [vmem:[%s1672_s5 + $0x150] sm:$0xff] %v348_v58  ;;  %351 = vst [vmem:[%s1672_s5 + $0x158] sm:$0xff] %v350_v59  ;;  %v354_v61 = vld [vmem:[%s1667_s10 + $0x2c8] sm:$0xff] }
  0x5b   : > { %353 = vst [vmem:[%s1672_s5 + $0x160] sm:$0xff] %v352_v60  ;;  %v356_v62 = vld [vmem:[%s1667_s10 + $0x2e0] sm:$0xff]  ;;  %v358_v63 = vld [vmem:[%s1667_s10 + $0x2e8] sm:$0xff]  ;;  %355 = vst [vmem:[%s1672_s5 + $0x168] sm:$0xff] %v354_v61 }
  0x5c   : > { %357 = vst [vmem:[%s1672_s5 + $0x170] sm:$0xff] %v356_v62  ;;  %359 = vst [vmem:[%s1672_s5 + $0x178] sm:$0xff] %v358_v63  ;;  %v360_v0 = vld [vmem:[%s1667_s10 + $0x300] sm:$0xff]  ;;  %v362_v1 = vld [vmem:[%s1667_s10 + $0x308] sm:$0xff] }
  0x5d   : > { %v364_v2 = vld [vmem:[%s1667_s10 + $0x320] sm:$0xff]  ;;  %361 = vst [vmem:[%s1672_s5 + $0x180] sm:$0xff] %v360_v0  ;;  %363 = vst [vmem:[%s1672_s5 + $0x188] sm:$0xff] %v362_v1  ;;  %v366_v3 = vld [vmem:[%s1667_s10 + $0x328] sm:$0xff] }
  0x5e   : > { %365 = vst [vmem:[%s1672_s5 + $0x190] sm:$0xff] %v364_v2  ;;  %v368_v4 = vld [vmem:[%s1667_s10 + $0x340] sm:$0xff]  ;;  %v370_v5 = vld [vmem:[%s1667_s10 + $0x348] sm:$0xff]  ;;  %367 = vst [vmem:[%s1672_s5 + $0x198] sm:$0xff] %v366_v3 }
  0x5f   : > { %369 = vst [vmem:[%s1672_s5 + $0x1a0] sm:$0xff] %v368_v4  ;;  %371 = vst [vmem:[%s1672_s5 + $0x1a8] sm:$0xff] %v370_v5  ;;  %v372_v6 = vld [vmem:[%s1667_s10 + $0x360] sm:$0xff]  ;;  %v374_v7 = vld [vmem:[%s1667_s10 + $0x368] sm:$0xff] }
  0x60   : > { %v376_v8 = vld [vmem:[%s1667_s10 + $0x380] sm:$0xff]  ;;  %373 = vst [vmem:[%s1672_s5 + $0x1b0] sm:$0xff] %v372_v6  ;;  %375 = vst [vmem:[%s1672_s5 + $0x1b8] sm:$0xff] %v374_v7  ;;  %v378_v9 = vld [vmem:[%s1667_s10 + $0x388] sm:$0xff] }
  0x61   : > { %377 = vst [vmem:[%s1672_s5 + $0x1c0] sm:$0xff] %v376_v8  ;;  %v380_v10 = vld [vmem:[%s1667_s10 + $0x3a0] sm:$0xff]  ;;  %v382_v11 = vld [vmem:[%s1667_s10 + $0x3a8] sm:$0xff]  ;;  %379 = vst [vmem:[%s1672_s5 + $0x1c8] sm:$0xff] %v378_v9 }
  0x62   : > { %381 = vst [vmem:[%s1672_s5 + $0x1d0] sm:$0xff] %v380_v10  ;;  %383 = vst [vmem:[%s1672_s5 + $0x1d8] sm:$0xff] %v382_v11  ;;  %v384_v12 = vld [vmem:[%s1667_s10 + $0x3c0] sm:$0xff]  ;;  %v386_v13 = vld [vmem:[%s1667_s10 + $0x3c8] sm:$0xff] }
  0x63   : > { %v388_v14 = vld [vmem:[%s1667_s10 + $0x3e0] sm:$0xff]  ;;  %385 = vst [vmem:[%s1672_s5 + $0x1e0] sm:$0xff] %v384_v12  ;;  %387 = vst [vmem:[%s1672_s5 + $0x1e8] sm:$0xff] %v386_v13  ;;  %v390_v15 = vld [vmem:[%s1667_s10 + $0x3e8] sm:$0xff] }
  0x64   : > { %389 = vst [vmem:[%s1672_s5 + $0x1f0] sm:$0xff] %v388_v14  ;;  %v392_v16 = vld [vmem:[%s1667_s10 + $0x400] sm:$0xff]  ;;  %v394_v17 = vld [vmem:[%s1667_s10 + $0x408] sm:$0xff]  ;;  %391 = vst [vmem:[%s1672_s5 + $0x1f8] sm:$0xff] %v390_v15 }
  0x65   : > { %393 = vst [vmem:[%s1672_s5 + $0x200] sm:$0xff] %v392_v16  ;;  %395 = vst [vmem:[%s1672_s5 + $0x208] sm:$0xff] %v394_v17  ;;  %v396_v18 = vld [vmem:[%s1667_s10 + $0x420] sm:$0xff]  ;;  %v398_v19 = vld [vmem:[%s1667_s10 + $0x428] sm:$0xff] }
  0x66   : > { %v400_v20 = vld [vmem:[%s1667_s10 + $0x440] sm:$0xff]  ;;  %397 = vst [vmem:[%s1672_s5 + $0x210] sm:$0xff] %v396_v18  ;;  %399 = vst [vmem:[%s1672_s5 + $0x218] sm:$0xff] %v398_v19  ;;  %v402_v21 = vld [vmem:[%s1667_s10 + $0x448] sm:$0xff] }
  0x67   : > { %401 = vst [vmem:[%s1672_s5 + $0x220] sm:$0xff] %v400_v20  ;;  %v404_v22 = vld [vmem:[%s1667_s10 + $0x460] sm:$0xff]  ;;  %v406_v23 = vld [vmem:[%s1667_s10 + $0x468] sm:$0xff]  ;;  %403 = vst [vmem:[%s1672_s5 + $0x228] sm:$0xff] %v402_v21 }
  0x68   : > { %405 = vst [vmem:[%s1672_s5 + $0x230] sm:$0xff] %v404_v22  ;;  %407 = vst [vmem:[%s1672_s5 + $0x238] sm:$0xff] %v406_v23  ;;  %v408_v24 = vld [vmem:[%s1667_s10 + $0x480] sm:$0xff]  ;;  %v410_v25 = vld [vmem:[%s1667_s10 + $0x488] sm:$0xff] }
  0x69   : > { %v412_v26 = vld [vmem:[%s1667_s10 + $0x4a0] sm:$0xff]  ;;  %409 = vst [vmem:[%s1672_s5 + $0x240] sm:$0xff] %v408_v24  ;;  %411 = vst [vmem:[%s1672_s5 + $0x248] sm:$0xff] %v410_v25  ;;  %v414_v27 = vld [vmem:[%s1667_s10 + $0x4a8] sm:$0xff] }
  0x6a   : > { %413 = vst [vmem:[%s1672_s5 + $0x250] sm:$0xff] %v412_v26  ;;  %v416_v28 = vld [vmem:[%s1667_s10 + $0x4c0] sm:$0xff]  ;;  %v418_v29 = vld [vmem:[%s1667_s10 + $0x4c8] sm:$0xff]  ;;  %415 = vst [vmem:[%s1672_s5 + $0x258] sm:$0xff] %v414_v27 }
  0x6b   : > { %417 = vst [vmem:[%s1672_s5 + $0x260] sm:$0xff] %v416_v28  ;;  %419 = vst [vmem:[%s1672_s5 + $0x268] sm:$0xff] %v418_v29  ;;  %v420_v30 = vld [vmem:[%s1667_s10 + $0x4e0] sm:$0xff]  ;;  %v422_v31 = vld [vmem:[%s1667_s10 + $0x4e8] sm:$0xff] }
  0x6c   : > { %v424_v32 = vld [vmem:[%s1667_s10 + $0x500] sm:$0xff]  ;;  %421 = vst [vmem:[%s1672_s5 + $0x270] sm:$0xff] %v420_v30  ;;  %423 = vst [vmem:[%s1672_s5 + $0x278] sm:$0xff] %v422_v31  ;;  %v426_v33 = vld [vmem:[%s1667_s10 + $0x508] sm:$0xff] }
  0x6d   : > { %425 = vst [vmem:[%s1672_s5 + $0x280] sm:$0xff] %v424_v32  ;;  %v428_v34 = vld [vmem:[%s1667_s10 + $0x520] sm:$0xff]  ;;  %v430_v35 = vld [vmem:[%s1667_s10 + $0x528] sm:$0xff]  ;;  %427 = vst [vmem:[%s1672_s5 + $0x288] sm:$0xff] %v426_v33 }
  0x6e   : > { %429 = vst [vmem:[%s1672_s5 + $0x290] sm:$0xff] %v428_v34  ;;  %431 = vst [vmem:[%s1672_s5 + $0x298] sm:$0xff] %v430_v35  ;;  %v432_v36 = vld [vmem:[%s1667_s10 + $0x540] sm:$0xff]  ;;  %v434_v37 = vld [vmem:[%s1667_s10 + $0x548] sm:$0xff] }
  0x6f   : > { %v436_v38 = vld [vmem:[%s1667_s10 + $0x560] sm:$0xff]  ;;  %433 = vst [vmem:[%s1672_s5 + $0x2a0] sm:$0xff] %v432_v36  ;;  %435 = vst [vmem:[%s1672_s5 + $0x2a8] sm:$0xff] %v434_v37  ;;  %v438_v39 = vld [vmem:[%s1667_s10 + $0x568] sm:$0xff] }
  0x70   : > { %437 = vst [vmem:[%s1672_s5 + $0x2b0] sm:$0xff] %v436_v38  ;;  %v440_v40 = vld [vmem:[%s1667_s10 + $0x580] sm:$0xff]  ;;  %v442_v41 = vld [vmem:[%s1667_s10 + $0x588] sm:$0xff]  ;;  %439 = vst [vmem:[%s1672_s5 + $0x2b8] sm:$0xff] %v438_v39 }
  0x71   : > { %441 = vst [vmem:[%s1672_s5 + $0x2c0] sm:$0xff] %v440_v40  ;;  %443 = vst [vmem:[%s1672_s5 + $0x2c8] sm:$0xff] %v442_v41  ;;  %v444_v42 = vld [vmem:[%s1667_s10 + $0x5a0] sm:$0xff]  ;;  %v446_v43 = vld [vmem:[%s1667_s10 + $0x5a8] sm:$0xff] }
  0x72   : > { %v448_v44 = vld [vmem:[%s1667_s10 + $0x5c0] sm:$0xff]  ;;  %445 = vst [vmem:[%s1672_s5 + $0x2d0] sm:$0xff] %v444_v42  ;;  %447 = vst [vmem:[%s1672_s5 + $0x2d8] sm:$0xff] %v446_v43  ;;  %v450_v45 = vld [vmem:[%s1667_s10 + $0x5c8] sm:$0xff] }
  0x73   : > { %449 = vst [vmem:[%s1672_s5 + $0x2e0] sm:$0xff] %v448_v44  ;;  %v452_v46 = vld [vmem:[%s1667_s10 + $0x5e0] sm:$0xff]  ;;  %v454_v47 = vld [vmem:[%s1667_s10 + $0x5e8] sm:$0xff]  ;;  %451 = vst [vmem:[%s1672_s5 + $0x2e8] sm:$0xff] %v450_v45 }
  0x74   : > { %453 = vst [vmem:[%s1672_s5 + $0x2f0] sm:$0xff] %v452_v46  ;;  %455 = vst [vmem:[%s1672_s5 + $0x2f8] sm:$0xff] %v454_v47  ;;  %v456_v48 = vld [vmem:[%s1667_s10 + $0x600] sm:$0xff]  ;;  %v458_v49 = vld [vmem:[%s1667_s10 + $0x608] sm:$0xff] }
  0x75   : > { %v460_v50 = vld [vmem:[%s1667_s10 + $0x620] sm:$0xff]  ;;  %457 = vst [vmem:[%s1672_s5 + $0x300] sm:$0xff] %v456_v48  ;;  %459 = vst [vmem:[%s1672_s5 + $0x308] sm:$0xff] %v458_v49  ;;  %v462_v51 = vld [vmem:[%s1667_s10 + $0x628] sm:$0xff] }
  0x76   : > { %461 = vst [vmem:[%s1672_s5 + $0x310] sm:$0xff] %v460_v50  ;;  %v464_v52 = vld [vmem:[%s1667_s10 + $0x640] sm:$0xff]  ;;  %v466_v53 = vld [vmem:[%s1667_s10 + $0x648] sm:$0xff]  ;;  %463 = vst [vmem:[%s1672_s5 + $0x318] sm:$0xff] %v462_v51 }
  0x77   : > { %465 = vst [vmem:[%s1672_s5 + $0x320] sm:$0xff] %v464_v52  ;;  %467 = vst [vmem:[%s1672_s5 + $0x328] sm:$0xff] %v466_v53  ;;  %v468_v54 = vld [vmem:[%s1667_s10 + $0x660] sm:$0xff]  ;;  %v470_v55 = vld [vmem:[%s1667_s10 + $0x668] sm:$0xff] }
  0x78   : > { %v472_v56 = vld [vmem:[%s1667_s10 + $0x680] sm:$0xff]  ;;  %469 = vst [vmem:[%s1672_s5 + $0x330] sm:$0xff] %v468_v54  ;;  %471 = vst [vmem:[%s1672_s5 + $0x338] sm:$0xff] %v470_v55  ;;  %v474_v57 = vld [vmem:[%s1667_s10 + $0x688] sm:$0xff] }
  0x79   : > { %473 = vst [vmem:[%s1672_s5 + $0x340] sm:$0xff] %v472_v56  ;;  %v476_v58 = vld [vmem:[%s1667_s10 + $0x6a0] sm:$0xff]  ;;  %v478_v59 = vld [vmem:[%s1667_s10 + $0x6a8] sm:$0xff]  ;;  %475 = vst [vmem:[%s1672_s5 + $0x348] sm:$0xff] %v474_v57 }
  0x7a   : > { %477 = vst [vmem:[%s1672_s5 + $0x350] sm:$0xff] %v476_v58  ;;  %479 = vst [vmem:[%s1672_s5 + $0x358] sm:$0xff] %v478_v59  ;;  %v480_v60 = vld [vmem:[%s1667_s10 + $0x6c0] sm:$0xff]  ;;  %v482_v61 = vld [vmem:[%s1667_s10 + $0x6c8] sm:$0xff] }
  0x7b   : > { %v484_v62 = vld [vmem:[%s1667_s10 + $0x6e0] sm:$0xff]  ;;  %481 = vst [vmem:[%s1672_s5 + $0x360] sm:$0xff] %v480_v60  ;;  %483 = vst [vmem:[%s1672_s5 + $0x368] sm:$0xff] %v482_v61  ;;  %v486_v63 = vld [vmem:[%s1667_s10 + $0x6e8] sm:$0xff] }
  0x7c   : > { %485 = vst [vmem:[%s1672_s5 + $0x370] sm:$0xff] %v484_v62  ;;  %v488_v0 = vld [vmem:[%s1667_s10 + $0x700] sm:$0xff]  ;;  %v490_v1 = vld [vmem:[%s1667_s10 + $0x708] sm:$0xff]  ;;  %487 = vst [vmem:[%s1672_s5 + $0x378] sm:$0xff] %v486_v63 }
  0x7d   : > { %489 = vst [vmem:[%s1672_s5 + $0x380] sm:$0xff] %v488_v0  ;;  %491 = vst [vmem:[%s1672_s5 + $0x388] sm:$0xff] %v490_v1  ;;  %v492_v2 = vld [vmem:[%s1667_s10 + $0x720] sm:$0xff]  ;;  %v494_v3 = vld [vmem:[%s1667_s10 + $0x728] sm:$0xff] }
  0x7e   : > { %v496_v4 = vld [vmem:[%s1667_s10 + $0x740] sm:$0xff]  ;;  %493 = vst [vmem:[%s1672_s5 + $0x390] sm:$0xff] %v492_v2  ;;  %495 = vst [vmem:[%s1672_s5 + $0x398] sm:$0xff] %v494_v3  ;;  %v498_v5 = vld [vmem:[%s1667_s10 + $0x748] sm:$0xff] }
  0x7f   : > { %497 = vst [vmem:[%s1672_s5 + $0x3a0] sm:$0xff] %v496_v4  ;;  %v500_v6 = vld [vmem:[%s1667_s10 + $0x760] sm:$0xff]  ;;  %v502_v7 = vld [vmem:[%s1667_s10 + $0x768] sm:$0xff]  ;;  %499 = vst [vmem:[%s1672_s5 + $0x3a8] sm:$0xff] %v498_v5 }
  0x80   : > { %501 = vst [vmem:[%s1672_s5 + $0x3b0] sm:$0xff] %v500_v6  ;;  %503 = vst [vmem:[%s1672_s5 + $0x3b8] sm:$0xff] %v502_v7  ;;  %v504_v8 = vld [vmem:[%s1667_s10 + $0x780] sm:$0xff]  ;;  %v506_v9 = vld [vmem:[%s1667_s10 + $0x788] sm:$0xff] }
  0x81   : > { %v508_v10 = vld [vmem:[%s1667_s10 + $0x7a0] sm:$0xff]  ;;  %505 = vst [vmem:[%s1672_s5 + $0x3c0] sm:$0xff] %v504_v8  ;;  %507 = vst [vmem:[%s1672_s5 + $0x3c8] sm:$0xff] %v506_v9  ;;  %v510_v11 = vld [vmem:[%s1667_s10 + $0x7a8] sm:$0xff] }
  0x82   : > { %509 = vst [vmem:[%s1672_s5 + $0x3d0] sm:$0xff] %v508_v10  ;;  %v512_v12 = vld [vmem:[%s1667_s10 + $0x7c0] sm:$0xff]  ;;  %v514_v13 = vld [vmem:[%s1667_s10 + $0x7c8] sm:$0xff]  ;;  %511 = vst [vmem:[%s1672_s5 + $0x3d8] sm:$0xff] %v510_v11 }
  0x83   : > { %513 = vst [vmem:[%s1672_s5 + $0x3e0] sm:$0xff] %v512_v12  ;;  %515 = vst [vmem:[%s1672_s5 + $0x3e8] sm:$0xff] %v514_v13  ;;  %v516_v14 = vld [vmem:[%s1667_s10 + $0x7e0] sm:$0xff]  ;;  %v518_v15 = vld [vmem:[%s1667_s10 + $0x7e8] sm:$0xff] }
  0x84   : > { %517 = vst [vmem:[%s1672_s5 + $0x3f0] sm:$0xff] %v516_v14  ;;  %519 = vst [vmem:[%s1672_s5 + $0x3f8] sm:$0xff] %v518_v15 }
  0x85 PF: > { %p1270_p1 = scmp.ge.s32.totalorder %s1494_s24, 1  ;;  %p524_p2 = scmp.lt.s32.totalorder %s1494_s24, 65 }
  0x87   : > { %p525_p3 = pnand %p1270_p1, %p524_p2 }
  0x88   : > { %s531_s0 = sand.u32 (!%p525_p3), 1, %s1462_s16   ;;  %s538_s4 = sand.u32 (!%p525_p3), 1, %s1454_s14  }
  0x89   : > { %528 = sbr.rel (%p525_p3) target bundleno = 482 (0x1e2), region = 66  ;;  %s1271_s11 = sshll.u32 (!%p525_p3), %s531_s0, 7 }
  0x8a   : > { %s1272_s25 = sshll.u32 (!%p525_p3), %s538_s4, 10  ;;  %s559_s27 = sand.u32 (!%p525_p3), 1, %s1446_s12  }
  0x8b   : > { %s1933_s29 = sshll.u32 (!%p525_p3), %s1474_s19, 1  ;;  %s1273_s30 = sshll.u32 (!%p525_p3), %s559_s27, 6 }
  0x8c   : > { %p584_p4 = scmp.lt.s32.totalorder (!%p525_p3), %s1478_s20, 3  ;;  %p588_p5 = scmp.lt.s32.totalorder (!%p525_p3), %s1933_s29, 3 }
  0x8d   : > { %s2185_s28 = sld [smem:[#allocation13_spill]] (!%p525_p3)  ;;  %s1944_s14 = scalar_lea.vmem (!%p525_p3), [#allocation3], %s1271_s11 }
  0x8e   : > { %s585_s6 = scalar_select %p584_p4, %s1478_s20, 3 }
  0x8f   : > { %s589_s7 = scalar_select %p588_p5, %s1933_s29, 3 }
  0x90   : > { %s1275_s8 = sshll.u32 %s585_s6, 2  ;;  %s1946_s12 = scalar_lea.vmem [#allocation4], %s1272_s25 }
  0x91   : > { %s593_s9 = sadd.s32 %s1275_s8, %s589_s7  ;;  %s1948_s19 = scalar_lea.vmem [#allocation5], %s1273_s30 }
  0x92   : > { %s1276_s10 = sshll.u32 %s593_s9, 1  ;;  %s2186_s0 = sld [smem:[#allocation6_spill]] }
  0x93   : > { %s1942_s16 = scalar_lea.vmem %s2185_s28, %s1276_s10 }
  0x98   : > { %p1277_p6 = scmp.ne.s32.totalorder %s2186_s0, 0 }
  0x9a   : > { %600 = sbr.rel (%p1277_p6) target bundleno = 164 (0xa4), region = 78 }
  0x9f   : > { %v1496_v16 = vmov 0.0  }
  0xa0   : > { %601 = vst [vmem:[#allocation2 + $0x30] sm:$0xff] %v1496_v16  ;;  %602 = vst [vmem:[#allocation2] sm:$0xff] %v1496_v16 }
  0xa1   : > { %603 = vst [vmem:[#allocation2 + $0x18] sm:$0xff] %v1496_v16  ;;  %604 = vst [vmem:[#allocation2 + $0x10] sm:$0xff] %v1496_v16 }
  0xa2   : > { %605 = vst [vmem:[#allocation2 + $0x8] sm:$0xff] %v1496_v16  ;;  %606 = vst [vmem:[#allocation2 + $0x20] sm:$0xff] %v1496_v16 }
  0xa3   : > { %607 = vst [vmem:[#allocation2 + $0x28] sm:$0xff] %v1496_v16  ;;  %608 = vst [vmem:[#allocation2 + $0x38] sm:$0xff] %v1496_v16 }
  0xa4 PF: > { %v664_v17 = vld [vmem:[%s1946_s12 + $0xf8] sm:$0xff]  ;;  %v663_v19 = vld [vmem:[%s1946_s12 + $0xf0] sm:$0xff]  ;;  %v662_v21 = vld [vmem:[%s1946_s12 + $0xe8] sm:$0xff]  ;;  %s2187_s1 = sld [smem:[#allocation6_spill]] }
  0xa5   : > { %v728_v18 = vld [vmem:[%s1946_s12 + $0x2f8] sm:$0xff]  ;;  %761 = vmatprep.subr.mxu0 %v664_v17  ;;  %v727_v20 = vld [vmem:[%s1946_s12 + $0x2f0] sm:$0xff]  ;;  %v726_v22 = vld [vmem:[%s1946_s12 + $0x2e8] sm:$0xff] }
  0xa6   : > { %850 = vmatprep.subr.mxu1 %v728_v18  ;;  %762 = vmatpush1.msra.mxu0 %v663_v19  ;;  %v661_v23 = vld [vmem:[%s1946_s12 + $0xe0] sm:$0xff]  ;;  %v660_v25 = vld [vmem:[%s1946_s12 + $0xd8] sm:$0xff]  ;;  %v659_v27 = vld [vmem:[%s1946_s12 + $0xd0] sm:$0xff] }
  0xa7   : > { %851 = vmatpush1.msra.mxu1 %v727_v20  ;;  %v725_v24 = vld [vmem:[%s1946_s12 + $0x2e0] sm:$0xff]  ;;  %763 = vmatprep.subr.mxu0 %v662_v21  ;;  %v724_v26 = vld [vmem:[%s1946_s12 + $0x2d8] sm:$0xff]  ;;  %v723_v28 = vld [vmem:[%s1946_s12 + $0x2d0] sm:$0xff] }
  0xa8   : > { %852 = vmatprep.subr.mxu1 %v726_v22  ;;  %764 = vmatpush1.msra.mxu0 %v661_v23  ;;  %v658_v29 = vld [vmem:[%s1946_s12 + $0xc8] sm:$0xff]  ;;  %v657_v31 = vld [vmem:[%s1946_s12 + $0xc0] sm:$0xff]  ;;  %v656_v33 = vld [vmem:[%s1946_s12 + $0xb8] sm:$0xff] }
  0xa9   : > { %853 = vmatpush1.msra.mxu1 %v725_v24  ;;  %v722_v30 = vld [vmem:[%s1946_s12 + $0x2c8] sm:$0xff]  ;;  %765 = vmatprep.subr.mxu0 %v660_v25  ;;  %v721_v32 = vld [vmem:[%s1946_s12 + $0x2c0] sm:$0xff]  ;;  %v720_v34 = vld [vmem:[%s1946_s12 + $0x2b8] sm:$0xff] }
  0xaa   : > { %854 = vmatprep.subr.mxu1 %v724_v26  ;;  %766 = vmatpush1.msra.mxu0 %v659_v27  ;;  %v655_v35 = vld [vmem:[%s1946_s12 + $0xb0] sm:$0xff]  ;;  %v654_v37 = vld [vmem:[%s1946_s12 + $0xa8] sm:$0xff]  ;;  %v653_v39 = vld [vmem:[%s1946_s12 + $0xa0] sm:$0xff]  ;;  %p1278_p7 = scmp.ne.s32.totalorder %s2187_s1, 7 }
  0xab   : > { %855 = vmatpush1.msra.mxu1 %v723_v28  ;;  %767 = vmatprep.subr.mxu0 %v658_v29  ;;  %v719_v36 = vld [vmem:[%s1946_s12 + $0x2b0] sm:$0xff]  ;;  %v718_v38 = vld [vmem:[%s1946_s12 + $0x2a8] sm:$0xff]  ;;  %v717_v40 = vld [vmem:[%s1946_s12 + $0x2a0] sm:$0xff] }
  0xac   : > { %856 = vmatprep.subr.mxu1 %v722_v30  ;;  %768 = vmatpush1.msra.mxu0 %v657_v31  ;;  %v652_v41 = vld [vmem:[%s1946_s12 + $0x98] sm:$0xff]  ;;  %v651_v43 = vld [vmem:[%s1946_s12 + $0x90] sm:$0xff]  ;;  %v650_v45 = vld [vmem:[%s1946_s12 + $0x88] sm:$0xff] }
  0xad   : > { %857 = vmatpush1.msra.mxu1 %v721_v32  ;;  %769 = vmatprep.subr.mxu0 %v656_v33  ;;  %v716_v42 = vld [vmem:[%s1946_s12 + $0x298] sm:$0xff]  ;;  %v715_v44 = vld [vmem:[%s1946_s12 + $0x290] sm:$0xff]  ;;  %v714_v46 = vld [vmem:[%s1946_s12 + $0x288] sm:$0xff] }
  0xae   : > { %858 = vmatprep.subr.mxu1 %v720_v34  ;;  %770 = vmatpush1.msra.mxu0 %v655_v35  ;;  %v649_v47 = vld [vmem:[%s1946_s12 + $0x80] sm:$0xff]  ;;  %v648_v49 = vld [vmem:[%s1946_s12 + $0x78] sm:$0xff]  ;;  %v647_v51 = vld [vmem:[%s1946_s12 + $0x70] sm:$0xff] }
  0xaf   : > { %859 = vmatpush1.msra.mxu1 %v719_v36  ;;  %771 = vmatprep.subr.mxu0 %v654_v37  ;;  %v713_v48 = vld [vmem:[%s1946_s12 + $0x280] sm:$0xff]  ;;  %v712_v50 = vld [vmem:[%s1946_s12 + $0x278] sm:$0xff]  ;;  %v711_v52 = vld [vmem:[%s1946_s12 + $0x270] sm:$0xff] }
  0xb0   : > { %860 = vmatprep.subr.mxu1 %v718_v38  ;;  %772 = vmatpush1.msra.mxu0 %v653_v39  ;;  %v646_v53 = vld [vmem:[%s1946_s12 + $0x68] sm:$0xff]  ;;  %v645_v55 = vld [vmem:[%s1946_s12 + $0x60] sm:$0xff]  ;;  %v644_v57 = vld [vmem:[%s1946_s12 + $0x58] sm:$0xff] }
  0xb1   : > { %861 = vmatpush1.msra.mxu1 %v717_v40  ;;  %773 = vmatprep.subr.mxu0 %v652_v41  ;;  %v710_v54 = vld [vmem:[%s1946_s12 + $0x268] sm:$0xff]  ;;  %v709_v56 = vld [vmem:[%s1946_s12 + $0x260] sm:$0xff]  ;;  %v708_v58 = vld [vmem:[%s1946_s12 + $0x258] sm:$0xff] }
  0xb2   : > { %862 = vmatprep.subr.mxu1 %v716_v42  ;;  %774 = vmatpush1.msra.mxu0 %v651_v43  ;;  %v643_v59 = vld [vmem:[%s1946_s12 + $0x50] sm:$0xff]  ;;  %v642_v61 = vld [vmem:[%s1946_s12 + $0x48] sm:$0xff]  ;;  %v641_v63 = vld [vmem:[%s1946_s12 + $0x40] sm:$0xff] }
  0xb3   : > { %863 = vmatpush1.msra.mxu1 %v715_v44  ;;  %775 = vmatprep.subr.mxu0 %v650_v45  ;;  %v707_v60 = vld [vmem:[%s1946_s12 + $0x250] sm:$0xff]  ;;  %v706_v62 = vld [vmem:[%s1946_s12 + $0x248] sm:$0xff]  ;;  %v705_v0 = vld [vmem:[%s1946_s12 + $0x240] sm:$0xff] }
  0xb4   : > { %864 = vmatprep.subr.mxu1 %v714_v46  ;;  %776 = vmatpush1.msra.mxu0 %v649_v47  ;;  %v640_v1 = vld [vmem:[%s1946_s12 + $0x38] sm:$0xff]  ;;  %v639_v3 = vld [vmem:[%s1946_s12 + $0x30] sm:$0xff]  ;;  %v638_v5 = vld [vmem:[%s1946_s12 + $0x28] sm:$0xff] }
  0xb5   : > { %865 = vmatpush1.msra.mxu1 %v713_v48  ;;  %777 = vmatprep.subr.mxu0 %v648_v49  ;;  %v704_v2 = vld [vmem:[%s1946_s12 + $0x238] sm:$0xff]  ;;  %v703_v4 = vld [vmem:[%s1946_s12 + $0x230] sm:$0xff]  ;;  %v702_v6 = vld [vmem:[%s1946_s12 + $0x228] sm:$0xff] }
  0xb6   : > { %866 = vmatprep.subr.mxu1 %v712_v50  ;;  %778 = vmatpush1.msra.mxu0 %v647_v51  ;;  %v637_v7 = vld [vmem:[%s1946_s12 + $0x20] sm:$0xff]  ;;  %v636_v9 = vld [vmem:[%s1946_s12 + $0x18] sm:$0xff]  ;;  %v635_v11 = vld [vmem:[%s1946_s12 + $0x10] sm:$0xff] }
  0xb7   : > { %867 = vmatpush1.msra.mxu1 %v711_v52  ;;  %779 = vmatprep.subr.mxu0 %v646_v53  ;;  %v701_v8 = vld [vmem:[%s1946_s12 + $0x220] sm:$0xff]  ;;  %v700_v10 = vld [vmem:[%s1946_s12 + $0x218] sm:$0xff]  ;;  %v699_v12 = vld [vmem:[%s1946_s12 + $0x210] sm:$0xff] }
  0xb8   : > { %868 = vmatprep.subr.mxu1 %v710_v54  ;;  %780 = vmatpush1.msra.mxu0 %v645_v55  ;;  %v634_v13 = vld [vmem:[%s1946_s12 + $0x8] sm:$0xff]  ;;  %v633_v15 = vld [vmem:[%s1946_s12] sm:$0xff]  ;;  %v696_v17 = vld [vmem:[%s1946_s12 + $0x1f8] sm:$0xff] }
  0xb9   : > { %869 = vmatpush1.msra.mxu1 %v709_v56  ;;  %781 = vmatprep.subr.mxu0 %v644_v57  ;;  %v698_v14 = vld [vmem:[%s1946_s12 + $0x208] sm:$0xff]  ;;  %v697_v16 = vld [vmem:[%s1946_s12 + $0x200] sm:$0xff]  ;;  %v760_v18 = vld [vmem:[%s1946_s12 + $0x3f8] sm:$0xff] }
  0xba   : > { %870 = vmatprep.subr.mxu1 %v708_v58  ;;  %782 = vmatpush1.msra.mxu0 %v643_v59  ;;  %v695_v19 = vld [vmem:[%s1946_s12 + $0x1f0] sm:$0xff]  ;;  %v694_v21 = vld [vmem:[%s1946_s12 + $0x1e8] sm:$0xff]  ;;  %v693_v23 = vld [vmem:[%s1946_s12 + $0x1e0] sm:$0xff] }
  0xbb   : > { %871 = vmatpush1.msra.mxu1 %v707_v60  ;;  %783 = vmatprep.subr.mxu0 %v642_v61  ;;  %v759_v20 = vld [vmem:[%s1946_s12 + $0x3f0] sm:$0xff]  ;;  %v758_v22 = vld [vmem:[%s1946_s12 + $0x3e8] sm:$0xff]  ;;  %v757_v24 = vld [vmem:[%s1946_s12 + $0x3e0] sm:$0xff] }
  0xbc   : > { %872 = vmatprep.subr.mxu1 %v706_v62  ;;  %784 = vmatpush1.msra.mxu0 %v641_v63  ;;  %v692_v25 = vld [vmem:[%s1946_s12 + $0x1d8] sm:$0xff]  ;;  %v691_v27 = vld [vmem:[%s1946_s12 + $0x1d0] sm:$0xff]  ;;  %v690_v29 = vld [vmem:[%s1946_s12 + $0x1c8] sm:$0xff] }
  0xbd   : > { %873 = vmatpush1.msra.mxu1 %v705_v0  ;;  %785 = vmatprep.subr.mxu0 %v640_v1  ;;  %v756_v26 = vld [vmem:[%s1946_s12 + $0x3d8] sm:$0xff]  ;;  %v755_v28 = vld [vmem:[%s1946_s12 + $0x3d0] sm:$0xff]  ;;  %v754_v30 = vld [vmem:[%s1946_s12 + $0x3c8] sm:$0xff] }
  0xbe   : > { %874 = vmatprep.subr.mxu1 %v704_v2  ;;  %786 = vmatpush1.msra.mxu0 %v639_v3  ;;  %v689_v31 = vld [vmem:[%s1946_s12 + $0x1c0] sm:$0xff]  ;;  %v688_v33 = vld [vmem:[%s1946_s12 + $0x1b8] sm:$0xff]  ;;  %v687_v35 = vld [vmem:[%s1946_s12 + $0x1b0] sm:$0xff] }
  0xbf   : > { %875 = vmatpush1.msra.mxu1 %v703_v4  ;;  %787 = vmatprep.subr.mxu0 %v638_v5  ;;  %v753_v32 = vld [vmem:[%s1946_s12 + $0x3c0] sm:$0xff]  ;;  %v752_v34 = vld [vmem:[%s1946_s12 + $0x3b8] sm:$0xff]  ;;  %v751_v36 = vld [vmem:[%s1946_s12 + $0x3b0] sm:$0xff] }
  0xc0   : > { %876 = vmatprep.subr.mxu1 %v702_v6  ;;  %788 = vmatpush1.msra.mxu0 %v637_v7  ;;  %v686_v37 = vld [vmem:[%s1946_s12 + $0x1a8] sm:$0xff]  ;;  %v685_v39 = vld [vmem:[%s1946_s12 + $0x1a0] sm:$0xff]  ;;  %v684_v41 = vld [vmem:[%s1946_s12 + $0x198] sm:$0xff] }
  0xc1   : > { %877 = vmatpush1.msra.mxu1 %v701_v8  ;;  %789 = vmatprep.subr.mxu0 %v636_v9  ;;  %v750_v38 = vld [vmem:[%s1946_s12 + $0x3a8] sm:$0xff]  ;;  %v749_v40 = vld [vmem:[%s1946_s12 + $0x3a0] sm:$0xff]  ;;  %v748_v42 = vld [vmem:[%s1946_s12 + $0x398] sm:$0xff] }
  0xc2   : > { %878 = vmatprep.subr.mxu1 %v700_v10  ;;  %790 = vmatpush1.msra.mxu0 %v635_v11  ;;  %v683_v43 = vld [vmem:[%s1946_s12 + $0x190] sm:$0xff]  ;;  %v682_v45 = vld [vmem:[%s1946_s12 + $0x188] sm:$0xff]  ;;  %v681_v47 = vld [vmem:[%s1946_s12 + $0x180] sm:$0xff] }
  0xc3   : > { %879 = vmatpush1.msra.mxu1 %v699_v12  ;;  %791 = vmatprep.subr.mxu0 %v634_v13  ;;  %v747_v44 = vld [vmem:[%s1946_s12 + $0x390] sm:$0xff]  ;;  %v746_v46 = vld [vmem:[%s1946_s12 + $0x388] sm:$0xff]  ;;  %v745_v48 = vld [vmem:[%s1946_s12 + $0x380] sm:$0xff] }
  0xc4   : > { %880 = vmatprep.subr.mxu1 %v698_v14  ;;  %792 = vmatpush1.msra.mxu0 %v633_v15  ;;  %v680_v49 = vld [vmem:[%s1946_s12 + $0x178] sm:$0xff]  ;;  %v679_v51 = vld [vmem:[%s1946_s12 + $0x170] sm:$0xff]  ;;  %v678_v53 = vld [vmem:[%s1946_s12 + $0x168] sm:$0xff] }
  0xc5   : > { %881 = vmatpush1.msra.mxu1 %v697_v16  ;;  %793 = vmatprep.subr.mxu0 %v696_v17  ;;  %v744_v50 = vld [vmem:[%s1946_s12 + $0x378] sm:$0xff]  ;;  %v743_v52 = vld [vmem:[%s1946_s12 + $0x370] sm:$0xff]  ;;  %v742_v54 = vld [vmem:[%s1946_s12 + $0x368] sm:$0xff] }
  0xc6   : > { %882 = vmatprep.subr.mxu1 %v760_v18  ;;  %794 = vmatpush2.msra.mxu0 %v695_v19  ;;  %v677_v55 = vld [vmem:[%s1946_s12 + $0x160] sm:$0xff]  ;;  %v676_v57 = vld [vmem:[%s1946_s12 + $0x158] sm:$0xff]  ;;  %v675_v59 = vld [vmem:[%s1946_s12 + $0x150] sm:$0xff] }
  0xc7   : > { %883 = vmatpush2.msra.mxu1 %v759_v20  ;;  %795 = vmatprep.subr.mxu0 %v694_v21  ;;  %v741_v56 = vld [vmem:[%s1946_s12 + $0x360] sm:$0xff]  ;;  %v740_v58 = vld [vmem:[%s1946_s12 + $0x358] sm:$0xff]  ;;  %v739_v60 = vld [vmem:[%s1946_s12 + $0x350] sm:$0xff] }
  0xc8   : > { %884 = vmatprep.subr.mxu1 %v758_v22  ;;  %796 = vmatpush2.msra.mxu0 %v693_v23  ;;  %v674_v61 = vld [vmem:[%s1946_s12 + $0x148] sm:$0xff]  ;;  %v673_v63 = vld [vmem:[%s1946_s12 + $0x140] sm:$0xff]  ;;  %v672_v1 = vld [vmem:[%s1946_s12 + $0x138] sm:$0xff] }
  0xc9   : > { %885 = vmatpush2.msra.mxu1 %v757_v24  ;;  %797 = vmatprep.subr.mxu0 %v692_v25  ;;  %v738_v62 = vld [vmem:[%s1946_s12 + $0x348] sm:$0xff]  ;;  %v737_v0 = vld [vmem:[%s1946_s12 + $0x340] sm:$0xff]  ;;  %v736_v2 = vld [vmem:[%s1946_s12 + $0x338] sm:$0xff] }
  0xca   : > { %886 = vmatprep.subr.mxu1 %v756_v26  ;;  %798 = vmatpush2.msra.mxu0 %v691_v27  ;;  %v671_v3 = vld [vmem:[%s1946_s12 + $0x130] sm:$0xff]  ;;  %v670_v5 = vld [vmem:[%s1946_s12 + $0x128] sm:$0xff]  ;;  %v669_v7 = vld [vmem:[%s1946_s12 + $0x120] sm:$0xff] }
  0xcb   : > { %887 = vmatpush2.msra.mxu1 %v755_v28  ;;  %799 = vmatprep.subr.mxu0 %v690_v29  ;;  %v735_v4 = vld [vmem:[%s1946_s12 + $0x330] sm:$0xff]  ;;  %v734_v6 = vld [vmem:[%s1946_s12 + $0x328] sm:$0xff]  ;;  %v733_v8 = vld [vmem:[%s1946_s12 + $0x320] sm:$0xff] }
  0xcc   : > { %888 = vmatprep.subr.mxu1 %v754_v30  ;;  %800 = vmatpush2.msra.mxu0 %v689_v31  ;;  %v668_v9 = vld [vmem:[%s1946_s12 + $0x118] sm:$0xff]  ;;  %v667_v11 = vld [vmem:[%s1946_s12 + $0x110] sm:$0xff]  ;;  %v666_v13 = vld [vmem:[%s1946_s12 + $0x108] sm:$0xff] }
  0xcd   : > { %889 = vmatpush2.msra.mxu1 %v753_v32  ;;  %801 = vmatprep.subr.mxu0 %v688_v33  ;;  %v732_v10 = vld [vmem:[%s1946_s12 + $0x318] sm:$0xff]  ;;  %v731_v12 = vld [vmem:[%s1946_s12 + $0x310] sm:$0xff]  ;;  %v730_v14 = vld [vmem:[%s1946_s12 + $0x308] sm:$0xff] }
  0xce   : > { %890 = vmatprep.subr.mxu1 %v752_v34  ;;  %802 = vmatpush2.msra.mxu0 %v687_v35  ;;  %v665_v15 = vld [vmem:[%s1946_s12 + $0x100] sm:$0xff]  ;;  %v618_v16 = vld [vmem:[%s1944_s14 + $0x8] sm:$0xff]  ;;  %v620_v18 = vld [vmem:[%s1944_s14 + $0x18] sm:$0xff] }
  0xcf   : > { %891 = vmatpush2.msra.mxu1 %v751_v36  ;;  %803 = vmatprep.subr.mxu0 %v686_v37  ;;  %v729_v17 = vld [vmem:[%s1946_s12 + $0x300] sm:$0xff]  ;;  %v619_v20 = vld [vmem:[%s1944_s14 + $0x10] sm:$0xff]  ;;  %v622_v21 = vld [vmem:[%s1944_s14 + $0x28] sm:$0xff] }
  0xd0   : > { %892 = vmatprep.subr.mxu1 %v750_v38  ;;  %804 = vmatpush2.msra.mxu0 %v685_v39  ;;  %v617_v19 = vld [vmem:[%s1944_s14] sm:$0xff]  ;;  %v624_v22 = vld [vmem:[%s1944_s14 + $0x38] sm:$0xff]  ;;  %v623_v24 = vld [vmem:[%s1944_s14 + $0x30] sm:$0xff] }
  0xd1   : > { %893 = vmatpush2.msra.mxu1 %v749_v40  ;;  %805 = vmatprep.subr.mxu0 %v684_v41  ;;  %v621_v23 = vld [vmem:[%s1944_s14 + $0x20] sm:$0xff]  ;;  %v626_v25 = vld [vmem:[%s1944_s14 + $0x48] sm:$0xff]  ;;  %v628_v26 = vld [vmem:[%s1944_s14 + $0x58] sm:$0xff] }
  0xd2   : > { %894 = vmatprep.subr.mxu1 %v748_v42  ;;  %806 = vmatpush2.msra.mxu0 %v683_v43  ;;  %v625_v27 = vld [vmem:[%s1944_s14 + $0x40] sm:$0xff]  ;;  %v627_v28 = vld [vmem:[%s1944_s14 + $0x50] sm:$0xff]  ;;  %v630_v29 = vld [vmem:[%s1944_s14 + $0x68] sm:$0xff] }
  0xd3   : > { %895 = vmatpush2.msra.mxu1 %v747_v44  ;;  %807 = vmatprep.subr.mxu0 %v682_v45  ;;  %v632_v30 = vld [vmem:[%s1944_s14 + $0x78] sm:$0xff]  ;;  %v629_v31 = vld [vmem:[%s1944_s14 + $0x60] sm:$0xff]  ;;  %v631_v32 = vld [vmem:[%s1944_s14 + $0x70] sm:$0xff] }
  0xd4   : > { %896 = vmatprep.subr.mxu1 %v746_v46  ;;  %808 = vmatpush2.msra.mxu0 %v681_v47  ;;  %v609_v34 = vld [vmem:[#allocation2 + $0x30] sm:$0xff]  ;;  %v610_v38 = vld [vmem:[#allocation2] sm:$0xff]  ;;  %v611_v43 = vld [vmem:[#allocation2 + $0x18] sm:$0xff] }
  0xd5   : > { %897 = vmatpush2.msra.mxu1 %v745_v48  ;;  %809 = vmatprep.subr.mxu0 %v680_v49  ;;  %v612_v48 = vld [vmem:[#allocation2 + $0x10] sm:$0xff] }
  0xd6   : > { %898 = vmatprep.subr.mxu1 %v744_v50  ;;  %810 = vmatpush2.msra.mxu0 %v679_v51 }
  0xd7   : > { %899 = vmatpush2.msra.mxu1 %v743_v52  ;;  %811 = vmatprep.subr.mxu0 %v678_v53  ;;  %v613_v53 = vld [vmem:[#allocation2 + $0x8] sm:$0xff] }
  0xd8   : > { %900 = vmatprep.subr.mxu1 %v742_v54  ;;  %812 = vmatpush2.msra.mxu0 %v677_v55 }
  0xd9   : > { %901 = vmatpush2.msra.mxu1 %v741_v56  ;;  %813 = vmatprep.subr.mxu0 %v676_v57 }
  0xda   : > { %902 = vmatprep.subr.mxu1 %v740_v58  ;;  %814 = vmatpush2.msra.mxu0 %v675_v59  ;;  %v614_v58 = vld [vmem:[#allocation2 + $0x20] sm:$0xff] }
  0xdb   : > { %903 = vmatpush2.msra.mxu1 %v739_v60  ;;  %815 = vmatprep.subr.mxu0 %v674_v61 }
  0xdc   : > { %904 = vmatprep.subr.mxu1 %v738_v62  ;;  %816 = vmatpush2.msra.mxu0 %v673_v63  ;;  %v615_v63 = vld [vmem:[#allocation2 + $0x28] sm:$0xff] }
  0xdd   : > { %905 = vmatpush2.msra.mxu1 %v737_v0  ;;  %817 = vmatprep.subr.mxu0 %v672_v1 }
  0xde   : > { %906 = vmatprep.subr.mxu1 %v736_v2  ;;  %818 = vmatpush2.msra.mxu0 %v671_v3 }
  0xdf   : > { %907 = vmatpush2.msra.mxu1 %v735_v4  ;;  %819 = vmatprep.subr.mxu0 %v670_v5  ;;  %v616_v4 = vld [vmem:[#allocation2 + $0x38] sm:$0xff] }
  0xe0   : > { %908 = vmatprep.subr.mxu1 %v734_v6  ;;  %820 = vmatpush2.msra.mxu0 %v669_v7 }
  0xe1   : > { %909 = vmatpush2.msra.mxu1 %v733_v8  ;;  %821 = vmatprep.subr.mxu0 %v668_v9 }
  0xe2   : > { %910 = vmatprep.subr.mxu1 %v732_v10  ;;  %822 = vmatpush2.msra.mxu0 %v667_v11 }
  0xe3   : > { %911 = vmatpush2.msra.mxu1 %v731_v12  ;;  %823 = vmatprep.subr.mxu0 %v666_v13 }
  0xe4   : > { %912 = vmatprep.subr.mxu1 %v730_v14  ;;  %824 = vmatpush2.msra.mxu0 %v665_v15 }
  0xe5   : > { %825 = vmatprep.mubr.f32.mxu0 %v618_v16  ;;  %913 = vmatpush2.msra.mxu1 %v729_v17 }
  0xe6   : > { %914 = vmatprep.mubr.f32.mxu1 %v620_v18  ;;  %826 = vmatmul.mubr.f32.vlgmr.msra.gmra.mxu0 %v617_v19 }
  0xe7   : > { %915 = vmatmul.mubr.f32.vlgmr.msra.gmra.mxu1 %v619_v20  ;;  %831 = vmatprep.mubr.f32.mxu0 %v622_v21 }
  0xe8   : > { %920 = vmatprep.mubr.f32.mxu1 %v624_v22 }
  0xea   : > { %832 = vmatmul.mubr.f32.gmra.mxu0 %v621_v23 }
  0xeb   : > { %921 = vmatmul.mubr.f32.gmra.mxu1 %v623_v24  ;;  %837 = vmatprep.mubr.f32.mxu0 %v626_v25 }
  0xec   : > { %926 = vmatprep.mubr.f32.mxu1 %v628_v26 }
  0xee   : > { %838 = vmatmul.mubr.f32.gmra.mxu0 %v625_v27 }
  0xef   : > { %927 = vmatmul.mubr.f32.gmra.mxu1 %v627_v28  ;;  %843 = vmatprep.mubr.f32.mxu0 %v630_v29 }
  0xf0   : > { %932 = vmatprep.mubr.f32.mxu1 %v632_v30 }
  0xf2   : > { %844 = vmatmul.mubr.f32.gmra.mxu0 %v629_v31 }
  0xf3   : > { %933 = vmatmul.mubr.f32.gmra.mxu1 %v631_v32 }
 0x1a6   : > { %v827_v33 = vpop.f32.mrf.mxu0 }
 0x1a7   : > { %v916_v35 = vpop.f32.mrf.mxu1 }
 0x1a8   : > { %v917_v36 = vadd.f32 %v916_v35, %v827_v33  ;;  %v829_v37 = vpop.f32.mrf.mxu0 }
 0x1a9   : > { %v918_v39 = vpop.f32.mrf.mxu1 }
 0x1aa   : > { %v939_v40 = vadd.f32 %v917_v36, %v609_v34  ;;  %v919_v41 = vadd.f32 %v918_v39, %v829_v37  ;;  %v833_v42 = vpop.f32.mrf.mxu0 }
 0x1ab   : > { %v922_v44 = vpop.f32.mrf.mxu1 }
 0x1ac   : > { %947 = vst [vmem:[#allocation2 + $0x30] sm:$0xff] %v939_v40  ;;  %v940_v45 = vadd.f32 %v919_v41, %v610_v38  ;;  %v923_v46 = vadd.f32 %v922_v44, %v833_v42  ;;  %v835_v47 = vpop.f32.mrf.mxu0 }
 0x1ad   : > { %v924_v49 = vpop.f32.mrf.mxu1 }
 0x1ae   : > { %948 = vst [vmem:[#allocation2] sm:$0xff] %v940_v45  ;;  %v941_v50 = vadd.f32 %v923_v46, %v611_v43  ;;  %v925_v51 = vadd.f32 %v924_v49, %v835_v47  ;;  %v839_v52 = vpop.f32.mrf.mxu0 }
 0x1af   : > { %v928_v54 = vpop.f32.mrf.mxu1 }
 0x1b0   : > { %949 = vst [vmem:[#allocation2 + $0x18] sm:$0xff] %v941_v50  ;;  %v942_v55 = vadd.f32 %v925_v51, %v612_v48  ;;  %v929_v56 = vadd.f32 %v928_v54, %v839_v52  ;;  %v841_v57 = vpop.f32.mrf.mxu0 }
 0x1b1   : > { %v930_v59 = vpop.f32.mrf.mxu1 }
 0x1b2   : > { %950 = vst [vmem:[#allocation2 + $0x10] sm:$0xff] %v942_v55  ;;  %v943_v60 = vadd.f32 %v929_v56, %v613_v53  ;;  %v931_v61 = vadd.f32 %v930_v59, %v841_v57  ;;  %v845_v62 = vpop.f32.mrf.mxu0 }
 0x1b3   : > { %v934_v0 = vpop.f32.mrf.mxu1 }
 0x1b4   : > { %951 = vst [vmem:[#allocation2 + $0x8] sm:$0xff] %v943_v60  ;;  %v944_v1 = vadd.f32 %v931_v61, %v614_v58  ;;  %v935_v2 = vadd.f32 %v934_v0, %v845_v62  ;;  %v847_v3 = vpop.f32.mrf.mxu0 }
 0x1b5   : > { %v936_v5 = vpop.f32.mrf.mxu1 }
 0x1b6   : > { %952 = vst [vmem:[#allocation2 + $0x20] sm:$0xff] %v944_v1  ;;  %v945_v6 = vadd.f32 %v935_v2, %v615_v63  ;;  %v937_v7 = vadd.f32 %v936_v5, %v847_v3  ;;  %958 = sbr.rel (%p1278_p7) target bundleno = 470 (0x1d6), region = 82 }
 0x1b8   : > { %953 = vst [vmem:[#allocation2 + $0x28] sm:$0xff] %v945_v6  ;;  %v946_v8 = vadd.f32 %v937_v7, %v616_v4 }
 0x1ba   : > { %954 = vst [vmem:[#allocation2 + $0x38] sm:$0xff] %v946_v8 }
 0x1bb   : > { %v959_v9 = vld [vmem:[#allocation2 + $0x30] sm:$0xff]  ;;  %v960_v10 = vld [vmem:[#allocation2] sm:$0xff]  ;;  %v961_v11 = vld [vmem:[#allocation2 + $0x18] sm:$0xff]  ;;  %vm1019_vm0 = vcmask 1040384  }
 0x1bc   : > { %967 = vst [vmem:[%s1948_s19] sm:$0xff] %v959_v9  ;;  %v993_v12 = vmul.f32 %v959_v9, %v959_v9  ;;  %968 = vst [vmem:[%s1948_s19 + $0x8] sm:$0xff] %v960_v10  ;;  %v994_v13 = vmul.f32 %v960_v10, %v960_v10  ;;  %v975_v14 = vadd.f32 %v961_v11, %v959_v9  ;;  %v962_v16 = vld [vmem:[#allocation2 + $0x10] sm:$0xff]  ;;  %v963_v17 = vld [vmem:[#allocation2 + $0x8] sm:$0xff] }
 0x1bd   : > { %969 = vst [vmem:[%s1948_s19 + $0x10] sm:$0xff] %v961_v11  ;;  %v995_v15 = vmul.f32 %v961_v11, %v961_v11  ;;  %v964_v18 = vld [vmem:[#allocation2 + $0x20] sm:$0xff]  ;;  %970 = vst [vmem:[%s1948_s19 + $0x18] sm:$0xff] %v962_v16  ;;  %v984_v19 = vadd.f32 %v962_v16, %v960_v10  ;;  %v996_v20 = vmul.f32 %v962_v16, %v962_v16 }
 0x1be   : > { %971 = vst [vmem:[%s1948_s19 + $0x20] sm:$0xff] %v963_v17  ;;  %v997_v21 = vmul.f32 %v963_v17, %v963_v17  ;;  %972 = vst [vmem:[%s1948_s19 + $0x28] sm:$0xff] %v964_v18  ;;  %v998_v22 = vmul.f32 %v964_v18, %v964_v18  ;;  %v976_v26 = vadd.f32 %v975_v14, %v963_v17 }
 0x1bf   : > { %v965_v23 = vld [vmem:[#allocation2 + $0x28] sm:$0xff]  ;;  %v1001_v25 = vadd.f32 %v995_v15, %v993_v12  ;;  %v1010_v28 = vadd.f32 %v996_v20, %v994_v13  ;;  %v985_v29 = vadd.f32 %v984_v19, %v964_v18 }
 0x1c0   : > { %973 = vst [vmem:[%s1948_s19 + $0x30] sm:$0xff] %v965_v23  ;;  %v999_v27 = vmul.f32 %v965_v23, %v965_v23  ;;  %v977_v32 = vadd.f32 %v976_v26, %v965_v23 }
 0x1c1   : > { %v966_v24 = vld [vmem:[#allocation2 + $0x38] sm:$0xff]  ;;  %v1002_v31 = vadd.f32 %v1001_v25, %v997_v21  ;;  %v1011_v33 = vadd.f32 %v1010_v28, %v998_v22 }
 0x1c2   : > { %974 = vst [vmem:[%s1948_s19 + $0x38] sm:$0xff] %v966_v24  ;;  %v1000_v30 = vmul.f32 %v966_v24, %v966_v24  ;;  %v986_v34 = vadd.f32 %v985_v29, %v966_v24  ;;  %v978_v35 = vrot.slane %v977_v32, 4 }
 0x1c3   : > { %v1003_v36 = vadd.f32 %v1002_v31, %v999_v27 }
 0x1c4   : > { %v987_v37 = vrot.slane %v986_v34, 4  ;;  %v1012_v38 = vadd.f32 %v1011_v33, %v1000_v30  ;;  %v979_v39 = vadd.f32 %v978_v35, %v977_v32 }
 0x1c5   : > { %v1004_v40 = vrot.slane %v1003_v36, 4 }
 0x1c6   : > { %v988_v41 = vadd.f32 %v987_v37, %v986_v34  ;;  %v1013_v42 = vrot.slane %v1012_v38, 4  ;;  %v980_v43 = vrot.slane %v979_v39, 2 }
 0x1c7   : > { %v1005_v44 = vadd.f32 %v1004_v40, %v1003_v36 }
 0x1c8   : > { %v989_v45 = vrot.slane %v988_v41, 2  ;;  %v1014_v46 = vadd.f32 %v1013_v42, %v1012_v38  ;;  %v981_v47 = vadd.f32 %v980_v43, %v979_v39 }
 0x1c9   : > { %v1006_v48 = vrot.slane %v1005_v44, 2 }
 0x1ca   : > { %v990_v49 = vadd.f32 %v989_v45, %v988_v41  ;;  %v1015_v50 = vrot.slane %v1014_v46, 2  ;;  %v982_v51 = vrot.slane %v981_v47, 1 }
 0x1cb   : > { %v1007_v52 = vadd.f32 %v1006_v48, %v1005_v44 }
 0x1cc   : > { %v991_v53 = vrot.slane %v990_v49, 1  ;;  %v1016_v54 = vadd.f32 %v1015_v50, %v1014_v46  ;;  %v983_v55 = vadd.f32 %v982_v51, %v981_v47 }
 0x1cd   : > { %v1008_v56 = vrot.slane %v1007_v52, 1 }
 0x1ce   : > { %v992_v57 = vadd.f32 %v991_v53, %v990_v49  ;;  %v1017_v58 = vrot.slane %v1016_v54, 1 }
 0x1cf   : > { %v1009_v59 = vadd.f32 %v1008_v56, %v1007_v52 }
 0x1d0   : > { %v1018_v60 = vadd.f32 %v1017_v58, %v1016_v54 }
 0x1d1   : > { %v1020_v61 = vsel %vm1019_vm0, %v983_v55, %v1009_v59 }
 0x1d2   : > { %v1021_v62 = vsel %vm1019_vm0, %v992_v57, %v1018_v60 }
 0x1d3   : > { %v1024_v63 = vcombine.low %v1020_v61, %v1021_v62 }
 0x1d5   : > { %1279 = vst.sshfl [vmem:[%s1942_s16] sm:$0x33 pattern:$0x76325410] %v1024_v63 }
 0x1d6 PF: > { %1053 = sbr.rel (!%p1627_p13) target bundleno = 482 (0x1e2), region = 86  ;;  %s1282_s28 = sshll.u32 (%p1627_p13), %s1478_s20, 4  ;;  %v1074_v0 = vld [vmem:[%s1948_s19] sm:$0xff] (%p1627_p13)  ;;  %v1076_v1 = vld [vmem:[%s1948_s19 + $0x8] sm:$0xff] (%p1627_p13)  ;;  %v1078_v2 = vld [vmem:[%s1948_s19 + $0x10] sm:$0xff] (%p1627_p13) }
 0x1d7   : > { %s1059_s4 = sadd.s32 (%p1627_p13), %s1282_s28, %s1933_s29  ;;  %v1080_v3 = vld [vmem:[%s1948_s19 + $0x18] sm:$0xff] (%p1627_p13)  ;;  %v1082_v4 = vld [vmem:[%s1948_s19 + $0x20] sm:$0xff] (%p1627_p13)  ;;  %v1084_v5 = vld [vmem:[%s1948_s19 + $0x28] sm:$0xff] (%p1627_p13)  ;;  %s2188_s27 = sld [smem:[#allocation12_spill]] (%p1627_p13) }
 0x1d8   : > { %s1283_s26 = sshll.u32 (%p1627_p13), %s1059_s4, 3  ;;  %v1086_v6 = vld [vmem:[%s1948_s19 + $0x30] sm:$0xff] (%p1627_p13)  ;;  %v1088_v7 = vld [vmem:[%s1948_s19 + $0x38] sm:$0xff] (%p1627_p13) }
 0x1dd   : > { %s1061_s30 = scalar_lea.vmem %s2188_s27, %s1283_s26 }
 0x1de   : > { %1075 = vst [vmem:[%s1061_s30] sm:$0xff] %v1074_v0  ;;  %1077 = vst [vmem:[%s1061_s30 + $0x8] sm:$0xff] %v1076_v1 }
 0x1df   : > { %1079 = vst [vmem:[%s1061_s30 + $0x20] sm:$0xff] %v1078_v2  ;;  %1081 = vst [vmem:[%s1061_s30 + $0x28] sm:$0xff] %v1080_v3 }
 0x1e0   : > { %1083 = vst [vmem:[%s1061_s30 + $0x40] sm:$0xff] %v1082_v4  ;;  %1085 = vst [vmem:[%s1061_s30 + $0x48] sm:$0xff] %v1084_v5 }
 0x1e1   : > { %1087 = vst [vmem:[%s1061_s30 + $0x60] sm:$0xff] %v1086_v6  ;;  %1089 = vst [vmem:[%s1061_s30 + $0x68] sm:$0xff] %v1088_v7 }
 0x1e2 PF: > { %s14_s24 = sadd.s32 1, %s1494_s24   ;;  %s2190_s29 = sld [smem:[#allocation7_spill]] }
 0x1e3   : > { %p2121_p8 = scmp.ge.s32.totalorder %s14_s24, 66   ;;  %s2191_s6 = sld [smem:[#allocation8_spill]] }
 0x1e4   : > { %s2192_s7 = sld [smem:[#allocation9_spill]]  ;;  %s2194_s12 = smov %s1450_s13 }
 0x1e5   : > { %s2195_s13 = smov %s1625_s3  ;;  %s2196_s14 = smov %s1458_s15 }
 0x1e6   : > { %s2197_s15 = smov %s1622_s18  ;;  %s2198_s16 = smov %s1466_s17 }
 0x1e7   : > { %s2199_s17 = smov %s1619_s2  ;;  %s2200_s18 = smov %s1482_s21 }
 0x1e8   : > { %s2201_s19 = smov %s1486_s22  ;;  %s2202_s20 = smov %s1490_s23 }
 0x1e9   : > { %s2203_s21 = smov %s2190_s29  ;;  %s2204_s22 = smov %s2191_s6 }
 0x1ea   : > { %s2205_s23 = smov %s2192_s7  ;;  %13 = sbr.rel (!%p2121_p8) target bundleno = 12 (0xc), region = 160 }

// kernel: pp2p_forward.12
= control target key start
LH: loop header
LB: loop body
LE: loop exit
PB: predicated region body
PF: predicated region fallthrough
CT: control target
= control target key end

     0   :  { %s638_s12 = smov 0   ;;  %s640_s13 = smov 0   ;;  %s812_s0 = inlined_call_operand.vmem [shape: f32[4,8,4,512], index: 0, kind: input, shape index: {}]   ;;  %s813_s1 = inlined_call_operand.vmem [shape: f32[1,512], index: 1, kind: input, shape index: {}]   ;;  %s814_s2 = inlined_call_operand.vmem [shape: f32[1,512], index: 2, kind: input, shape index: {}]   ;;  %s815_s3 = inlined_call_operand.vmem [shape: f32[8,2,4,1024], index: 3, kind: output, shape index: {}]  }
   0x1   :  { %s642_s14 = smov 0   ;;  %s644_s15 = smov 0  }
   0x2   :  { %s646_s16 = smov 0   ;;  %s648_s17 = smov 0  }
   0x3   :  { %s650_s18 = smov 0  }
   0x4 LB: > { %s25_s19 = sadd.s32 1, %s608_s16  ;;  %s28_s20 = sadd.s32 1, %s612_s17  ;;  %s616_s18 = sphi %s650_s18, %s13_s18   ;;  %s612_s17 = sphi %s648_s17, %s822_s17   ;;  %s608_s16 = sphi %s646_s16, %s821_s16   ;;  %s604_s15 = sphi %s644_s15, %s820_s15   ;;  %s600_s14 = sphi %s642_s14, %s819_s14   ;;  %s596_s13 = sphi %s640_s13, %s818_s13   ;;  %s592_s12 = sphi %s638_s12, %s817_s12  }
   0x5   : > { %p26_p0 = scmp.ge.s32.totalorder %s25_s19, 2  ;;  %s488_s21 = sadd.s32 4294967295, %s616_s18  }
   0x6   : > { %p127_p1 = scmp.ne.s32.totalorder %s596_s13, %s592_s12  ;;  %p128_p2 = scmp.eq.s32.totalorder %s488_s21, 3 }
   0x7   : > { %s824_s19 = smov (%p26_p0, %s25_s19), 0  ;;  %s826_s20 = smov (!%p26_p0, %s28_s20), %s612_s17 }
   0x8   : > { %s113_s22 = ssub.s32 %s608_s16, %s824_s19  ;;  %p30_p3 = scmp.ge.s32.totalorder %s826_s20, 2 }
   0x9   : > { %p494_p4 = scmp.ge.s32.totalorder %s616_s18, 1  ;;  %p684_p5 = por %p128_p2, %p127_p1 }
   0xa   : > { %p176_p6 = scmp.lt.s32.totalorder %s616_s18, 5  ;;  %s828_s20 = smov (%p30_p3, %s826_s20), 0 }
   0xb   : > { %s111_s24 = ssub.s32 %s612_s17, %s828_s20  ;;  %s117_s26 = sadd.s32 1, %s596_s13 }
   0xc   : > { %p177_p7 = pnand %p494_p4, %p176_p6  ;;  %s114_s25 = sor.u32 %s113_s22, %s111_s24 }
   0xd   : > { %p115_p8 = scmp.eq.s32.totalorder %s114_s25, 0  ;;  %s496_s28 = sshll.u32 (!%p177_p7), %s604_s15, 1 }
   0xe   : > { %180 = sbr.rel (%p177_p7) target bundleno = 54 (0x36), region = 32  ;;  %s207_s29 = sadd.s32 (!%p177_p7), %s600_s14, %s496_s28 }
   0xf   : > { %s695_s27 = scalar_select %p115_p8, %s596_s13, %s117_s26  }
  0x10   : > { %p209_p9 = scmp.lt.s32.totalorder (!%p177_p7), %s207_s29, 3  ;;  %s203_s8 = sand.u32 (!%p177_p7), 1, %s592_s12  }
  0x11   : > { %s721_s12 = sshll.u32 (!%p177_p7), %s203_s8, 7 }
  0x12   : > { %s742_s21 = scalar_lea.vmem (!%p177_p7), [#allocation2], %s721_s12 }
  0x13   : > { %v241_v0 = vlaneseq  ;;  %v239_v2 = vld [vmem:[%s813_s1] sm:$0xf]  ;;  %s830_s29 = smov (!%p209_p9, %s207_s29), 3  ;;  %s500_s22 = sshll.u32 (%p684_p5), %s600_s14, 2 }
  0x14   : > { %v277_v3 = vld [vmem:[%s814_s2] sm:$0xf]  ;;  %s505_s7 = sshll.u32 %s830_s29, 7  ;;  %s501_s24 = sshll.u32 (%p684_p5), %s604_s15, 3 }
  0x15   : > { %v242_v1 = vshrl.u32 %v241_v0, 7  ;;  %s709_s11 = scalar_lea.vmem %s812_s0, %s505_s7  ;;  %s357_s23 = sadd.s32 (%p684_p5), %s501_s24, %s500_s22 }
  0x16   : > { %v223_v16 = vld [vmem:[%s709_s11] sm:$0xff]  ;;  %v224_v19 = vld [vmem:[%s709_s11 + $0x8] sm:$0xff]  ;;  %v225_v20 = vld [vmem:[%s709_s11 + $0x10] sm:$0xff]  ;;  %s502_s25 = sshll.u32 (%p684_p5), %s357_s23, 2 }
  0x17   : > { %v243_v4 = vsub.s32 0, %v242_v1  ;;  %v247_v5 = vsub.s32 1, %v242_v1  ;;  %v251_v6 = vsub.s32 2, %v242_v1  ;;  %v255_v7 = vsub.s32 3, %v242_v1  ;;  %v226_v23 = vld [vmem:[%s709_s11 + $0x18] sm:$0xff]  ;;  %v227_v24 = vld [vmem:[%s709_s11 + $0x20] sm:$0xff]  ;;  %s361_s29 = scalar_lea.vmem (%p684_p5), %s815_s3, %s502_s25 }
  0x18   : > { %v228_v25 = vld [vmem:[%s709_s11 + $0x28] sm:$0xff]  ;;  %v229_v29 = vld [vmem:[%s709_s11 + $0x30] sm:$0xff]  ;;  %v230_v30 = vld [vmem:[%s709_s11 + $0x38] sm:$0xff] }
  0x19   : > { %v244_v8 = vrot.slane %v239_v2, %v243_v4  ;;  %v248_v9 = vrot.slane %v239_v2, %v247_v5  ;;  %v282_v10 = vrot.slane %v277_v3, %v243_v4  ;;  %v286_v11 = vrot.slane %v277_v3, %v247_v5  ;;  %v231_v39 = vld [vmem:[%s709_s11 + $0x40] sm:$0xff]  ;;  %v232_v44 = vld [vmem:[%s709_s11 + $0x48] sm:$0xff]  ;;  %v233_v45 = vld [vmem:[%s709_s11 + $0x50] sm:$0xff] }
  0x1a   : > { %v252_v12 = vrot.slane %v239_v2, %v251_v6  ;;  %v256_v13 = vrot.slane %v239_v2, %v255_v7  ;;  %v290_v14 = vrot.slane %v277_v3, %v251_v6  ;;  %v294_v15 = vrot.slane %v277_v3, %v255_v7  ;;  %v234_v46 = vld [vmem:[%s709_s11 + $0x58] sm:$0xff]  ;;  %v235_v51 = vld [vmem:[%s709_s11 + $0x60] sm:$0xff]  ;;  %v236_v52 = vld [vmem:[%s709_s11 + $0x68] sm:$0xff] }
  0x1b   : > { %v257_v17 = vcombine.low %v244_v8, %v248_v9  ;;  %v712_v18 = vcombine.low %v282_v10, %v286_v11  ;;  %v237_v53 = vld [vmem:[%s709_s11 + $0x70] sm:$0xff]  ;;  %v238_v58 = vld [vmem:[%s709_s11 + $0x78] sm:$0xff] }
  0x1c   : > { %v258_v21 = vcombine.low %v252_v12, %v256_v13  ;;  %v716_v22 = vcombine.low %v290_v14, %v294_v15 }
  0x1d   : > { %v261_v26 = vmul.f32 %v257_v17, %v223_v16  ;;  %v263_v27 = vmul.f32 %v257_v17, %v225_v20  ;;  %v265_v28 = vmul.f32 %v257_v17, %v227_v24  ;;  %v267_v34 = vmul.f32 %v257_v17, %v229_v29 }
  0x1e   : > { %v262_v31 = vmul.f32 %v258_v21, %v224_v19  ;;  %v264_v32 = vmul.f32 %v258_v21, %v226_v23  ;;  %v266_v33 = vmul.f32 %v258_v21, %v228_v25  ;;  %v268_v38 = vmul.f32 %v258_v21, %v230_v30 }
  0x1f   : > { %v299_v35 = vadd.f32 %v712_v18, %v261_v26  ;;  %v301_v36 = vadd.f32 %v712_v18, %v263_v27  ;;  %v303_v37 = vadd.f32 %v712_v18, %v265_v28  ;;  %v305_v43 = vadd.f32 %v712_v18, %v267_v34 }
  0x20   : > { %v300_v40 = vadd.f32 %v716_v22, %v262_v31  ;;  %v302_v41 = vadd.f32 %v716_v22, %v264_v32  ;;  %v304_v42 = vadd.f32 %v716_v22, %v266_v33  ;;  %v306_v50 = vadd.f32 %v716_v22, %v268_v38 }
  0x21   : > { %v315_v47 = vmax.f32 %v299_v35, 0.0  ;;  %v317_v48 = vmax.f32 %v301_v36, 0.0  ;;  %v319_v49 = vmax.f32 %v303_v37, 0.0  ;;  %v321_v57 = vmax.f32 %v305_v43, 0.0 }
  0x22   : > { %v316_v54 = vmax.f32 %v300_v40, 0.0  ;;  %v318_v55 = vmax.f32 %v302_v41, 0.0  ;;  %v320_v56 = vmax.f32 %v304_v42, 0.0  ;;  %v322_v59 = vmax.f32 %v306_v50, 0.0 }
  0x23   : > { %331 = vst [vmem:[%s742_s21] sm:$0xff] %v315_v47  ;;  %333 = vst [vmem:[%s742_s21 + $0x10] sm:$0xff] %v317_v48  ;;  %v269_v60 = vmul.f32 %v257_v17, %v231_v39  ;;  %v270_v61 = vmul.f32 %v258_v21, %v232_v44  ;;  %v271_v62 = vmul.f32 %v257_v17, %v233_v45 }
  0x24   : > { %335 = vst [vmem:[%s742_s21 + $0x20] sm:$0xff] %v319_v49  ;;  %332 = vst [vmem:[%s742_s21 + $0x8] sm:$0xff] %v316_v54  ;;  %v272_v63 = vmul.f32 %v258_v21, %v234_v46  ;;  %v273_v0 = vmul.f32 %v257_v17, %v235_v51  ;;  %v274_v1 = vmul.f32 %v258_v21, %v236_v52 }
  0x25   : > { %334 = vst [vmem:[%s742_s21 + $0x18] sm:$0xff] %v318_v55  ;;  %336 = vst [vmem:[%s742_s21 + $0x28] sm:$0xff] %v320_v56  ;;  %v275_v2 = vmul.f32 %v257_v17, %v237_v53  ;;  %v307_v3 = vadd.f32 %v712_v18, %v269_v60  ;;  %v308_v4 = vadd.f32 %v716_v22, %v270_v61 }
  0x26   : > { %337 = vst [vmem:[%s742_s21 + $0x30] sm:$0xff] %v321_v57  ;;  %338 = vst [vmem:[%s742_s21 + $0x38] sm:$0xff] %v322_v59  ;;  %v309_v5 = vadd.f32 %v712_v18, %v271_v62  ;;  %v276_v6 = vmul.f32 %v258_v21, %v238_v58  ;;  %v310_v7 = vadd.f32 %v716_v22, %v272_v63 }
  0x27   : > { %v311_v8 = vadd.f32 %v712_v18, %v273_v0  ;;  %v312_v9 = vadd.f32 %v716_v22, %v274_v1  ;;  %v313_v10 = vadd.f32 %v712_v18, %v275_v2  ;;  %v323_v11 = vmax.f32 %v307_v3, 0.0 }
  0x28   : > { %v324_v12 = vmax.f32 %v308_v4, 0.0  ;;  %v325_v13 = vmax.f32 %v309_v5, 0.0  ;;  %v314_v14 = vadd.f32 %v716_v22, %v276_v6  ;;  %v326_v15 = vmax.f32 %v310_v7, 0.0 }
  0x29   : > { %v327_v16 = vmax.f32 %v311_v8, 0.0  ;;  %v328_v17 = vmax.f32 %v312_v9, 0.0  ;;  %v329_v19 = vmax.f32 %v313_v10, 0.0  ;;  %339 = vst [vmem:[%s742_s21 + $0x40] sm:$0xff] %v323_v11  ;;  %353 = sbr.rel (!%p684_p5) target bundleno = 54 (0x36), region = 36 }
  0x2a   : > { %340 = vst [vmem:[%s742_s21 + $0x48] sm:$0xff] %v324_v12  ;;  %341 = vst [vmem:[%s742_s21 + $0x50] sm:$0xff] %v325_v13  ;;  %v330_v20 = vmax.f32 %v314_v14, 0.0  ;;  %v374_v18 = vld [vmem:[%s742_s21] sm:$0xff] (%p684_p5)  ;;  %v378_v22 = vld [vmem:[%s742_s21 + $0x10] sm:$0xff] (%p684_p5) }
  0x2b   : > { %342 = vst [vmem:[%s742_s21 + $0x58] sm:$0xff] %v326_v15  ;;  %343 = vst [vmem:[%s742_s21 + $0x60] sm:$0xff] %v327_v16  ;;  %v376_v21 = vld [vmem:[%s742_s21 + $0x8] sm:$0xff] (%p684_p5)  ;;  %v382_v24 = vld [vmem:[%s742_s21 + $0x20] sm:$0xff] (%p684_p5) }
  0x2c   : > { %344 = vst [vmem:[%s742_s21 + $0x68] sm:$0xff] %v328_v17  ;;  %345 = vst [vmem:[%s742_s21 + $0x70] sm:$0xff] %v329_v19  ;;  %v380_v23 = vld [vmem:[%s742_s21 + $0x18] sm:$0xff] (%p684_p5)  ;;  %v384_v25 = vld [vmem:[%s742_s21 + $0x28] sm:$0xff] (%p684_p5) }
  0x2d   : > { %346 = vst [vmem:[%s742_s21 + $0x78] sm:$0xff] %v330_v20  ;;  %v386_v26 = vld [vmem:[%s742_s21 + $0x30] sm:$0xff] (%p684_p5)  ;;  %v388_v27 = vld [vmem:[%s742_s21 + $0x38] sm:$0xff] (%p684_p5)  ;;  %375 = vst [vmem:[%s361_s29] sm:$0xff] (%p684_p5), %v374_v18 }
  0x2e   : > { %377 = vst [vmem:[%s361_s29 + $0x8] sm:$0xff] %v376_v21  ;;  %379 = vst [vmem:[%s361_s29 + $0x40] sm:$0xff] %v378_v22 }
  0x2f   : > { %381 = vst [vmem:[%s361_s29 + $0x48] sm:$0xff] %v380_v23  ;;  %383 = vst [vmem:[%s361_s29 + $0x80] sm:$0xff] %v382_v24 }
  0x30   : > { %v390_v28 = vld [vmem:[%s742_s21 + $0x40] sm:$0xff]  ;;  %385 = vst [vmem:[%s361_s29 + $0x88] sm:$0xff] %v384_v25  ;;  %387 = vst [vmem:[%s361_s29 + $0xc0] sm:$0xff] %v386_v26 }
  0x31   : > { %v392_v29 = vld [vmem:[%s742_s21 + $0x48] sm:$0xff]  ;;  %v394_v30 = vld [vmem:[%s742_s21 + $0x50] sm:$0xff]  ;;  %389 = vst [vmem:[%s361_s29 + $0xc8] sm:$0xff] %v388_v27  ;;  %391 = vst [vmem:[%s361_s29 + $0x100] sm:$0xff] %v390_v28 }
  0x32   : > { %v396_v31 = vld [vmem:[%s742_s21 + $0x58] sm:$0xff]  ;;  %393 = vst [vmem:[%s361_s29 + $0x108] sm:$0xff] %v392_v29  ;;  %395 = vst [vmem:[%s361_s29 + $0x140] sm:$0xff] %v394_v30  ;;  %v398_v32 = vld [vmem:[%s742_s21 + $0x60] sm:$0xff] }
  0x33   : > { %397 = vst [vmem:[%s361_s29 + $0x148] sm:$0xff] %v396_v31  ;;  %v400_v33 = vld [vmem:[%s742_s21 + $0x68] sm:$0xff]  ;;  %v402_v34 = vld [vmem:[%s742_s21 + $0x70] sm:$0xff]  ;;  %399 = vst [vmem:[%s361_s29 + $0x180] sm:$0xff] %v398_v32 }
  0x34   : > { %401 = vst [vmem:[%s361_s29 + $0x188] sm:$0xff] %v400_v33  ;;  %403 = vst [vmem:[%s361_s29 + $0x1c0] sm:$0xff] %v402_v34  ;;  %v404_v35 = vld [vmem:[%s742_s21 + $0x78] sm:$0xff] }
  0x35   : > { %405 = vst [vmem:[%s361_s29 + $0x1c8] sm:$0xff] %v404_v35 }
  0x36 PF: > { %s13_s18 = sadd.s32 1, %s616_s18   ;;  %s817_s12 = smov %s596_s13 }
  0x37   : > { %p10_p10 = scmp.ge.s32.totalorder %s13_s18, 6   ;;  %s818_s13 = smov %s695_s27 }
  0x38   : > { %s819_s14 = smov %s608_s16  ;;  %s820_s15 = smov %s612_s17 }
  0x39   : > { %s821_s16 = smov %s824_s19  ;;  %s822_s17 = smov %s828_s20 }
  0x3a   :  { %12 = sbr.rel (!%p10_p10) target bundleno = 4 (0x4), region = 85 }

// kernel: pp2p_forward.13
= control target key start
LH: loop header
LB: loop body
LE: loop exit
PB: predicated region body
PF: predicated region fallthrough
CT: control target
= control target key end

     0   :  { %s1681_s12 = smov 0   ;;  %s1683_s13 = smov 0   ;;  %s2180_s0 = inlined_call_operand.vmem [shape: f32[4,128,2048], index: 0, kind: input, shape index: {}]   ;;  %s2181_s1 = inlined_call_operand.vmem [shape: f32[4,2048,256], index: 1, kind: input, shape index: {}]   ;;  %s2182_s2 = inlined_call_operand.vmem [shape: f32[4,128,256], index: 2, kind: output, shape index: {0}]   ;;  %s2183_s3 = inlined_call_operand.vmem [shape: f32[4,1,2,256], index: 3, kind: output, shape index: {1}]  }
   0x1   :  { %s1685_s14 = smov 0   ;;  %s1687_s15 = smov 0  }
   0x2   :  { %s1689_s16 = smov 0   ;;  %s1691_s17 = smov 0  }
   0x3   :  { %s1693_s18 = smov 0  }
   0x4 LB: > { %s29_s19 = sadd.s32 1, %s1650_s16  ;;  %s40_s20 = sadd.s32 1, %s1654_s17  ;;  %s1658_s18 = sphi %s1693_s18, %s14_s18   ;;  %s1654_s17 = sphi %s1691_s17, %s2189_s17   ;;  %s1650_s16 = sphi %s1689_s16, %s2188_s16   ;;  %s1646_s15 = sphi %s1687_s15, %s2187_s15   ;;  %s1642_s14 = sphi %s1685_s14, %s2186_s14   ;;  %s1638_s13 = sphi %s1683_s13, %s2185_s13   ;;  %s1634_s12 = sphi %s1681_s12, %s2184_s12  }
   0x5   : > { %p30_p0 = scmp.ge.s32.totalorder %s29_s19, 4  ;;  %p58_p1 = scmp.ne.s32.totalorder %s1638_s13, %s1634_s12 }
   0x6   : > { %p59_p2 = scmp.eq.s32.totalorder %s1658_s18, 0  ;;  %s51_s24 = sadd.s32 1, %s1638_s13 }
   0x7   : > { %s2191_s19 = smov (%p30_p0, %s29_s19), 0  ;;  %s2193_s20 = smov (!%p30_p0, %s40_s20), %s1654_s17 }
   0x8   : > { %p60_p3 = por %p59_p2, %p58_p1  ;;  %p42_p4 = scmp.ge.s32.totalorder %s2193_s20, 4 }
   0x9   : > { %s47_s21 = ssub.s32 %s1650_s16, %s2191_s19  ;;  %p1525_p6 = scmp.ge.s32.totalorder %s1658_s18, 16 }
   0xa   : > { %s2195_s20 = smov (%p42_p4, %s2193_s20), 0 }
   0xb   : > { %s44_s22 = ssub.s32 %s1654_s17, %s2195_s20  ;;  %174 = sbr.rel (%p1525_p6) target bundleno = 55 (0x37), region = 16 }
   0xc   : > { %s48_s23 = sor.u32 %s47_s21, %s44_s22 }
   0xd   : > { %p49_p5 = scmp.eq.s32.totalorder %s48_s23, 0 }
   0xf   : > { %s1732_s25 = scalar_select %p49_p5, %s1638_s13, %s51_s24  }
  0x10   : > { %177 = sbr.rel (!%p60_p3) target bundleno = 55 (0x37), region = 20  ;;  %s179_s26 = sand.u32 (%p60_p3), 1, %s1638_s13  }
  0x11   : > { %s1527_s27 = sshll.u32 (%p60_p3), %s1650_s16, 2  ;;  %s1526_s28 = sshll.u32 (%p60_p3), %s179_s26, 9 }
  0x12   : > { %s1528_s29 = sshll.u32 (%p60_p3), %s1654_s17, 8  ;;  %s1746_s8 = scalar_lea.vmem (%p60_p3), [#allocation3], %s1526_s28 }
  0x13   : > { %s187_s30 = sadd.s32 (%p60_p3), %s1528_s29, %s1527_s27 }
  0x14   : > { %s1529_s4 = sshll.u32 (%p60_p3), %s187_s30, 3 }
  0x15   : > { %s1741_s7 = scalar_lea.vmem %s2180_s0, %s1529_s4 }
  0x16   : > { %v202_v0 = vld [vmem:[%s1741_s7] sm:$0xff]  ;;  %v204_v1 = vld [vmem:[%s1741_s7 + $0x8] sm:$0xff]  ;;  %v206_v2 = vld [vmem:[%s1741_s7 + $0x10] sm:$0xff] }
  0x17   : > { %203 = vst [vmem:[%s1746_s8] sm:$0xff] %v202_v0  ;;  %205 = vst [vmem:[%s1746_s8 + $0x8] sm:$0xff] %v204_v1  ;;  %v208_v3 = vld [vmem:[%s1741_s7 + $0x18] sm:$0xff]  ;;  %v210_v4 = vld [vmem:[%s1741_s7 + $0x80] sm:$0xff] }
  0x18   : > { %207 = vst [vmem:[%s1746_s8 + $0x10] sm:$0xff] %v206_v2  ;;  %v212_v5 = vld [vmem:[%s1741_s7 + $0x88] sm:$0xff]  ;;  %209 = vst [vmem:[%s1746_s8 + $0x18] sm:$0xff] %v208_v3  ;;  %v214_v6 = vld [vmem:[%s1741_s7 + $0x90] sm:$0xff] }
  0x19   : > { %211 = vst [vmem:[%s1746_s8 + $0x20] sm:$0xff] %v210_v4  ;;  %213 = vst [vmem:[%s1746_s8 + $0x28] sm:$0xff] %v212_v5  ;;  %v216_v7 = vld [vmem:[%s1741_s7 + $0x98] sm:$0xff]  ;;  %v218_v8 = vld [vmem:[%s1741_s7 + $0x100] sm:$0xff] }
  0x1a   : > { %215 = vst [vmem:[%s1746_s8 + $0x30] sm:$0xff] %v214_v6  ;;  %217 = vst [vmem:[%s1746_s8 + $0x38] sm:$0xff] %v216_v7  ;;  %v220_v9 = vld [vmem:[%s1741_s7 + $0x108] sm:$0xff]  ;;  %v222_v10 = vld [vmem:[%s1741_s7 + $0x110] sm:$0xff] }
  0x1b   : > { %219 = vst [vmem:[%s1746_s8 + $0x40] sm:$0xff] %v218_v8  ;;  %v224_v11 = vld [vmem:[%s1741_s7 + $0x118] sm:$0xff]  ;;  %221 = vst [vmem:[%s1746_s8 + $0x48] sm:$0xff] %v220_v9  ;;  %v226_v12 = vld [vmem:[%s1741_s7 + $0x180] sm:$0xff] }
  0x1c   : > { %223 = vst [vmem:[%s1746_s8 + $0x50] sm:$0xff] %v222_v10  ;;  %225 = vst [vmem:[%s1746_s8 + $0x58] sm:$0xff] %v224_v11  ;;  %v228_v13 = vld [vmem:[%s1741_s7 + $0x188] sm:$0xff]  ;;  %v230_v14 = vld [vmem:[%s1741_s7 + $0x190] sm:$0xff] }
  0x1d   : > { %227 = vst [vmem:[%s1746_s8 + $0x60] sm:$0xff] %v226_v12  ;;  %229 = vst [vmem:[%s1746_s8 + $0x68] sm:$0xff] %v228_v13  ;;  %v232_v15 = vld [vmem:[%s1741_s7 + $0x198] sm:$0xff]  ;;  %v234_v16 = vld [vmem:[%s1741_s7 + $0x200] sm:$0xff] }
  0x1e   : > { %231 = vst [vmem:[%s1746_s8 + $0x70] sm:$0xff] %v230_v14  ;;  %v236_v17 = vld [vmem:[%s1741_s7 + $0x208] sm:$0xff]  ;;  %233 = vst [vmem:[%s1746_s8 + $0x78] sm:$0xff] %v232_v15  ;;  %v238_v18 = vld [vmem:[%s1741_s7 + $0x210] sm:$0xff] }
  0x1f   : > { %235 = vst [vmem:[%s1746_s8 + $0x80] sm:$0xff] %v234_v16  ;;  %237 = vst [vmem:[%s1746_s8 + $0x88] sm:$0xff] %v236_v17  ;;  %v240_v19 = vld [vmem:[%s1741_s7 + $0x218] sm:$0xff]  ;;  %v242_v20 = vld [vmem:[%s1741_s7 + $0x280] sm:$0xff] }
  0x20   : > { %239 = vst [vmem:[%s1746_s8 + $0x90] sm:$0xff] %v238_v18  ;;  %241 = vst [vmem:[%s1746_s8 + $0x98] sm:$0xff] %v240_v19  ;;  %v244_v21 = vld [vmem:[%s1741_s7 + $0x288] sm:$0xff]  ;;  %v246_v22 = vld [vmem:[%s1741_s7 + $0x290] sm:$0xff] }
  0x21   : > { %243 = vst [vmem:[%s1746_s8 + $0xa0] sm:$0xff] %v242_v20  ;;  %v248_v23 = vld [vmem:[%s1741_s7 + $0x298] sm:$0xff]  ;;  %245 = vst [vmem:[%s1746_s8 + $0xa8] sm:$0xff] %v244_v21  ;;  %v250_v24 = vld [vmem:[%s1741_s7 + $0x300] sm:$0xff] }
  0x22   : > { %247 = vst [vmem:[%s1746_s8 + $0xb0] sm:$0xff] %v246_v22  ;;  %249 = vst [vmem:[%s1746_s8 + $0xb8] sm:$0xff] %v248_v23  ;;  %v252_v25 = vld [vmem:[%s1741_s7 + $0x308] sm:$0xff]  ;;  %v254_v26 = vld [vmem:[%s1741_s7 + $0x310] sm:$0xff] }
  0x23   : > { %251 = vst [vmem:[%s1746_s8 + $0xc0] sm:$0xff] %v250_v24  ;;  %253 = vst [vmem:[%s1746_s8 + $0xc8] sm:$0xff] %v252_v25  ;;  %v256_v27 = vld [vmem:[%s1741_s7 + $0x318] sm:$0xff]  ;;  %v258_v28 = vld [vmem:[%s1741_s7 + $0x380] sm:$0xff] }
  0x24   : > { %255 = vst [vmem:[%s1746_s8 + $0xd0] sm:$0xff] %v254_v26  ;;  %v260_v29 = vld [vmem:[%s1741_s7 + $0x388] sm:$0xff]  ;;  %257 = vst [vmem:[%s1746_s8 + $0xd8] sm:$0xff] %v256_v27  ;;  %v262_v30 = vld [vmem:[%s1741_s7 + $0x390] sm:$0xff] }
  0x25   : > { %259 = vst [vmem:[%s1746_s8 + $0xe0] sm:$0xff] %v258_v28  ;;  %261 = vst [vmem:[%s1746_s8 + $0xe8] sm:$0xff] %v260_v29  ;;  %v264_v31 = vld [vmem:[%s1741_s7 + $0x398] sm:$0xff]  ;;  %v266_v32 = vld [vmem:[%s1741_s7 + $0x400] sm:$0xff] }
  0x26   : > { %263 = vst [vmem:[%s1746_s8 + $0xf0] sm:$0xff] %v262_v30  ;;  %265 = vst [vmem:[%s1746_s8 + $0xf8] sm:$0xff] %v264_v31  ;;  %v268_v33 = vld [vmem:[%s1741_s7 + $0x408] sm:$0xff]  ;;  %v270_v34 = vld [vmem:[%s1741_s7 + $0x410] sm:$0xff] }
  0x27   : > { %267 = vst [vmem:[%s1746_s8 + $0x100] sm:$0xff] %v266_v32  ;;  %v272_v35 = vld [vmem:[%s1741_s7 + $0x418] sm:$0xff]  ;;  %269 = vst [vmem:[%s1746_s8 + $0x108] sm:$0xff] %v268_v33  ;;  %v274_v36 = vld [vmem:[%s1741_s7 + $0x480] sm:$0xff] }
  0x28   : > { %271 = vst [vmem:[%s1746_s8 + $0x110] sm:$0xff] %v270_v34  ;;  %273 = vst [vmem:[%s1746_s8 + $0x118] sm:$0xff] %v272_v35  ;;  %v276_v37 = vld [vmem:[%s1741_s7 + $0x488] sm:$0xff]  ;;  %v278_v38 = vld [vmem:[%s1741_s7 + $0x490] sm:$0xff] }
  0x29   : > { %275 = vst [vmem:[%s1746_s8 + $0x120] sm:$0xff] %v274_v36  ;;  %277 = vst [vmem:[%s1746_s8 + $0x128] sm:$0xff] %v276_v37  ;;  %v280_v39 = vld [vmem:[%s1741_s7 + $0x498] sm:$0xff]  ;;  %v282_v40 = vld [vmem:[%s1741_s7 + $0x500] sm:$0xff] }
  0x2a   : > { %279 = vst [vmem:[%s1746_s8 + $0x130] sm:$0xff] %v278_v38  ;;  %v284_v41 = vld [vmem:[%s1741_s7 + $0x508] sm:$0xff]  ;;  %281 = vst [vmem:[%s1746_s8 + $0x138] sm:$0xff] %v280_v39  ;;  %v286_v42 = vld [vmem:[%s1741_s7 + $0x510] sm:$0xff] }
  0x2b   : > { %283 = vst [vmem:[%s1746_s8 + $0x140] sm:$0xff] %v282_v40  ;;  %285 = vst [vmem:[%s1746_s8 + $0x148] sm:$0xff] %v284_v41  ;;  %v288_v43 = vld [vmem:[%s1741_s7 + $0x518] sm:$0xff]  ;;  %v290_v44 = vld [vmem:[%s1741_s7 + $0x580] sm:$0xff] }
  0x2c   : > { %287 = vst [vmem:[%s1746_s8 + $0x150] sm:$0xff] %v286_v42  ;;  %289 = vst [vmem:[%s1746_s8 + $0x158] sm:$0xff] %v288_v43  ;;  %v292_v45 = vld [vmem:[%s1741_s7 + $0x588] sm:$0xff]  ;;  %v294_v46 = vld [vmem:[%s1741_s7 + $0x590] sm:$0xff] }
  0x2d   : > { %291 = vst [vmem:[%s1746_s8 + $0x160] sm:$0xff] %v290_v44  ;;  %v296_v47 = vld [vmem:[%s1741_s7 + $0x598] sm:$0xff]  ;;  %293 = vst [vmem:[%s1746_s8 + $0x168] sm:$0xff] %v292_v45  ;;  %v298_v48 = vld [vmem:[%s1741_s7 + $0x600] sm:$0xff] }
  0x2e   : > { %295 = vst [vmem:[%s1746_s8 + $0x170] sm:$0xff] %v294_v46  ;;  %297 = vst [vmem:[%s1746_s8 + $0x178] sm:$0xff] %v296_v47  ;;  %v300_v49 = vld [vmem:[%s1741_s7 + $0x608] sm:$0xff]  ;;  %v302_v50 = vld [vmem:[%s1741_s7 + $0x610] sm:$0xff] }
  0x2f   : > { %299 = vst [vmem:[%s1746_s8 + $0x180] sm:$0xff] %v298_v48  ;;  %301 = vst [vmem:[%s1746_s8 + $0x188] sm:$0xff] %v300_v49  ;;  %v304_v51 = vld [vmem:[%s1741_s7 + $0x618] sm:$0xff]  ;;  %v306_v52 = vld [vmem:[%s1741_s7 + $0x680] sm:$0xff] }
  0x30   : > { %303 = vst [vmem:[%s1746_s8 + $0x190] sm:$0xff] %v302_v50  ;;  %v308_v53 = vld [vmem:[%s1741_s7 + $0x688] sm:$0xff]  ;;  %305 = vst [vmem:[%s1746_s8 + $0x198] sm:$0xff] %v304_v51  ;;  %v310_v54 = vld [vmem:[%s1741_s7 + $0x690] sm:$0xff] }
  0x31   : > { %307 = vst [vmem:[%s1746_s8 + $0x1a0] sm:$0xff] %v306_v52  ;;  %309 = vst [vmem:[%s1746_s8 + $0x1a8] sm:$0xff] %v308_v53  ;;  %v312_v55 = vld [vmem:[%s1741_s7 + $0x698] sm:$0xff]  ;;  %v314_v56 = vld [vmem:[%s1741_s7 + $0x700] sm:$0xff] }
  0x32   : > { %311 = vst [vmem:[%s1746_s8 + $0x1b0] sm:$0xff] %v310_v54  ;;  %313 = vst [vmem:[%s1746_s8 + $0x1b8] sm:$0xff] %v312_v55  ;;  %v316_v57 = vld [vmem:[%s1741_s7 + $0x708] sm:$0xff]  ;;  %v318_v58 = vld [vmem:[%s1741_s7 + $0x710] sm:$0xff] }
  0x33   : > { %315 = vst [vmem:[%s1746_s8 + $0x1c0] sm:$0xff] %v314_v56  ;;  %v320_v59 = vld [vmem:[%s1741_s7 + $0x718] sm:$0xff]  ;;  %317 = vst [vmem:[%s1746_s8 + $0x1c8] sm:$0xff] %v316_v57  ;;  %v322_v60 = vld [vmem:[%s1741_s7 + $0x780] sm:$0xff] }
  0x34   : > { %319 = vst [vmem:[%s1746_s8 + $0x1d0] sm:$0xff] %v318_v58  ;;  %321 = vst [vmem:[%s1746_s8 + $0x1d8] sm:$0xff] %v320_v59  ;;  %v324_v61 = vld [vmem:[%s1741_s7 + $0x788] sm:$0xff]  ;;  %v326_v62 = vld [vmem:[%s1741_s7 + $0x790] sm:$0xff] }
  0x35   : > { %323 = vst [vmem:[%s1746_s8 + $0x1e0] sm:$0xff] %v322_v60  ;;  %325 = vst [vmem:[%s1746_s8 + $0x1e8] sm:$0xff] %v324_v61  ;;  %v328_v63 = vld [vmem:[%s1741_s7 + $0x798] sm:$0xff] }
  0x36   : > { %327 = vst [vmem:[%s1746_s8 + $0x1f0] sm:$0xff] %v326_v62  ;;  %329 = vst [vmem:[%s1746_s8 + $0x1f8] sm:$0xff] %v328_v63 }
  0x37 PF: > { %p1530_p7 = scmp.ge.s32.totalorder %s1658_s18, 1  ;;  %p353_p8 = scmp.lt.s32.totalorder %s1658_s18, 17 }
  0x39   : > { %p354_p9 = pnand %p1530_p7, %p353_p8 }
  0x3a   : > { %s360_s9 = sand.u32 (!%p354_p9), 1, %s1634_s12   ;;  %s1532_s10 = sshll.u32 (!%p354_p9), %s1642_s14, 6 }
  0x3b   : > { %357 = sbr.rel (%p354_p9) target bundleno = 468 (0x1d4), region = 47  ;;  %s1531_s11 = sshll.u32 (!%p354_p9), %s360_s9, 9 }
  0x3c   : > { %p423_p10 = scmp.lt.s32.totalorder (!%p354_p9), %s1646_s15, 3  ;;  %p425_p11 = scmp.lt.s32.totalorder (!%p354_p9), %s1532_s10, 255 }
  0x3d   : > { %s1894_s9 = scalar_lea.vmem (!%p354_p9), [#allocation3], %s1531_s11  ;;  %p1540_p12 = scmp.ne.s32.totalorder (!%p354_p9), %s1642_s14, 0 }
  0x40   : > { %s2197_s15 = smov (!%p423_p10, %s1646_s15), 3  ;;  %s2199_s10 = smov (!%p425_p11, %s1532_s10), 255 }
  0x41   : > { %s1534_s21 = sshll.u32 %s2197_s15, 9  ;;  %s1545_s22 = sshll.u32 %s2197_s15, 8 }
  0x42   : > { %s1533_s23 = sshll.u32 %s2199_s10, 1  ;;  %s1882_s27 = scalar_lea.vmem %s2182_s2, %s1545_s22 }
  0x43   : > { %s432_s28 = sadd.s32 %s1534_s21, %s1533_s23  ;;  %s1546_s29 = sshll.u32 %s2197_s15, 2 }
  0x44   : > { %s1535_s30 = sshll.u32 %s432_s28, 3  ;;  %s1887_s12 = scalar_lea.vmem %s2183_s3, %s1546_s29 }
  0x45   : > { %s1892_s8 = scalar_lea.vmem %s2181_s1, %s1535_s30  ;;  %470 = sbr.rel (%p1540_p12) target bundleno = 91 (0x5b), region = 55 }
  0x4a   : > { %v1660_v0 = vmov 0.0  }
  0x4b   : > { %471 = vst [vmem:[#allocation2 + $0xb0] sm:$0xff] %v1660_v0  ;;  %472 = vst [vmem:[#allocation2] sm:$0xff] %v1660_v0 }
  0x4c   : > { %473 = vst [vmem:[#allocation2 + $0xd8] sm:$0xff] %v1660_v0  ;;  %474 = vst [vmem:[#allocation2 + $0x18] sm:$0xff] %v1660_v0 }
  0x4d   : > { %475 = vst [vmem:[#allocation2 + $0x50] sm:$0xff] %v1660_v0  ;;  %476 = vst [vmem:[#allocation2 + $0x68] sm:$0xff] %v1660_v0 }
  0x4e   : > { %477 = vst [vmem:[#allocation2 + $0x30] sm:$0xff] %v1660_v0  ;;  %478 = vst [vmem:[#allocation2 + $0x48] sm:$0xff] %v1660_v0 }
  0x4f   : > { %479 = vst [vmem:[#allocation2 + $0x80] sm:$0xff] %v1660_v0  ;;  %480 = vst [vmem:[#allocation2 + $0x88] sm:$0xff] %v1660_v0 }
  0x50   : > { %481 = vst [vmem:[#allocation2 + $0xe8] sm:$0xff] %v1660_v0  ;;  %482 = vst [vmem:[#allocation2 + $0xb8] sm:$0xff] %v1660_v0 }
  0x51   : > { %483 = vst [vmem:[#allocation2 + $0x60] sm:$0xff] %v1660_v0  ;;  %484 = vst [vmem:[#allocation2 + $0xf0] sm:$0xff] %v1660_v0 }
  0x52   : > { %485 = vst [vmem:[#allocation2 + $0x8] sm:$0xff] %v1660_v0  ;;  %486 = vst [vmem:[#allocation2 + $0x78] sm:$0xff] %v1660_v0 }
  0x53   : > { %487 = vst [vmem:[#allocation2 + $0x38] sm:$0xff] %v1660_v0  ;;  %488 = vst [vmem:[#allocation2 + $0x58] sm:$0xff] %v1660_v0 }
  0x54   : > { %489 = vst [vmem:[#allocation2 + $0x40] sm:$0xff] %v1660_v0  ;;  %490 = vst [vmem:[#allocation2 + $0xc8] sm:$0xff] %v1660_v0 }
  0x55   : > { %491 = vst [vmem:[#allocation2 + $0xe0] sm:$0xff] %v1660_v0  ;;  %492 = vst [vmem:[#allocation2 + $0x90] sm:$0xff] %v1660_v0 }
  0x56   : > { %493 = vst [vmem:[#allocation2 + $0x70] sm:$0xff] %v1660_v0  ;;  %494 = vst [vmem:[#allocation2 + $0xc0] sm:$0xff] %v1660_v0 }
  0x57   : > { %495 = vst [vmem:[#allocation2 + $0xa8] sm:$0xff] %v1660_v0  ;;  %496 = vst [vmem:[#allocation2 + $0xd0] sm:$0xff] %v1660_v0 }
  0x58   : > { %497 = vst [vmem:[#allocation2 + $0x10] sm:$0xff] %v1660_v0  ;;  %498 = vst [vmem:[#allocation2 + $0x28] sm:$0xff] %v1660_v0 }
  0x59   : > { %499 = vst [vmem:[#allocation2 + $0xa0] sm:$0xff] %v1660_v0  ;;  %500 = vst [vmem:[#allocation2 + $0xf8] sm:$0xff] %v1660_v0 }
  0x5a   : > { %501 = vst [vmem:[#allocation2 + $0x20] sm:$0xff] %v1660_v0  ;;  %502 = vst [vmem:[#allocation2 + $0x98] sm:$0xff] %v1660_v0 }
  0x5b PF: > { %v630_v1 = vld [vmem:[%s1892_s8 + $0xf8] sm:$0xff]  ;;  %v629_v3 = vld [vmem:[%s1892_s8 + $0xf0] sm:$0xff]  ;;  %v628_v5 = vld [vmem:[%s1892_s8 + $0xe8] sm:$0xff]  ;;  %p1541_p13 = scmp.ne.s32.totalorder %s1642_s14, 3 }
  0x5c   : > { %v694_v2 = vld [vmem:[%s1892_s8 + $0x2f8] sm:$0xff]  ;;  %727 = vmatprep.subr.mxu0 %v630_v1  ;;  %v693_v4 = vld [vmem:[%s1892_s8 + $0x2f0] sm:$0xff]  ;;  %v692_v6 = vld [vmem:[%s1892_s8 + $0x2e8] sm:$0xff] }
  0x5d   : > { %888 = vmatprep.subr.mxu1 %v694_v2  ;;  %728 = vmatpush1.msra.mxu0 %v629_v3  ;;  %v627_v7 = vld [vmem:[%s1892_s8 + $0xe0] sm:$0xff]  ;;  %v626_v9 = vld [vmem:[%s1892_s8 + $0xd8] sm:$0xff]  ;;  %v625_v11 = vld [vmem:[%s1892_s8 + $0xd0] sm:$0xff] }
  0x5e   : > { %889 = vmatpush1.msra.mxu1 %v693_v4  ;;  %v691_v8 = vld [vmem:[%s1892_s8 + $0x2e0] sm:$0xff]  ;;  %729 = vmatprep.subr.mxu0 %v628_v5  ;;  %v690_v10 = vld [vmem:[%s1892_s8 + $0x2d8] sm:$0xff]  ;;  %v689_v12 = vld [vmem:[%s1892_s8 + $0x2d0] sm:$0xff] }
  0x5f   : > { %890 = vmatprep.subr.mxu1 %v692_v6  ;;  %730 = vmatpush1.msra.mxu0 %v627_v7  ;;  %v624_v13 = vld [vmem:[%s1892_s8 + $0xc8] sm:$0xff]  ;;  %v623_v15 = vld [vmem:[%s1892_s8 + $0xc0] sm:$0xff]  ;;  %v622_v17 = vld [vmem:[%s1892_s8 + $0xb8] sm:$0xff] }
  0x60   : > { %891 = vmatpush1.msra.mxu1 %v691_v8  ;;  %v688_v14 = vld [vmem:[%s1892_s8 + $0x2c8] sm:$0xff]  ;;  %731 = vmatprep.subr.mxu0 %v626_v9  ;;  %v687_v16 = vld [vmem:[%s1892_s8 + $0x2c0] sm:$0xff]  ;;  %v686_v18 = vld [vmem:[%s1892_s8 + $0x2b8] sm:$0xff] }
  0x61   : > { %892 = vmatprep.subr.mxu1 %v690_v10  ;;  %732 = vmatpush1.msra.mxu0 %v625_v11  ;;  %v621_v19 = vld [vmem:[%s1892_s8 + $0xb0] sm:$0xff]  ;;  %v620_v21 = vld [vmem:[%s1892_s8 + $0xa8] sm:$0xff]  ;;  %v619_v23 = vld [vmem:[%s1892_s8 + $0xa0] sm:$0xff] }
  0x62   : > { %893 = vmatpush1.msra.mxu1 %v689_v12  ;;  %733 = vmatprep.subr.mxu0 %v624_v13  ;;  %v685_v20 = vld [vmem:[%s1892_s8 + $0x2b0] sm:$0xff]  ;;  %v684_v22 = vld [vmem:[%s1892_s8 + $0x2a8] sm:$0xff]  ;;  %v683_v24 = vld [vmem:[%s1892_s8 + $0x2a0] sm:$0xff] }
  0x63   : > { %894 = vmatprep.subr.mxu1 %v688_v14  ;;  %734 = vmatpush1.msra.mxu0 %v623_v15  ;;  %v618_v25 = vld [vmem:[%s1892_s8 + $0x98] sm:$0xff]  ;;  %v617_v27 = vld [vmem:[%s1892_s8 + $0x90] sm:$0xff]  ;;  %v616_v29 = vld [vmem:[%s1892_s8 + $0x88] sm:$0xff] }
  0x64   : > { %895 = vmatpush1.msra.mxu1 %v687_v16  ;;  %735 = vmatprep.subr.mxu0 %v622_v17  ;;  %v682_v26 = vld [vmem:[%s1892_s8 + $0x298] sm:$0xff]  ;;  %v681_v28 = vld [vmem:[%s1892_s8 + $0x290] sm:$0xff]  ;;  %v680_v30 = vld [vmem:[%s1892_s8 + $0x288] sm:$0xff] }
  0x65   : > { %896 = vmatprep.subr.mxu1 %v686_v18  ;;  %736 = vmatpush1.msra.mxu0 %v621_v19  ;;  %v615_v31 = vld [vmem:[%s1892_s8 + $0x80] sm:$0xff]  ;;  %v614_v33 = vld [vmem:[%s1892_s8 + $0x78] sm:$0xff]  ;;  %v613_v35 = vld [vmem:[%s1892_s8 + $0x70] sm:$0xff] }
  0x66   : > { %897 = vmatpush1.msra.mxu1 %v685_v20  ;;  %737 = vmatprep.subr.mxu0 %v620_v21  ;;  %v679_v32 = vld [vmem:[%s1892_s8 + $0x280] sm:$0xff]  ;;  %v678_v34 = vld [vmem:[%s1892_s8 + $0x278] sm:$0xff]  ;;  %v677_v36 = vld [vmem:[%s1892_s8 + $0x270] sm:$0xff] }
  0x67   : > { %898 = vmatprep.subr.mxu1 %v684_v22  ;;  %738 = vmatpush1.msra.mxu0 %v619_v23  ;;  %v612_v37 = vld [vmem:[%s1892_s8 + $0x68] sm:$0xff]  ;;  %v611_v39 = vld [vmem:[%s1892_s8 + $0x60] sm:$0xff]  ;;  %v610_v41 = vld [vmem:[%s1892_s8 + $0x58] sm:$0xff] }
  0x68   : > { %899 = vmatpush1.msra.mxu1 %v683_v24  ;;  %739 = vmatprep.subr.mxu0 %v618_v25  ;;  %v676_v38 = vld [vmem:[%s1892_s8 + $0x268] sm:$0xff]  ;;  %v675_v40 = vld [vmem:[%s1892_s8 + $0x260] sm:$0xff]  ;;  %v674_v42 = vld [vmem:[%s1892_s8 + $0x258] sm:$0xff] }
  0x69   : > { %900 = vmatprep.subr.mxu1 %v682_v26  ;;  %740 = vmatpush1.msra.mxu0 %v617_v27  ;;  %v609_v43 = vld [vmem:[%s1892_s8 + $0x50] sm:$0xff]  ;;  %v608_v45 = vld [vmem:[%s1892_s8 + $0x48] sm:$0xff]  ;;  %v607_v47 = vld [vmem:[%s1892_s8 + $0x40] sm:$0xff] }
  0x6a   : > { %901 = vmatpush1.msra.mxu1 %v681_v28  ;;  %741 = vmatprep.subr.mxu0 %v616_v29  ;;  %v673_v44 = vld [vmem:[%s1892_s8 + $0x250] sm:$0xff]  ;;  %v672_v46 = vld [vmem:[%s1892_s8 + $0x248] sm:$0xff]  ;;  %v671_v48 = vld [vmem:[%s1892_s8 + $0x240] sm:$0xff] }
  0x6b   : > { %902 = vmatprep.subr.mxu1 %v680_v30  ;;  %742 = vmatpush1.msra.mxu0 %v615_v31  ;;  %v606_v49 = vld [vmem:[%s1892_s8 + $0x38] sm:$0xff]  ;;  %v605_v51 = vld [vmem:[%s1892_s8 + $0x30] sm:$0xff]  ;;  %v604_v53 = vld [vmem:[%s1892_s8 + $0x28] sm:$0xff] }
  0x6c   : > { %903 = vmatpush1.msra.mxu1 %v679_v32  ;;  %743 = vmatprep.subr.mxu0 %v614_v33  ;;  %v670_v50 = vld [vmem:[%s1892_s8 + $0x238] sm:$0xff]  ;;  %v669_v52 = vld [vmem:[%s1892_s8 + $0x230] sm:$0xff]  ;;  %v668_v54 = vld [vmem:[%s1892_s8 + $0x228] sm:$0xff] }
  0x6d   : > { %904 = vmatprep.subr.mxu1 %v678_v34  ;;  %744 = vmatpush1.msra.mxu0 %v613_v35  ;;  %v603_v55 = vld [vmem:[%s1892_s8 + $0x20] sm:$0xff]  ;;  %v602_v57 = vld [vmem:[%s1892_s8 + $0x18] sm:$0xff]  ;;  %v601_v59 = vld [vmem:[%s1892_s8 + $0x10] sm:$0xff] }
  0x6e   : > { %905 = vmatpush1.msra.mxu1 %v677_v36  ;;  %745 = vmatprep.subr.mxu0 %v612_v37  ;;  %v667_v56 = vld [vmem:[%s1892_s8 + $0x220] sm:$0xff]  ;;  %v666_v58 = vld [vmem:[%s1892_s8 + $0x218] sm:$0xff]  ;;  %v665_v60 = vld [vmem:[%s1892_s8 + $0x210] sm:$0xff] }
  0x6f   : > { %906 = vmatprep.subr.mxu1 %v676_v38  ;;  %746 = vmatpush1.msra.mxu0 %v611_v39  ;;  %v600_v61 = vld [vmem:[%s1892_s8 + $0x8] sm:$0xff]  ;;  %v599_v63 = vld [vmem:[%s1892_s8] sm:$0xff]  ;;  %v662_v1 = vld [vmem:[%s1892_s8 + $0x1f8] sm:$0xff] }
  0x70   : > { %907 = vmatpush1.msra.mxu1 %v675_v40  ;;  %747 = vmatprep.subr.mxu0 %v610_v41  ;;  %v664_v62 = vld [vmem:[%s1892_s8 + $0x208] sm:$0xff]  ;;  %v663_v0 = vld [vmem:[%s1892_s8 + $0x200] sm:$0xff]  ;;  %v726_v2 = vld [vmem:[%s1892_s8 + $0x3f8] sm:$0xff] }
  0x71   : > { %908 = vmatprep.subr.mxu1 %v674_v42  ;;  %748 = vmatpush1.msra.mxu0 %v609_v43  ;;  %v661_v3 = vld [vmem:[%s1892_s8 + $0x1f0] sm:$0xff]  ;;  %v660_v5 = vld [vmem:[%s1892_s8 + $0x1e8] sm:$0xff]  ;;  %v659_v7 = vld [vmem:[%s1892_s8 + $0x1e0] sm:$0xff] }
  0x72   : > { %909 = vmatpush1.msra.mxu1 %v673_v44  ;;  %749 = vmatprep.subr.mxu0 %v608_v45  ;;  %v725_v4 = vld [vmem:[%s1892_s8 + $0x3f0] sm:$0xff]  ;;  %v724_v6 = vld [vmem:[%s1892_s8 + $0x3e8] sm:$0xff]  ;;  %v723_v8 = vld [vmem:[%s1892_s8 + $0x3e0] sm:$0xff] }
  0x73   : > { %910 = vmatprep.subr.mxu1 %v672_v46  ;;  %750 = vmatpush1.msra.mxu0 %v607_v47  ;;  %v658_v9 = vld [vmem:[%s1892_s8 + $0x1d8] sm:$0xff]  ;;  %v657_v11 = vld [vmem:[%s1892_s8 + $0x1d0] sm:$0xff]  ;;  %v656_v13 = vld [vmem:[%s1892_s8 + $0x1c8] sm:$0xff] }
  0x74   : > { %911 = vmatpush1.msra.mxu1 %v671_v48  ;;  %751 = vmatprep.subr.mxu0 %v606_v49  ;;  %v722_v10 = vld [vmem:[%s1892_s8 + $0x3d8] sm:$0xff]  ;;  %v721_v12 = vld [vmem:[%s1892_s8 + $0x3d0] sm:$0xff]  ;;  %v720_v14 = vld [vmem:[%s1892_s8 + $0x3c8] sm:$0xff] }
  0x75   : > { %912 = vmatprep.subr.mxu1 %v670_v50  ;;  %752 = vmatpush1.msra.mxu0 %v605_v51  ;;  %v655_v15 = vld [vmem:[%s1892_s8 + $0x1c0] sm:$0xff]  ;;  %v654_v17 = vld [vmem:[%s1892_s8 + $0x1b8] sm:$0xff]  ;;  %v653_v19 = vld [vmem:[%s1892_s8 + $0x1b0] sm:$0xff] }
  0x76   : > { %913 = vmatpush1.msra.mxu1 %v669_v52  ;;  %753 = vmatprep.subr.mxu0 %v604_v53  ;;  %v719_v16 = vld [vmem:[%s1892_s8 + $0x3c0] sm:$0xff]  ;;  %v718_v18 = vld [vmem:[%s1892_s8 + $0x3b8] sm:$0xff]  ;;  %v717_v20 = vld [vmem:[%s1892_s8 + $0x3b0] sm:$0xff] }
  0x77   : > { %914 = vmatprep.subr.mxu1 %v668_v54  ;;  %754 = vmatpush1.msra.mxu0 %v603_v55  ;;  %v652_v21 = vld [vmem:[%s1892_s8 + $0x1a8] sm:$0xff]  ;;  %v651_v23 = vld [vmem:[%s1892_s8 + $0x1a0] sm:$0xff]  ;;  %v650_v25 = vld [vmem:[%s1892_s8 + $0x198] sm:$0xff] }
  0x78   : > { %915 = vmatpush1.msra.mxu1 %v667_v56  ;;  %755 = vmatprep.subr.mxu0 %v602_v57  ;;  %v716_v22 = vld [vmem:[%s1892_s8 + $0x3a8] sm:$0xff]  ;;  %v715_v24 = vld [vmem:[%s1892_s8 + $0x3a0] sm:$0xff]  ;;  %v714_v26 = vld [vmem:[%s1892_s8 + $0x398] sm:$0xff] }
  0x79   : > { %916 = vmatprep.subr.mxu1 %v666_v58  ;;  %756 = vmatpush1.msra.mxu0 %v601_v59  ;;  %v649_v27 = vld [vmem:[%s1892_s8 + $0x190] sm:$0xff]  ;;  %v648_v29 = vld [vmem:[%s1892_s8 + $0x188] sm:$0xff]  ;;  %v647_v31 = vld [vmem:[%s1892_s8 + $0x180] sm:$0xff] }
  0x7a   : > { %917 = vmatpush1.msra.mxu1 %v665_v60  ;;  %757 = vmatprep.subr.mxu0 %v600_v61  ;;  %v713_v28 = vld [vmem:[%s1892_s8 + $0x390] sm:$0xff]  ;;  %v712_v30 = vld [vmem:[%s1892_s8 + $0x388] sm:$0xff]  ;;  %v711_v32 = vld [vmem:[%s1892_s8 + $0x380] sm:$0xff] }
  0x7b   : > { %918 = vmatprep.subr.mxu1 %v664_v62  ;;  %758 = vmatpush1.msra.mxu0 %v599_v63  ;;  %v646_v33 = vld [vmem:[%s1892_s8 + $0x178] sm:$0xff]  ;;  %v645_v35 = vld [vmem:[%s1892_s8 + $0x170] sm:$0xff]  ;;  %v644_v37 = vld [vmem:[%s1892_s8 + $0x168] sm:$0xff] }
  0x7c   : > { %919 = vmatpush1.msra.mxu1 %v663_v0  ;;  %759 = vmatprep.subr.mxu0 %v662_v1  ;;  %v710_v34 = vld [vmem:[%s1892_s8 + $0x378] sm:$0xff]  ;;  %v709_v36 = vld [vmem:[%s1892_s8 + $0x370] sm:$0xff]  ;;  %v708_v38 = vld [vmem:[%s1892_s8 + $0x368] sm:$0xff] }
  0x7d   : > { %920 = vmatprep.subr.mxu1 %v726_v2  ;;  %760 = vmatpush2.msra.mxu0 %v661_v3  ;;  %v643_v39 = vld [vmem:[%s1892_s8 + $0x160] sm:$0xff]  ;;  %v642_v41 = vld [vmem:[%s1892_s8 + $0x158] sm:$0xff]  ;;  %v641_v43 = vld [vmem:[%s1892_s8 + $0x150] sm:$0xff] }
  0x7e   : > { %921 = vmatpush2.msra.mxu1 %v725_v4  ;;  %761 = vmatprep.subr.mxu0 %v660_v5  ;;  %v707_v40 = vld [vmem:[%s1892_s8 + $0x360] sm:$0xff]  ;;  %v706_v42 = vld [vmem:[%s1892_s8 + $0x358] sm:$0xff]  ;;  %v705_v44 = vld [vmem:[%s1892_s8 + $0x350] sm:$0xff] }
  0x7f   : > { %922 = vmatprep.subr.mxu1 %v724_v6  ;;  %762 = vmatpush2.msra.mxu0 %v659_v7  ;;  %v640_v45 = vld [vmem:[%s1892_s8 + $0x148] sm:$0xff]  ;;  %v639_v47 = vld [vmem:[%s1892_s8 + $0x140] sm:$0xff]  ;;  %v638_v49 = vld [vmem:[%s1892_s8 + $0x138] sm:$0xff] }
  0x80   : > { %923 = vmatpush2.msra.mxu1 %v723_v8  ;;  %763 = vmatprep.subr.mxu0 %v658_v9  ;;  %v704_v46 = vld [vmem:[%s1892_s8 + $0x348] sm:$0xff]  ;;  %v703_v48 = vld [vmem:[%s1892_s8 + $0x340] sm:$0xff]  ;;  %v702_v50 = vld [vmem:[%s1892_s8 + $0x338] sm:$0xff] }
  0x81   : > { %924 = vmatprep.subr.mxu1 %v722_v10  ;;  %764 = vmatpush2.msra.mxu0 %v657_v11  ;;  %v637_v51 = vld [vmem:[%s1892_s8 + $0x130] sm:$0xff]  ;;  %v636_v53 = vld [vmem:[%s1892_s8 + $0x128] sm:$0xff]  ;;  %v635_v55 = vld [vmem:[%s1892_s8 + $0x120] sm:$0xff] }
  0x82   : > { %925 = vmatpush2.msra.mxu1 %v721_v12  ;;  %765 = vmatprep.subr.mxu0 %v656_v13  ;;  %v701_v52 = vld [vmem:[%s1892_s8 + $0x330] sm:$0xff]  ;;  %v700_v54 = vld [vmem:[%s1892_s8 + $0x328] sm:$0xff]  ;;  %v699_v56 = vld [vmem:[%s1892_s8 + $0x320] sm:$0xff] }
  0x83   : > { %926 = vmatprep.subr.mxu1 %v720_v14  ;;  %766 = vmatpush2.msra.mxu0 %v655_v15  ;;  %v634_v57 = vld [vmem:[%s1892_s8 + $0x118] sm:$0xff]  ;;  %v633_v59 = vld [vmem:[%s1892_s8 + $0x110] sm:$0xff]  ;;  %v632_v61 = vld [vmem:[%s1892_s8 + $0x108] sm:$0xff] }
  0x84   : > { %927 = vmatpush2.msra.mxu1 %v719_v16  ;;  %767 = vmatprep.subr.mxu0 %v654_v17  ;;  %v698_v58 = vld [vmem:[%s1892_s8 + $0x318] sm:$0xff]  ;;  %v697_v60 = vld [vmem:[%s1892_s8 + $0x310] sm:$0xff]  ;;  %v696_v62 = vld [vmem:[%s1892_s8 + $0x308] sm:$0xff] }
  0x85   : > { %928 = vmatprep.subr.mxu1 %v718_v18  ;;  %768 = vmatpush2.msra.mxu0 %v653_v19  ;;  %v631_v63 = vld [vmem:[%s1892_s8 + $0x100] sm:$0xff]  ;;  %v536_v0 = vld [vmem:[%s1894_s9 + $0x8] sm:$0xff]  ;;  %v538_v2 = vld [vmem:[%s1894_s9 + $0x18] sm:$0xff] }
  0x86   : > { %929 = vmatpush2.msra.mxu1 %v717_v20  ;;  %769 = vmatprep.subr.mxu0 %v652_v21  ;;  %v695_v1 = vld [vmem:[%s1892_s8 + $0x300] sm:$0xff]  ;;  %v537_v4 = vld [vmem:[%s1894_s9 + $0x10] sm:$0xff]  ;;  %v540_v5 = vld [vmem:[%s1894_s9 + $0x28] sm:$0xff] }
  0x87   : > { %930 = vmatprep.subr.mxu1 %v716_v22  ;;  %770 = vmatpush2.msra.mxu0 %v651_v23  ;;  %v535_v3 = vld [vmem:[%s1894_s9] sm:$0xff]  ;;  %v542_v6 = vld [vmem:[%s1894_s9 + $0x38] sm:$0xff]  ;;  %v541_v8 = vld [vmem:[%s1894_s9 + $0x30] sm:$0xff] }
  0x88   : > { %931 = vmatpush2.msra.mxu1 %v715_v24  ;;  %771 = vmatprep.subr.mxu0 %v650_v25  ;;  %v539_v7 = vld [vmem:[%s1894_s9 + $0x20] sm:$0xff]  ;;  %v544_v9 = vld [vmem:[%s1894_s9 + $0x48] sm:$0xff]  ;;  %v546_v10 = vld [vmem:[%s1894_s9 + $0x58] sm:$0xff] }
  0x89   : > { %932 = vmatprep.subr.mxu1 %v714_v26  ;;  %772 = vmatpush2.msra.mxu0 %v649_v27  ;;  %v543_v11 = vld [vmem:[%s1894_s9 + $0x40] sm:$0xff]  ;;  %v545_v12 = vld [vmem:[%s1894_s9 + $0x50] sm:$0xff]  ;;  %v548_v13 = vld [vmem:[%s1894_s9 + $0x68] sm:$0xff] }
  0x8a   : > { %933 = vmatpush2.msra.mxu1 %v713_v28  ;;  %773 = vmatprep.subr.mxu0 %v648_v29  ;;  %v550_v14 = vld [vmem:[%s1894_s9 + $0x78] sm:$0xff]  ;;  %v547_v15 = vld [vmem:[%s1894_s9 + $0x60] sm:$0xff]  ;;  %v549_v16 = vld [vmem:[%s1894_s9 + $0x70] sm:$0xff] }
  0x8b   : > { %934 = vmatprep.subr.mxu1 %v712_v30  ;;  %774 = vmatpush2.msra.mxu0 %v647_v31  ;;  %v552_v17 = vld [vmem:[%s1894_s9 + $0x88] sm:$0xff]  ;;  %v554_v18 = vld [vmem:[%s1894_s9 + $0x98] sm:$0xff]  ;;  %v551_v19 = vld [vmem:[%s1894_s9 + $0x80] sm:$0xff] }
  0x8c   : > { %935 = vmatpush2.msra.mxu1 %v711_v32  ;;  %775 = vmatprep.subr.mxu0 %v646_v33  ;;  %v553_v20 = vld [vmem:[%s1894_s9 + $0x90] sm:$0xff]  ;;  %v556_v21 = vld [vmem:[%s1894_s9 + $0xa8] sm:$0xff]  ;;  %v558_v22 = vld [vmem:[%s1894_s9 + $0xb8] sm:$0xff] }
  0x8d   : > { %936 = vmatprep.subr.mxu1 %v710_v34  ;;  %776 = vmatpush2.msra.mxu0 %v645_v35  ;;  %v555_v23 = vld [vmem:[%s1894_s9 + $0xa0] sm:$0xff]  ;;  %v557_v24 = vld [vmem:[%s1894_s9 + $0xb0] sm:$0xff]  ;;  %v560_v25 = vld [vmem:[%s1894_s9 + $0xc8] sm:$0xff] }
  0x8e   : > { %937 = vmatpush2.msra.mxu1 %v709_v36  ;;  %777 = vmatprep.subr.mxu0 %v644_v37  ;;  %v562_v26 = vld [vmem:[%s1894_s9 + $0xd8] sm:$0xff]  ;;  %v559_v27 = vld [vmem:[%s1894_s9 + $0xc0] sm:$0xff]  ;;  %v561_v28 = vld [vmem:[%s1894_s9 + $0xd0] sm:$0xff] }
  0x8f   : > { %938 = vmatprep.subr.mxu1 %v708_v38  ;;  %778 = vmatpush2.msra.mxu0 %v643_v39  ;;  %v564_v29 = vld [vmem:[%s1894_s9 + $0xe8] sm:$0xff]  ;;  %v566_v30 = vld [vmem:[%s1894_s9 + $0xf8] sm:$0xff]  ;;  %v563_v31 = vld [vmem:[%s1894_s9 + $0xe0] sm:$0xff] }
  0x90   : > { %939 = vmatpush2.msra.mxu1 %v707_v40  ;;  %779 = vmatprep.subr.mxu0 %v642_v41  ;;  %v565_v32 = vld [vmem:[%s1894_s9 + $0xf0] sm:$0xff]  ;;  %v568_v33 = vld [vmem:[%s1894_s9 + $0x108] sm:$0xff]  ;;  %v570_v34 = vld [vmem:[%s1894_s9 + $0x118] sm:$0xff] }
  0x91   : > { %940 = vmatprep.subr.mxu1 %v706_v42  ;;  %780 = vmatpush2.msra.mxu0 %v641_v43  ;;  %v567_v35 = vld [vmem:[%s1894_s9 + $0x100] sm:$0xff]  ;;  %v569_v36 = vld [vmem:[%s1894_s9 + $0x110] sm:$0xff]  ;;  %v572_v37 = vld [vmem:[%s1894_s9 + $0x128] sm:$0xff] }
  0x92   : > { %941 = vmatpush2.msra.mxu1 %v705_v44  ;;  %781 = vmatprep.subr.mxu0 %v640_v45  ;;  %v574_v38 = vld [vmem:[%s1894_s9 + $0x138] sm:$0xff]  ;;  %v571_v39 = vld [vmem:[%s1894_s9 + $0x120] sm:$0xff]  ;;  %v573_v40 = vld [vmem:[%s1894_s9 + $0x130] sm:$0xff] }
  0x93   : > { %942 = vmatprep.subr.mxu1 %v704_v46  ;;  %782 = vmatpush2.msra.mxu0 %v639_v47  ;;  %v576_v41 = vld [vmem:[%s1894_s9 + $0x148] sm:$0xff]  ;;  %v578_v42 = vld [vmem:[%s1894_s9 + $0x158] sm:$0xff]  ;;  %v575_v43 = vld [vmem:[%s1894_s9 + $0x140] sm:$0xff] }
  0x94   : > { %943 = vmatpush2.msra.mxu1 %v703_v48  ;;  %783 = vmatprep.subr.mxu0 %v638_v49  ;;  %v577_v44 = vld [vmem:[%s1894_s9 + $0x150] sm:$0xff]  ;;  %v580_v45 = vld [vmem:[%s1894_s9 + $0x168] sm:$0xff]  ;;  %v582_v46 = vld [vmem:[%s1894_s9 + $0x178] sm:$0xff] }
  0x95   : > { %944 = vmatprep.subr.mxu1 %v702_v50  ;;  %784 = vmatpush2.msra.mxu0 %v637_v51  ;;  %v579_v47 = vld [vmem:[%s1894_s9 + $0x160] sm:$0xff]  ;;  %v581_v48 = vld [vmem:[%s1894_s9 + $0x170] sm:$0xff]  ;;  %v584_v49 = vld [vmem:[%s1894_s9 + $0x188] sm:$0xff] }
  0x96   : > { %945 = vmatpush2.msra.mxu1 %v701_v52  ;;  %785 = vmatprep.subr.mxu0 %v636_v53  ;;  %v586_v50 = vld [vmem:[%s1894_s9 + $0x198] sm:$0xff]  ;;  %v583_v51 = vld [vmem:[%s1894_s9 + $0x180] sm:$0xff]  ;;  %v585_v52 = vld [vmem:[%s1894_s9 + $0x190] sm:$0xff] }
  0x97   : > { %946 = vmatprep.subr.mxu1 %v700_v54  ;;  %786 = vmatpush2.msra.mxu0 %v635_v55  ;;  %v588_v53 = vld [vmem:[%s1894_s9 + $0x1a8] sm:$0xff]  ;;  %v590_v54 = vld [vmem:[%s1894_s9 + $0x1b8] sm:$0xff]  ;;  %v587_v55 = vld [vmem:[%s1894_s9 + $0x1a0] sm:$0xff] }
  0x98   : > { %947 = vmatpush2.msra.mxu1 %v699_v56  ;;  %787 = vmatprep.subr.mxu0 %v634_v57  ;;  %v589_v56 = vld [vmem:[%s1894_s9 + $0x1b0] sm:$0xff]  ;;  %v592_v57 = vld [vmem:[%s1894_s9 + $0x1c8] sm:$0xff] }
  0x99   : > { %948 = vmatprep.subr.mxu1 %v698_v58  ;;  %788 = vmatpush2.msra.mxu0 %v633_v59  ;;  %v594_v58 = vld [vmem:[%s1894_s9 + $0x1d8] sm:$0xff]  ;;  %v591_v59 = vld [vmem:[%s1894_s9 + $0x1c0] sm:$0xff] }
  0x9a   : > { %949 = vmatpush2.msra.mxu1 %v697_v60  ;;  %789 = vmatprep.subr.mxu0 %v632_v61  ;;  %v593_v60 = vld [vmem:[%s1894_s9 + $0x1d0] sm:$0xff]  ;;  %v596_v61 = vld [vmem:[%s1894_s9 + $0x1e8] sm:$0xff] }
  0x9b   : > { %950 = vmatprep.subr.mxu1 %v696_v62  ;;  %790 = vmatpush2.msra.mxu0 %v631_v63  ;;  %v598_v62 = vld [vmem:[%s1894_s9 + $0x1f8] sm:$0xff]  ;;  %v595_v63 = vld [vmem:[%s1894_s9 + $0x1e0] sm:$0xff] }
  0x9c   : > { %791 = vmatprep.mubr.f32.mxu0 %v536_v0  ;;  %951 = vmatpush2.msra.mxu1 %v695_v1  ;;  %v597_v0 = vld [vmem:[%s1894_s9 + $0x1f0] sm:$0xff] }
  0x9d   : > { %952 = vmatprep.mubr.f32.mxu1 %v538_v2  ;;  %792 = vmatmul.mubr.f32.vlgmr.msra.gmra.mxu0 %v535_v3  ;;  %v503_v2 = vld [vmem:[#allocation2 + $0xb0] sm:$0xff] }
  0x9e   : > { %953 = vmatmul.mubr.f32.vlgmr.msra.gmra.mxu1 %v537_v4  ;;  %797 = vmatprep.mubr.f32.mxu0 %v540_v5 }
  0x9f   : > { %958 = vmatprep.mubr.f32.mxu1 %v542_v6  ;;  %v504_v6 = vld [vmem:[#allocation2] sm:$0xff] }
  0xa1   : > { %798 = vmatmul.mubr.f32.gmra.mxu0 %v539_v7 }
  0xa2   : > { %959 = vmatmul.mubr.f32.gmra.mxu1 %v541_v8  ;;  %803 = vmatprep.mubr.f32.mxu0 %v544_v9 }
  0xa3   : > { %964 = vmatprep.mubr.f32.mxu1 %v546_v10 }
  0xa5   : > { %804 = vmatmul.mubr.f32.gmra.mxu0 %v543_v11  ;;  %v505_v11 = vld [vmem:[#allocation2 + $0xd8] sm:$0xff] }
  0xa6   : > { %965 = vmatmul.mubr.f32.gmra.mxu1 %v545_v12  ;;  %809 = vmatprep.mubr.f32.mxu0 %v548_v13 }
  0xa7   : > { %970 = vmatprep.mubr.f32.mxu1 %v550_v14 }
  0xa9   : > { %810 = vmatmul.mubr.f32.gmra.mxu0 %v547_v15 }
  0xaa   : > { %971 = vmatmul.mubr.f32.gmra.mxu1 %v549_v16  ;;  %815 = vmatprep.mubr.f32.mxu0 %v552_v17  ;;  %v506_v16 = vld [vmem:[#allocation2 + $0x18] sm:$0xff] }
  0xab   : > { %976 = vmatprep.mubr.f32.mxu1 %v554_v18 }
  0xad   : > { %816 = vmatmul.mubr.f32.gmra.mxu0 %v551_v19 }
  0xae   : > { %977 = vmatmul.mubr.f32.gmra.mxu1 %v553_v20  ;;  %821 = vmatprep.mubr.f32.mxu0 %v556_v21  ;;  %v507_v21 = vld [vmem:[#allocation2 + $0x50] sm:$0xff] }
  0xaf   : > { %982 = vmatprep.mubr.f32.mxu1 %v558_v22 }
  0xb1   : > { %822 = vmatmul.mubr.f32.gmra.mxu0 %v555_v23 }
  0xb2   : > { %983 = vmatmul.mubr.f32.gmra.mxu1 %v557_v24  ;;  %827 = vmatprep.mubr.f32.mxu0 %v560_v25 }
  0xb3   : > { %988 = vmatprep.mubr.f32.mxu1 %v562_v26  ;;  %v508_v26 = vld [vmem:[#allocation2 + $0x68] sm:$0xff] }
  0xb5   : > { %828 = vmatmul.mubr.f32.gmra.mxu0 %v559_v27 }
  0xb6   : > { %989 = vmatmul.mubr.f32.gmra.mxu1 %v561_v28  ;;  %833 = vmatprep.mubr.f32.mxu0 %v564_v29 }
  0xb7   : > { %994 = vmatprep.mubr.f32.mxu1 %v566_v30 }
  0xb9   : > { %834 = vmatmul.mubr.f32.gmra.mxu0 %v563_v31  ;;  %v509_v31 = vld [vmem:[#allocation2 + $0x30] sm:$0xff] }
  0xba   : > { %995 = vmatmul.mubr.f32.gmra.mxu1 %v565_v32  ;;  %839 = vmatprep.mubr.f32.mxu0 %v568_v33 }
  0xbb   : > { %1000 = vmatprep.mubr.f32.mxu1 %v570_v34 }
  0xbd   : > { %840 = vmatmul.mubr.f32.gmra.mxu0 %v567_v35 }
  0xbe   : > { %1001 = vmatmul.mubr.f32.gmra.mxu1 %v569_v36  ;;  %845 = vmatprep.mubr.f32.mxu0 %v572_v37  ;;  %v510_v36 = vld [vmem:[#allocation2 + $0x48] sm:$0xff] }
  0xbf   : > { %1006 = vmatprep.mubr.f32.mxu1 %v574_v38 }
  0xc1   : > { %846 = vmatmul.mubr.f32.gmra.mxu0 %v571_v39 }
  0xc2   : > { %1007 = vmatmul.mubr.f32.gmra.mxu1 %v573_v40  ;;  %851 = vmatprep.mubr.f32.mxu0 %v576_v41  ;;  %v511_v41 = vld [vmem:[#allocation2 + $0x80] sm:$0xff] }
  0xc3   : > { %1012 = vmatprep.mubr.f32.mxu1 %v578_v42 }
  0xc5   : > { %852 = vmatmul.mubr.f32.gmra.mxu0 %v575_v43 }
  0xc6   : > { %1013 = vmatmul.mubr.f32.gmra.mxu1 %v577_v44  ;;  %857 = vmatprep.mubr.f32.mxu0 %v580_v45 }
  0xc7   : > { %1018 = vmatprep.mubr.f32.mxu1 %v582_v46  ;;  %v512_v46 = vld [vmem:[#allocation2 + $0x88] sm:$0xff] }
  0xc9   : > { %858 = vmatmul.mubr.f32.gmra.mxu0 %v579_v47 }
  0xca   : > { %1019 = vmatmul.mubr.f32.gmra.mxu1 %v581_v48  ;;  %863 = vmatprep.mubr.f32.mxu0 %v584_v49 }
  0xcb   : > { %1024 = vmatprep.mubr.f32.mxu1 %v586_v50 }
  0xcd   : > { %864 = vmatmul.mubr.f32.gmra.mxu0 %v583_v51  ;;  %v513_v51 = vld [vmem:[#allocation2 + $0xe8] sm:$0xff] }
  0xce   : > { %1025 = vmatmul.mubr.f32.gmra.mxu1 %v585_v52  ;;  %869 = vmatprep.mubr.f32.mxu0 %v588_v53 }
  0xcf   : > { %1030 = vmatprep.mubr.f32.mxu1 %v590_v54 }
  0xd1   : > { %870 = vmatmul.mubr.f32.gmra.mxu0 %v587_v55 }
  0xd2   : > { %1031 = vmatmul.mubr.f32.gmra.mxu1 %v589_v56  ;;  %875 = vmatprep.mubr.f32.mxu0 %v592_v57  ;;  %v514_v56 = vld [vmem:[#allocation2 + $0xb8] sm:$0xff] }
  0xd3   : > { %1036 = vmatprep.mubr.f32.mxu1 %v594_v58 }
  0xd5   : > { %876 = vmatmul.mubr.f32.gmra.mxu0 %v591_v59 }
  0xd6   : > { %1037 = vmatmul.mubr.f32.gmra.mxu1 %v593_v60  ;;  %881 = vmatprep.mubr.f32.mxu0 %v596_v61  ;;  %v515_v61 = vld [vmem:[#allocation2 + $0x60] sm:$0xff] }
  0xd7   : > { %1042 = vmatprep.mubr.f32.mxu1 %v598_v62 }
  0xd9   : > { %882 = vmatmul.mubr.f32.gmra.mxu0 %v595_v63 }
  0xda   : > { %1043 = vmatmul.mubr.f32.gmra.mxu1 %v597_v0 }
 0x15d   : > { %v793_v1 = vpop.f32.mrf.mxu0 }
 0x15e   : > { %v954_v3 = vpop.f32.mrf.mxu1 }
 0x15f   : > { %v955_v4 = vadd.f32 %v954_v3, %v793_v1  ;;  %v795_v5 = vpop.f32.mrf.mxu0 }
 0x160   : > { %v956_v7 = vpop.f32.mrf.mxu1 }
 0x161   : > { %v1049_v8 = vadd.f32 %v955_v4, %v503_v2  ;;  %v957_v9 = vadd.f32 %v956_v7, %v795_v5  ;;  %v799_v10 = vpop.f32.mrf.mxu0  ;;  %v516_v2 = vld [vmem:[#allocation2 + $0xf0] sm:$0xff]  ;;  %v517_v7 = vld [vmem:[#allocation2 + $0x8] sm:$0xff] }
 0x162   : > { %v960_v12 = vpop.f32.mrf.mxu1 }
 0x163   : > { %1081 = vst [vmem:[#allocation2 + $0xb0] sm:$0xff] %v1049_v8  ;;  %v1050_v13 = vadd.f32 %v957_v9, %v504_v6  ;;  %v961_v14 = vadd.f32 %v960_v12, %v799_v10  ;;  %v801_v15 = vpop.f32.mrf.mxu0  ;;  %v518_v12 = vld [vmem:[#allocation2 + $0x78] sm:$0xff] }
 0x164   : > { %v962_v17 = vpop.f32.mrf.mxu1 }
 0x165   : > { %1082 = vst [vmem:[#allocation2] sm:$0xff] %v1050_v13  ;;  %v1051_v18 = vadd.f32 %v961_v14, %v505_v11  ;;  %v963_v19 = vadd.f32 %v962_v17, %v801_v15  ;;  %v805_v20 = vpop.f32.mrf.mxu0  ;;  %v519_v17 = vld [vmem:[#allocation2 + $0x38] sm:$0xff] }
 0x166   : > { %v966_v22 = vpop.f32.mrf.mxu1 }
 0x167   : > { %1083 = vst [vmem:[#allocation2 + $0xd8] sm:$0xff] %v1051_v18  ;;  %v1052_v23 = vadd.f32 %v963_v19, %v506_v16  ;;  %v967_v24 = vadd.f32 %v966_v22, %v805_v20  ;;  %v807_v25 = vpop.f32.mrf.mxu0  ;;  %v520_v22 = vld [vmem:[#allocation2 + $0x58] sm:$0xff] }
 0x168   : > { %v968_v27 = vpop.f32.mrf.mxu1 }
 0x169   : > { %1084 = vst [vmem:[#allocation2 + $0x18] sm:$0xff] %v1052_v23  ;;  %v1053_v28 = vadd.f32 %v967_v24, %v507_v21  ;;  %v969_v29 = vadd.f32 %v968_v27, %v807_v25  ;;  %v811_v30 = vpop.f32.mrf.mxu0  ;;  %v521_v27 = vld [vmem:[#allocation2 + $0x40] sm:$0xff] }
 0x16a   : > { %v972_v32 = vpop.f32.mrf.mxu1 }
 0x16b   : > { %1085 = vst [vmem:[#allocation2 + $0x50] sm:$0xff] %v1053_v28  ;;  %v1054_v33 = vadd.f32 %v969_v29, %v508_v26  ;;  %v973_v34 = vadd.f32 %v972_v32, %v811_v30  ;;  %v813_v35 = vpop.f32.mrf.mxu0  ;;  %v522_v32 = vld [vmem:[#allocation2 + $0xc8] sm:$0xff] }
 0x16c   : > { %v974_v37 = vpop.f32.mrf.mxu1 }
 0x16d   : > { %1086 = vst [vmem:[#allocation2 + $0x68] sm:$0xff] %v1054_v33  ;;  %v1055_v38 = vadd.f32 %v973_v34, %v509_v31  ;;  %v975_v39 = vadd.f32 %v974_v37, %v813_v35  ;;  %v817_v40 = vpop.f32.mrf.mxu0  ;;  %v523_v37 = vld [vmem:[#allocation2 + $0xe0] sm:$0xff] }
 0x16e   : > { %v978_v42 = vpop.f32.mrf.mxu1 }
 0x16f   : > { %1087 = vst [vmem:[#allocation2 + $0x30] sm:$0xff] %v1055_v38  ;;  %v1056_v43 = vadd.f32 %v975_v39, %v510_v36  ;;  %v979_v44 = vadd.f32 %v978_v42, %v817_v40  ;;  %v819_v45 = vpop.f32.mrf.mxu0  ;;  %v524_v42 = vld [vmem:[#allocation2 + $0x90] sm:$0xff] }
 0x170   : > { %v980_v47 = vpop.f32.mrf.mxu1 }
 0x171   : > { %1088 = vst [vmem:[#allocation2 + $0x48] sm:$0xff] %v1056_v43  ;;  %v1057_v48 = vadd.f32 %v979_v44, %v511_v41  ;;  %v981_v49 = vadd.f32 %v980_v47, %v819_v45  ;;  %v823_v50 = vpop.f32.mrf.mxu0  ;;  %v525_v47 = vld [vmem:[#allocation2 + $0x70] sm:$0xff] }
 0x172   : > { %v984_v52 = vpop.f32.mrf.mxu1 }
 0x173   : > { %1089 = vst [vmem:[#allocation2 + $0x80] sm:$0xff] %v1057_v48  ;;  %v1058_v53 = vadd.f32 %v981_v49, %v512_v46  ;;  %v985_v54 = vadd.f32 %v984_v52, %v823_v50  ;;  %v825_v55 = vpop.f32.mrf.mxu0  ;;  %v526_v52 = vld [vmem:[#allocation2 + $0xc0] sm:$0xff] }
 0x174   : > { %v986_v57 = vpop.f32.mrf.mxu1 }
 0x175   : > { %1090 = vst [vmem:[#allocation2 + $0x88] sm:$0xff] %v1058_v53  ;;  %v1059_v58 = vadd.f32 %v985_v54, %v513_v51  ;;  %v987_v59 = vadd.f32 %v986_v57, %v825_v55  ;;  %v829_v60 = vpop.f32.mrf.mxu0  ;;  %v527_v57 = vld [vmem:[#allocation2 + $0xa8] sm:$0xff] }
 0x176   : > { %v990_v62 = vpop.f32.mrf.mxu1 }
 0x177   : > { %1091 = vst [vmem:[#allocation2 + $0xe8] sm:$0xff] %v1059_v58  ;;  %v1060_v63 = vadd.f32 %v987_v59, %v514_v56  ;;  %v991_v0 = vadd.f32 %v990_v62, %v829_v60  ;;  %v831_v1 = vpop.f32.mrf.mxu0  ;;  %v528_v62 = vld [vmem:[#allocation2 + $0xd0] sm:$0xff] }
 0x178   : > { %v992_v3 = vpop.f32.mrf.mxu1 }
 0x179   : > { %1092 = vst [vmem:[#allocation2 + $0xb8] sm:$0xff] %v1060_v63  ;;  %v1061_v4 = vadd.f32 %v991_v0, %v515_v61  ;;  %v993_v5 = vadd.f32 %v992_v3, %v831_v1  ;;  %v835_v6 = vpop.f32.mrf.mxu0  ;;  %v529_v3 = vld [vmem:[#allocation2 + $0x10] sm:$0xff] }
 0x17a   : > { %v996_v8 = vpop.f32.mrf.mxu1 }
 0x17b   : > { %1093 = vst [vmem:[#allocation2 + $0x60] sm:$0xff] %v1061_v4  ;;  %v1062_v9 = vadd.f32 %v993_v5, %v516_v2  ;;  %v997_v10 = vadd.f32 %v996_v8, %v835_v6  ;;  %v837_v11 = vpop.f32.mrf.mxu0  ;;  %v530_v8 = vld [vmem:[#allocation2 + $0x28] sm:$0xff] }
 0x17c   : > { %v998_v13 = vpop.f32.mrf.mxu1 }
 0x17d   : > { %1094 = vst [vmem:[#allocation2 + $0xf0] sm:$0xff] %v1062_v9  ;;  %v1063_v14 = vadd.f32 %v997_v10, %v517_v7  ;;  %v999_v15 = vadd.f32 %v998_v13, %v837_v11  ;;  %v841_v16 = vpop.f32.mrf.mxu0  ;;  %v531_v13 = vld [vmem:[#allocation2 + $0xa0] sm:$0xff] }
 0x17e   : > { %v1002_v18 = vpop.f32.mrf.mxu1 }
 0x17f   : > { %1095 = vst [vmem:[#allocation2 + $0x8] sm:$0xff] %v1063_v14  ;;  %v1064_v19 = vadd.f32 %v999_v15, %v518_v12  ;;  %v1003_v20 = vadd.f32 %v1002_v18, %v841_v16  ;;  %v843_v21 = vpop.f32.mrf.mxu0  ;;  %v532_v18 = vld [vmem:[#allocation2 + $0xf8] sm:$0xff] }
 0x180   : > { %v1004_v23 = vpop.f32.mrf.mxu1 }
 0x181   : > { %1096 = vst [vmem:[#allocation2 + $0x78] sm:$0xff] %v1064_v19  ;;  %v1065_v24 = vadd.f32 %v1003_v20, %v519_v17  ;;  %v1005_v25 = vadd.f32 %v1004_v23, %v843_v21  ;;  %v847_v26 = vpop.f32.mrf.mxu0  ;;  %v533_v23 = vld [vmem:[#allocation2 + $0x20] sm:$0xff] }
 0x182   : > { %v1008_v28 = vpop.f32.mrf.mxu1 }
 0x183   : > { %1097 = vst [vmem:[#allocation2 + $0x38] sm:$0xff] %v1065_v24  ;;  %v1066_v29 = vadd.f32 %v1005_v25, %v520_v22  ;;  %v1009_v30 = vadd.f32 %v1008_v28, %v847_v26  ;;  %v849_v31 = vpop.f32.mrf.mxu0  ;;  %v534_v28 = vld [vmem:[#allocation2 + $0x98] sm:$0xff] }
 0x184   : > { %v1010_v33 = vpop.f32.mrf.mxu1 }
 0x185   : > { %1098 = vst [vmem:[#allocation2 + $0x58] sm:$0xff] %v1066_v29  ;;  %v1067_v34 = vadd.f32 %v1009_v30, %v521_v27  ;;  %v1011_v35 = vadd.f32 %v1010_v33, %v849_v31  ;;  %v853_v36 = vpop.f32.mrf.mxu0 }
 0x186   : > { %v1014_v38 = vpop.f32.mrf.mxu1 }
 0x187   : > { %1099 = vst [vmem:[#allocation2 + $0x40] sm:$0xff] %v1067_v34  ;;  %v1068_v39 = vadd.f32 %v1011_v35, %v522_v32  ;;  %v1015_v40 = vadd.f32 %v1014_v38, %v853_v36  ;;  %v855_v41 = vpop.f32.mrf.mxu0 }
 0x188   : > { %v1016_v43 = vpop.f32.mrf.mxu1 }
 0x189   : > { %1100 = vst [vmem:[#allocation2 + $0xc8] sm:$0xff] %v1068_v39  ;;  %v1069_v44 = vadd.f32 %v1015_v40, %v523_v37  ;;  %v1017_v45 = vadd.f32 %v1016_v43, %v855_v41  ;;  %v859_v46 = vpop.f32.mrf.mxu0 }
 0x18a   : > { %v1020_v48 = vpop.f32.mrf.mxu1 }
 0x18b   : > { %1101 = vst [vmem:[#allocation2 + $0xe0] sm:$0xff] %v1069_v44  ;;  %v1070_v49 = vadd.f32 %v1017_v45, %v524_v42  ;;  %v1021_v50 = vadd.f32 %v1020_v48, %v859_v46  ;;  %v861_v51 = vpop.f32.mrf.mxu0 }
 0x18c   : > { %v1022_v53 = vpop.f32.mrf.mxu1 }
 0x18d   : > { %1102 = vst [vmem:[#allocation2 + $0x90] sm:$0xff] %v1070_v49  ;;  %v1071_v54 = vadd.f32 %v1021_v50, %v525_v47  ;;  %v1023_v55 = vadd.f32 %v1022_v53, %v861_v51  ;;  %v865_v56 = vpop.f32.mrf.mxu0 }
 0x18e   : > { %v1026_v58 = vpop.f32.mrf.mxu1 }
 0x18f   : > { %1103 = vst [vmem:[#allocation2 + $0x70] sm:$0xff] %v1071_v54  ;;  %v1072_v59 = vadd.f32 %v1023_v55, %v526_v52  ;;  %v1027_v60 = vadd.f32 %v1026_v58, %v865_v56  ;;  %v867_v61 = vpop.f32.mrf.mxu0 }
 0x190   : > { %v1028_v63 = vpop.f32.mrf.mxu1 }
 0x191   : > { %1104 = vst [vmem:[#allocation2 + $0xc0] sm:$0xff] %v1072_v59  ;;  %v1073_v0 = vadd.f32 %v1027_v60, %v527_v57  ;;  %v1029_v1 = vadd.f32 %v1028_v63, %v867_v61  ;;  %v871_v2 = vpop.f32.mrf.mxu0 }
 0x192   : > { %v1032_v4 = vpop.f32.mrf.mxu1 }
 0x193   : > { %1105 = vst [vmem:[#allocation2 + $0xa8] sm:$0xff] %v1073_v0  ;;  %v1074_v5 = vadd.f32 %v1029_v1, %v528_v62  ;;  %v1033_v6 = vadd.f32 %v1032_v4, %v871_v2  ;;  %v873_v7 = vpop.f32.mrf.mxu0 }
 0x194   : > { %v1034_v9 = vpop.f32.mrf.mxu1 }
 0x195   : > { %1106 = vst [vmem:[#allocation2 + $0xd0] sm:$0xff] %v1074_v5  ;;  %v1075_v10 = vadd.f32 %v1033_v6, %v529_v3  ;;  %v1035_v11 = vadd.f32 %v1034_v9, %v873_v7  ;;  %v877_v12 = vpop.f32.mrf.mxu0 }
 0x196   : > { %v1038_v14 = vpop.f32.mrf.mxu1 }
 0x197   : > { %1107 = vst [vmem:[#allocation2 + $0x10] sm:$0xff] %v1075_v10  ;;  %v1076_v15 = vadd.f32 %v1035_v11, %v530_v8  ;;  %v1039_v16 = vadd.f32 %v1038_v14, %v877_v12  ;;  %v879_v17 = vpop.f32.mrf.mxu0 }
 0x198   : > { %v1040_v19 = vpop.f32.mrf.mxu1 }
 0x199   : > { %1108 = vst [vmem:[#allocation2 + $0x28] sm:$0xff] %v1076_v15  ;;  %v1077_v20 = vadd.f32 %v1039_v16, %v531_v13  ;;  %v1041_v21 = vadd.f32 %v1040_v19, %v879_v17  ;;  %v883_v22 = vpop.f32.mrf.mxu0 }
 0x19a   : > { %v1044_v24 = vpop.f32.mrf.mxu1 }
 0x19b   : > { %1109 = vst [vmem:[#allocation2 + $0xa0] sm:$0xff] %v1077_v20  ;;  %v1078_v25 = vadd.f32 %v1041_v21, %v532_v18  ;;  %v1045_v26 = vadd.f32 %v1044_v24, %v883_v22  ;;  %v885_v27 = vpop.f32.mrf.mxu0 }
 0x19c   : > { %v1046_v29 = vpop.f32.mrf.mxu1 }
 0x19d   : > { %1110 = vst [vmem:[#allocation2 + $0xf8] sm:$0xff] %v1078_v25  ;;  %v1079_v30 = vadd.f32 %v1045_v26, %v533_v23  ;;  %v1047_v31 = vadd.f32 %v1046_v29, %v885_v27  ;;  %1116 = sbr.rel (%p1541_p13) target bundleno = 468 (0x1d4), region = 59 }
 0x19f   : > { %1111 = vst [vmem:[#allocation2 + $0x20] sm:$0xff] %v1079_v30  ;;  %v1080_v32 = vadd.f32 %v1047_v31, %v534_v28 }
 0x1a1   : > { %1112 = vst [vmem:[#allocation2 + $0x98] sm:$0xff] %v1080_v32 }
 0x1a2   : > { %v1117_v33 = vld [vmem:[#allocation2 + $0xb0] sm:$0xff]  ;;  %v1118_v34 = vld [vmem:[#allocation2] sm:$0xff]  ;;  %v1119_v35 = vld [vmem:[#allocation2 + $0xd8] sm:$0xff]  ;;  %vm1297_vm0 = vcmask 1040384  }
 0x1a3   : > { %1149 = vst [vmem:[%s1882_s27] sm:$0xff] %v1117_v33  ;;  %v1223_v36 = vmul.f32 %v1117_v33, %v1117_v33  ;;  %1150 = vst [vmem:[%s1882_s27 + $0x8] sm:$0xff] %v1118_v34  ;;  %v1224_v37 = vmul.f32 %v1118_v34, %v1118_v34  ;;  %v1181_v38 = vadd.f32 %v1119_v35, %v1117_v33  ;;  %v1120_v40 = vld [vmem:[#allocation2 + $0x18] sm:$0xff]  ;;  %v1121_v41 = vld [vmem:[#allocation2 + $0x50] sm:$0xff] }
 0x1a4   : > { %1151 = vst [vmem:[%s1882_s27 + $0x10] sm:$0xff] %v1119_v35  ;;  %v1225_v39 = vmul.f32 %v1119_v35, %v1119_v35  ;;  %v1122_v42 = vld [vmem:[#allocation2 + $0x68] sm:$0xff]  ;;  %1152 = vst [vmem:[%s1882_s27 + $0x18] sm:$0xff] %v1120_v40  ;;  %v1202_v43 = vadd.f32 %v1120_v40, %v1118_v34  ;;  %v1226_v44 = vmul.f32 %v1120_v40, %v1120_v40  ;;  %v1123_v47 = vld [vmem:[#allocation2 + $0x30] sm:$0xff] }
 0x1a5   : > { %1153 = vst [vmem:[%s1882_s27 + $0x20] sm:$0xff] %v1121_v41  ;;  %v1227_v45 = vmul.f32 %v1121_v41, %v1121_v41  ;;  %1154 = vst [vmem:[%s1882_s27 + $0x28] sm:$0xff] %v1122_v42  ;;  %v1228_v46 = vmul.f32 %v1122_v42, %v1122_v42  ;;  %v1124_v48 = vld [vmem:[#allocation2 + $0x48] sm:$0xff]  ;;  %v1125_v49 = vld [vmem:[#allocation2 + $0x80] sm:$0xff]  ;;  %v1182_v51 = vadd.f32 %v1181_v38, %v1121_v41 }
 0x1a6   : > { %v1255_v50 = vadd.f32 %v1225_v39, %v1223_v36  ;;  %1155 = vst [vmem:[%s1882_s27 + $0x30] sm:$0xff] %v1123_v47  ;;  %v1229_v52 = vmul.f32 %v1123_v47, %v1123_v47  ;;  %1156 = vst [vmem:[%s1882_s27 + $0x38] sm:$0xff] %v1124_v48  ;;  %v1126_v53 = vld [vmem:[#allocation2 + $0x88] sm:$0xff]  ;;  %v1128_v55 = vld [vmem:[#allocation2 + $0xb8] sm:$0xff]  ;;  %v1276_v56 = vadd.f32 %v1226_v44, %v1224_v37 }
 0x1a7   : > { %1157 = vst [vmem:[%s1882_s27 + $0x40] sm:$0xff] %v1125_v49  ;;  %v1127_v54 = vld [vmem:[#allocation2 + $0xe8] sm:$0xff]  ;;  %v1203_v57 = vadd.f32 %v1202_v43, %v1122_v42  ;;  %v1230_v58 = vmul.f32 %v1124_v48, %v1124_v48  ;;  %1158 = vst [vmem:[%s1882_s27 + $0x48] sm:$0xff] %v1126_v53  ;;  %v1129_v59 = vld [vmem:[#allocation2 + $0x60] sm:$0xff]  ;;  %v1183_v63 = vadd.f32 %v1182_v51, %v1123_v47 }
 0x1a8   : > { %1159 = vst [vmem:[%s1882_s27 + $0x50] sm:$0xff] %v1127_v54  ;;  %1160 = vst [vmem:[%s1882_s27 + $0x58] sm:$0xff] %v1128_v55  ;;  %v1130_v60 = vld [vmem:[#allocation2 + $0xf0] sm:$0xff]  ;;  %v2102_v61 = vld [vmem:[#allocation2 + $0x8] sm:$0xff]  ;;  %v1256_v62 = vadd.f32 %v1255_v50, %v1227_v45  ;;  %v1231_v0 = vmul.f32 %v1125_v49, %v1125_v49  ;;  %v1277_v4 = vadd.f32 %v1276_v56, %v1228_v46 }
 0x1a9   : > { %1161 = vst [vmem:[%s1882_s27 + $0x60] sm:$0xff] %v1129_v59  ;;  %1162 = vst [vmem:[%s1882_s27 + $0x68] sm:$0xff] %v1130_v60  ;;  %v1132_v1 = vld [vmem:[#allocation2 + $0x78] sm:$0xff]  ;;  %v1204_v5 = vadd.f32 %v1203_v57, %v1124_v48  ;;  %v1232_v6 = vmul.f32 %v1126_v53, %v1126_v53  ;;  %v1135_v7 = vld [vmem:[#allocation2 + $0x40] sm:$0xff]  ;;  %v1184_v11 = vadd.f32 %v1183_v63, %v1125_v49 }
 0x1aa   : > { %1163 = vst [vmem:[%s1882_s27 + $0x70] sm:$0xff] %v2102_v61  ;;  %v1133_v2 = vld [vmem:[#allocation2 + $0x38] sm:$0xff]  ;;  %1164 = vst [vmem:[%s1882_s27 + $0x78] sm:$0xff] %v1132_v1  ;;  %v1136_v8 = vld [vmem:[#allocation2 + $0xc8] sm:$0xff]  ;;  %v1257_v10 = vadd.f32 %v1256_v62, %v1229_v52  ;;  %v1233_v12 = vmul.f32 %v1127_v54, %v1127_v54  ;;  %v1278_v16 = vadd.f32 %v1277_v4, %v1230_v58 }
 0x1ab   : > { %v2108_v3 = vld [vmem:[#allocation2 + $0x58] sm:$0xff]  ;;  %1165 = vst [vmem:[%s1882_s27 + $0x80] sm:$0xff] %v1133_v2  ;;  %v2114_v9 = vld [vmem:[#allocation2 + $0xe0] sm:$0xff]  ;;  %1167 = vst [vmem:[%s1882_s27 + $0x90] sm:$0xff] %v1135_v7  ;;  %v1205_v17 = vadd.f32 %v1204_v5, %v1126_v53  ;;  %v1234_v18 = vmul.f32 %v1128_v55, %v1128_v55  ;;  %v1185_v23 = vadd.f32 %v1184_v11, %v1127_v54 }
 0x1ac   : > { %1166 = vst [vmem:[%s1882_s27 + $0x88] sm:$0xff] %v2108_v3  ;;  %1168 = vst [vmem:[%s1882_s27 + $0x98] sm:$0xff] %v1136_v8  ;;  %v1138_v13 = vld [vmem:[#allocation2 + $0x90] sm:$0xff]  ;;  %v2120_v15 = vld [vmem:[#allocation2 + $0xc0] sm:$0xff]  ;;  %v1258_v22 = vadd.f32 %v1257_v10, %v1231_v0  ;;  %v1235_v24 = vmul.f32 %v1129_v59, %v1129_v59  ;;  %v1279_v28 = vadd.f32 %v1278_v16, %v1232_v6 }
 0x1ad   : > { %1169 = vst [vmem:[%s1882_s27 + $0xa0] sm:$0xff] %v2114_v9  ;;  %v1139_v14 = vld [vmem:[#allocation2 + $0x70] sm:$0xff]  ;;  %1170 = vst [vmem:[%s1882_s27 + $0xa8] sm:$0xff] %v1138_v13  ;;  %v1141_v19 = vld [vmem:[#allocation2 + $0xa8] sm:$0xff]  ;;  %v1206_v29 = vadd.f32 %v1205_v17, %v1128_v55  ;;  %v1236_v30 = vmul.f32 %v1130_v60, %v1130_v60  ;;  %v1186_v34 = vadd.f32 %v1185_v23, %v1129_v59 }
 0x1ae   : > { %1171 = vst [vmem:[%s1882_s27 + $0xb0] sm:$0xff] %v1139_v14  ;;  %1172 = vst [vmem:[%s1882_s27 + $0xb8] sm:$0xff] %v2120_v15  ;;  %v1142_v20 = vld [vmem:[#allocation2 + $0xd0] sm:$0xff]  ;;  %v1144_v25 = vld [vmem:[#allocation2 + $0x28] sm:$0xff]  ;;  %v1259_v33 = vadd.f32 %v1258_v22, %v1233_v12  ;;  %v1237_v35 = vmul.f32 %v2102_v61, %v2102_v61  ;;  %v1280_v36 = vadd.f32 %v1279_v28, %v1234_v18 }
 0x1af   : > { %v2126_v21 = vld [vmem:[#allocation2 + $0x10] sm:$0xff]  ;;  %1173 = vst [vmem:[%s1882_s27 + $0xc0] sm:$0xff] %v1141_v19  ;;  %1174 = vst [vmem:[%s1882_s27 + $0xc8] sm:$0xff] %v1142_v20  ;;  %v1145_v26 = vld [vmem:[#allocation2 + $0xa0] sm:$0xff]  ;;  %v1207_v37 = vadd.f32 %v1206_v29, %v1130_v60  ;;  %v1238_v38 = vmul.f32 %v1132_v1, %v1132_v1  ;;  %v1187_v40 = vadd.f32 %v1186_v34, %v2102_v61 }
 0x1b0   : > { %1175 = vst [vmem:[%s1882_s27 + $0xd0] sm:$0xff] %v2126_v21  ;;  %v2132_v27 = vld [vmem:[#allocation2 + $0xf8] sm:$0xff]  ;;  %1176 = vst [vmem:[%s1882_s27 + $0xd8] sm:$0xff] %v1144_v25  ;;  %v1147_v31 = vld [vmem:[#allocation2 + $0x20] sm:$0xff]  ;;  %v1260_v39 = vadd.f32 %v1259_v33, %v1235_v24  ;;  %v1239_v41 = vmul.f32 %v1133_v2, %v1133_v2  ;;  %v1281_v42 = vadd.f32 %v1280_v36, %v1236_v30 }
 0x1b1   : > { %1177 = vst [vmem:[%s1882_s27 + $0xe0] sm:$0xff] %v1145_v26  ;;  %1178 = vst [vmem:[%s1882_s27 + $0xe8] sm:$0xff] %v2132_v27  ;;  %v1148_v32 = vld [vmem:[#allocation2 + $0x98] sm:$0xff]  ;;  %v1208_v43 = vadd.f32 %v1207_v37, %v1132_v1  ;;  %v1240_v44 = vmul.f32 %v2108_v3, %v2108_v3  ;;  %v1188_v46 = vadd.f32 %v1187_v40, %v1133_v2 }
 0x1b2   : > { %1179 = vst [vmem:[%s1882_s27 + $0xf0] sm:$0xff] %v1147_v31  ;;  %1180 = vst [vmem:[%s1882_s27 + $0xf8] sm:$0xff] %v1148_v32  ;;  %v1261_v45 = vadd.f32 %v1260_v39, %v1237_v35  ;;  %v1241_v47 = vmul.f32 %v1135_v7, %v1135_v7  ;;  %v1282_v48 = vadd.f32 %v1281_v42, %v1238_v38 }
 0x1b3   : > { %v1209_v49 = vadd.f32 %v1208_v43, %v2108_v3  ;;  %v1242_v50 = vmul.f32 %v1136_v8, %v1136_v8  ;;  %v1189_v52 = vadd.f32 %v1188_v46, %v1135_v7  ;;  %v1243_v53 = vmul.f32 %v2114_v9, %v2114_v9 }
 0x1b4   : > { %v1262_v51 = vadd.f32 %v1261_v45, %v1239_v41  ;;  %v1283_v54 = vadd.f32 %v1282_v48, %v1240_v44  ;;  %v1244_v56 = vmul.f32 %v1138_v13, %v1138_v13  ;;  %v1245_v59 = vmul.f32 %v1139_v14, %v1139_v14 }
 0x1b5   : > { %v1210_v55 = vadd.f32 %v1209_v49, %v1136_v8  ;;  %v1190_v58 = vadd.f32 %v1189_v52, %v2114_v9  ;;  %v1246_v62 = vmul.f32 %v2120_v15, %v2120_v15  ;;  %v1247_v1 = vmul.f32 %v1141_v19, %v1141_v19 }
 0x1b6   : > { %v1263_v57 = vadd.f32 %v1262_v51, %v1241_v47  ;;  %v1284_v60 = vadd.f32 %v1283_v54, %v1242_v50  ;;  %v1248_v4 = vmul.f32 %v1142_v20, %v1142_v20  ;;  %v1249_v7 = vmul.f32 %v2126_v21, %v2126_v21 }
 0x1b7   : > { %v1211_v61 = vadd.f32 %v1210_v55, %v1138_v13  ;;  %v1191_v0 = vadd.f32 %v1190_v58, %v1139_v14  ;;  %v1250_v10 = vmul.f32 %v1144_v25, %v1144_v25  ;;  %v1251_v13 = vmul.f32 %v1145_v26, %v1145_v26 }
 0x1b8   : > { %v1264_v63 = vadd.f32 %v1263_v57, %v1243_v53  ;;  %v1285_v2 = vadd.f32 %v1284_v60, %v1244_v56  ;;  %v1252_v14 = vmul.f32 %v2132_v27, %v2132_v27  ;;  %v1253_v22 = vmul.f32 %v1147_v31, %v1147_v31 }
 0x1b9   : > { %v1212_v3 = vadd.f32 %v1211_v61, %v2120_v15  ;;  %v1192_v6 = vadd.f32 %v1191_v0, %v1141_v19  ;;  %v1254_v24 = vmul.f32 %v1148_v32, %v1148_v32 }
 0x1ba   : > { %v1265_v5 = vadd.f32 %v1264_v63, %v1245_v59  ;;  %v1286_v8 = vadd.f32 %v1285_v2, %v1246_v62 }
 0x1bb   : > { %v1213_v9 = vadd.f32 %v1212_v3, %v1142_v20  ;;  %v1193_v12 = vadd.f32 %v1192_v6, %v2126_v21 }
 0x1bc   : > { %v1266_v11 = vadd.f32 %v1265_v5, %v1247_v1  ;;  %v1287_v16 = vadd.f32 %v1286_v8, %v1248_v4 }
 0x1bd   : > { %v1214_v17 = vadd.f32 %v1213_v9, %v1144_v25  ;;  %v1194_v15 = vadd.f32 %v1193_v12, %v1145_v26 }
 0x1be   : > { %v1267_v18 = vadd.f32 %v1266_v11, %v1249_v7  ;;  %v1288_v23 = vadd.f32 %v1287_v16, %v1250_v10 }
 0x1bf   : > { %v1215_v19 = vadd.f32 %v1214_v17, %v2132_v27  ;;  %v1195_v29 = vadd.f32 %v1194_v15, %v1147_v31 }
 0x1c0   : > { %v1268_v28 = vadd.f32 %v1267_v18, %v1251_v13  ;;  %v1289_v20 = vadd.f32 %v1288_v23, %v1252_v14 }
 0x1c1   : > { %v1216_v30 = vadd.f32 %v1215_v19, %v1148_v32  ;;  %v1196_v33 = vrot.slane %v1195_v29, 4 }
 0x1c2   : > { %v1269_v34 = vadd.f32 %v1268_v28, %v1253_v22  ;;  %v1290_v35 = vadd.f32 %v1289_v20, %v1254_v24 }
 0x1c3   : > { %v1217_v21 = vrot.slane %v1216_v30, 4  ;;  %v1197_v36 = vadd.f32 %v1196_v33, %v1195_v29 }
 0x1c4   : > { %v1270_v25 = vrot.slane %v1269_v34, 4  ;;  %v1291_v38 = vrot.slane %v1290_v35, 4 }
 0x1c5   : > { %v1218_v37 = vadd.f32 %v1217_v21, %v1216_v30  ;;  %v1198_v39 = vrot.slane %v1197_v36, 2 }
 0x1c6   : > { %v1271_v40 = vadd.f32 %v1270_v25, %v1269_v34  ;;  %v1292_v41 = vadd.f32 %v1291_v38, %v1290_v35 }
 0x1c7   : > { %v1219_v26 = vrot.slane %v1218_v37, 2  ;;  %v1199_v42 = vadd.f32 %v1198_v39, %v1197_v36 }
 0x1c8   : > { %v1272_v43 = vrot.slane %v1271_v40, 2  ;;  %v1293_v44 = vrot.slane %v1292_v41, 2 }
 0x1c9   : > { %v1220_v27 = vadd.f32 %v1219_v26, %v1218_v37  ;;  %v1200_v31 = vrot.slane %v1199_v42, 1 }
 0x1ca   : > { %v1273_v45 = vadd.f32 %v1272_v43, %v1271_v40  ;;  %v1294_v46 = vadd.f32 %v1293_v44, %v1292_v41 }
 0x1cb   : > { %v1221_v32 = vrot.slane %v1220_v27, 1  ;;  %v1201_v47 = vadd.f32 %v1200_v31, %v1199_v42 }
 0x1cc   : > { %v1274_v48 = vrot.slane %v1273_v45, 1  ;;  %v1295_v50 = vrot.slane %v1294_v46, 1 }
 0x1cd   : > { %v1222_v49 = vadd.f32 %v1221_v32, %v1220_v27 }
 0x1ce   : > { %v1275_v51 = vadd.f32 %v1274_v48, %v1273_v45  ;;  %v1296_v52 = vadd.f32 %v1295_v50, %v1294_v46 }
 0x1d0   : > { %v1298_v53 = vsel %vm1297_vm0, %v1201_v47, %v1275_v51  ;;  %v1299_v54 = vsel %vm1297_vm0, %v1222_v49, %v1296_v52 }
 0x1d1   : > { %v1302_v55 = vcombine.low %v1298_v53, %v1299_v54 }
 0x1d3   : > { %1542 = vst.sshfl [vmem:[%s1887_s12] sm:$0x33 pattern:$0x76325410] %v1302_v55 }
 0x1d4 PF: > { %s14_s18 = sadd.s32 1, %s1658_s18   ;;  %s2184_s12 = smov %s1638_s13 }
 0x1d5   : > { %p11_p0 = scmp.ge.s32.totalorder %s14_s18, 18   ;;  %s2185_s13 = smov %s1732_s25 }
 0x1d6   : > { %s2186_s14 = smov %s1650_s16  ;;  %s2187_s15 = smov %s1654_s17 }
 0x1d7   : > { %s2188_s16 = smov %s2191_s19  ;;  %s2189_s17 = smov %s2195_s20 }
 0x1d8   :  { %13 = sbr.rel (!%p11_p0) target bundleno = 4 (0x4), region = 109 }

// kernel: pp2p_forward.14
= control target key start
LH: loop header
LB: loop body
LE: loop exit
PB: predicated region body
PF: predicated region fallthrough
CT: control target
= control target key end

     0   :  { %s730_s12 = smov 0   ;;  %s732_s13 = smov 0   ;;  %s1038_s0 = inlined_call_operand.vmem [shape: f32[4,16,8,256], index: 0, kind: input, shape index: {}]   ;;  %s1039_s1 = inlined_call_operand.vmem [shape: f32[1,256], index: 1, kind: input, shape index: {}]   ;;  %s1040_s2 = inlined_call_operand.vmem [shape: f32[1,256], index: 2, kind: input, shape index: {}]   ;;  %s1041_s3 = inlined_call_operand.vmem [shape: f32[16,2,8,512], index: 3, kind: output, shape index: {}]  }
   0x1   :  { %s734_s14 = smov 0   ;;  %s736_s15 = smov 0  }
   0x2   :  { %s738_s16 = smov 0   ;;  %s740_s17 = smov 0  }
   0x3   :  { %s742_s18 = smov 0  }
   0x4 LB: > { %s25_s19 = sadd.s32 1, %s700_s16  ;;  %s28_s20 = sadd.s32 1, %s704_s17  ;;  %s708_s18 = sphi %s742_s18, %s13_s18   ;;  %s704_s17 = sphi %s740_s17, %s1048_s17   ;;  %s700_s16 = sphi %s738_s16, %s1047_s16   ;;  %s696_s15 = sphi %s736_s15, %s1046_s15   ;;  %s692_s14 = sphi %s734_s14, %s1045_s14   ;;  %s688_s13 = sphi %s732_s13, %s1044_s13   ;;  %s684_s12 = sphi %s730_s12, %s1043_s12  }
   0x5   : > { %p26_p0 = scmp.ge.s32.totalorder %s25_s19, 2  ;;  %s580_s21 = sadd.s32 4294967295, %s708_s18  }
   0x6   : > { %p127_p1 = scmp.ne.s32.totalorder %s688_s13, %s684_s12  ;;  %p128_p2 = scmp.eq.s32.totalorder %s580_s21, 3 }
   0x7   : > { %s1050_s19 = smov (%p26_p0, %s25_s19), 0  ;;  %s1052_s20 = smov (!%p26_p0, %s28_s20), %s704_s17 }
   0x8   : > { %s113_s22 = ssub.s32 %s700_s16, %s1050_s19  ;;  %p30_p3 = scmp.ge.s32.totalorder %s1052_s20, 2 }
   0x9   : > { %p586_p4 = scmp.ge.s32.totalorder %s708_s18, 1  ;;  %p776_p5 = por %p128_p2, %p127_p1 }
   0xa   : > { %p176_p6 = scmp.lt.s32.totalorder %s708_s18, 5  ;;  %s1054_s20 = smov (%p30_p3, %s1052_s20), 0 }
   0xb   : > { %s111_s24 = ssub.s32 %s704_s17, %s1054_s20  ;;  %s117_s26 = sadd.s32 1, %s688_s13 }
   0xc   : > { %p177_p7 = pnand %p586_p4, %p176_p6  ;;  %s114_s25 = sor.u32 %s113_s22, %s111_s24 }
   0xd   : > { %p115_p8 = scmp.eq.s32.totalorder %s114_s25, 0  ;;  %s588_s28 = sshll.u32 (!%p177_p7), %s696_s15, 1 }
   0xe   : > { %180 = sbr.rel (%p177_p7) target bundleno = 68 (0x44), region = 32  ;;  %s207_s29 = sadd.s32 (!%p177_p7), %s692_s14, %s588_s28 }
   0xf   : > { %s787_s27 = scalar_select %p115_p8, %s688_s13, %s117_s26  }
  0x10   : > { %p209_p9 = scmp.lt.s32.totalorder (!%p177_p7), %s207_s29, 3  ;;  %s203_s7 = sand.u32 (!%p177_p7), 1, %s684_s12  }
  0x11   : > { %s814_s12 = sshll.u32 (!%p177_p7), %s203_s7, 8 }
  0x12   : > { %s845_s21 = scalar_lea.vmem (!%p177_p7), [#allocation2], %s814_s12 }
  0x13   : > { %v257_v0 = vlaneseq  ;;  %v255_v2 = vld [vmem:[%s1039_s1] sm:$0x3]  ;;  %s1056_s29 = smov (!%p209_p9, %s207_s29), 3  ;;  %s592_s22 = sshll.u32 (%p776_p5), %s692_s14, 1 }
  0x14   : > { %v299_v4 = vld [vmem:[%s1040_s2] sm:$0x3]  ;;  %s597_s8 = sshll.u32 %s1056_s29, 8  ;;  %s593_s24 = sshll.u32 (%p776_p5), %s696_s15, 2 }
  0x15   : > { %v258_v1 = vshrl.u32 %v257_v0, 7  ;;  %s805_s11 = scalar_lea.vmem %s1038_s0, %s597_s8  ;;  %s417_s23 = sadd.s32 (%p776_p5), %s593_s24, %s592_s22 }
  0x16   : > { %v223_v10 = vld [vmem:[%s805_s11] sm:$0xff]  ;;  %v224_v11 = vld [vmem:[%s805_s11 + $0x8] sm:$0xff]  ;;  %v225_v12 = vld [vmem:[%s805_s11 + $0x10] sm:$0xff]  ;;  %s594_s25 = sshll.u32 (%p776_p5), %s417_s23, 3 }
  0x17   : > { %v259_v3 = vsub.s32 0, %v258_v1  ;;  %v263_v5 = vsub.s32 1, %v258_v1  ;;  %v226_v16 = vld [vmem:[%s805_s11 + $0x18] sm:$0xff]  ;;  %v227_v17 = vld [vmem:[%s805_s11 + $0x20] sm:$0xff]  ;;  %v228_v18 = vld [vmem:[%s805_s11 + $0x28] sm:$0xff]  ;;  %s960_s29 = scalar_lea.vmem (%p776_p5), %s1041_s3, %s594_s25 }
  0x18   : > { %v229_v22 = vld [vmem:[%s805_s11 + $0x30] sm:$0xff]  ;;  %v230_v23 = vld [vmem:[%s805_s11 + $0x38] sm:$0xff]  ;;  %v231_v32 = vld [vmem:[%s805_s11 + $0x40] sm:$0xff] }
  0x19   : > { %v798_v6 = vrot.slane %v255_v2, %v259_v3  ;;  %v800_v7 = vrot.slane %v255_v2, %v263_v5  ;;  %v807_v8 = vrot.slane %v299_v4, %v259_v3  ;;  %v809_v9 = vrot.slane %v299_v4, %v263_v5  ;;  %v232_v33 = vld [vmem:[%s805_s11 + $0x48] sm:$0xff]  ;;  %v233_v34 = vld [vmem:[%s805_s11 + $0x50] sm:$0xff]  ;;  %v234_v39 = vld [vmem:[%s805_s11 + $0x58] sm:$0xff] }
  0x1a   : > { %v235_v40 = vld [vmem:[%s805_s11 + $0x60] sm:$0xff]  ;;  %v236_v41 = vld [vmem:[%s805_s11 + $0x68] sm:$0xff]  ;;  %v237_v46 = vld [vmem:[%s805_s11 + $0x70] sm:$0xff] }
  0x1b   : > { %v267_v13 = vmul.f32 %v798_v6, %v223_v10  ;;  %v268_v14 = vmul.f32 %v800_v7, %v224_v11  ;;  %v269_v15 = vmul.f32 %v798_v6, %v225_v12  ;;  %v270_v19 = vmul.f32 %v800_v7, %v226_v16  ;;  %v238_v51 = vld [vmem:[%s805_s11 + $0x78] sm:$0xff]  ;;  %v239_v0 = vld [vmem:[%s805_s11 + $0x80] sm:$0xff]  ;;  %v240_v1 = vld [vmem:[%s805_s11 + $0x88] sm:$0xff] }
  0x1c   : > { %v271_v20 = vmul.f32 %v798_v6, %v227_v17  ;;  %v272_v21 = vmul.f32 %v800_v7, %v228_v18  ;;  %v273_v27 = vmul.f32 %v798_v6, %v229_v22  ;;  %v274_v31 = vmul.f32 %v800_v7, %v230_v23  ;;  %v241_v2 = vld [vmem:[%s805_s11 + $0x90] sm:$0xff]  ;;  %v242_v11 = vld [vmem:[%s805_s11 + $0x98] sm:$0xff]  ;;  %v243_v12 = vld [vmem:[%s805_s11 + $0xa0] sm:$0xff] }
  0x1d   : > { %v311_v24 = vadd.f32 %v807_v8, %v267_v13  ;;  %v312_v25 = vadd.f32 %v809_v9, %v268_v14  ;;  %v313_v26 = vadd.f32 %v807_v8, %v269_v15  ;;  %v314_v28 = vadd.f32 %v809_v9, %v270_v19  ;;  %v244_v13 = vld [vmem:[%s805_s11 + $0xa8] sm:$0xff]  ;;  %v245_v18 = vld [vmem:[%s805_s11 + $0xb0] sm:$0xff]  ;;  %v246_v23 = vld [vmem:[%s805_s11 + $0xb8] sm:$0xff] }
  0x1e   : > { %v315_v29 = vadd.f32 %v807_v8, %v271_v20  ;;  %v316_v30 = vadd.f32 %v809_v9, %v272_v21  ;;  %v317_v38 = vadd.f32 %v807_v8, %v273_v27  ;;  %v318_v45 = vadd.f32 %v809_v9, %v274_v31 }
  0x1f   : > { %v343_v35 = vmax.f32 %v311_v24, 0.0  ;;  %v344_v36 = vmax.f32 %v312_v25, 0.0  ;;  %v345_v37 = vmax.f32 %v313_v26, 0.0  ;;  %v346_v42 = vmax.f32 %v314_v28, 0.0 }
  0x20   : > { %v347_v43 = vmax.f32 %v315_v29, 0.0  ;;  %v348_v44 = vmax.f32 %v316_v30, 0.0  ;;  %v349_v47 = vmax.f32 %v317_v38, 0.0  ;;  %v275_v48 = vmul.f32 %v798_v6, %v231_v32  ;;  %v249_v38 = vld [vmem:[%s805_s11 + $0xd0] sm:$0xff] }
  0x21   : > { %375 = vst [vmem:[%s845_s21] sm:$0xff] %v343_v35  ;;  %376 = vst [vmem:[%s845_s21 + $0x8] sm:$0xff] %v344_v36  ;;  %v276_v49 = vmul.f32 %v800_v7, %v232_v33  ;;  %v277_v50 = vmul.f32 %v798_v6, %v233_v34  ;;  %v350_v52 = vmax.f32 %v318_v45, 0.0  ;;  %v278_v53 = vmul.f32 %v800_v7, %v234_v39  ;;  %v247_v36 = vld [vmem:[%s805_s11 + $0xc0] sm:$0xff]  ;;  %v252_v45 = vld [vmem:[%s805_s11 + $0xe8] sm:$0xff] }
  0x22   : > { %377 = vst [vmem:[%s845_s21 + $0x10] sm:$0xff] %v345_v37  ;;  %378 = vst [vmem:[%s845_s21 + $0x18] sm:$0xff] %v346_v42  ;;  %v279_v54 = vmul.f32 %v798_v6, %v235_v40  ;;  %v280_v55 = vmul.f32 %v800_v7, %v236_v41  ;;  %v319_v56 = vadd.f32 %v807_v8, %v275_v48  ;;  %v248_v37 = vld [vmem:[%s805_s11 + $0xc8] sm:$0xff] }
  0x23   : > { %379 = vst [vmem:[%s845_s21 + $0x20] sm:$0xff] %v347_v43  ;;  %380 = vst [vmem:[%s845_s21 + $0x28] sm:$0xff] %v348_v44  ;;  %v320_v57 = vadd.f32 %v809_v9, %v276_v49  ;;  %v321_v58 = vadd.f32 %v807_v8, %v277_v50  ;;  %v281_v59 = vmul.f32 %v798_v6, %v237_v46  ;;  %v250_v43 = vld [vmem:[%s805_s11 + $0xd8] sm:$0xff]  ;;  %v251_v44 = vld [vmem:[%s805_s11 + $0xe0] sm:$0xff] }
  0x24   : > { %381 = vst [vmem:[%s845_s21 + $0x30] sm:$0xff] %v349_v47  ;;  %382 = vst [vmem:[%s845_s21 + $0x38] sm:$0xff] %v350_v52  ;;  %v322_v60 = vadd.f32 %v809_v9, %v278_v53  ;;  %v323_v61 = vadd.f32 %v807_v8, %v279_v54  ;;  %v324_v62 = vadd.f32 %v809_v9, %v280_v55  ;;  %v351_v3 = vmax.f32 %v319_v56, 0.0  ;;  %v253_v50 = vld [vmem:[%s805_s11 + $0xf0] sm:$0xff]  ;;  %v254_v55 = vld [vmem:[%s805_s11 + $0xf8] sm:$0xff] }
  0x25   : > { %v282_v63 = vmul.f32 %v800_v7, %v238_v51  ;;  %v352_v4 = vmax.f32 %v320_v57, 0.0  ;;  %v353_v5 = vmax.f32 %v321_v58, 0.0  ;;  %v325_v10 = vadd.f32 %v807_v8, %v281_v59 }
  0x26   : > { %v354_v14 = vmax.f32 %v322_v60, 0.0  ;;  %v355_v15 = vmax.f32 %v323_v61, 0.0  ;;  %v356_v16 = vmax.f32 %v324_v62, 0.0  ;;  %383 = vst [vmem:[%s845_s21 + $0x40] sm:$0xff] %v351_v3  ;;  %v283_v20 = vmul.f32 %v798_v6, %v239_v0 }
  0x27   : > { %v326_v17 = vadd.f32 %v809_v9, %v282_v63  ;;  %384 = vst [vmem:[%s845_s21 + $0x48] sm:$0xff] %v352_v4  ;;  %385 = vst [vmem:[%s845_s21 + $0x50] sm:$0xff] %v353_v5  ;;  %v357_v19 = vmax.f32 %v325_v10, 0.0  ;;  %v284_v21 = vmul.f32 %v800_v7, %v240_v1  ;;  %v285_v22 = vmul.f32 %v798_v6, %v241_v2 }
  0x28   : > { %386 = vst [vmem:[%s845_s21 + $0x58] sm:$0xff] %v354_v14  ;;  %387 = vst [vmem:[%s845_s21 + $0x60] sm:$0xff] %v355_v15  ;;  %v286_v25 = vmul.f32 %v800_v7, %v242_v11  ;;  %v287_v26 = vmul.f32 %v798_v6, %v243_v12  ;;  %v288_v27 = vmul.f32 %v800_v7, %v244_v13 }
  0x29   : > { %388 = vst [vmem:[%s845_s21 + $0x68] sm:$0xff] %v356_v16  ;;  %v358_v24 = vmax.f32 %v326_v17, 0.0  ;;  %389 = vst [vmem:[%s845_s21 + $0x70] sm:$0xff] %v357_v19  ;;  %v327_v28 = vadd.f32 %v807_v8, %v283_v20  ;;  %v328_v29 = vadd.f32 %v809_v9, %v284_v21  ;;  %v329_v30 = vadd.f32 %v807_v8, %v285_v22  ;;  %v438_v16 = vld [vmem:[%s845_s21 + $0x10] sm:$0xff] (%p776_p5)  ;;  %v440_v17 = vld [vmem:[%s845_s21 + $0x18] sm:$0xff] (%p776_p5) }
  0x2a   : > { %v289_v31 = vmul.f32 %v798_v6, %v245_v18  ;;  %v330_v32 = vadd.f32 %v809_v9, %v286_v25  ;;  %v331_v33 = vadd.f32 %v807_v8, %v287_v26  ;;  %v332_v34 = vadd.f32 %v809_v9, %v288_v27  ;;  %v442_v18 = vld [vmem:[%s845_s21 + $0x20] sm:$0xff] (%p776_p5)  ;;  %v444_v19 = vld [vmem:[%s845_s21 + $0x28] sm:$0xff] (%p776_p5)  ;;  %439 = vst [vmem:[%s960_s29 + $0x40] sm:$0xff] (%p776_p5), %v438_v16 }
  0x2b   : > { %390 = vst [vmem:[%s845_s21 + $0x78] sm:$0xff] %v358_v24  ;;  %v290_v35 = vmul.f32 %v800_v7, %v246_v23  ;;  %v359_v39 = vmax.f32 %v327_v28, 0.0  ;;  %v360_v40 = vmax.f32 %v328_v29, 0.0  ;;  %v361_v41 = vmax.f32 %v329_v30, 0.0  ;;  %v446_v20 = vld [vmem:[%s845_s21 + $0x30] sm:$0xff] (%p776_p5)  ;;  %v448_v21 = vld [vmem:[%s845_s21 + $0x38] sm:$0xff] (%p776_p5) }
  0x2c   : > { %v333_v42 = vadd.f32 %v807_v8, %v289_v31  ;;  %v362_v46 = vmax.f32 %v330_v32, 0.0  ;;  %v363_v47 = vmax.f32 %v331_v33, 0.0  ;;  %v364_v48 = vmax.f32 %v332_v34, 0.0  ;;  %441 = vst [vmem:[%s960_s29 + $0x48] sm:$0xff] (%p776_p5), %v440_v17  ;;  %443 = vst [vmem:[%s960_s29 + $0x80] sm:$0xff] (%p776_p5), %v442_v18 }
  0x2d   : > { %v334_v49 = vadd.f32 %v809_v9, %v290_v35  ;;  %391 = vst [vmem:[%s845_s21 + $0x80] sm:$0xff] %v359_v39  ;;  %392 = vst [vmem:[%s845_s21 + $0x88] sm:$0xff] %v360_v40  ;;  %v291_v52 = vmul.f32 %v798_v6, %v247_v36  ;;  %v292_v53 = vmul.f32 %v800_v7, %v248_v37  ;;  %v450_v22 = vld [vmem:[%s845_s21 + $0x40] sm:$0xff] (%p776_p5) }
  0x2e   : > { %393 = vst [vmem:[%s845_s21 + $0x90] sm:$0xff] %v361_v41  ;;  %v365_v51 = vmax.f32 %v333_v42, 0.0  ;;  %v293_v54 = vmul.f32 %v798_v6, %v249_v38  ;;  %394 = vst [vmem:[%s845_s21 + $0x98] sm:$0xff] %v362_v46  ;;  %v294_v57 = vmul.f32 %v800_v7, %v250_v43  ;;  %v295_v58 = vmul.f32 %v798_v6, %v251_v44  ;;  %v452_v23 = vld [vmem:[%s845_s21 + $0x48] sm:$0xff] (%p776_p5)  ;;  %v454_v24 = vld [vmem:[%s845_s21 + $0x50] sm:$0xff] (%p776_p5) }
  0x2f   : > { %395 = vst [vmem:[%s845_s21 + $0xa0] sm:$0xff] %v363_v47  ;;  %396 = vst [vmem:[%s845_s21 + $0xa8] sm:$0xff] %v364_v48  ;;  %v366_v56 = vmax.f32 %v334_v49, 0.0  ;;  %v296_v59 = vmul.f32 %v800_v7, %v252_v45  ;;  %v335_v60 = vadd.f32 %v807_v8, %v291_v52  ;;  %v336_v61 = vadd.f32 %v809_v9, %v292_v53  ;;  %v456_v25 = vld [vmem:[%s845_s21 + $0x58] sm:$0xff] (%p776_p5)  ;;  %v458_v26 = vld [vmem:[%s845_s21 + $0x60] sm:$0xff] (%p776_p5) }
  0x30   : > { %397 = vst [vmem:[%s845_s21 + $0xb0] sm:$0xff] %v365_v51  ;;  %v337_v62 = vadd.f32 %v807_v8, %v293_v54  ;;  %v297_v63 = vmul.f32 %v798_v6, %v253_v50  ;;  %v338_v0 = vadd.f32 %v809_v9, %v294_v57  ;;  %v339_v1 = vadd.f32 %v807_v8, %v295_v58  ;;  %v460_v27 = vld [vmem:[%s845_s21 + $0x68] sm:$0xff] (%p776_p5)  ;;  %v462_v28 = vld [vmem:[%s845_s21 + $0x70] sm:$0xff] (%p776_p5) }
  0x31   : > { %398 = vst [vmem:[%s845_s21 + $0xb8] sm:$0xff] %v366_v56  ;;  %v340_v2 = vadd.f32 %v809_v9, %v296_v59  ;;  %v298_v3 = vmul.f32 %v800_v7, %v254_v55  ;;  %v367_v4 = vmax.f32 %v335_v60, 0.0  ;;  %v368_v5 = vmax.f32 %v336_v61, 0.0  ;;  %445 = vst [vmem:[%s960_s29 + $0x88] sm:$0xff] (%p776_p5), %v444_v19 }
  0x32   : > { %v369_v10 = vmax.f32 %v337_v62, 0.0  ;;  %v341_v6 = vadd.f32 %v807_v8, %v297_v63  ;;  %v370_v11 = vmax.f32 %v338_v0, 0.0  ;;  %v371_v12 = vmax.f32 %v339_v1, 0.0  ;;  %v434_v8 = vld [vmem:[%s845_s21] sm:$0xff] (%p776_p5)  ;;  %447 = vst [vmem:[%s960_s29 + $0xc0] sm:$0xff] (%p776_p5), %v446_v20  ;;  %449 = vst [vmem:[%s960_s29 + $0xc8] sm:$0xff] (%p776_p5), %v448_v21 }
  0x33   : > { %v372_v13 = vmax.f32 %v340_v2, 0.0  ;;  %v342_v14 = vadd.f32 %v809_v9, %v298_v3  ;;  %399 = vst [vmem:[%s845_s21 + $0xc0] sm:$0xff] %v367_v4  ;;  %400 = vst [vmem:[%s845_s21 + $0xc8] sm:$0xff] %v368_v5  ;;  %413 = sbr.rel (!%p776_p5) target bundleno = 68 (0x44), region = 36  ;;  %v436_v9 = vld [vmem:[%s845_s21 + $0x8] sm:$0xff] (%p776_p5)  ;;  %v464_v29 = vld [vmem:[%s845_s21 + $0x78] sm:$0xff] (%p776_p5) }
  0x34   : > { %401 = vst [vmem:[%s845_s21 + $0xd0] sm:$0xff] %v369_v10  ;;  %v373_v15 = vmax.f32 %v341_v6, 0.0  ;;  %402 = vst [vmem:[%s845_s21 + $0xd8] sm:$0xff] %v370_v11  ;;  %v466_v30 = vld [vmem:[%s845_s21 + $0x80] sm:$0xff] (%p776_p5)  ;;  %v468_v31 = vld [vmem:[%s845_s21 + $0x88] sm:$0xff] (%p776_p5) }
  0x35   : > { %403 = vst [vmem:[%s845_s21 + $0xe0] sm:$0xff] %v371_v12  ;;  %404 = vst [vmem:[%s845_s21 + $0xe8] sm:$0xff] %v372_v13  ;;  %v374_v7 = vmax.f32 %v342_v14, 0.0  ;;  %v470_v32 = vld [vmem:[%s845_s21 + $0x90] sm:$0xff] (%p776_p5)  ;;  %v472_v33 = vld [vmem:[%s845_s21 + $0x98] sm:$0xff] (%p776_p5) }
  0x36   : > { %405 = vst [vmem:[%s845_s21 + $0xf0] sm:$0xff] %v373_v15  ;;  %435 = vst [vmem:[%s960_s29] sm:$0xff] (%p776_p5), %v434_v8  ;;  %v474_v34 = vld [vmem:[%s845_s21 + $0xa0] sm:$0xff] (%p776_p5)  ;;  %v476_v35 = vld [vmem:[%s845_s21 + $0xa8] sm:$0xff] (%p776_p5) }
  0x37   : > { %406 = vst [vmem:[%s845_s21 + $0xf8] sm:$0xff] %v374_v7  ;;  %437 = vst [vmem:[%s960_s29 + $0x8] sm:$0xff] (%p776_p5), %v436_v9  ;;  %v478_v36 = vld [vmem:[%s845_s21 + $0xb0] sm:$0xff] (%p776_p5) }
  0x38   : > { %451 = vst [vmem:[%s960_s29 + $0x100] sm:$0xff] %v450_v22  ;;  %453 = vst [vmem:[%s960_s29 + $0x108] sm:$0xff] %v452_v23  ;;  %v480_v37 = vld [vmem:[%s845_s21 + $0xb8] sm:$0xff] }
  0x39   : > { %455 = vst [vmem:[%s960_s29 + $0x140] sm:$0xff] %v454_v24  ;;  %457 = vst [vmem:[%s960_s29 + $0x148] sm:$0xff] %v456_v25 }
  0x3a   : > { %459 = vst [vmem:[%s960_s29 + $0x180] sm:$0xff] %v458_v26  ;;  %461 = vst [vmem:[%s960_s29 + $0x188] sm:$0xff] %v460_v27  ;;  %v482_v38 = vld [vmem:[%s845_s21 + $0xc0] sm:$0xff]  ;;  %v484_v39 = vld [vmem:[%s845_s21 + $0xc8] sm:$0xff] }
  0x3b   : > { %463 = vst [vmem:[%s960_s29 + $0x1c0] sm:$0xff] %v462_v28  ;;  %465 = vst [vmem:[%s960_s29 + $0x1c8] sm:$0xff] %v464_v29  ;;  %v486_v40 = vld [vmem:[%s845_s21 + $0xd0] sm:$0xff]  ;;  %v488_v41 = vld [vmem:[%s845_s21 + $0xd8] sm:$0xff] }
  0x3c   : > { %467 = vst [vmem:[%s960_s29 + $0x200] sm:$0xff] %v466_v30  ;;  %469 = vst [vmem:[%s960_s29 + $0x208] sm:$0xff] %v468_v31  ;;  %v490_v42 = vld [vmem:[%s845_s21 + $0xe0] sm:$0xff]  ;;  %v492_v43 = vld [vmem:[%s845_s21 + $0xe8] sm:$0xff] }
  0x3d   : > { %471 = vst [vmem:[%s960_s29 + $0x240] sm:$0xff] %v470_v32  ;;  %473 = vst [vmem:[%s960_s29 + $0x248] sm:$0xff] %v472_v33  ;;  %v494_v44 = vld [vmem:[%s845_s21 + $0xf0] sm:$0xff] }
  0x3e   : > { %475 = vst [vmem:[%s960_s29 + $0x280] sm:$0xff] %v474_v34  ;;  %477 = vst [vmem:[%s960_s29 + $0x288] sm:$0xff] %v476_v35  ;;  %v496_v45 = vld [vmem:[%s845_s21 + $0xf8] sm:$0xff] }
  0x3f   : > { %479 = vst [vmem:[%s960_s29 + $0x2c0] sm:$0xff] %v478_v36  ;;  %481 = vst [vmem:[%s960_s29 + $0x2c8] sm:$0xff] %v480_v37 }
  0x40   : > { %483 = vst [vmem:[%s960_s29 + $0x300] sm:$0xff] %v482_v38  ;;  %485 = vst [vmem:[%s960_s29 + $0x308] sm:$0xff] %v484_v39 }
  0x41   : > { %487 = vst [vmem:[%s960_s29 + $0x340] sm:$0xff] %v486_v40  ;;  %489 = vst [vmem:[%s960_s29 + $0x348] sm:$0xff] %v488_v41 }
  0x42   : > { %491 = vst [vmem:[%s960_s29 + $0x380] sm:$0xff] %v490_v42  ;;  %493 = vst [vmem:[%s960_s29 + $0x388] sm:$0xff] %v492_v43 }
  0x43   : > { %495 = vst [vmem:[%s960_s29 + $0x3c0] sm:$0xff] %v494_v44  ;;  %497 = vst [vmem:[%s960_s29 + $0x3c8] sm:$0xff] %v496_v45 }
  0x44 PF: > { %s13_s18 = sadd.s32 1, %s708_s18   ;;  %s1043_s12 = smov %s688_s13 }
  0x45   : > { %p10_p10 = scmp.ge.s32.totalorder %s13_s18, 6   ;;  %s1044_s13 = smov %s787_s27 }
  0x46   : > { %s1045_s14 = smov %s700_s16  ;;  %s1046_s15 = smov %s704_s17 }
  0x47   : > { %s1047_s16 = smov %s1050_s19  ;;  %s1048_s17 = smov %s1054_s20 }
  0x48   :  { %12 = sbr.rel (!%p10_p10) target bundleno = 4 (0x4), region = 85 }

// kernel: pp2p_forward.15
= control target key start
LH: loop header
LB: loop body
LE: loop exit
PB: predicated region body
PF: predicated region fallthrough
CT: control target
= control target key end

     0   :  { %s2756_s0 = inlined_call_operand.vmem [shape: f32[4,512,1024], index: 0, kind: input, shape index: {}]   ;;  %s2757_s1 = inlined_call_operand.vmem [shape: f32[4,1024,128], index: 1, kind: input, shape index: {}]   ;;  %s2758_s2 = inlined_call_operand.vmem [shape: f32[4,512,128], index: 2, kind: output, shape index: {0}]   ;;  %s2759_s3 = inlined_call_operand.vmem [shape: f32[4,2,2,128], index: 3, kind: output, shape index: {1}]  }
   0x1   :  { %2762 = sst [smem:[#allocation6_spill]] %s2756_s0 }
   0x2   :  { %s1913_s12 = smov 0   ;;  %s1915_s13 = smov 0  }
   0x3   :  { %s1917_s14 = smov 0   ;;  %s1919_s15 = smov 0  }
   0x4   :  { %s1921_s16 = smov 0   ;;  %s1923_s17 = smov 0  }
   0x5   :  { %s1925_s18 = smov 0   ;;  %s1927_s19 = smov 0  }
   0x6   :  { %s1929_s20 = smov 0  }
   0x7 LB: > { %s29_s21 = sadd.s32 1, %s1877_s17  ;;  %s36_s22 = sadd.s32 1, %s1881_s18  ;;  %s1889_s20 = sphi %s1929_s20, %s14_s20   ;;  %s1885_s19 = sphi %s1927_s19, %s2776_s19   ;;  %s1881_s18 = sphi %s1925_s18, %s2775_s18   ;;  %s1877_s17 = sphi %s1923_s17, %s2774_s17   ;;  %s1873_s16 = sphi %s1921_s16, %s2773_s16   ;;  %s1869_s15 = sphi %s1919_s15, %s2772_s15   ;;  %s1865_s14 = sphi %s1917_s14, %s2771_s14   ;;  %s1861_s13 = sphi %s1915_s13, %s2770_s13   ;;  %s1857_s12 = sphi %s1913_s12, %s2769_s12  }
   0x8   : > { %p30_p0 = scmp.ge.s32.totalorder %s29_s21, 2  ;;  %p58_p1 = scmp.ne.s32.totalorder %s1861_s13, %s1857_s12 }
   0x9   : > { %p59_p2 = scmp.eq.s32.totalorder %s1889_s20, 0  ;;  %s40_s23 = sadd.s32 1, %s1885_s19 }
   0xa   : > { %s2778_s22 = smov (!%p30_p0, %s36_s22), %s1881_s18  ;;  %s2784_s21 = smov (%p30_p0, %s29_s21), 0 }
   0xb   : > { %p38_p3 = scmp.ge.s32.totalorder %s2778_s22, 2  ;;  %p1965_p4 = por %p59_p2, %p58_p1 }
   0xc   : > { %s47_s26 = ssub.s32 %s1877_s17, %s2784_s21  ;;  %s51_s30 = sadd.s32 1, %s1861_s13 }
   0xd   : > { %s2780_s22 = smov (%p38_p3, %s2778_s22), 0  ;;  %s2782_s23 = smov (!%p38_p3, %s40_s23), %s1885_s19 }
   0xe   : > { %2764 = sst [smem:[#allocation4_spill]] %s2780_s22  ;;  %p42_p5 = scmp.ge.s32.totalorder %s2782_s23, 4 }
   0xf   : > { %s45_s25 = ssub.s32 %s1881_s18, %s2780_s22  ;;  %p1723_p7 = scmp.ge.s32.totalorder %s1889_s20, 16 }
  0x10   : > { %s2786_s23 = smov (%p42_p5, %s2782_s23), 0 }
  0x11   : > { %2765 = sst [smem:[#allocation5_spill]] %s2786_s23  ;;  %s44_s27 = ssub.s32 %s1885_s19, %s2786_s23 }
  0x12   : > { %s46_s28 = sor.u32 %s45_s25, %s44_s27  ;;  %174 = sbr.rel (%p1723_p7) target bundleno = 98 (0x62), region = 16 }
  0x13   : > { %s48_s29 = sor.u32 %s47_s26, %s46_s28 }
  0x14   : > { %p49_p6 = scmp.eq.s32.totalorder %s48_s29, 0 }
  0x16   : > { %s1984_s4 = scalar_select %p49_p6, %s1861_s13, %s51_s30  }
  0x17   : > { %177 = sbr.rel (!%p1965_p4) target bundleno = 98 (0x62), region = 20  ;;  %s179_s5 = sand.u32 (%p1965_p4), 1, %s1861_s13  }
  0x18   : > { %s1726_s6 = sshll.u32 (%p1965_p4), %s1877_s17, 2  ;;  %s1744_s7 = sshll.u32 (%p1965_p4), %s1881_s18, 8 }
  0x19   : > { %s1724_s8 = sshll.u32 (%p1965_p4), %s179_s5, 10  ;;  %s185_s9 = sadd.s32 (%p1965_p4), %s1744_s7, %s1726_s6 }
  0x1a   : > { %s1728_s10 = sshll.u32 (%p1965_p4), %s1885_s19, 9  ;;  %s2766_s0 = sld [smem:[#allocation6_spill]] (%p1965_p4) }
  0x1b   : > { %s187_s11 = sadd.s32 (%p1965_p4), %s1728_s10, %s185_s9  ;;  %s2001_s24 = scalar_lea.vmem (%p1965_p4), [#allocation3], %s1724_s8 }
  0x1c   : > { %s1729_s25 = sshll.u32 %s187_s11, 3 }
  0x20   : > { %s1996_s28 = scalar_lea.vmem %s2766_s0, %s1729_s25 }
  0x21   : > { %v202_v0 = vld [vmem:[%s1996_s28] sm:$0xff]  ;;  %v204_v1 = vld [vmem:[%s1996_s28 + $0x8] sm:$0xff]  ;;  %v206_v2 = vld [vmem:[%s1996_s28 + $0x10] sm:$0xff] }
  0x22   : > { %203 = vst [vmem:[%s2001_s24] sm:$0xff] %v202_v0  ;;  %205 = vst [vmem:[%s2001_s24 + $0x8] sm:$0xff] %v204_v1  ;;  %v208_v3 = vld [vmem:[%s1996_s28 + $0x18] sm:$0xff]  ;;  %v210_v4 = vld [vmem:[%s1996_s28 + $0x40] sm:$0xff] }
  0x23   : > { %207 = vst [vmem:[%s2001_s24 + $0x10] sm:$0xff] %v206_v2  ;;  %v212_v5 = vld [vmem:[%s1996_s28 + $0x48] sm:$0xff]  ;;  %209 = vst [vmem:[%s2001_s24 + $0x18] sm:$0xff] %v208_v3  ;;  %v214_v6 = vld [vmem:[%s1996_s28 + $0x50] sm:$0xff] }
  0x24   : > { %211 = vst [vmem:[%s2001_s24 + $0x20] sm:$0xff] %v210_v4  ;;  %213 = vst [vmem:[%s2001_s24 + $0x28] sm:$0xff] %v212_v5  ;;  %v216_v7 = vld [vmem:[%s1996_s28 + $0x58] sm:$0xff]  ;;  %v218_v8 = vld [vmem:[%s1996_s28 + $0x80] sm:$0xff] }
  0x25   : > { %215 = vst [vmem:[%s2001_s24 + $0x30] sm:$0xff] %v214_v6  ;;  %217 = vst [vmem:[%s2001_s24 + $0x38] sm:$0xff] %v216_v7  ;;  %v220_v9 = vld [vmem:[%s1996_s28 + $0x88] sm:$0xff]  ;;  %v222_v10 = vld [vmem:[%s1996_s28 + $0x90] sm:$0xff] }
  0x26   : > { %219 = vst [vmem:[%s2001_s24 + $0x40] sm:$0xff] %v218_v8  ;;  %v224_v11 = vld [vmem:[%s1996_s28 + $0x98] sm:$0xff]  ;;  %221 = vst [vmem:[%s2001_s24 + $0x48] sm:$0xff] %v220_v9  ;;  %v226_v12 = vld [vmem:[%s1996_s28 + $0xc0] sm:$0xff] }
  0x27   : > { %223 = vst [vmem:[%s2001_s24 + $0x50] sm:$0xff] %v222_v10  ;;  %225 = vst [vmem:[%s2001_s24 + $0x58] sm:$0xff] %v224_v11  ;;  %v228_v13 = vld [vmem:[%s1996_s28 + $0xc8] sm:$0xff]  ;;  %v230_v14 = vld [vmem:[%s1996_s28 + $0xd0] sm:$0xff] }
  0x28   : > { %227 = vst [vmem:[%s2001_s24 + $0x60] sm:$0xff] %v226_v12  ;;  %229 = vst [vmem:[%s2001_s24 + $0x68] sm:$0xff] %v228_v13  ;;  %v232_v15 = vld [vmem:[%s1996_s28 + $0xd8] sm:$0xff]  ;;  %v234_v16 = vld [vmem:[%s1996_s28 + $0x100] sm:$0xff] }
  0x29   : > { %231 = vst [vmem:[%s2001_s24 + $0x70] sm:$0xff] %v230_v14  ;;  %v236_v17 = vld [vmem:[%s1996_s28 + $0x108] sm:$0xff]  ;;  %233 = vst [vmem:[%s2001_s24 + $0x78] sm:$0xff] %v232_v15  ;;  %v238_v18 = vld [vmem:[%s1996_s28 + $0x110] sm:$0xff] }
  0x2a   : > { %235 = vst [vmem:[%s2001_s24 + $0x80] sm:$0xff] %v234_v16  ;;  %237 = vst [vmem:[%s2001_s24 + $0x88] sm:$0xff] %v236_v17  ;;  %v240_v19 = vld [vmem:[%s1996_s28 + $0x118] sm:$0xff]  ;;  %v242_v20 = vld [vmem:[%s1996_s28 + $0x140] sm:$0xff] }
  0x2b   : > { %239 = vst [vmem:[%s2001_s24 + $0x90] sm:$0xff] %v238_v18  ;;  %241 = vst [vmem:[%s2001_s24 + $0x98] sm:$0xff] %v240_v19  ;;  %v244_v21 = vld [vmem:[%s1996_s28 + $0x148] sm:$0xff]  ;;  %v246_v22 = vld [vmem:[%s1996_s28 + $0x150] sm:$0xff] }
  0x2c   : > { %243 = vst [vmem:[%s2001_s24 + $0xa0] sm:$0xff] %v242_v20  ;;  %v248_v23 = vld [vmem:[%s1996_s28 + $0x158] sm:$0xff]  ;;  %245 = vst [vmem:[%s2001_s24 + $0xa8] sm:$0xff] %v244_v21  ;;  %v250_v24 = vld [vmem:[%s1996_s28 + $0x180] sm:$0xff] }
  0x2d   : > { %247 = vst [vmem:[%s2001_s24 + $0xb0] sm:$0xff] %v246_v22  ;;  %249 = vst [vmem:[%s2001_s24 + $0xb8] sm:$0xff] %v248_v23  ;;  %v252_v25 = vld [vmem:[%s1996_s28 + $0x188] sm:$0xff]  ;;  %v254_v26 = vld [vmem:[%s1996_s28 + $0x190] sm:$0xff] }
  0x2e   : > { %251 = vst [vmem:[%s2001_s24 + $0xc0] sm:$0xff] %v250_v24  ;;  %253 = vst [vmem:[%s2001_s24 + $0xc8] sm:$0xff] %v252_v25  ;;  %v256_v27 = vld [vmem:[%s1996_s28 + $0x198] sm:$0xff]  ;;  %v258_v28 = vld [vmem:[%s1996_s28 + $0x1c0] sm:$0xff] }
  0x2f   : > { %255 = vst [vmem:[%s2001_s24 + $0xd0] sm:$0xff] %v254_v26  ;;  %v260_v29 = vld [vmem:[%s1996_s28 + $0x1c8] sm:$0xff]  ;;  %257 = vst [vmem:[%s2001_s24 + $0xd8] sm:$0xff] %v256_v27  ;;  %v262_v30 = vld [vmem:[%s1996_s28 + $0x1d0] sm:$0xff] }
  0x30   : > { %259 = vst [vmem:[%s2001_s24 + $0xe0] sm:$0xff] %v258_v28  ;;  %261 = vst [vmem:[%s2001_s24 + $0xe8] sm:$0xff] %v260_v29  ;;  %v264_v31 = vld [vmem:[%s1996_s28 + $0x1d8] sm:$0xff]  ;;  %v266_v32 = vld [vmem:[%s1996_s28 + $0x200] sm:$0xff] }
  0x31   : > { %263 = vst [vmem:[%s2001_s24 + $0xf0] sm:$0xff] %v262_v30  ;;  %265 = vst [vmem:[%s2001_s24 + $0xf8] sm:$0xff] %v264_v31  ;;  %v268_v33 = vld [vmem:[%s1996_s28 + $0x208] sm:$0xff]  ;;  %v270_v34 = vld [vmem:[%s1996_s28 + $0x210] sm:$0xff] }
  0x32   : > { %267 = vst [vmem:[%s2001_s24 + $0x100] sm:$0xff] %v266_v32  ;;  %v272_v35 = vld [vmem:[%s1996_s28 + $0x218] sm:$0xff]  ;;  %269 = vst [vmem:[%s2001_s24 + $0x108] sm:$0xff] %v268_v33  ;;  %v274_v36 = vld [vmem:[%s1996_s28 + $0x240] sm:$0xff] }
  0x33   : > { %271 = vst [vmem:[%s2001_s24 + $0x110] sm:$0xff] %v270_v34  ;;  %273 = vst [vmem:[%s2001_s24 + $0x118] sm:$0xff] %v272_v35  ;;  %v276_v37 = vld [vmem:[%s1996_s28 + $0x248] sm:$0xff]  ;;  %v278_v38 = vld [vmem:[%s1996_s28 + $0x250] sm:$0xff] }
  0x34   : > { %275 = vst [vmem:[%s2001_s24 + $0x120] sm:$0xff] %v274_v36  ;;  %277 = vst [vmem:[%s2001_s24 + $0x128] sm:$0xff] %v276_v37  ;;  %v280_v39 = vld [vmem:[%s1996_s28 + $0x258] sm:$0xff]  ;;  %v282_v40 = vld [vmem:[%s1996_s28 + $0x280] sm:$0xff] }
  0x35   : > { %279 = vst [vmem:[%s2001_s24 + $0x130] sm:$0xff] %v278_v38  ;;  %v284_v41 = vld [vmem:[%s1996_s28 + $0x288] sm:$0xff]  ;;  %281 = vst [vmem:[%s2001_s24 + $0x138] sm:$0xff] %v280_v39  ;;  %v286_v42 = vld [vmem:[%s1996_s28 + $0x290] sm:$0xff] }
  0x36   : > { %283 = vst [vmem:[%s2001_s24 + $0x140] sm:$0xff] %v282_v40  ;;  %285 = vst [vmem:[%s2001_s24 + $0x148] sm:$0xff] %v284_v41  ;;  %v288_v43 = vld [vmem:[%s1996_s28 + $0x298] sm:$0xff]  ;;  %v290_v44 = vld [vmem:[%s1996_s28 + $0x2c0] sm:$0xff] }
  0x37   : > { %287 = vst [vmem:[%s2001_s24 + $0x150] sm:$0xff] %v286_v42  ;;  %289 = vst [vmem:[%s2001_s24 + $0x158] sm:$0xff] %v288_v43  ;;  %v292_v45 = vld [vmem:[%s1996_s28 + $0x2c8] sm:$0xff]  ;;  %v294_v46 = vld [vmem:[%s1996_s28 + $0x2d0] sm:$0xff] }
  0x38   : > { %291 = vst [vmem:[%s2001_s24 + $0x160] sm:$0xff] %v290_v44  ;;  %v296_v47 = vld [vmem:[%s1996_s28 + $0x2d8] sm:$0xff]  ;;  %293 = vst [vmem:[%s2001_s24 + $0x168] sm:$0xff] %v292_v45  ;;  %v298_v48 = vld [vmem:[%s1996_s28 + $0x300] sm:$0xff] }
  0x39   : > { %295 = vst [vmem:[%s2001_s24 + $0x170] sm:$0xff] %v294_v46  ;;  %297 = vst [vmem:[%s2001_s24 + $0x178] sm:$0xff] %v296_v47  ;;  %v300_v49 = vld [vmem:[%s1996_s28 + $0x308] sm:$0xff]  ;;  %v302_v50 = vld [vmem:[%s1996_s28 + $0x310] sm:$0xff] }
  0x3a   : > { %299 = vst [vmem:[%s2001_s24 + $0x180] sm:$0xff] %v298_v48  ;;  %301 = vst [vmem:[%s2001_s24 + $0x188] sm:$0xff] %v300_v49  ;;  %v304_v51 = vld [vmem:[%s1996_s28 + $0x318] sm:$0xff]  ;;  %v306_v52 = vld [vmem:[%s1996_s28 + $0x340] sm:$0xff] }
  0x3b   : > { %303 = vst [vmem:[%s2001_s24 + $0x190] sm:$0xff] %v302_v50  ;;  %v308_v53 = vld [vmem:[%s1996_s28 + $0x348] sm:$0xff]  ;;  %305 = vst [vmem:[%s2001_s24 + $0x198] sm:$0xff] %v304_v51  ;;  %v310_v54 = vld [vmem:[%s1996_s28 + $0x350] sm:$0xff] }
  0x3c   : > { %307 = vst [vmem:[%s2001_s24 + $0x1a0] sm:$0xff] %v306_v52  ;;  %309 = vst [vmem:[%s2001_s24 + $0x1a8] sm:$0xff] %v308_v53  ;;  %v312_v55 = vld [vmem:[%s1996_s28 + $0x358] sm:$0xff]  ;;  %v314_v56 = vld [vmem:[%s1996_s28 + $0x380] sm:$0xff] }
  0x3d   : > { %311 = vst [vmem:[%s2001_s24 + $0x1b0] sm:$0xff] %v310_v54  ;;  %313 = vst [vmem:[%s2001_s24 + $0x1b8] sm:$0xff] %v312_v55  ;;  %v316_v57 = vld [vmem:[%s1996_s28 + $0x388] sm:$0xff]  ;;  %v318_v58 = vld [vmem:[%s1996_s28 + $0x390] sm:$0xff] }
  0x3e   : > { %315 = vst [vmem:[%s2001_s24 + $0x1c0] sm:$0xff] %v314_v56  ;;  %v320_v59 = vld [vmem:[%s1996_s28 + $0x398] sm:$0xff]  ;;  %317 = vst [vmem:[%s2001_s24 + $0x1c8] sm:$0xff] %v316_v57  ;;  %v322_v60 = vld [vmem:[%s1996_s28 + $0x3c0] sm:$0xff] }
  0x3f   : > { %319 = vst [vmem:[%s2001_s24 + $0x1d0] sm:$0xff] %v318_v58  ;;  %321 = vst [vmem:[%s2001_s24 + $0x1d8] sm:$0xff] %v320_v59  ;;  %v324_v61 = vld [vmem:[%s1996_s28 + $0x3c8] sm:$0xff]  ;;  %v326_v62 = vld [vmem:[%s1996_s28 + $0x3d0] sm:$0xff] }
  0x40   : > { %323 = vst [vmem:[%s2001_s24 + $0x1e0] sm:$0xff] %v322_v60  ;;  %325 = vst [vmem:[%s2001_s24 + $0x1e8] sm:$0xff] %v324_v61  ;;  %v328_v63 = vld [vmem:[%s1996_s28 + $0x3d8] sm:$0xff]  ;;  %v330_v0 = vld [vmem:[%s1996_s28 + $0x400] sm:$0xff] }
  0x41   : > { %327 = vst [vmem:[%s2001_s24 + $0x1f0] sm:$0xff] %v326_v62  ;;  %v332_v1 = vld [vmem:[%s1996_s28 + $0x408] sm:$0xff]  ;;  %329 = vst [vmem:[%s2001_s24 + $0x1f8] sm:$0xff] %v328_v63  ;;  %v334_v2 = vld [vmem:[%s1996_s28 + $0x410] sm:$0xff] }
  0x42   : > { %331 = vst [vmem:[%s2001_s24 + $0x200] sm:$0xff] %v330_v0  ;;  %333 = vst [vmem:[%s2001_s24 + $0x208] sm:$0xff] %v332_v1  ;;  %v336_v3 = vld [vmem:[%s1996_s28 + $0x418] sm:$0xff]  ;;  %v338_v4 = vld [vmem:[%s1996_s28 + $0x440] sm:$0xff] }
  0x43   : > { %335 = vst [vmem:[%s2001_s24 + $0x210] sm:$0xff] %v334_v2  ;;  %337 = vst [vmem:[%s2001_s24 + $0x218] sm:$0xff] %v336_v3  ;;  %v340_v5 = vld [vmem:[%s1996_s28 + $0x448] sm:$0xff]  ;;  %v342_v6 = vld [vmem:[%s1996_s28 + $0x450] sm:$0xff] }
  0x44   : > { %339 = vst [vmem:[%s2001_s24 + $0x220] sm:$0xff] %v338_v4  ;;  %v344_v7 = vld [vmem:[%s1996_s28 + $0x458] sm:$0xff]  ;;  %341 = vst [vmem:[%s2001_s24 + $0x228] sm:$0xff] %v340_v5  ;;  %v346_v8 = vld [vmem:[%s1996_s28 + $0x480] sm:$0xff] }
  0x45   : > { %343 = vst [vmem:[%s2001_s24 + $0x230] sm:$0xff] %v342_v6  ;;  %345 = vst [vmem:[%s2001_s24 + $0x238] sm:$0xff] %v344_v7  ;;  %v348_v9 = vld [vmem:[%s1996_s28 + $0x488] sm:$0xff]  ;;  %v350_v10 = vld [vmem:[%s1996_s28 + $0x490] sm:$0xff] }
  0x46   : > { %347 = vst [vmem:[%s2001_s24 + $0x240] sm:$0xff] %v346_v8  ;;  %349 = vst [vmem:[%s2001_s24 + $0x248] sm:$0xff] %v348_v9  ;;  %v352_v11 = vld [vmem:[%s1996_s28 + $0x498] sm:$0xff]  ;;  %v354_v12 = vld [vmem:[%s1996_s28 + $0x4c0] sm:$0xff] }
  0x47   : > { %351 = vst [vmem:[%s2001_s24 + $0x250] sm:$0xff] %v350_v10  ;;  %v356_v13 = vld [vmem:[%s1996_s28 + $0x4c8] sm:$0xff]  ;;  %353 = vst [vmem:[%s2001_s24 + $0x258] sm:$0xff] %v352_v11  ;;  %v358_v14 = vld [vmem:[%s1996_s28 + $0x4d0] sm:$0xff] }
  0x48   : > { %355 = vst [vmem:[%s2001_s24 + $0x260] sm:$0xff] %v354_v12  ;;  %357 = vst [vmem:[%s2001_s24 + $0x268] sm:$0xff] %v356_v13  ;;  %v360_v15 = vld [vmem:[%s1996_s28 + $0x4d8] sm:$0xff]  ;;  %v362_v16 = vld [vmem:[%s1996_s28 + $0x500] sm:$0xff] }
  0x49   : > { %359 = vst [vmem:[%s2001_s24 + $0x270] sm:$0xff] %v358_v14  ;;  %361 = vst [vmem:[%s2001_s24 + $0x278] sm:$0xff] %v360_v15  ;;  %v364_v17 = vld [vmem:[%s1996_s28 + $0x508] sm:$0xff]  ;;  %v366_v18 = vld [vmem:[%s1996_s28 + $0x510] sm:$0xff] }
  0x4a   : > { %363 = vst [vmem:[%s2001_s24 + $0x280] sm:$0xff] %v362_v16  ;;  %v368_v19 = vld [vmem:[%s1996_s28 + $0x518] sm:$0xff]  ;;  %365 = vst [vmem:[%s2001_s24 + $0x288] sm:$0xff] %v364_v17  ;;  %v370_v20 = vld [vmem:[%s1996_s28 + $0x540] sm:$0xff] }
  0x4b   : > { %367 = vst [vmem:[%s2001_s24 + $0x290] sm:$0xff] %v366_v18  ;;  %369 = vst [vmem:[%s2001_s24 + $0x298] sm:$0xff] %v368_v19  ;;  %v372_v21 = vld [vmem:[%s1996_s28 + $0x548] sm:$0xff]  ;;  %v374_v22 = vld [vmem:[%s1996_s28 + $0x550] sm:$0xff] }
  0x4c   : > { %371 = vst [vmem:[%s2001_s24 + $0x2a0] sm:$0xff] %v370_v20  ;;  %373 = vst [vmem:[%s2001_s24 + $0x2a8] sm:$0xff] %v372_v21  ;;  %v376_v23 = vld [vmem:[%s1996_s28 + $0x558] sm:$0xff]  ;;  %v378_v24 = vld [vmem:[%s1996_s28 + $0x580] sm:$0xff] }
  0x4d   : > { %375 = vst [vmem:[%s2001_s24 + $0x2b0] sm:$0xff] %v374_v22  ;;  %v380_v25 = vld [vmem:[%s1996_s28 + $0x588] sm:$0xff]  ;;  %377 = vst [vmem:[%s2001_s24 + $0x2b8] sm:$0xff] %v376_v23  ;;  %v382_v26 = vld [vmem:[%s1996_s28 + $0x590] sm:$0xff] }
  0x4e   : > { %379 = vst [vmem:[%s2001_s24 + $0x2c0] sm:$0xff] %v378_v24  ;;  %381 = vst [vmem:[%s2001_s24 + $0x2c8] sm:$0xff] %v380_v25  ;;  %v384_v27 = vld [vmem:[%s1996_s28 + $0x598] sm:$0xff]  ;;  %v386_v28 = vld [vmem:[%s1996_s28 + $0x5c0] sm:$0xff] }
  0x4f   : > { %383 = vst [vmem:[%s2001_s24 + $0x2d0] sm:$0xff] %v382_v26  ;;  %385 = vst [vmem:[%s2001_s24 + $0x2d8] sm:$0xff] %v384_v27  ;;  %v388_v29 = vld [vmem:[%s1996_s28 + $0x5c8] sm:$0xff]  ;;  %v390_v30 = vld [vmem:[%s1996_s28 + $0x5d0] sm:$0xff] }
  0x50   : > { %387 = vst [vmem:[%s2001_s24 + $0x2e0] sm:$0xff] %v386_v28  ;;  %v392_v31 = vld [vmem:[%s1996_s28 + $0x5d8] sm:$0xff]  ;;  %389 = vst [vmem:[%s2001_s24 + $0x2e8] sm:$0xff] %v388_v29  ;;  %v394_v32 = vld [vmem:[%s1996_s28 + $0x600] sm:$0xff] }
  0x51   : > { %391 = vst [vmem:[%s2001_s24 + $0x2f0] sm:$0xff] %v390_v30  ;;  %393 = vst [vmem:[%s2001_s24 + $0x2f8] sm:$0xff] %v392_v31  ;;  %v396_v33 = vld [vmem:[%s1996_s28 + $0x608] sm:$0xff]  ;;  %v398_v34 = vld [vmem:[%s1996_s28 + $0x610] sm:$0xff] }
  0x52   : > { %395 = vst [vmem:[%s2001_s24 + $0x300] sm:$0xff] %v394_v32  ;;  %397 = vst [vmem:[%s2001_s24 + $0x308] sm:$0xff] %v396_v33  ;;  %v400_v35 = vld [vmem:[%s1996_s28 + $0x618] sm:$0xff]  ;;  %v402_v36 = vld [vmem:[%s1996_s28 + $0x640] sm:$0xff] }
  0x53   : > { %399 = vst [vmem:[%s2001_s24 + $0x310] sm:$0xff] %v398_v34  ;;  %v404_v37 = vld [vmem:[%s1996_s28 + $0x648] sm:$0xff]  ;;  %401 = vst [vmem:[%s2001_s24 + $0x318] sm:$0xff] %v400_v35  ;;  %v406_v38 = vld [vmem:[%s1996_s28 + $0x650] sm:$0xff] }
  0x54   : > { %403 = vst [vmem:[%s2001_s24 + $0x320] sm:$0xff] %v402_v36  ;;  %405 = vst [vmem:[%s2001_s24 + $0x328] sm:$0xff] %v404_v37  ;;  %v408_v39 = vld [vmem:[%s1996_s28 + $0x658] sm:$0xff]  ;;  %v410_v40 = vld [vmem:[%s1996_s28 + $0x680] sm:$0xff] }
  0x55   : > { %407 = vst [vmem:[%s2001_s24 + $0x330] sm:$0xff] %v406_v38  ;;  %409 = vst [vmem:[%s2001_s24 + $0x338] sm:$0xff] %v408_v39  ;;  %v412_v41 = vld [vmem:[%s1996_s28 + $0x688] sm:$0xff]  ;;  %v414_v42 = vld [vmem:[%s1996_s28 + $0x690] sm:$0xff] }
  0x56   : > { %411 = vst [vmem:[%s2001_s24 + $0x340] sm:$0xff] %v410_v40  ;;  %v416_v43 = vld [vmem:[%s1996_s28 + $0x698] sm:$0xff]  ;;  %413 = vst [vmem:[%s2001_s24 + $0x348] sm:$0xff] %v412_v41  ;;  %v418_v44 = vld [vmem:[%s1996_s28 + $0x6c0] sm:$0xff] }
  0x57   : > { %415 = vst [vmem:[%s2001_s24 + $0x350] sm:$0xff] %v414_v42  ;;  %417 = vst [vmem:[%s2001_s24 + $0x358] sm:$0xff] %v416_v43  ;;  %v420_v45 = vld [vmem:[%s1996_s28 + $0x6c8] sm:$0xff]  ;;  %v422_v46 = vld [vmem:[%s1996_s28 + $0x6d0] sm:$0xff] }
  0x58   : > { %419 = vst [vmem:[%s2001_s24 + $0x360] sm:$0xff] %v418_v44  ;;  %421 = vst [vmem:[%s2001_s24 + $0x368] sm:$0xff] %v420_v45  ;;  %v424_v47 = vld [vmem:[%s1996_s28 + $0x6d8] sm:$0xff]  ;;  %v426_v48 = vld [vmem:[%s1996_s28 + $0x700] sm:$0xff] }
  0x59   : > { %423 = vst [vmem:[%s2001_s24 + $0x370] sm:$0xff] %v422_v46  ;;  %v428_v49 = vld [vmem:[%s1996_s28 + $0x708] sm:$0xff]  ;;  %425 = vst [vmem:[%s2001_s24 + $0x378] sm:$0xff] %v424_v47  ;;  %v430_v50 = vld [vmem:[%s1996_s28 + $0x710] sm:$0xff] }
  0x5a   : > { %427 = vst [vmem:[%s2001_s24 + $0x380] sm:$0xff] %v426_v48  ;;  %429 = vst [vmem:[%s2001_s24 + $0x388] sm:$0xff] %v428_v49  ;;  %v432_v51 = vld [vmem:[%s1996_s28 + $0x718] sm:$0xff]  ;;  %v434_v52 = vld [vmem:[%s1996_s28 + $0x740] sm:$0xff] }
  0x5b   : > { %431 = vst [vmem:[%s2001_s24 + $0x390] sm:$0xff] %v430_v50  ;;  %433 = vst [vmem:[%s2001_s24 + $0x398] sm:$0xff] %v432_v51  ;;  %v436_v53 = vld [vmem:[%s1996_s28 + $0x748] sm:$0xff]  ;;  %v438_v54 = vld [vmem:[%s1996_s28 + $0x750] sm:$0xff] }
  0x5c   : > { %435 = vst [vmem:[%s2001_s24 + $0x3a0] sm:$0xff] %v434_v52  ;;  %v440_v55 = vld [vmem:[%s1996_s28 + $0x758] sm:$0xff]  ;;  %437 = vst [vmem:[%s2001_s24 + $0x3a8] sm:$0xff] %v436_v53  ;;  %v442_v56 = vld [vmem:[%s1996_s28 + $0x780] sm:$0xff] }
  0x5d   : > { %439 = vst [vmem:[%s2001_s24 + $0x3b0] sm:$0xff] %v438_v54  ;;  %441 = vst [vmem:[%s2001_s24 + $0x3b8] sm:$0xff] %v440_v55  ;;  %v444_v57 = vld [vmem:[%s1996_s28 + $0x788] sm:$0xff]  ;;  %v446_v58 = vld [vmem:[%s1996_s28 + $0x790] sm:$0xff] }
  0x5e   : > { %443 = vst [vmem:[%s2001_s24 + $0x3c0] sm:$0xff] %v442_v56  ;;  %445 = vst [vmem:[%s2001_s24 + $0x3c8] sm:$0xff] %v444_v57  ;;  %v448_v59 = vld [vmem:[%s1996_s28 + $0x798] sm:$0xff]  ;;  %v450_v60 = vld [vmem:[%s1996_s28 + $0x7c0] sm:$0xff] }
  0x5f   : > { %447 = vst [vmem:[%s2001_s24 + $0x3d0] sm:$0xff] %v446_v58  ;;  %v452_v61 = vld [vmem:[%s1996_s28 + $0x7c8] sm:$0xff]  ;;  %449 = vst [vmem:[%s2001_s24 + $0x3d8] sm:$0xff] %v448_v59  ;;  %v454_v62 = vld [vmem:[%s1996_s28 + $0x7d0] sm:$0xff] }
  0x60   : > { %451 = vst [vmem:[%s2001_s24 + $0x3e0] sm:$0xff] %v450_v60  ;;  %453 = vst [vmem:[%s2001_s24 + $0x3e8] sm:$0xff] %v452_v61  ;;  %v456_v63 = vld [vmem:[%s1996_s28 + $0x7d8] sm:$0xff] }
  0x61   : > { %455 = vst [vmem:[%s2001_s24 + $0x3f0] sm:$0xff] %v454_v62  ;;  %457 = vst [vmem:[%s2001_s24 + $0x3f8] sm:$0xff] %v456_v63 }
  0x62 PF: > { %p1730_p8 = scmp.ge.s32.totalorder %s1889_s20, 1  ;;  %p478_p9 = scmp.lt.s32.totalorder %s1889_s20, 17 }
  0x64   : > { %p479_p10 = pnand %p1730_p8, %p478_p9 }
  0x65   : > { %s485_s29 = sand.u32 (!%p479_p10), 1, %s1857_s12   ;;  %s1732_s30 = sshll.u32 (!%p479_p10), %s1865_s14, 6 }
  0x66   : > { %482 = sbr.rel (%p479_p10) target bundleno = 604 (0x25c), region = 47  ;;  %s1731_s5 = sshll.u32 (!%p479_p10), %s485_s29, 10 }
  0x67   : > { %p541_p11 = scmp.lt.s32.totalorder (!%p479_p10), %s1873_s16, 3  ;;  %p543_p12 = scmp.lt.s32.totalorder (!%p479_p10), %s1732_s30, 127 }
  0x68   : > { %s1735_s7 = sshll.u32 (!%p479_p10), %s1869_s15, 5  ;;  %p568_p0 = scmp.lt.s32.totalorder (!%p479_p10), %s1869_s15, 1 }
  0x69   : > { %p556_p13 = scmp.lt.s32.totalorder (!%p479_p10), %s1735_s7, 63  ;;  %p1740_p1 = scmp.ne.s32.totalorder (!%p479_p10), %s1865_s14, 0 }
  0x6b   : > { %s2788_s16 = smov (!%p541_p11, %s1873_s16), 3  ;;  %s2790_s30 = smov (!%p543_p12, %s1732_s30), 127 }
  0x6c   : > { %s1733_s6 = sshll.u32 %s2788_s16, 7  ;;  %s1736_s10 = sshll.u32 %s2788_s16, 6 }
  0x6d   : > { %s549_s8 = sadd.s32 %s1733_s6, %s2790_s30  ;;  %s2792_s7 = smov (!%p556_p13, %s1735_s7), 63 }
  0x6e   : > { %s1734_s9 = sshll.u32 %s549_s8, 3  ;;  %s2794_s15 = smov (!%p568_p0, %s1869_s15), 1 }
  0x6f   : > { %s2266_s26 = scalar_lea.vmem %s2757_s1, %s1734_s9  ;;  %s562_s12 = sadd.s32 %s1736_s10, %s2792_s7 }
  0x70   : > { %s1738_s27 = sshll.u32 %s2788_s16, 1  ;;  %s1737_s28 = sshll.u32 %s562_s12, 3 }
  0x71   : > { %s574_s24 = sadd.s32 %s1738_s27, %s2794_s15  ;;  %s2273_s23 = scalar_lea.vmem %s2758_s2, %s1737_s28 }
  0x72   : > { %s1739_s30 = sshll.u32 %s574_s24, 1  ;;  %s2280_s9 = scalar_lea.vmem [#allocation3], %s1731_s5 }
  0x73   : > { %s2278_s22 = scalar_lea.vmem %s2759_s3, %s1739_s30  ;;  %580 = sbr.rel (%p1740_p1) target bundleno = 137 (0x89), region = 55 }
  0x78   : > { %v1891_v0 = vmov 0.0  }
  0x79   : > { %581 = vst [vmem:[#allocation2 + $0xb0] sm:$0xff] %v1891_v0  ;;  %582 = vst [vmem:[#allocation2] sm:$0xff] %v1891_v0 }
  0x7a   : > { %583 = vst [vmem:[#allocation2 + $0xd8] sm:$0xff] %v1891_v0  ;;  %584 = vst [vmem:[#allocation2 + $0x18] sm:$0xff] %v1891_v0 }
  0x7b   : > { %585 = vst [vmem:[#allocation2 + $0x50] sm:$0xff] %v1891_v0  ;;  %586 = vst [vmem:[#allocation2 + $0x68] sm:$0xff] %v1891_v0 }
  0x7c   : > { %587 = vst [vmem:[#allocation2 + $0x30] sm:$0xff] %v1891_v0  ;;  %588 = vst [vmem:[#allocation2 + $0x48] sm:$0xff] %v1891_v0 }
  0x7d   : > { %589 = vst [vmem:[#allocation2 + $0x80] sm:$0xff] %v1891_v0  ;;  %590 = vst [vmem:[#allocation2 + $0x88] sm:$0xff] %v1891_v0 }
  0x7e   : > { %591 = vst [vmem:[#allocation2 + $0xe8] sm:$0xff] %v1891_v0  ;;  %592 = vst [vmem:[#allocation2 + $0xb8] sm:$0xff] %v1891_v0 }
  0x7f   : > { %593 = vst [vmem:[#allocation2 + $0x60] sm:$0xff] %v1891_v0  ;;  %594 = vst [vmem:[#allocation2 + $0xf0] sm:$0xff] %v1891_v0 }
  0x80   : > { %595 = vst [vmem:[#allocation2 + $0x8] sm:$0xff] %v1891_v0  ;;  %596 = vst [vmem:[#allocation2 + $0x78] sm:$0xff] %v1891_v0 }
  0x81   : > { %597 = vst [vmem:[#allocation2 + $0x38] sm:$0xff] %v1891_v0  ;;  %598 = vst [vmem:[#allocation2 + $0x58] sm:$0xff] %v1891_v0 }
  0x82   : > { %599 = vst [vmem:[#allocation2 + $0x40] sm:$0xff] %v1891_v0  ;;  %600 = vst [vmem:[#allocation2 + $0xc8] sm:$0xff] %v1891_v0 }
  0x83   : > { %601 = vst [vmem:[#allocation2 + $0xe0] sm:$0xff] %v1891_v0  ;;  %602 = vst [vmem:[#allocation2 + $0x90] sm:$0xff] %v1891_v0 }
  0x84   : > { %603 = vst [vmem:[#allocation2 + $0x70] sm:$0xff] %v1891_v0  ;;  %604 = vst [vmem:[#allocation2 + $0xc0] sm:$0xff] %v1891_v0 }
  0x85   : > { %605 = vst [vmem:[#allocation2 + $0xa8] sm:$0xff] %v1891_v0  ;;  %606 = vst [vmem:[#allocation2 + $0xd0] sm:$0xff] %v1891_v0 }
  0x86   : > { %607 = vst [vmem:[#allocation2 + $0x10] sm:$0xff] %v1891_v0  ;;  %608 = vst [vmem:[#allocation2 + $0x28] sm:$0xff] %v1891_v0 }
  0x87   : > { %609 = vst [vmem:[#allocation2 + $0xa0] sm:$0xff] %v1891_v0  ;;  %610 = vst [vmem:[#allocation2 + $0xf8] sm:$0xff] %v1891_v0 }
  0x88   : > { %611 = vst [vmem:[#allocation2 + $0x20] sm:$0xff] %v1891_v0  ;;  %612 = vst [vmem:[#allocation2 + $0x98] sm:$0xff] %v1891_v0 }
  0x89 PF: > { %v788_v1 = vld [vmem:[%s2266_s26 + $0x78] sm:$0xff]  ;;  %v1892_v3 = vmov 0.0   ;;  %v787_v4 = vld [vmem:[%s2266_s26 + $0x70] sm:$0xff]  ;;  %v786_v6 = vld [vmem:[%s2266_s26 + $0x68] sm:$0xff]  ;;  %p1741_p2 = scmp.ne.s32.totalorder %s1865_s14, 1 }
  0x8a   : > { %v820_v2 = vld [vmem:[%s2266_s26 + $0x178] sm:$0xff]  ;;  %837 = vmatprep.subr.mxu0 %v1892_v3  ;;  %1062 = vmatprep.subr.mxu1 %v1892_v3  ;;  %v819_v5 = vld [vmem:[%s2266_s26 + $0x170] sm:$0xff]  ;;  %v818_v7 = vld [vmem:[%s2266_s26 + $0x168] sm:$0xff] }
  0x8b   : > { %838 = vmatpush1.msra.mxu0 %v788_v1  ;;  %1063 = vmatpush1.msra.mxu1 %v820_v2  ;;  %v785_v8 = vld [vmem:[%s2266_s26 + $0x60] sm:$0xff]  ;;  %v784_v10 = vld [vmem:[%s2266_s26 + $0x58] sm:$0xff]  ;;  %v783_v12 = vld [vmem:[%s2266_s26 + $0x50] sm:$0xff] }
  0x8c   : > { %839 = vmatprep.subr.mxu0 %v1892_v3  ;;  %1064 = vmatprep.subr.mxu1 %v1892_v3  ;;  %v817_v9 = vld [vmem:[%s2266_s26 + $0x160] sm:$0xff]  ;;  %v816_v11 = vld [vmem:[%s2266_s26 + $0x158] sm:$0xff]  ;;  %v815_v13 = vld [vmem:[%s2266_s26 + $0x150] sm:$0xff] }
  0x8d   : > { %840 = vmatpush1.msra.mxu0 %v787_v4  ;;  %1065 = vmatpush1.msra.mxu1 %v819_v5  ;;  %v782_v14 = vld [vmem:[%s2266_s26 + $0x48] sm:$0xff]  ;;  %v781_v16 = vld [vmem:[%s2266_s26 + $0x40] sm:$0xff]  ;;  %v780_v18 = vld [vmem:[%s2266_s26 + $0x38] sm:$0xff] }
  0x8e   : > { %841 = vmatprep.subr.mxu0 %v1892_v3  ;;  %1066 = vmatprep.subr.mxu1 %v1892_v3  ;;  %v814_v15 = vld [vmem:[%s2266_s26 + $0x148] sm:$0xff]  ;;  %v813_v17 = vld [vmem:[%s2266_s26 + $0x140] sm:$0xff]  ;;  %v812_v19 = vld [vmem:[%s2266_s26 + $0x138] sm:$0xff] }
  0x8f   : > { %842 = vmatpush1.msra.mxu0 %v786_v6  ;;  %1067 = vmatpush1.msra.mxu1 %v818_v7  ;;  %v779_v20 = vld [vmem:[%s2266_s26 + $0x30] sm:$0xff]  ;;  %v778_v22 = vld [vmem:[%s2266_s26 + $0x28] sm:$0xff]  ;;  %v777_v24 = vld [vmem:[%s2266_s26 + $0x20] sm:$0xff] }
  0x90   : > { %843 = vmatprep.subr.mxu0 %v1892_v3  ;;  %1068 = vmatprep.subr.mxu1 %v1892_v3  ;;  %v811_v21 = vld [vmem:[%s2266_s26 + $0x130] sm:$0xff]  ;;  %v810_v23 = vld [vmem:[%s2266_s26 + $0x128] sm:$0xff]  ;;  %v809_v25 = vld [vmem:[%s2266_s26 + $0x120] sm:$0xff] }
  0x91   : > { %844 = vmatpush1.msra.mxu0 %v785_v8  ;;  %1069 = vmatpush1.msra.mxu1 %v817_v9  ;;  %v776_v26 = vld [vmem:[%s2266_s26 + $0x18] sm:$0xff]  ;;  %v775_v28 = vld [vmem:[%s2266_s26 + $0x10] sm:$0xff]  ;;  %v774_v30 = vld [vmem:[%s2266_s26 + $0x8] sm:$0xff] }
  0x92   : > { %845 = vmatprep.subr.mxu0 %v1892_v3  ;;  %1070 = vmatprep.subr.mxu1 %v1892_v3  ;;  %v808_v27 = vld [vmem:[%s2266_s26 + $0x118] sm:$0xff]  ;;  %v807_v29 = vld [vmem:[%s2266_s26 + $0x110] sm:$0xff]  ;;  %v806_v31 = vld [vmem:[%s2266_s26 + $0x108] sm:$0xff] }
  0x93   : > { %846 = vmatpush1.msra.mxu0 %v784_v10  ;;  %1071 = vmatpush1.msra.mxu1 %v816_v11  ;;  %v773_v32 = vld [vmem:[%s2266_s26] sm:$0xff]  ;;  %v804_v34 = vld [vmem:[%s2266_s26 + $0xf8] sm:$0xff]  ;;  %v803_v36 = vld [vmem:[%s2266_s26 + $0xf0] sm:$0xff] }
  0x94   : > { %847 = vmatprep.subr.mxu0 %v1892_v3  ;;  %1072 = vmatprep.subr.mxu1 %v1892_v3  ;;  %v805_v33 = vld [vmem:[%s2266_s26 + $0x100] sm:$0xff]  ;;  %v836_v35 = vld [vmem:[%s2266_s26 + $0x1f8] sm:$0xff]  ;;  %v835_v37 = vld [vmem:[%s2266_s26 + $0x1f0] sm:$0xff] }
  0x95   : > { %848 = vmatpush1.msra.mxu0 %v783_v12  ;;  %1073 = vmatpush1.msra.mxu1 %v815_v13  ;;  %v802_v38 = vld [vmem:[%s2266_s26 + $0xe8] sm:$0xff]  ;;  %v801_v40 = vld [vmem:[%s2266_s26 + $0xe0] sm:$0xff]  ;;  %v800_v42 = vld [vmem:[%s2266_s26 + $0xd8] sm:$0xff] }
  0x96   : > { %849 = vmatprep.subr.mxu0 %v1892_v3  ;;  %1074 = vmatprep.subr.mxu1 %v1892_v3  ;;  %v834_v39 = vld [vmem:[%s2266_s26 + $0x1e8] sm:$0xff]  ;;  %v833_v41 = vld [vmem:[%s2266_s26 + $0x1e0] sm:$0xff]  ;;  %v832_v43 = vld [vmem:[%s2266_s26 + $0x1d8] sm:$0xff] }
  0x97   : > { %850 = vmatpush1.msra.mxu0 %v782_v14  ;;  %1075 = vmatpush1.msra.mxu1 %v814_v15  ;;  %v799_v44 = vld [vmem:[%s2266_s26 + $0xd0] sm:$0xff]  ;;  %v798_v46 = vld [vmem:[%s2266_s26 + $0xc8] sm:$0xff]  ;;  %v797_v48 = vld [vmem:[%s2266_s26 + $0xc0] sm:$0xff] }
  0x98   : > { %851 = vmatprep.subr.mxu0 %v1892_v3  ;;  %1076 = vmatprep.subr.mxu1 %v1892_v3  ;;  %v831_v45 = vld [vmem:[%s2266_s26 + $0x1d0] sm:$0xff]  ;;  %v830_v47 = vld [vmem:[%s2266_s26 + $0x1c8] sm:$0xff]  ;;  %v829_v49 = vld [vmem:[%s2266_s26 + $0x1c0] sm:$0xff] }
  0x99   : > { %852 = vmatpush1.msra.mxu0 %v781_v16  ;;  %1077 = vmatpush1.msra.mxu1 %v813_v17  ;;  %v796_v50 = vld [vmem:[%s2266_s26 + $0xb8] sm:$0xff]  ;;  %v795_v52 = vld [vmem:[%s2266_s26 + $0xb0] sm:$0xff]  ;;  %v794_v54 = vld [vmem:[%s2266_s26 + $0xa8] sm:$0xff] }
  0x9a   : > { %853 = vmatprep.subr.mxu0 %v1892_v3  ;;  %1078 = vmatprep.subr.mxu1 %v1892_v3  ;;  %v828_v51 = vld [vmem:[%s2266_s26 + $0x1b8] sm:$0xff]  ;;  %v827_v53 = vld [vmem:[%s2266_s26 + $0x1b0] sm:$0xff]  ;;  %v826_v55 = vld [vmem:[%s2266_s26 + $0x1a8] sm:$0xff] }
  0x9b   : > { %854 = vmatpush1.msra.mxu0 %v780_v18  ;;  %1079 = vmatpush1.msra.mxu1 %v812_v19  ;;  %v793_v56 = vld [vmem:[%s2266_s26 + $0xa0] sm:$0xff]  ;;  %v792_v58 = vld [vmem:[%s2266_s26 + $0x98] sm:$0xff]  ;;  %v791_v60 = vld [vmem:[%s2266_s26 + $0x90] sm:$0xff] }
  0x9c   : > { %855 = vmatprep.subr.mxu0 %v1892_v3  ;;  %1080 = vmatprep.subr.mxu1 %v1892_v3  ;;  %v825_v57 = vld [vmem:[%s2266_s26 + $0x1a0] sm:$0xff]  ;;  %v824_v59 = vld [vmem:[%s2266_s26 + $0x198] sm:$0xff]  ;;  %v823_v61 = vld [vmem:[%s2266_s26 + $0x190] sm:$0xff] }
  0x9d   : > { %856 = vmatpush1.msra.mxu0 %v779_v20  ;;  %1081 = vmatpush1.msra.mxu1 %v811_v21  ;;  %v790_v62 = vld [vmem:[%s2266_s26 + $0x88] sm:$0xff]  ;;  %v789_v0 = vld [vmem:[%s2266_s26 + $0x80] sm:$0xff]  ;;  %v648_v4 = vld [vmem:[%s2280_s9 + $0x18] sm:$0xff] }
  0x9e   : > { %857 = vmatprep.subr.mxu0 %v1892_v3  ;;  %1082 = vmatprep.subr.mxu1 %v1892_v3  ;;  %v822_v63 = vld [vmem:[%s2266_s26 + $0x188] sm:$0xff]  ;;  %v821_v2 = vld [vmem:[%s2266_s26 + $0x180] sm:$0xff]  ;;  %v647_v6 = vld [vmem:[%s2280_s9 + $0x10] sm:$0xff] }
  0x9f   : > { %858 = vmatpush1.msra.mxu0 %v778_v22  ;;  %1083 = vmatpush1.msra.mxu1 %v810_v23  ;;  %v646_v1 = vld [vmem:[%s2280_s9 + $0x8] sm:$0xff]  ;;  %v645_v5 = vld [vmem:[%s2280_s9] sm:$0xff]  ;;  %v652_v8 = vld [vmem:[%s2280_s9 + $0x38] sm:$0xff] }
  0xa0   : > { %859 = vmatprep.subr.mxu0 %v1892_v3  ;;  %1084 = vmatprep.subr.mxu1 %v1892_v3  ;;  %v650_v7 = vld [vmem:[%s2280_s9 + $0x28] sm:$0xff]  ;;  %v649_v9 = vld [vmem:[%s2280_s9 + $0x20] sm:$0xff]  ;;  %v656_v11 = vld [vmem:[%s2280_s9 + $0x58] sm:$0xff] }
  0xa1   : > { %860 = vmatpush1.msra.mxu0 %v777_v24  ;;  %1085 = vmatpush1.msra.mxu1 %v809_v25  ;;  %v654_v10 = vld [vmem:[%s2280_s9 + $0x48] sm:$0xff]  ;;  %v653_v12 = vld [vmem:[%s2280_s9 + $0x40] sm:$0xff]  ;;  %v655_v13 = vld [vmem:[%s2280_s9 + $0x50] sm:$0xff] }
  0xa2   : > { %861 = vmatprep.subr.mxu0 %v1892_v3  ;;  %1086 = vmatprep.subr.mxu1 %v1892_v3  ;;  %v658_v14 = vld [vmem:[%s2280_s9 + $0x68] sm:$0xff]  ;;  %v660_v15 = vld [vmem:[%s2280_s9 + $0x78] sm:$0xff]  ;;  %v657_v16 = vld [vmem:[%s2280_s9 + $0x60] sm:$0xff] }
  0xa3   : > { %862 = vmatpush1.msra.mxu0 %v776_v26  ;;  %1087 = vmatpush1.msra.mxu1 %v808_v27  ;;  %v659_v17 = vld [vmem:[%s2280_s9 + $0x70] sm:$0xff]  ;;  %v662_v18 = vld [vmem:[%s2280_s9 + $0x88] sm:$0xff]  ;;  %v664_v19 = vld [vmem:[%s2280_s9 + $0x98] sm:$0xff] }
  0xa4   : > { %863 = vmatprep.subr.mxu0 %v1892_v3  ;;  %1088 = vmatprep.subr.mxu1 %v1892_v3  ;;  %v661_v20 = vld [vmem:[%s2280_s9 + $0x80] sm:$0xff]  ;;  %v663_v21 = vld [vmem:[%s2280_s9 + $0x90] sm:$0xff]  ;;  %v666_v22 = vld [vmem:[%s2280_s9 + $0xa8] sm:$0xff] }
  0xa5   : > { %864 = vmatpush1.msra.mxu0 %v775_v28  ;;  %1089 = vmatpush1.msra.mxu1 %v807_v29  ;;  %v668_v23 = vld [vmem:[%s2280_s9 + $0xb8] sm:$0xff]  ;;  %v665_v24 = vld [vmem:[%s2280_s9 + $0xa0] sm:$0xff]  ;;  %v667_v25 = vld [vmem:[%s2280_s9 + $0xb0] sm:$0xff] }
  0xa6   : > { %865 = vmatprep.subr.mxu0 %v1892_v3  ;;  %1090 = vmatprep.subr.mxu1 %v1892_v3  ;;  %v670_v26 = vld [vmem:[%s2280_s9 + $0xc8] sm:$0xff]  ;;  %v672_v27 = vld [vmem:[%s2280_s9 + $0xd8] sm:$0xff]  ;;  %v669_v28 = vld [vmem:[%s2280_s9 + $0xc0] sm:$0xff] }
  0xa7   : > { %866 = vmatpush1.msra.mxu0 %v774_v30  ;;  %1091 = vmatpush1.msra.mxu1 %v806_v31  ;;  %v671_v29 = vld [vmem:[%s2280_s9 + $0xd0] sm:$0xff]  ;;  %v674_v30 = vld [vmem:[%s2280_s9 + $0xe8] sm:$0xff]  ;;  %v676_v31 = vld [vmem:[%s2280_s9 + $0xf8] sm:$0xff] }
  0xa8   : > { %867 = vmatprep.subr.mxu0 %v1892_v3  ;;  %1092 = vmatprep.subr.mxu1 %v1892_v3 }
  0xa9   : > { %868 = vmatpush1.msra.mxu0 %v773_v32  ;;  %1093 = vmatpush1.msra.mxu1 %v805_v33  ;;  %v673_v32 = vld [vmem:[%s2280_s9 + $0xe0] sm:$0xff]  ;;  %v675_v33 = vld [vmem:[%s2280_s9 + $0xf0] sm:$0xff] }
  0xaa   : > { %869 = vmatprep.subr.mxu0 %v1892_v3  ;;  %1094 = vmatprep.subr.mxu1 %v1892_v3 }
  0xab   : > { %870 = vmatpush2.msra.mxu0 %v804_v34  ;;  %1095 = vmatpush2.msra.mxu1 %v836_v35  ;;  %v678_v34 = vld [vmem:[%s2280_s9 + $0x108] sm:$0xff]  ;;  %v680_v35 = vld [vmem:[%s2280_s9 + $0x118] sm:$0xff] }
  0xac   : > { %871 = vmatprep.subr.mxu0 %v1892_v3  ;;  %1096 = vmatprep.subr.mxu1 %v1892_v3 }
  0xad   : > { %872 = vmatpush2.msra.mxu0 %v803_v36  ;;  %1097 = vmatpush2.msra.mxu1 %v835_v37  ;;  %v677_v36 = vld [vmem:[%s2280_s9 + $0x100] sm:$0xff]  ;;  %v679_v37 = vld [vmem:[%s2280_s9 + $0x110] sm:$0xff] }
  0xae   : > { %873 = vmatprep.subr.mxu0 %v1892_v3  ;;  %1098 = vmatprep.subr.mxu1 %v1892_v3 }
  0xaf   : > { %874 = vmatpush2.msra.mxu0 %v802_v38  ;;  %1099 = vmatpush2.msra.mxu1 %v834_v39  ;;  %v682_v38 = vld [vmem:[%s2280_s9 + $0x128] sm:$0xff]  ;;  %v684_v39 = vld [vmem:[%s2280_s9 + $0x138] sm:$0xff] }
  0xb0   : > { %875 = vmatprep.subr.mxu0 %v1892_v3  ;;  %1100 = vmatprep.subr.mxu1 %v1892_v3 }
  0xb1   : > { %876 = vmatpush2.msra.mxu0 %v801_v40  ;;  %1101 = vmatpush2.msra.mxu1 %v833_v41  ;;  %v681_v40 = vld [vmem:[%s2280_s9 + $0x120] sm:$0xff]  ;;  %v683_v41 = vld [vmem:[%s2280_s9 + $0x130] sm:$0xff] }
  0xb2   : > { %877 = vmatprep.subr.mxu0 %v1892_v3  ;;  %1102 = vmatprep.subr.mxu1 %v1892_v3 }
  0xb3   : > { %878 = vmatpush2.msra.mxu0 %v800_v42  ;;  %1103 = vmatpush2.msra.mxu1 %v832_v43  ;;  %v686_v42 = vld [vmem:[%s2280_s9 + $0x148] sm:$0xff]  ;;  %v688_v43 = vld [vmem:[%s2280_s9 + $0x158] sm:$0xff] }
  0xb4   : > { %879 = vmatprep.subr.mxu0 %v1892_v3  ;;  %1104 = vmatprep.subr.mxu1 %v1892_v3 }
  0xb5   : > { %880 = vmatpush2.msra.mxu0 %v799_v44  ;;  %1105 = vmatpush2.msra.mxu1 %v831_v45  ;;  %v685_v44 = vld [vmem:[%s2280_s9 + $0x140] sm:$0xff]  ;;  %v687_v45 = vld [vmem:[%s2280_s9 + $0x150] sm:$0xff] }
  0xb6   : > { %881 = vmatprep.subr.mxu0 %v1892_v3  ;;  %1106 = vmatprep.subr.mxu1 %v1892_v3 }
  0xb7   : > { %882 = vmatpush2.msra.mxu0 %v798_v46  ;;  %1107 = vmatpush2.msra.mxu1 %v830_v47  ;;  %v690_v46 = vld [vmem:[%s2280_s9 + $0x168] sm:$0xff]  ;;  %v692_v47 = vld [vmem:[%s2280_s9 + $0x178] sm:$0xff] }
  0xb8   : > { %883 = vmatprep.subr.mxu0 %v1892_v3  ;;  %1108 = vmatprep.subr.mxu1 %v1892_v3 }
  0xb9   : > { %884 = vmatpush2.msra.mxu0 %v797_v48  ;;  %1109 = vmatpush2.msra.mxu1 %v829_v49  ;;  %v689_v48 = vld [vmem:[%s2280_s9 + $0x160] sm:$0xff]  ;;  %v691_v49 = vld [vmem:[%s2280_s9 + $0x170] sm:$0xff] }
  0xba   : > { %885 = vmatprep.subr.mxu0 %v1892_v3  ;;  %1110 = vmatprep.subr.mxu1 %v1892_v3 }
  0xbb   : > { %886 = vmatpush2.msra.mxu0 %v796_v50  ;;  %1111 = vmatpush2.msra.mxu1 %v828_v51  ;;  %v694_v50 = vld [vmem:[%s2280_s9 + $0x188] sm:$0xff]  ;;  %v696_v51 = vld [vmem:[%s2280_s9 + $0x198] sm:$0xff] }
  0xbc   : > { %887 = vmatprep.subr.mxu0 %v1892_v3  ;;  %1112 = vmatprep.subr.mxu1 %v1892_v3 }
  0xbd   : > { %888 = vmatpush2.msra.mxu0 %v795_v52  ;;  %1113 = vmatpush2.msra.mxu1 %v827_v53  ;;  %v693_v52 = vld [vmem:[%s2280_s9 + $0x180] sm:$0xff]  ;;  %v695_v53 = vld [vmem:[%s2280_s9 + $0x190] sm:$0xff] }
  0xbe   : > { %889 = vmatprep.subr.mxu0 %v1892_v3  ;;  %1114 = vmatprep.subr.mxu1 %v1892_v3 }
  0xbf   : > { %890 = vmatpush2.msra.mxu0 %v794_v54  ;;  %1115 = vmatpush2.msra.mxu1 %v826_v55  ;;  %v698_v54 = vld [vmem:[%s2280_s9 + $0x1a8] sm:$0xff]  ;;  %v700_v55 = vld [vmem:[%s2280_s9 + $0x1b8] sm:$0xff] }
  0xc0   : > { %891 = vmatprep.subr.mxu0 %v1892_v3  ;;  %1116 = vmatprep.subr.mxu1 %v1892_v3 }
  0xc1   : > { %892 = vmatpush2.msra.mxu0 %v793_v56  ;;  %1117 = vmatpush2.msra.mxu1 %v825_v57  ;;  %v697_v56 = vld [vmem:[%s2280_s9 + $0x1a0] sm:$0xff]  ;;  %v699_v57 = vld [vmem:[%s2280_s9 + $0x1b0] sm:$0xff] }
  0xc2   : > { %893 = vmatprep.subr.mxu0 %v1892_v3  ;;  %1118 = vmatprep.subr.mxu1 %v1892_v3 }
  0xc3   : > { %894 = vmatpush2.msra.mxu0 %v792_v58  ;;  %1119 = vmatpush2.msra.mxu1 %v824_v59  ;;  %v702_v58 = vld [vmem:[%s2280_s9 + $0x1c8] sm:$0xff]  ;;  %v704_v59 = vld [vmem:[%s2280_s9 + $0x1d8] sm:$0xff] }
  0xc4   : > { %895 = vmatprep.subr.mxu0 %v1892_v3  ;;  %1120 = vmatprep.subr.mxu1 %v1892_v3 }
  0xc5   : > { %896 = vmatpush2.msra.mxu0 %v791_v60  ;;  %1121 = vmatpush2.msra.mxu1 %v823_v61  ;;  %v701_v60 = vld [vmem:[%s2280_s9 + $0x1c0] sm:$0xff]  ;;  %v703_v61 = vld [vmem:[%s2280_s9 + $0x1d0] sm:$0xff] }
  0xc6   : > { %897 = vmatprep.subr.mxu0 %v1892_v3  ;;  %1122 = vmatprep.subr.mxu1 %v1892_v3 }
  0xc7   : > { %898 = vmatpush2.msra.mxu0 %v790_v62  ;;  %1123 = vmatpush2.msra.mxu1 %v822_v63  ;;  %v706_v62 = vld [vmem:[%s2280_s9 + $0x1e8] sm:$0xff]  ;;  %v708_v63 = vld [vmem:[%s2280_s9 + $0x1f8] sm:$0xff] }
  0xc8   : > { %899 = vmatprep.subr.mxu0 %v1892_v3  ;;  %1124 = vmatprep.subr.mxu1 %v1892_v3  ;;  %v651_v3 = vld [vmem:[%s2280_s9 + $0x30] sm:$0xff] }
  0xc9   : > { %900 = vmatpush2.msra.mxu0 %v789_v0  ;;  %901 = vmatprep.mubr.f32.mxu0 %v646_v1  ;;  %v705_v0 = vld [vmem:[%s2280_s9 + $0x1e0] sm:$0xff]  ;;  %v707_v1 = vld [vmem:[%s2280_s9 + $0x1f0] sm:$0xff] }
  0xca   : > { %1125 = vmatpush2.msra.mxu1 %v821_v2  ;;  %1126 = vmatprep.mubr.f32.mxu1 %v648_v4  ;;  %v710_v2 = vld [vmem:[%s2280_s9 + $0x208] sm:$0xff]  ;;  %v712_v4 = vld [vmem:[%s2280_s9 + $0x218] sm:$0xff] }
  0xcb   : > { %902 = vmatmul.mubr.f32.vlgmr.msra.gmra.mxu0 %v645_v5  ;;  %1127 = vmatmul.mubr.f32.vlgmr.msra.gmra.mxu1 %v647_v6  ;;  %v709_v5 = vld [vmem:[%s2280_s9 + $0x200] sm:$0xff]  ;;  %v711_v6 = vld [vmem:[%s2280_s9 + $0x210] sm:$0xff] }
  0xcc   : > { %906 = vmatprep.mubr.f32.mxu0 %v650_v7  ;;  %1131 = vmatprep.mubr.f32.mxu1 %v652_v8  ;;  %v714_v7 = vld [vmem:[%s2280_s9 + $0x228] sm:$0xff]  ;;  %v716_v8 = vld [vmem:[%s2280_s9 + $0x238] sm:$0xff] }
  0xcf   : > { %907 = vmatmul.mubr.f32.gmra.mxu0 %v649_v9  ;;  %1132 = vmatmul.mubr.f32.gmra.mxu1 %v651_v3  ;;  %v713_v9 = vld [vmem:[%s2280_s9 + $0x220] sm:$0xff]  ;;  %v715_v3 = vld [vmem:[%s2280_s9 + $0x230] sm:$0xff] }
  0xd0   : > { %911 = vmatprep.mubr.f32.mxu0 %v654_v10  ;;  %1136 = vmatprep.mubr.f32.mxu1 %v656_v11  ;;  %v718_v10 = vld [vmem:[%s2280_s9 + $0x248] sm:$0xff]  ;;  %v720_v11 = vld [vmem:[%s2280_s9 + $0x258] sm:$0xff] }
  0xd3   : > { %912 = vmatmul.mubr.f32.gmra.mxu0 %v653_v12  ;;  %1137 = vmatmul.mubr.f32.gmra.mxu1 %v655_v13  ;;  %v717_v12 = vld [vmem:[%s2280_s9 + $0x240] sm:$0xff]  ;;  %v719_v13 = vld [vmem:[%s2280_s9 + $0x250] sm:$0xff] }
  0xd4   : > { %916 = vmatprep.mubr.f32.mxu0 %v658_v14  ;;  %1141 = vmatprep.mubr.f32.mxu1 %v660_v15  ;;  %v722_v14 = vld [vmem:[%s2280_s9 + $0x268] sm:$0xff]  ;;  %v724_v15 = vld [vmem:[%s2280_s9 + $0x278] sm:$0xff] }
  0xd7   : > { %917 = vmatmul.mubr.f32.gmra.mxu0 %v657_v16  ;;  %1142 = vmatmul.mubr.f32.gmra.mxu1 %v659_v17  ;;  %v721_v16 = vld [vmem:[%s2280_s9 + $0x260] sm:$0xff]  ;;  %v723_v17 = vld [vmem:[%s2280_s9 + $0x270] sm:$0xff] }
  0xd8   : > { %921 = vmatprep.mubr.f32.mxu0 %v662_v18  ;;  %1146 = vmatprep.mubr.f32.mxu1 %v664_v19  ;;  %v726_v18 = vld [vmem:[%s2280_s9 + $0x288] sm:$0xff]  ;;  %v728_v19 = vld [vmem:[%s2280_s9 + $0x298] sm:$0xff] }
  0xdb   : > { %922 = vmatmul.mubr.f32.gmra.mxu0 %v661_v20  ;;  %1147 = vmatmul.mubr.f32.gmra.mxu1 %v663_v21  ;;  %v725_v20 = vld [vmem:[%s2280_s9 + $0x280] sm:$0xff]  ;;  %v727_v21 = vld [vmem:[%s2280_s9 + $0x290] sm:$0xff] }
  0xdc   : > { %926 = vmatprep.mubr.f32.mxu0 %v666_v22  ;;  %1151 = vmatprep.mubr.f32.mxu1 %v668_v23  ;;  %v730_v22 = vld [vmem:[%s2280_s9 + $0x2a8] sm:$0xff]  ;;  %v732_v23 = vld [vmem:[%s2280_s9 + $0x2b8] sm:$0xff] }
  0xdf   : > { %927 = vmatmul.mubr.f32.gmra.mxu0 %v665_v24  ;;  %1152 = vmatmul.mubr.f32.gmra.mxu1 %v667_v25  ;;  %v729_v24 = vld [vmem:[%s2280_s9 + $0x2a0] sm:$0xff]  ;;  %v731_v25 = vld [vmem:[%s2280_s9 + $0x2b0] sm:$0xff] }
  0xe0   : > { %931 = vmatprep.mubr.f32.mxu0 %v670_v26  ;;  %1156 = vmatprep.mubr.f32.mxu1 %v672_v27  ;;  %v734_v26 = vld [vmem:[%s2280_s9 + $0x2c8] sm:$0xff]  ;;  %v736_v27 = vld [vmem:[%s2280_s9 + $0x2d8] sm:$0xff] }
  0xe3   : > { %932 = vmatmul.mubr.f32.gmra.mxu0 %v669_v28  ;;  %1157 = vmatmul.mubr.f32.gmra.mxu1 %v671_v29  ;;  %v733_v28 = vld [vmem:[%s2280_s9 + $0x2c0] sm:$0xff]  ;;  %v735_v29 = vld [vmem:[%s2280_s9 + $0x2d0] sm:$0xff] }
  0xe4   : > { %936 = vmatprep.mubr.f32.mxu0 %v674_v30  ;;  %1161 = vmatprep.mubr.f32.mxu1 %v676_v31  ;;  %v738_v30 = vld [vmem:[%s2280_s9 + $0x2e8] sm:$0xff]  ;;  %v740_v31 = vld [vmem:[%s2280_s9 + $0x2f8] sm:$0xff] }
  0xe7   : > { %937 = vmatmul.mubr.f32.gmra.mxu0 %v673_v32  ;;  %1162 = vmatmul.mubr.f32.gmra.mxu1 %v675_v33  ;;  %v737_v32 = vld [vmem:[%s2280_s9 + $0x2e0] sm:$0xff]  ;;  %v739_v33 = vld [vmem:[%s2280_s9 + $0x2f0] sm:$0xff] }
  0xe8   : > { %941 = vmatprep.mubr.f32.mxu0 %v678_v34  ;;  %1166 = vmatprep.mubr.f32.mxu1 %v680_v35  ;;  %v742_v34 = vld [vmem:[%s2280_s9 + $0x308] sm:$0xff]  ;;  %v744_v35 = vld [vmem:[%s2280_s9 + $0x318] sm:$0xff] }
  0xeb   : > { %942 = vmatmul.mubr.f32.gmra.mxu0 %v677_v36  ;;  %1167 = vmatmul.mubr.f32.gmra.mxu1 %v679_v37  ;;  %v741_v36 = vld [vmem:[%s2280_s9 + $0x300] sm:$0xff]  ;;  %v743_v37 = vld [vmem:[%s2280_s9 + $0x310] sm:$0xff] }
  0xec   : > { %946 = vmatprep.mubr.f32.mxu0 %v682_v38  ;;  %1171 = vmatprep.mubr.f32.mxu1 %v684_v39  ;;  %v746_v38 = vld [vmem:[%s2280_s9 + $0x328] sm:$0xff]  ;;  %v748_v39 = vld [vmem:[%s2280_s9 + $0x338] sm:$0xff] }
  0xef   : > { %947 = vmatmul.mubr.f32.gmra.mxu0 %v681_v40  ;;  %1172 = vmatmul.mubr.f32.gmra.mxu1 %v683_v41  ;;  %v745_v40 = vld [vmem:[%s2280_s9 + $0x320] sm:$0xff]  ;;  %v747_v41 = vld [vmem:[%s2280_s9 + $0x330] sm:$0xff] }
  0xf0   : > { %951 = vmatprep.mubr.f32.mxu0 %v686_v42  ;;  %1176 = vmatprep.mubr.f32.mxu1 %v688_v43  ;;  %v750_v42 = vld [vmem:[%s2280_s9 + $0x348] sm:$0xff]  ;;  %v752_v43 = vld [vmem:[%s2280_s9 + $0x358] sm:$0xff] }
  0xf3   : > { %952 = vmatmul.mubr.f32.gmra.mxu0 %v685_v44  ;;  %1177 = vmatmul.mubr.f32.gmra.mxu1 %v687_v45  ;;  %v749_v44 = vld [vmem:[%s2280_s9 + $0x340] sm:$0xff]  ;;  %v751_v45 = vld [vmem:[%s2280_s9 + $0x350] sm:$0xff] }
  0xf4   : > { %956 = vmatprep.mubr.f32.mxu0 %v690_v46  ;;  %1181 = vmatprep.mubr.f32.mxu1 %v692_v47  ;;  %v754_v46 = vld [vmem:[%s2280_s9 + $0x368] sm:$0xff]  ;;  %v756_v47 = vld [vmem:[%s2280_s9 + $0x378] sm:$0xff] }
  0xf7   : > { %957 = vmatmul.mubr.f32.gmra.mxu0 %v689_v48  ;;  %1182 = vmatmul.mubr.f32.gmra.mxu1 %v691_v49  ;;  %v753_v48 = vld [vmem:[%s2280_s9 + $0x360] sm:$0xff]  ;;  %v755_v49 = vld [vmem:[%s2280_s9 + $0x370] sm:$0xff] }
  0xf8   : > { %961 = vmatprep.mubr.f32.mxu0 %v694_v50  ;;  %1186 = vmatprep.mubr.f32.mxu1 %v696_v51  ;;  %v758_v50 = vld [vmem:[%s2280_s9 + $0x388] sm:$0xff]  ;;  %v760_v51 = vld [vmem:[%s2280_s9 + $0x398] sm:$0xff] }
  0xfb   : > { %962 = vmatmul.mubr.f32.gmra.mxu0 %v693_v52  ;;  %1187 = vmatmul.mubr.f32.gmra.mxu1 %v695_v53  ;;  %v757_v52 = vld [vmem:[%s2280_s9 + $0x380] sm:$0xff]  ;;  %v759_v53 = vld [vmem:[%s2280_s9 + $0x390] sm:$0xff] }
  0xfc   : > { %966 = vmatprep.mubr.f32.mxu0 %v698_v54  ;;  %1191 = vmatprep.mubr.f32.mxu1 %v700_v55  ;;  %v762_v54 = vld [vmem:[%s2280_s9 + $0x3a8] sm:$0xff]  ;;  %v764_v55 = vld [vmem:[%s2280_s9 + $0x3b8] sm:$0xff] }
  0xff   : > { %967 = vmatmul.mubr.f32.gmra.mxu0 %v697_v56  ;;  %1192 = vmatmul.mubr.f32.gmra.mxu1 %v699_v57  ;;  %v761_v56 = vld [vmem:[%s2280_s9 + $0x3a0] sm:$0xff]  ;;  %v763_v57 = vld [vmem:[%s2280_s9 + $0x3b0] sm:$0xff] }
 0x100   : > { %971 = vmatprep.mubr.f32.mxu0 %v702_v58  ;;  %1196 = vmatprep.mubr.f32.mxu1 %v704_v59  ;;  %v766_v58 = vld [vmem:[%s2280_s9 + $0x3c8] sm:$0xff]  ;;  %v768_v59 = vld [vmem:[%s2280_s9 + $0x3d8] sm:$0xff] }
 0x103   : > { %972 = vmatmul.mubr.f32.gmra.mxu0 %v701_v60  ;;  %1197 = vmatmul.mubr.f32.gmra.mxu1 %v703_v61  ;;  %v765_v60 = vld [vmem:[%s2280_s9 + $0x3c0] sm:$0xff]  ;;  %v767_v61 = vld [vmem:[%s2280_s9 + $0x3d0] sm:$0xff] }
 0x104   : > { %976 = vmatprep.mubr.f32.mxu0 %v706_v62  ;;  %1201 = vmatprep.mubr.f32.mxu1 %v708_v63  ;;  %v770_v62 = vld [vmem:[%s2280_s9 + $0x3e8] sm:$0xff]  ;;  %v772_v63 = vld [vmem:[%s2280_s9 + $0x3f8] sm:$0xff] }
 0x107   : > { %977 = vmatmul.mubr.f32.gmra.mxu0 %v705_v0  ;;  %1202 = vmatmul.mubr.f32.gmra.mxu1 %v707_v1  ;;  %v769_v0 = vld [vmem:[%s2280_s9 + $0x3e0] sm:$0xff]  ;;  %v771_v1 = vld [vmem:[%s2280_s9 + $0x3f0] sm:$0xff] }
 0x108   : > { %981 = vmatprep.mubr.f32.mxu0 %v710_v2  ;;  %1206 = vmatprep.mubr.f32.mxu1 %v712_v4  ;;  %v613_v4 = vld [vmem:[#allocation2 + $0xb0] sm:$0xff] }
 0x10b   : > { %982 = vmatmul.mubr.f32.gmra.mxu0 %v709_v5  ;;  %1207 = vmatmul.mubr.f32.gmra.mxu1 %v711_v6 }
 0x10c   : > { %986 = vmatprep.mubr.f32.mxu0 %v714_v7  ;;  %1211 = vmatprep.mubr.f32.mxu1 %v716_v8 }
 0x10f   : > { %987 = vmatmul.mubr.f32.gmra.mxu0 %v713_v9  ;;  %1212 = vmatmul.mubr.f32.gmra.mxu1 %v715_v3 }
 0x110   : > { %991 = vmatprep.mubr.f32.mxu0 %v718_v10  ;;  %1216 = vmatprep.mubr.f32.mxu1 %v720_v11  ;;  %v614_v10 = vld [vmem:[#allocation2] sm:$0xff] }
 0x113   : > { %992 = vmatmul.mubr.f32.gmra.mxu0 %v717_v12  ;;  %1217 = vmatmul.mubr.f32.gmra.mxu1 %v719_v13 }
 0x114   : > { %996 = vmatprep.mubr.f32.mxu0 %v722_v14  ;;  %1221 = vmatprep.mubr.f32.mxu1 %v724_v15 }
 0x117   : > { %997 = vmatmul.mubr.f32.gmra.mxu0 %v721_v16  ;;  %1222 = vmatmul.mubr.f32.gmra.mxu1 %v723_v17  ;;  %v615_v17 = vld [vmem:[#allocation2 + $0xd8] sm:$0xff] }
 0x118   : > { %1001 = vmatprep.mubr.f32.mxu0 %v726_v18  ;;  %1226 = vmatprep.mubr.f32.mxu1 %v728_v19 }
 0x11b   : > { %1002 = vmatmul.mubr.f32.gmra.mxu0 %v725_v20  ;;  %1227 = vmatmul.mubr.f32.gmra.mxu1 %v727_v21 }
 0x11c   : > { %1006 = vmatprep.mubr.f32.mxu0 %v730_v22  ;;  %1231 = vmatprep.mubr.f32.mxu1 %v732_v23 }
 0x11f   : > { %1007 = vmatmul.mubr.f32.gmra.mxu0 %v729_v24  ;;  %1232 = vmatmul.mubr.f32.gmra.mxu1 %v731_v25  ;;  %v616_v24 = vld [vmem:[#allocation2 + $0x18] sm:$0xff] }
 0x120   : > { %1011 = vmatprep.mubr.f32.mxu0 %v734_v26  ;;  %1236 = vmatprep.mubr.f32.mxu1 %v736_v27 }
 0x123   : > { %1012 = vmatmul.mubr.f32.gmra.mxu0 %v733_v28  ;;  %1237 = vmatmul.mubr.f32.gmra.mxu1 %v735_v29 }
 0x124   : > { %1016 = vmatprep.mubr.f32.mxu0 %v738_v30  ;;  %1241 = vmatprep.mubr.f32.mxu1 %v740_v31  ;;  %v617_v31 = vld [vmem:[#allocation2 + $0x50] sm:$0xff] }
 0x127   : > { %1017 = vmatmul.mubr.f32.gmra.mxu0 %v737_v32  ;;  %1242 = vmatmul.mubr.f32.gmra.mxu1 %v739_v33 }
 0x128   : > { %1021 = vmatprep.mubr.f32.mxu0 %v742_v34  ;;  %1246 = vmatprep.mubr.f32.mxu1 %v744_v35 }
 0x12b   : > { %1022 = vmatmul.mubr.f32.gmra.mxu0 %v741_v36  ;;  %1247 = vmatmul.mubr.f32.gmra.mxu1 %v743_v37 }
 0x12c   : > { %1026 = vmatprep.mubr.f32.mxu0 %v746_v38  ;;  %1251 = vmatprep.mubr.f32.mxu1 %v748_v39  ;;  %v618_v38 = vld [vmem:[#allocation2 + $0x68] sm:$0xff] }
 0x12f   : > { %1027 = vmatmul.mubr.f32.gmra.mxu0 %v745_v40  ;;  %1252 = vmatmul.mubr.f32.gmra.mxu1 %v747_v41 }
 0x130   : > { %1031 = vmatprep.mubr.f32.mxu0 %v750_v42  ;;  %1256 = vmatprep.mubr.f32.mxu1 %v752_v43 }
 0x133   : > { %1032 = vmatmul.mubr.f32.gmra.mxu0 %v749_v44  ;;  %1257 = vmatmul.mubr.f32.gmra.mxu1 %v751_v45  ;;  %v619_v45 = vld [vmem:[#allocation2 + $0x30] sm:$0xff] }
 0x134   : > { %1036 = vmatprep.mubr.f32.mxu0 %v754_v46  ;;  %1261 = vmatprep.mubr.f32.mxu1 %v756_v47 }
 0x137   : > { %1037 = vmatmul.mubr.f32.gmra.mxu0 %v753_v48  ;;  %1262 = vmatmul.mubr.f32.gmra.mxu1 %v755_v49 }
 0x138   : > { %1041 = vmatprep.mubr.f32.mxu0 %v758_v50  ;;  %1266 = vmatprep.mubr.f32.mxu1 %v760_v51 }
 0x13b   : > { %1042 = vmatmul.mubr.f32.gmra.mxu0 %v757_v52  ;;  %1267 = vmatmul.mubr.f32.gmra.mxu1 %v759_v53  ;;  %v620_v52 = vld [vmem:[#allocation2 + $0x48] sm:$0xff] }
 0x13c   : > { %1046 = vmatprep.mubr.f32.mxu0 %v762_v54  ;;  %1271 = vmatprep.mubr.f32.mxu1 %v764_v55 }
 0x13f   : > { %1047 = vmatmul.mubr.f32.gmra.mxu0 %v761_v56  ;;  %1272 = vmatmul.mubr.f32.gmra.mxu1 %v763_v57 }
 0x140   : > { %1051 = vmatprep.mubr.f32.mxu0 %v766_v58  ;;  %1276 = vmatprep.mubr.f32.mxu1 %v768_v59  ;;  %v621_v59 = vld [vmem:[#allocation2 + $0x80] sm:$0xff] }
 0x143   : > { %1052 = vmatmul.mubr.f32.gmra.mxu0 %v765_v60  ;;  %1277 = vmatmul.mubr.f32.gmra.mxu1 %v767_v61 }
 0x144   : > { %1056 = vmatprep.mubr.f32.mxu0 %v770_v62  ;;  %1281 = vmatprep.mubr.f32.mxu1 %v772_v63 }
 0x147   : > { %1057 = vmatmul.mubr.f32.gmra.mxu0 %v769_v0  ;;  %1282 = vmatmul.mubr.f32.gmra.mxu1 %v771_v1 }
 0x18b   : > { %v903_v2 = vpop.f32.mrf.mxu0  ;;  %v1128_v5 = vpop.f32.mrf.mxu1 }
 0x18c   : > { %v1129_v6 = vadd.f32 %v1128_v5, %v903_v2  ;;  %v622_v2 = vld [vmem:[#allocation2 + $0x88] sm:$0xff] }
 0x18d   : > { %v905_v7 = vpop.f32.mrf.mxu0  ;;  %v1130_v8 = vpop.f32.mrf.mxu1 }
 0x18e   : > { %v1287_v9 = vadd.f32 %v1129_v6, %v613_v4 }
 0x18f   : > { %v908_v3 = vpop.f32.mrf.mxu0  ;;  %v1133_v11 = vpop.f32.mrf.mxu1 }
 0x190   : > { %1319 = vst [vmem:[#allocation2 + $0xb0] sm:$0xff] %v1287_v9  ;;  %v1134_v12 = vadd.f32 %v1133_v11, %v908_v3  ;;  %v623_v3 = vld [vmem:[#allocation2 + $0xe8] sm:$0xff] }
 0x191   : > { %v910_v13 = vpop.f32.mrf.mxu0  ;;  %v1135_v14 = vpop.f32.mrf.mxu1 }
 0x192   : > { %v1288_v15 = vadd.f32 %v1134_v12, %v614_v10 }
 0x193   : > { %v913_v16 = vpop.f32.mrf.mxu0  ;;  %v1138_v18 = vpop.f32.mrf.mxu1 }
 0x194   : > { %1320 = vst [vmem:[#allocation2] sm:$0xff] %v1288_v15  ;;  %v1139_v19 = vadd.f32 %v1138_v18, %v913_v16  ;;  %v624_v16 = vld [vmem:[#allocation2 + $0xb8] sm:$0xff] }
 0x195   : > { %v915_v20 = vpop.f32.mrf.mxu0  ;;  %v1140_v21 = vpop.f32.mrf.mxu1 }
 0x196   : > { %v1289_v22 = vadd.f32 %v1139_v19, %v615_v17 }
 0x197   : > { %v918_v23 = vpop.f32.mrf.mxu0  ;;  %v1143_v25 = vpop.f32.mrf.mxu1 }
 0x198   : > { %1321 = vst [vmem:[#allocation2 + $0xd8] sm:$0xff] %v1289_v22  ;;  %v1144_v26 = vadd.f32 %v1143_v25, %v918_v23  ;;  %v625_v23 = vld [vmem:[#allocation2 + $0x60] sm:$0xff] }
 0x199   : > { %v920_v27 = vpop.f32.mrf.mxu0  ;;  %v1145_v28 = vpop.f32.mrf.mxu1 }
 0x19a   : > { %v1290_v29 = vadd.f32 %v1144_v26, %v616_v24 }
 0x19b   : > { %v923_v30 = vpop.f32.mrf.mxu0  ;;  %v1148_v32 = vpop.f32.mrf.mxu1 }
 0x19c   : > { %1322 = vst [vmem:[#allocation2 + $0x18] sm:$0xff] %v1290_v29  ;;  %v1149_v33 = vadd.f32 %v1148_v32, %v923_v30  ;;  %v626_v30 = vld [vmem:[#allocation2 + $0xf0] sm:$0xff] }
 0x19d   : > { %v925_v34 = vpop.f32.mrf.mxu0  ;;  %v1150_v35 = vpop.f32.mrf.mxu1 }
 0x19e   : > { %v1291_v36 = vadd.f32 %v1149_v33, %v617_v31 }
 0x19f   : > { %v928_v37 = vpop.f32.mrf.mxu0  ;;  %v1153_v39 = vpop.f32.mrf.mxu1 }
 0x1a0   : > { %1323 = vst [vmem:[#allocation2 + $0x50] sm:$0xff] %v1291_v36  ;;  %v1154_v40 = vadd.f32 %v1153_v39, %v928_v37  ;;  %v627_v37 = vld [vmem:[#allocation2 + $0x8] sm:$0xff] }
 0x1a1   : > { %v930_v41 = vpop.f32.mrf.mxu0  ;;  %v1155_v42 = vpop.f32.mrf.mxu1 }
 0x1a2   : > { %v1292_v43 = vadd.f32 %v1154_v40, %v618_v38 }
 0x1a3   : > { %v933_v44 = vpop.f32.mrf.mxu0  ;;  %v1158_v46 = vpop.f32.mrf.mxu1 }
 0x1a4   : > { %1324 = vst [vmem:[#allocation2 + $0x68] sm:$0xff] %v1292_v43  ;;  %v1159_v47 = vadd.f32 %v1158_v46, %v933_v44  ;;  %v628_v44 = vld [vmem:[#allocation2 + $0x78] sm:$0xff] }
 0x1a5   : > { %v935_v48 = vpop.f32.mrf.mxu0  ;;  %v1160_v49 = vpop.f32.mrf.mxu1 }
 0x1a6   : > { %v1293_v50 = vadd.f32 %v1159_v47, %v619_v45 }
 0x1a7   : > { %v938_v51 = vpop.f32.mrf.mxu0  ;;  %v1163_v53 = vpop.f32.mrf.mxu1 }
 0x1a8   : > { %1325 = vst [vmem:[#allocation2 + $0x30] sm:$0xff] %v1293_v50  ;;  %v1164_v54 = vadd.f32 %v1163_v53, %v938_v51  ;;  %v629_v51 = vld [vmem:[#allocation2 + $0x38] sm:$0xff] }
 0x1a9   : > { %v940_v55 = vpop.f32.mrf.mxu0  ;;  %v1165_v56 = vpop.f32.mrf.mxu1 }
 0x1aa   : > { %v1294_v57 = vadd.f32 %v1164_v54, %v620_v52 }
 0x1ab   : > { %v943_v58 = vpop.f32.mrf.mxu0  ;;  %v1168_v60 = vpop.f32.mrf.mxu1 }
 0x1ac   : > { %1326 = vst [vmem:[#allocation2 + $0x48] sm:$0xff] %v1294_v57  ;;  %v1169_v61 = vadd.f32 %v1168_v60, %v943_v58  ;;  %v630_v58 = vld [vmem:[#allocation2 + $0x58] sm:$0xff] }
 0x1ad   : > { %v945_v62 = vpop.f32.mrf.mxu0  ;;  %v1170_v63 = vpop.f32.mrf.mxu1 }
 0x1ae   : > { %v1295_v0 = vadd.f32 %v1169_v61, %v621_v59 }
 0x1af   : > { %v948_v1 = vpop.f32.mrf.mxu0  ;;  %v1173_v4 = vpop.f32.mrf.mxu1 }
 0x1b0   : > { %1327 = vst [vmem:[#allocation2 + $0x80] sm:$0xff] %v1295_v0  ;;  %v1174_v5 = vadd.f32 %v1173_v4, %v948_v1  ;;  %v631_v1 = vld [vmem:[#allocation2 + $0x40] sm:$0xff] }
 0x1b1   : > { %v950_v6 = vpop.f32.mrf.mxu0  ;;  %v1175_v7 = vpop.f32.mrf.mxu1 }
 0x1b2   : > { %v1296_v8 = vadd.f32 %v1174_v5, %v622_v2 }
 0x1b3   : > { %v953_v9 = vpop.f32.mrf.mxu0  ;;  %v1178_v10 = vpop.f32.mrf.mxu1 }
 0x1b4   : > { %1328 = vst [vmem:[#allocation2 + $0x88] sm:$0xff] %v1296_v8  ;;  %v1179_v11 = vadd.f32 %v1178_v10, %v953_v9  ;;  %v632_v9 = vld [vmem:[#allocation2 + $0xc8] sm:$0xff] }
 0x1b5   : > { %v955_v12 = vpop.f32.mrf.mxu0  ;;  %v1180_v13 = vpop.f32.mrf.mxu1 }
 0x1b6   : > { %v1297_v14 = vadd.f32 %v1179_v11, %v623_v3 }
 0x1b7   : > { %v958_v15 = vpop.f32.mrf.mxu0  ;;  %v1183_v17 = vpop.f32.mrf.mxu1 }
 0x1b8   : > { %1329 = vst [vmem:[#allocation2 + $0xe8] sm:$0xff] %v1297_v14  ;;  %v1184_v18 = vadd.f32 %v1183_v17, %v958_v15  ;;  %v633_v15 = vld [vmem:[#allocation2 + $0xe0] sm:$0xff] }
 0x1b9   : > { %v960_v19 = vpop.f32.mrf.mxu0  ;;  %v1185_v20 = vpop.f32.mrf.mxu1 }
 0x1ba   : > { %v1298_v21 = vadd.f32 %v1184_v18, %v624_v16 }
 0x1bb   : > { %v963_v22 = vpop.f32.mrf.mxu0  ;;  %v1188_v24 = vpop.f32.mrf.mxu1 }
 0x1bc   : > { %1330 = vst [vmem:[#allocation2 + $0xb8] sm:$0xff] %v1298_v21  ;;  %v1189_v25 = vadd.f32 %v1188_v24, %v963_v22  ;;  %v634_v22 = vld [vmem:[#allocation2 + $0x90] sm:$0xff] }
 0x1bd   : > { %v965_v26 = vpop.f32.mrf.mxu0  ;;  %v1190_v27 = vpop.f32.mrf.mxu1 }
 0x1be   : > { %v1299_v28 = vadd.f32 %v1189_v25, %v625_v23 }
 0x1bf   : > { %v968_v29 = vpop.f32.mrf.mxu0  ;;  %v1193_v31 = vpop.f32.mrf.mxu1 }
 0x1c0   : > { %1331 = vst [vmem:[#allocation2 + $0x60] sm:$0xff] %v1299_v28  ;;  %v1194_v32 = vadd.f32 %v1193_v31, %v968_v29  ;;  %v635_v29 = vld [vmem:[#allocation2 + $0x70] sm:$0xff] }
 0x1c1   : > { %v970_v33 = vpop.f32.mrf.mxu0  ;;  %v1195_v34 = vpop.f32.mrf.mxu1 }
 0x1c2   : > { %v1300_v35 = vadd.f32 %v1194_v32, %v626_v30 }
 0x1c3   : > { %v973_v36 = vpop.f32.mrf.mxu0  ;;  %v1198_v38 = vpop.f32.mrf.mxu1 }
 0x1c4   : > { %1332 = vst [vmem:[#allocation2 + $0xf0] sm:$0xff] %v1300_v35  ;;  %v1199_v39 = vadd.f32 %v1198_v38, %v973_v36  ;;  %v636_v36 = vld [vmem:[#allocation2 + $0xc0] sm:$0xff] }
 0x1c5   : > { %v975_v40 = vpop.f32.mrf.mxu0  ;;  %v1200_v41 = vpop.f32.mrf.mxu1 }
 0x1c6   : > { %v1301_v42 = vadd.f32 %v1199_v39, %v627_v37 }
 0x1c7   : > { %v978_v43 = vpop.f32.mrf.mxu0  ;;  %v1203_v45 = vpop.f32.mrf.mxu1 }
 0x1c8   : > { %1333 = vst [vmem:[#allocation2 + $0x8] sm:$0xff] %v1301_v42  ;;  %v1204_v46 = vadd.f32 %v1203_v45, %v978_v43  ;;  %v637_v43 = vld [vmem:[#allocation2 + $0xa8] sm:$0xff] }
 0x1c9   : > { %v980_v47 = vpop.f32.mrf.mxu0  ;;  %v1205_v48 = vpop.f32.mrf.mxu1 }
 0x1ca   : > { %v1302_v49 = vadd.f32 %v1204_v46, %v628_v44 }
 0x1cb   : > { %v983_v50 = vpop.f32.mrf.mxu0  ;;  %v1208_v52 = vpop.f32.mrf.mxu1 }
 0x1cc   : > { %1334 = vst [vmem:[#allocation2 + $0x78] sm:$0xff] %v1302_v49  ;;  %v1209_v53 = vadd.f32 %v1208_v52, %v983_v50  ;;  %v638_v50 = vld [vmem:[#allocation2 + $0xd0] sm:$0xff] }
 0x1cd   : > { %v985_v54 = vpop.f32.mrf.mxu0  ;;  %v1210_v55 = vpop.f32.mrf.mxu1 }
 0x1ce   : > { %v1303_v56 = vadd.f32 %v1209_v53, %v629_v51 }
 0x1cf   : > { %v988_v57 = vpop.f32.mrf.mxu0  ;;  %v1213_v59 = vpop.f32.mrf.mxu1 }
 0x1d0   : > { %1335 = vst [vmem:[#allocation2 + $0x38] sm:$0xff] %v1303_v56  ;;  %v1214_v60 = vadd.f32 %v1213_v59, %v988_v57  ;;  %v639_v57 = vld [vmem:[#allocation2 + $0x10] sm:$0xff] }
 0x1d1   : > { %v990_v61 = vpop.f32.mrf.mxu0  ;;  %v1215_v62 = vpop.f32.mrf.mxu1 }
 0x1d2   : > { %v1304_v63 = vadd.f32 %v1214_v60, %v630_v58 }
 0x1d3   : > { %v993_v0 = vpop.f32.mrf.mxu0  ;;  %v1218_v2 = vpop.f32.mrf.mxu1 }
 0x1d4   : > { %1336 = vst [vmem:[#allocation2 + $0x58] sm:$0xff] %v1304_v63  ;;  %v1219_v4 = vadd.f32 %v1218_v2, %v993_v0  ;;  %v640_v0 = vld [vmem:[#allocation2 + $0x28] sm:$0xff] }
 0x1d5   : > { %v995_v5 = vpop.f32.mrf.mxu0  ;;  %v1220_v6 = vpop.f32.mrf.mxu1 }
 0x1d6   : > { %v1305_v7 = vadd.f32 %v1219_v4, %v631_v1 }
 0x1d7   : > { %v998_v8 = vpop.f32.mrf.mxu0  ;;  %v1223_v3 = vpop.f32.mrf.mxu1 }
 0x1d8   : > { %1337 = vst [vmem:[#allocation2 + $0x40] sm:$0xff] %v1305_v7  ;;  %v1224_v10 = vadd.f32 %v1223_v3, %v998_v8  ;;  %v641_v8 = vld [vmem:[#allocation2 + $0xa0] sm:$0xff] }
 0x1d9   : > { %v1000_v11 = vpop.f32.mrf.mxu0  ;;  %v1225_v12 = vpop.f32.mrf.mxu1 }
 0x1da   : > { %v1306_v13 = vadd.f32 %v1224_v10, %v632_v9 }
 0x1db   : > { %v1003_v14 = vpop.f32.mrf.mxu0  ;;  %v1228_v16 = vpop.f32.mrf.mxu1 }
 0x1dc   : > { %1338 = vst [vmem:[#allocation2 + $0xc8] sm:$0xff] %v1306_v13  ;;  %v1229_v17 = vadd.f32 %v1228_v16, %v1003_v14  ;;  %v642_v14 = vld [vmem:[#allocation2 + $0xf8] sm:$0xff] }
 0x1dd   : > { %v1005_v18 = vpop.f32.mrf.mxu0  ;;  %v1230_v19 = vpop.f32.mrf.mxu1 }
 0x1de   : > { %v1307_v20 = vadd.f32 %v1229_v17, %v633_v15 }
 0x1df   : > { %v1008_v21 = vpop.f32.mrf.mxu0  ;;  %v1233_v23 = vpop.f32.mrf.mxu1 }
 0x1e0   : > { %1339 = vst [vmem:[#allocation2 + $0xe0] sm:$0xff] %v1307_v20  ;;  %v1234_v24 = vadd.f32 %v1233_v23, %v1008_v21  ;;  %v643_v21 = vld [vmem:[#allocation2 + $0x20] sm:$0xff] }
 0x1e1   : > { %v1010_v25 = vpop.f32.mrf.mxu0  ;;  %v1235_v26 = vpop.f32.mrf.mxu1 }
 0x1e2   : > { %v1308_v27 = vadd.f32 %v1234_v24, %v634_v22 }
 0x1e3   : > { %v1013_v28 = vpop.f32.mrf.mxu0  ;;  %v1238_v30 = vpop.f32.mrf.mxu1 }
 0x1e4   : > { %1340 = vst [vmem:[#allocation2 + $0x90] sm:$0xff] %v1308_v27  ;;  %v1239_v31 = vadd.f32 %v1238_v30, %v1013_v28  ;;  %v644_v28 = vld [vmem:[#allocation2 + $0x98] sm:$0xff] }
 0x1e5   : > { %v1015_v32 = vpop.f32.mrf.mxu0  ;;  %v1240_v33 = vpop.f32.mrf.mxu1 }
 0x1e6   : > { %v1309_v34 = vadd.f32 %v1239_v31, %v635_v29 }
 0x1e7   : > { %v1018_v35 = vpop.f32.mrf.mxu0  ;;  %v1243_v37 = vpop.f32.mrf.mxu1 }
 0x1e8   : > { %1341 = vst [vmem:[#allocation2 + $0x70] sm:$0xff] %v1309_v34  ;;  %v1244_v38 = vadd.f32 %v1243_v37, %v1018_v35 }
 0x1e9   : > { %v1020_v39 = vpop.f32.mrf.mxu0  ;;  %v1245_v40 = vpop.f32.mrf.mxu1 }
 0x1ea   : > { %v1310_v41 = vadd.f32 %v1244_v38, %v636_v36 }
 0x1eb   : > { %v1023_v42 = vpop.f32.mrf.mxu0  ;;  %v1248_v44 = vpop.f32.mrf.mxu1 }
 0x1ec   : > { %1342 = vst [vmem:[#allocation2 + $0xc0] sm:$0xff] %v1310_v41  ;;  %v1249_v45 = vadd.f32 %v1248_v44, %v1023_v42 }
 0x1ed   : > { %v1025_v46 = vpop.f32.mrf.mxu0  ;;  %v1250_v47 = vpop.f32.mrf.mxu1 }
 0x1ee   : > { %v1311_v48 = vadd.f32 %v1249_v45, %v637_v43 }
 0x1ef   : > { %v1028_v49 = vpop.f32.mrf.mxu0  ;;  %v1253_v51 = vpop.f32.mrf.mxu1 }
 0x1f0   : > { %1343 = vst [vmem:[#allocation2 + $0xa8] sm:$0xff] %v1311_v48  ;;  %v1254_v52 = vadd.f32 %v1253_v51, %v1028_v49 }
 0x1f1   : > { %v1030_v53 = vpop.f32.mrf.mxu0  ;;  %v1255_v54 = vpop.f32.mrf.mxu1 }
 0x1f2   : > { %v1312_v55 = vadd.f32 %v1254_v52, %v638_v50 }
 0x1f3   : > { %v1033_v56 = vpop.f32.mrf.mxu0  ;;  %v1258_v58 = vpop.f32.mrf.mxu1 }
 0x1f4   : > { %1344 = vst [vmem:[#allocation2 + $0xd0] sm:$0xff] %v1312_v55  ;;  %v1259_v59 = vadd.f32 %v1258_v58, %v1033_v56 }
 0x1f5   : > { %v1035_v60 = vpop.f32.mrf.mxu0  ;;  %v1260_v61 = vpop.f32.mrf.mxu1 }
 0x1f6   : > { %v1313_v62 = vadd.f32 %v1259_v59, %v639_v57 }
 0x1f7   : > { %v1038_v63 = vpop.f32.mrf.mxu0  ;;  %v1263_v1 = vpop.f32.mrf.mxu1 }
 0x1f8   : > { %1345 = vst [vmem:[#allocation2 + $0x10] sm:$0xff] %v1313_v62  ;;  %v1264_v2 = vadd.f32 %v1263_v1, %v1038_v63 }
 0x1f9   : > { %v1040_v4 = vpop.f32.mrf.mxu0  ;;  %v1265_v5 = vpop.f32.mrf.mxu1 }
 0x1fa   : > { %v1314_v6 = vadd.f32 %v1264_v2, %v640_v0 }
 0x1fb   : > { %v1043_v7 = vpop.f32.mrf.mxu0  ;;  %v1268_v9 = vpop.f32.mrf.mxu1 }
 0x1fc   : > { %1346 = vst [vmem:[#allocation2 + $0x28] sm:$0xff] %v1314_v6  ;;  %v1269_v3 = vadd.f32 %v1268_v9, %v1043_v7 }
 0x1fd   : > { %v1045_v10 = vpop.f32.mrf.mxu0  ;;  %v1270_v11 = vpop.f32.mrf.mxu1 }
 0x1fe   : > { %v1315_v12 = vadd.f32 %v1269_v3, %v641_v8 }
 0x1ff   : > { %v1048_v13 = vpop.f32.mrf.mxu0  ;;  %v1273_v15 = vpop.f32.mrf.mxu1 }
 0x200   : > { %1347 = vst [vmem:[#allocation2 + $0xa0] sm:$0xff] %v1315_v12  ;;  %v1274_v16 = vadd.f32 %v1273_v15, %v1048_v13 }
 0x201   : > { %v1050_v17 = vpop.f32.mrf.mxu0  ;;  %v1275_v18 = vpop.f32.mrf.mxu1 }
 0x202   : > { %v1316_v19 = vadd.f32 %v1274_v16, %v642_v14 }
 0x203   : > { %v1053_v20 = vpop.f32.mrf.mxu0  ;;  %v1278_v22 = vpop.f32.mrf.mxu1 }
 0x204   : > { %1348 = vst [vmem:[#allocation2 + $0xf8] sm:$0xff] %v1316_v19  ;;  %v1279_v23 = vadd.f32 %v1278_v22, %v1053_v20 }
 0x205   : > { %v1055_v24 = vpop.f32.mrf.mxu0  ;;  %v1280_v25 = vpop.f32.mrf.mxu1 }
 0x206   : > { %v1317_v26 = vadd.f32 %v1279_v23, %v643_v21 }
 0x207   : > { %v1058_v27 = vpop.f32.mrf.mxu0  ;;  %v1283_v29 = vpop.f32.mrf.mxu1 }
 0x208   : > { %1349 = vst [vmem:[#allocation2 + $0x20] sm:$0xff] %v1317_v26  ;;  %v1284_v30 = vadd.f32 %v1283_v29, %v1058_v27  ;;  %1354 = sbr.rel (%p1741_p2) target bundleno = 604 (0x25c), region = 59 }
 0x209   : > { %v1060_v31 = vpop.f32.mrf.mxu0  ;;  %v1285_v32 = vpop.f32.mrf.mxu1 }
 0x20a   : > { %v1318_v33 = vadd.f32 %v1284_v30, %v644_v28 }
 0x20c   : > { %1350 = vst [vmem:[#allocation2 + $0x98] sm:$0xff] %v1318_v33 }
 0x20d   : > { %v1355_v34 = vld [vmem:[#allocation2 + $0xb0] sm:$0xff]  ;;  %v1356_v35 = vld [vmem:[#allocation2] sm:$0xff]  ;;  %v1357_v36 = vld [vmem:[#allocation2 + $0xd8] sm:$0xff]  ;;  %vm1525_vm0 = vcmask 1040384  }
 0x20e   : > { %1387 = vst [vmem:[%s2273_s23] sm:$0xff] %v1355_v34  ;;  %v1456_v37 = vmul.f32 %v1355_v34, %v1355_v34  ;;  %1388 = vst [vmem:[%s2273_s23 + $0x8] sm:$0xff] %v1356_v35  ;;  %v1419_v38 = vadd.f32 %v1356_v35, %v1355_v34  ;;  %v1457_v39 = vmul.f32 %v1356_v35, %v1356_v35  ;;  %v1358_v41 = vld [vmem:[#allocation2 + $0x18] sm:$0xff]  ;;  %v1359_v42 = vld [vmem:[#allocation2 + $0x50] sm:$0xff] }
 0x20f   : > { %1389 = vst [vmem:[%s2273_s23 + $0x10] sm:$0xff] %v1357_v36  ;;  %v1458_v40 = vmul.f32 %v1357_v36, %v1357_v36  ;;  %v1360_v43 = vld [vmem:[#allocation2 + $0x68] sm:$0xff]  ;;  %1390 = vst [vmem:[%s2273_s23 + $0x18] sm:$0xff] %v1358_v41  ;;  %v2546_v44 = vld [vmem:[#allocation2 + $0x30] sm:$0xff]  ;;  %v1459_v49 = vmul.f32 %v1358_v41, %v1358_v41  ;;  %v1460_v58 = vmul.f32 %v1359_v42, %v1359_v42 }
 0x210   : > { %1391 = vst [vmem:[%s2273_s23 + $0x20] sm:$0xff] %v1359_v42  ;;  %1392 = vst [vmem:[%s2273_s23 + $0x28] sm:$0xff] %v1360_v43  ;;  %v2548_v45 = vld [vmem:[#allocation2 + $0x48] sm:$0xff]  ;;  %v2550_v46 = vld [vmem:[#allocation2 + $0x80] sm:$0xff]  ;;  %v1488_v47 = vadd.f32 %v1457_v39, %v1456_v37  ;;  %v1420_v48 = vadd.f32 %v1419_v38, %v1357_v36  ;;  %v1461_v4 = vmul.f32 %v1360_v43, %v1360_v43 }
 0x211   : > { %1393 = vst [vmem:[%s2273_s23 + $0x30] sm:$0xff] %v2546_v44  ;;  %1394 = vst [vmem:[%s2273_s23 + $0x38] sm:$0xff] %v2548_v45  ;;  %v2558_v50 = vld [vmem:[#allocation2 + $0x88] sm:$0xff]  ;;  %v2562_v52 = vld [vmem:[#allocation2 + $0xb8] sm:$0xff]  ;;  %v1462_v12 = vmul.f32 %v2546_v44, %v2546_v44  ;;  %v1463_v20 = vmul.f32 %v2548_v45, %v2548_v45  ;;  %v1464_v23 = vmul.f32 %v2550_v46, %v2550_v46 }
 0x212   : > { %1395 = vst [vmem:[%s2273_s23 + $0x40] sm:$0xff] %v2550_v46  ;;  %v2560_v51 = vld [vmem:[#allocation2 + $0xe8] sm:$0xff]  ;;  %1396 = vst [vmem:[%s2273_s23 + $0x48] sm:$0xff] %v2558_v50  ;;  %v2570_v53 = vld [vmem:[#allocation2 + $0x60] sm:$0xff]  ;;  %v1489_v56 = vadd.f32 %v1488_v47, %v1458_v40  ;;  %v1421_v57 = vadd.f32 %v1420_v48, %v1358_v41  ;;  %v1465_v26 = vmul.f32 %v2558_v50, %v2558_v50 }
 0x213   : > { %1397 = vst [vmem:[%s2273_s23 + $0x50] sm:$0xff] %v2560_v51  ;;  %1398 = vst [vmem:[%s2273_s23 + $0x58] sm:$0xff] %v2562_v52  ;;  %v2572_v54 = vld [vmem:[#allocation2 + $0xf0] sm:$0xff]  ;;  %v2574_v55 = vld [vmem:[#allocation2 + $0x8] sm:$0xff]  ;;  %v1466_v29 = vmul.f32 %v2560_v51, %v2560_v51  ;;  %v1467_v32 = vmul.f32 %v2562_v52, %v2562_v52  ;;  %v1468_v35 = vmul.f32 %v2570_v53, %v2570_v53 }
 0x214   : > { %1399 = vst [vmem:[%s2273_s23 + $0x60] sm:$0xff] %v2570_v53  ;;  %1400 = vst [vmem:[%s2273_s23 + $0x68] sm:$0xff] %v2572_v54  ;;  %v2582_v59 = vld [vmem:[#allocation2 + $0x78] sm:$0xff]  ;;  %v2594_v62 = vld [vmem:[#allocation2 + $0x40] sm:$0xff]  ;;  %v1490_v1 = vadd.f32 %v1489_v56, %v1459_v49  ;;  %v1422_v2 = vadd.f32 %v1421_v57, %v1359_v42  ;;  %v1469_v38 = vmul.f32 %v2572_v54, %v2572_v54 }
 0x215   : > { %1401 = vst [vmem:[%s2273_s23 + $0x70] sm:$0xff] %v2574_v55  ;;  %v2584_v60 = vld [vmem:[#allocation2 + $0x38] sm:$0xff]  ;;  %1402 = vst [vmem:[%s2273_s23 + $0x78] sm:$0xff] %v2582_v59  ;;  %v2596_v63 = vld [vmem:[#allocation2 + $0xc8] sm:$0xff]  ;;  %v1470_v41 = vmul.f32 %v2574_v55, %v2574_v55 }
 0x216   : > { %v2586_v61 = vld [vmem:[#allocation2 + $0x58] sm:$0xff]  ;;  %1403 = vst [vmem:[%s2273_s23 + $0x80] sm:$0xff] %v2584_v60  ;;  %v2598_v0 = vld [vmem:[#allocation2 + $0xe0] sm:$0xff]  ;;  %1405 = vst [vmem:[%s2273_s23 + $0x90] sm:$0xff] %v2594_v62  ;;  %v1491_v10 = vadd.f32 %v1490_v1, %v1460_v58  ;;  %v1423_v11 = vadd.f32 %v1422_v2, %v1360_v43  ;;  %v1472_v47 = vmul.f32 %v2584_v60, %v2584_v60 }
 0x217   : > { %1404 = vst [vmem:[%s2273_s23 + $0x88] sm:$0xff] %v2586_v61  ;;  %1406 = vst [vmem:[%s2273_s23 + $0x98] sm:$0xff] %v2596_v63  ;;  %v2606_v5 = vld [vmem:[#allocation2 + $0x90] sm:$0xff]  ;;  %v2610_v7 = vld [vmem:[#allocation2 + $0xc0] sm:$0xff]  ;;  %v1475_v56 = vmul.f32 %v2596_v63, %v2596_v63 }
 0x218   : > { %1407 = vst [vmem:[%s2273_s23 + $0xa0] sm:$0xff] %v2598_v0  ;;  %v2608_v6 = vld [vmem:[#allocation2 + $0x70] sm:$0xff]  ;;  %1408 = vst [vmem:[%s2273_s23 + $0xa8] sm:$0xff] %v2606_v5  ;;  %v2618_v8 = vld [vmem:[#allocation2 + $0xa8] sm:$0xff]  ;;  %v1492_v18 = vadd.f32 %v1491_v10, %v1461_v4  ;;  %v1424_v19 = vadd.f32 %v1423_v11, %v2546_v44  ;;  %v1471_v44 = vmul.f32 %v2582_v59, %v2582_v59 }
 0x219   : > { %1409 = vst [vmem:[%s2273_s23 + $0xb0] sm:$0xff] %v2608_v6  ;;  %1410 = vst [vmem:[%s2273_s23 + $0xb8] sm:$0xff] %v2610_v7  ;;  %v2620_v9 = vld [vmem:[#allocation2 + $0xd0] sm:$0xff]  ;;  %v2632_v13 = vld [vmem:[#allocation2 + $0x28] sm:$0xff] }
 0x21a   : > { %v2622_v3 = vld [vmem:[#allocation2 + $0x10] sm:$0xff]  ;;  %1411 = vst [vmem:[%s2273_s23 + $0xc0] sm:$0xff] %v2618_v8  ;;  %1412 = vst [vmem:[%s2273_s23 + $0xc8] sm:$0xff] %v2620_v9  ;;  %v2634_v14 = vld [vmem:[#allocation2 + $0xa0] sm:$0xff]  ;;  %v1493_v21 = vadd.f32 %v1492_v18, %v1462_v12  ;;  %v1425_v22 = vadd.f32 %v1424_v19, %v2548_v45 }
 0x21b   : > { %1413 = vst [vmem:[%s2273_s23 + $0xd0] sm:$0xff] %v2622_v3  ;;  %v2636_v15 = vld [vmem:[#allocation2 + $0xf8] sm:$0xff]  ;;  %1414 = vst [vmem:[%s2273_s23 + $0xd8] sm:$0xff] %v2632_v13  ;;  %v2644_v16 = vld [vmem:[#allocation2 + $0x20] sm:$0xff] }
 0x21c   : > { %1415 = vst [vmem:[%s2273_s23 + $0xe0] sm:$0xff] %v2634_v14  ;;  %1416 = vst [vmem:[%s2273_s23 + $0xe8] sm:$0xff] %v2636_v15  ;;  %v2646_v17 = vld [vmem:[#allocation2 + $0x98] sm:$0xff]  ;;  %v1494_v24 = vadd.f32 %v1493_v21, %v1463_v20  ;;  %v1426_v25 = vadd.f32 %v1425_v22, %v2550_v46 }
 0x21d   : > { %1417 = vst [vmem:[%s2273_s23 + $0xf0] sm:$0xff] %v2644_v16  ;;  %1418 = vst [vmem:[%s2273_s23 + $0xf8] sm:$0xff] %v2646_v17 }
 0x21e   : > { %v1495_v27 = vadd.f32 %v1494_v24, %v1464_v23  ;;  %v1427_v28 = vadd.f32 %v1426_v25, %v2558_v50  ;;  %v1473_v50 = vmul.f32 %v2586_v61, %v2586_v61 }
 0x220   : > { %v1496_v30 = vadd.f32 %v1495_v27, %v1465_v26  ;;  %v1428_v31 = vadd.f32 %v1427_v28, %v2560_v51 }
 0x222   : > { %v1497_v33 = vadd.f32 %v1496_v30, %v1466_v29  ;;  %v1429_v34 = vadd.f32 %v1428_v31, %v2562_v52 }
 0x224   : > { %v1498_v36 = vadd.f32 %v1497_v33, %v1467_v32  ;;  %v1430_v37 = vadd.f32 %v1429_v34, %v2570_v53  ;;  %v1474_v53 = vmul.f32 %v2594_v62, %v2594_v62 }
 0x226   : > { %v1499_v39 = vadd.f32 %v1498_v36, %v1468_v35  ;;  %v1431_v40 = vadd.f32 %v1430_v37, %v2572_v54 }
 0x228   : > { %v1500_v42 = vadd.f32 %v1499_v39, %v1469_v38  ;;  %v1432_v43 = vadd.f32 %v1431_v40, %v2574_v55 }
 0x22a   : > { %v1501_v45 = vadd.f32 %v1500_v42, %v1470_v41  ;;  %v1433_v46 = vadd.f32 %v1432_v43, %v2582_v59  ;;  %v1476_v59 = vmul.f32 %v2598_v0, %v2598_v0 }
 0x22c   : > { %v1502_v48 = vadd.f32 %v1501_v45, %v1471_v44  ;;  %v1434_v49 = vadd.f32 %v1433_v46, %v2584_v60 }
 0x22e   : > { %v1503_v51 = vadd.f32 %v1502_v48, %v1472_v47  ;;  %v1435_v52 = vadd.f32 %v1434_v49, %v2586_v61  ;;  %v1477_v61 = vmul.f32 %v2606_v5, %v2606_v5 }
 0x230   : > { %v1504_v54 = vadd.f32 %v1503_v51, %v1473_v50  ;;  %v1436_v55 = vadd.f32 %v1435_v52, %v2594_v62  ;;  %v1478_v62 = vmul.f32 %v2608_v6, %v2608_v6 }
 0x232   : > { %v1505_v57 = vadd.f32 %v1504_v54, %v1474_v53  ;;  %v1437_v58 = vadd.f32 %v1436_v55, %v2596_v63  ;;  %v1479_v63 = vmul.f32 %v2610_v7, %v2610_v7 }
 0x234   : > { %v1506_v60 = vadd.f32 %v1505_v57, %v1475_v56  ;;  %v1438_v1 = vadd.f32 %v1437_v58, %v2598_v0  ;;  %v1480_v0 = vmul.f32 %v2618_v8, %v2618_v8 }
 0x236   : > { %v1507_v2 = vadd.f32 %v1506_v60, %v1476_v59  ;;  %v1439_v4 = vadd.f32 %v1438_v1, %v2606_v5  ;;  %v1481_v5 = vmul.f32 %v2620_v9, %v2620_v9 }
 0x238   : > { %v1508_v10 = vadd.f32 %v1507_v2, %v1477_v61  ;;  %v1440_v11 = vadd.f32 %v1439_v4, %v2608_v6  ;;  %v1482_v6 = vmul.f32 %v2622_v3, %v2622_v3 }
 0x23a   : > { %v1509_v12 = vadd.f32 %v1508_v10, %v1478_v62  ;;  %v1441_v18 = vadd.f32 %v1440_v11, %v2610_v7  ;;  %v1483_v7 = vmul.f32 %v2632_v13, %v2632_v13 }
 0x23c   : > { %v1510_v19 = vadd.f32 %v1509_v12, %v1479_v63  ;;  %v1442_v20 = vadd.f32 %v1441_v18, %v2618_v8  ;;  %v1484_v8 = vmul.f32 %v2634_v14, %v2634_v14 }
 0x23e   : > { %v1511_v21 = vadd.f32 %v1510_v19, %v1480_v0  ;;  %v1443_v22 = vadd.f32 %v1442_v20, %v2620_v9  ;;  %v1485_v9 = vmul.f32 %v2636_v15, %v2636_v15 }
 0x240   : > { %v1512_v23 = vadd.f32 %v1511_v21, %v1481_v5  ;;  %v1444_v24 = vadd.f32 %v1443_v22, %v2622_v3  ;;  %v1486_v3 = vmul.f32 %v2644_v16, %v2644_v16 }
 0x242   : > { %v1513_v25 = vadd.f32 %v1512_v23, %v1482_v6  ;;  %v1445_v26 = vadd.f32 %v1444_v24, %v2632_v13  ;;  %v1487_v13 = vmul.f32 %v2646_v17, %v2646_v17 }
 0x244   : > { %v1514_v27 = vadd.f32 %v1513_v25, %v1483_v7  ;;  %v1446_v28 = vadd.f32 %v1445_v26, %v2634_v14 }
 0x246   : > { %v1515_v29 = vadd.f32 %v1514_v27, %v1484_v8  ;;  %v1447_v30 = vadd.f32 %v1446_v28, %v2636_v15 }
 0x248   : > { %v1516_v31 = vadd.f32 %v1515_v29, %v1485_v9  ;;  %v1448_v32 = vadd.f32 %v1447_v30, %v2644_v16 }
 0x24a   : > { %v1517_v33 = vadd.f32 %v1516_v31, %v1486_v3  ;;  %v1449_v34 = vadd.f32 %v1448_v32, %v2646_v17 }
 0x24c   : > { %v1450_v14 = vrot.slane %v1449_v34, 4  ;;  %v1518_v35 = vadd.f32 %v1517_v33, %v1487_v13 }
 0x24e   : > { %v1451_v36 = vadd.f32 %v1450_v14, %v1449_v34  ;;  %v1519_v37 = vrot.slane %v1518_v35, 4 }
 0x250   : > { %v1452_v38 = vrot.slane %v1451_v36, 2  ;;  %v1520_v39 = vadd.f32 %v1519_v37, %v1518_v35 }
 0x252   : > { %v1453_v15 = vadd.f32 %v1452_v38, %v1451_v36  ;;  %v1521_v40 = vrot.slane %v1520_v39, 2 }
 0x254   : > { %v1454_v41 = vrot.slane %v1453_v15, 1  ;;  %v1522_v42 = vadd.f32 %v1521_v40, %v1520_v39 }
 0x256   : > { %v1455_v43 = vadd.f32 %v1454_v41, %v1453_v15  ;;  %v1523_v44 = vrot.slane %v1522_v42, 1 }
 0x258   : > { %v1524_v16 = vadd.f32 %v1523_v44, %v1522_v42 }
 0x25a   : > { %v1526_v45 = vsel %vm1525_vm0, %v1455_v43, %v1524_v16 }
 0x25b   : > { %1527 = vst [vmem:[%s2278_s22] sm:$0x3] %v1526_v45 }
 0x25c PF: > { %s14_s20 = sadd.s32 1, %s1889_s20   ;;  %s2767_s0 = sld [smem:[#allocation4_spill]] }
 0x25d   : > { %p11_p3 = scmp.ge.s32.totalorder %s14_s20, 18   ;;  %s2768_s23 = sld [smem:[#allocation5_spill]] }
 0x25e   : > { %s2769_s12 = smov %s1861_s13  ;;  %s2770_s13 = smov %s1984_s4 }
 0x25f   : > { %s2771_s14 = smov %s1877_s17  ;;  %s2772_s15 = smov %s1881_s18 }
 0x260   : > { %s2773_s16 = smov %s1885_s19  ;;  %s2774_s17 = smov %s2784_s21 }
 0x261   :  { %13 = sbr.rel (!%p11_p3) target bundleno = 7 (0x7), region = 109 }
 0x262   : > { %s2775_s18 = smov %s2767_s0 }
 0x263   : > { %s2776_s19 = smov %s2768_s23 }

// kernel: pp2p_forward.16
= control target key start
LH: loop header
LB: loop body
LE: loop exit
PB: predicated region body
PF: predicated region fallthrough
CT: control target
= control target key end

     0   :  { %s1084_s12 = smov 0   ;;  %s1086_s13 = smov 0   ;;  %s1580_s0 = inlined_call_operand.vmem [shape: f32[4,32,16,128], index: 0, kind: input, shape index: {}]   ;;  %s1581_s1 = inlined_call_operand.vmem [shape: f32[1,128], index: 1, kind: input, shape index: {}]   ;;  %s1582_s2 = inlined_call_operand.vmem [shape: f32[1,128], index: 2, kind: input, shape index: {}]   ;;  %s1583_s3 = inlined_call_operand.vmem [shape: f32[32,2,16,256], index: 3, kind: output, shape index: {}]  }
   0x1   :  { %s1088_s14 = smov 0   ;;  %s1090_s15 = smov 0  }
   0x2   :  { %s1092_s16 = smov 0   ;;  %s1094_s17 = smov 0  }
   0x3   :  { %s1096_s18 = smov 0  }
   0x4 LB: > { %s25_s19 = sadd.s32 1, %s1054_s16  ;;  %s28_s20 = sadd.s32 1, %s1058_s17  ;;  %s1062_s18 = sphi %s1096_s18, %s13_s18   ;;  %s1058_s17 = sphi %s1094_s17, %s1590_s17   ;;  %s1054_s16 = sphi %s1092_s16, %s1589_s16   ;;  %s1050_s15 = sphi %s1090_s15, %s1588_s15   ;;  %s1046_s14 = sphi %s1088_s14, %s1587_s14   ;;  %s1042_s13 = sphi %s1086_s13, %s1586_s13   ;;  %s1038_s12 = sphi %s1084_s12, %s1585_s12  }
   0x5   : > { %p26_p0 = scmp.ge.s32.totalorder %s25_s19, 2  ;;  %s933_s21 = sadd.s32 4294967295, %s1062_s18  }
   0x6   : > { %p127_p1 = scmp.ne.s32.totalorder %s1042_s13, %s1038_s12  ;;  %p128_p2 = scmp.eq.s32.totalorder %s933_s21, 3 }
   0x7   : > { %s1592_s19 = smov (%p26_p0, %s25_s19), 0  ;;  %s1594_s20 = smov (!%p26_p0, %s28_s20), %s1058_s17 }
   0x8   : > { %s113_s22 = ssub.s32 %s1054_s16, %s1592_s19  ;;  %p30_p3 = scmp.ge.s32.totalorder %s1594_s20, 2 }
   0x9   : > { %p939_p4 = scmp.ge.s32.totalorder %s1062_s18, 1  ;;  %p1130_p5 = por %p128_p2, %p127_p1 }
   0xa   : > { %p176_p6 = scmp.lt.s32.totalorder %s1062_s18, 5  ;;  %s1596_s20 = smov (%p30_p3, %s1594_s20), 0 }
   0xb   : > { %s111_s24 = ssub.s32 %s1058_s17, %s1596_s20  ;;  %s117_s26 = sadd.s32 1, %s1042_s13 }
   0xc   : > { %p177_p7 = pnand %p939_p4, %p176_p6  ;;  %s114_s25 = sor.u32 %s113_s22, %s111_s24 }
   0xd   : > { %p115_p8 = scmp.eq.s32.totalorder %s114_s25, 0  ;;  %s941_s28 = sshll.u32 (!%p177_p7), %s1050_s15, 1 }
   0xe   : > { %180 = sbr.rel (%p177_p7) target bundleno = 106 (0x6a), region = 32  ;;  %s207_s29 = sadd.s32 (!%p177_p7), %s1046_s14, %s941_s28 }
   0xf   : > { %s1141_s27 = scalar_select %p115_p8, %s1042_s13, %s117_s26  }
  0x10   : > { %p209_p9 = scmp.lt.s32.totalorder (!%p177_p7), %s207_s29, 3  ;;  %s203_s30 = sand.u32 (!%p177_p7), 1, %s1038_s12  }
  0x11   : > { %s1164_s12 = sshll.u32 (!%p177_p7), %s203_s30, 9 }
  0x12   : > { %s1195_s21 = scalar_lea.vmem (!%p177_p7), [#allocation2], %s1164_s12 }
  0x13   : > { %s1598_s29 = smov (!%p209_p9, %s207_s29), 3  ;;  %v1149_v0 = vld [vmem:[%s1581_s1] ss:$0 sm:$0xff]  ;;  %s947_s22 = sshll.u32 (%p1130_p5), %s1050_s15, 2 }
  0x14   : > { %s951_s4 = sshll.u32 %s1598_s29, 9  ;;  %v1159_v1 = vld [vmem:[%s1582_s2] ss:$0 sm:$0xff]  ;;  %s565_s23 = sadd.s32 (%p1130_p5), %s1046_s14, %s947_s22 }
  0x15   : > { %s1154_s9 = scalar_lea.vmem %s1580_s0, %s951_s4  ;;  %s948_s24 = sshll.u32 (%p1130_p5), %s565_s23, 3 }
  0x16   : > { %v222_v2 = vld [vmem:[%s1154_s9] sm:$0xff]  ;;  %v223_v3 = vld [vmem:[%s1154_s9 + $0x8] sm:$0xff]  ;;  %v224_v4 = vld [vmem:[%s1154_s9 + $0x10] sm:$0xff]  ;;  %s1438_s28 = scalar_lea.vmem (%p1130_p5), %s1583_s3, %s948_s24 }
  0x17   : > { %v293_v5 = vmul.f32 %v1149_v0, %v222_v2  ;;  %v294_v6 = vmul.f32 %v1149_v0, %v223_v3  ;;  %v295_v7 = vmul.f32 %v1149_v0, %v224_v4  ;;  %v225_v8 = vld [vmem:[%s1154_s9 + $0x18] sm:$0xff]  ;;  %v226_v9 = vld [vmem:[%s1154_s9 + $0x20] sm:$0xff]  ;;  %v227_v10 = vld [vmem:[%s1154_s9 + $0x28] sm:$0xff] }
  0x18   : > { %v296_v11 = vmul.f32 %v1149_v0, %v225_v8  ;;  %v297_v12 = vmul.f32 %v1149_v0, %v226_v9  ;;  %v298_v13 = vmul.f32 %v1149_v0, %v227_v10  ;;  %v228_v14 = vld [vmem:[%s1154_s9 + $0x30] sm:$0xff]  ;;  %v229_v15 = vld [vmem:[%s1154_s9 + $0x38] sm:$0xff]  ;;  %v230_v24 = vld [vmem:[%s1154_s9 + $0x40] sm:$0xff] }
  0x19   : > { %v364_v16 = vadd.f32 %v1159_v1, %v293_v5  ;;  %v365_v17 = vadd.f32 %v1159_v1, %v294_v6  ;;  %v366_v18 = vadd.f32 %v1159_v1, %v295_v7  ;;  %v299_v19 = vmul.f32 %v1149_v0, %v228_v14  ;;  %v231_v25 = vld [vmem:[%s1154_s9 + $0x48] sm:$0xff]  ;;  %v232_v26 = vld [vmem:[%s1154_s9 + $0x50] sm:$0xff]  ;;  %v233_v31 = vld [vmem:[%s1154_s9 + $0x58] sm:$0xff] }
  0x1a   : > { %v367_v20 = vadd.f32 %v1159_v1, %v296_v11  ;;  %v368_v21 = vadd.f32 %v1159_v1, %v297_v12  ;;  %v369_v22 = vadd.f32 %v1159_v1, %v298_v13  ;;  %v300_v23 = vmul.f32 %v1149_v0, %v229_v15  ;;  %v234_v32 = vld [vmem:[%s1154_s9 + $0x60] sm:$0xff]  ;;  %v235_v33 = vld [vmem:[%s1154_s9 + $0x68] sm:$0xff]  ;;  %v236_v38 = vld [vmem:[%s1154_s9 + $0x70] sm:$0xff] }
  0x1b   : > { %v428_v27 = vmax.f32 %v364_v16, 0.0  ;;  %v429_v28 = vmax.f32 %v365_v17, 0.0  ;;  %v430_v29 = vmax.f32 %v366_v18, 0.0  ;;  %v370_v30 = vadd.f32 %v1159_v1, %v299_v19  ;;  %v237_v43 = vld [vmem:[%s1154_s9 + $0x78] sm:$0xff]  ;;  %v238_v56 = vld [vmem:[%s1154_s9 + $0x80] sm:$0xff]  ;;  %v239_v57 = vld [vmem:[%s1154_s9 + $0x88] sm:$0xff] }
  0x1c   : > { %v431_v34 = vmax.f32 %v367_v20, 0.0  ;;  %v432_v35 = vmax.f32 %v368_v21, 0.0  ;;  %v433_v36 = vmax.f32 %v369_v22, 0.0  ;;  %v371_v37 = vadd.f32 %v1159_v1, %v300_v23  ;;  %v240_v58 = vld [vmem:[%s1154_s9 + $0x90] sm:$0xff]  ;;  %v241_v63 = vld [vmem:[%s1154_s9 + $0x98] sm:$0xff]  ;;  %v242_v2 = vld [vmem:[%s1154_s9 + $0xa0] sm:$0xff] }
  0x1d   : > { %492 = vst [vmem:[%s1195_s21] sm:$0xff] %v428_v27  ;;  %493 = vst [vmem:[%s1195_s21 + $0x8] sm:$0xff] %v429_v28  ;;  %v434_v39 = vmax.f32 %v370_v30, 0.0  ;;  %v301_v40 = vmul.f32 %v1149_v0, %v230_v24  ;;  %v302_v41 = vmul.f32 %v1149_v0, %v231_v25  ;;  %v303_v42 = vmul.f32 %v1149_v0, %v232_v26  ;;  %v243_v3 = vld [vmem:[%s1154_s9 + $0xa8] sm:$0xff]  ;;  %v244_v8 = vld [vmem:[%s1154_s9 + $0xb0] sm:$0xff] }
  0x1e   : > { %494 = vst [vmem:[%s1195_s21 + $0x10] sm:$0xff] %v430_v29  ;;  %495 = vst [vmem:[%s1195_s21 + $0x18] sm:$0xff] %v431_v34  ;;  %v435_v44 = vmax.f32 %v371_v37, 0.0  ;;  %v304_v45 = vmul.f32 %v1149_v0, %v233_v31  ;;  %v305_v46 = vmul.f32 %v1149_v0, %v234_v32  ;;  %v306_v47 = vmul.f32 %v1149_v0, %v235_v33  ;;  %v245_v13 = vld [vmem:[%s1154_s9 + $0xb8] sm:$0xff]  ;;  %v246_v26 = vld [vmem:[%s1154_s9 + $0xc0] sm:$0xff] }
  0x1f   : > { %496 = vst [vmem:[%s1195_s21 + $0x20] sm:$0xff] %v432_v35  ;;  %497 = vst [vmem:[%s1195_s21 + $0x28] sm:$0xff] %v433_v36  ;;  %v372_v48 = vadd.f32 %v1159_v1, %v301_v40  ;;  %v373_v49 = vadd.f32 %v1159_v1, %v302_v41  ;;  %v374_v50 = vadd.f32 %v1159_v1, %v303_v42  ;;  %v247_v27 = vld [vmem:[%s1154_s9 + $0xc8] sm:$0xff]  ;;  %v248_v28 = vld [vmem:[%s1154_s9 + $0xd0] sm:$0xff] }
  0x20   : > { %498 = vst [vmem:[%s1195_s21 + $0x30] sm:$0xff] %v434_v39  ;;  %v307_v51 = vmul.f32 %v1149_v0, %v236_v38  ;;  %499 = vst [vmem:[%s1195_s21 + $0x38] sm:$0xff] %v435_v44  ;;  %v375_v52 = vadd.f32 %v1159_v1, %v304_v45  ;;  %v376_v53 = vadd.f32 %v1159_v1, %v305_v46  ;;  %v249_v33 = vld [vmem:[%s1154_s9 + $0xd8] sm:$0xff]  ;;  %v250_v34 = vld [vmem:[%s1154_s9 + $0xe0] sm:$0xff] }
  0x21   : > { %v377_v54 = vadd.f32 %v1159_v1, %v306_v47  ;;  %v308_v55 = vmul.f32 %v1149_v0, %v237_v43  ;;  %v436_v59 = vmax.f32 %v372_v48, 0.0  ;;  %v437_v60 = vmax.f32 %v373_v49, 0.0  ;;  %v251_v35 = vld [vmem:[%s1154_s9 + $0xe8] sm:$0xff]  ;;  %v252_v40 = vld [vmem:[%s1154_s9 + $0xf0] sm:$0xff]  ;;  %v253_v45 = vld [vmem:[%s1154_s9 + $0xf8] sm:$0xff] }
  0x22   : > { %v438_v61 = vmax.f32 %v374_v50, 0.0  ;;  %v378_v62 = vadd.f32 %v1159_v1, %v307_v51  ;;  %v439_v4 = vmax.f32 %v375_v52, 0.0  ;;  %v440_v5 = vmax.f32 %v376_v53, 0.0 }
  0x23   : > { %v441_v6 = vmax.f32 %v377_v54, 0.0  ;;  %v379_v7 = vadd.f32 %v1159_v1, %v308_v55  ;;  %500 = vst [vmem:[%s1195_s21 + $0x40] sm:$0xff] %v436_v59  ;;  %501 = vst [vmem:[%s1195_s21 + $0x48] sm:$0xff] %v437_v60  ;;  %v309_v10 = vmul.f32 %v1149_v0, %v238_v56  ;;  %v310_v11 = vmul.f32 %v1149_v0, %v239_v57  ;;  %v255_v59 = vld [vmem:[%s1154_s9 + $0x108] sm:$0xff]  ;;  %v256_v60 = vld [vmem:[%s1154_s9 + $0x110] sm:$0xff] }
  0x24   : > { %502 = vst [vmem:[%s1195_s21 + $0x50] sm:$0xff] %v438_v61  ;;  %v442_v9 = vmax.f32 %v378_v62, 0.0  ;;  %v311_v12 = vmul.f32 %v1149_v0, %v240_v58  ;;  %503 = vst [vmem:[%s1195_s21 + $0x58] sm:$0xff] %v439_v4  ;;  %v312_v15 = vmul.f32 %v1149_v0, %v241_v63  ;;  %v313_v16 = vmul.f32 %v1149_v0, %v242_v2  ;;  %v254_v58 = vld [vmem:[%s1154_s9 + $0x100] sm:$0xff] }
  0x25   : > { %504 = vst [vmem:[%s1195_s21 + $0x60] sm:$0xff] %v440_v5  ;;  %505 = vst [vmem:[%s1195_s21 + $0x68] sm:$0xff] %v441_v6  ;;  %v443_v14 = vmax.f32 %v379_v7, 0.0  ;;  %v314_v17 = vmul.f32 %v1149_v0, %v243_v3  ;;  %v380_v18 = vadd.f32 %v1159_v1, %v309_v10  ;;  %v381_v19 = vadd.f32 %v1159_v1, %v310_v11  ;;  %v257_v3 = vld [vmem:[%s1154_s9 + $0x118] sm:$0xff]  ;;  %v258_v4 = vld [vmem:[%s1154_s9 + $0x120] sm:$0xff] }
  0x26   : > { %506 = vst [vmem:[%s1195_s21 + $0x70] sm:$0xff] %v442_v9  ;;  %v382_v20 = vadd.f32 %v1159_v1, %v311_v12  ;;  %v315_v21 = vmul.f32 %v1149_v0, %v244_v8  ;;  %v383_v22 = vadd.f32 %v1159_v1, %v312_v15  ;;  %v384_v23 = vadd.f32 %v1159_v1, %v313_v16  ;;  %v259_v5 = vld [vmem:[%s1154_s9 + $0x128] sm:$0xff]  ;;  %v260_v10 = vld [vmem:[%s1154_s9 + $0x130] sm:$0xff]  ;;  %v261_v15 = vld [vmem:[%s1154_s9 + $0x138] sm:$0xff] }
  0x27   : > { %507 = vst [vmem:[%s1195_s21 + $0x78] sm:$0xff] %v443_v14  ;;  %v385_v24 = vadd.f32 %v1159_v1, %v314_v17  ;;  %v316_v25 = vmul.f32 %v1149_v0, %v245_v13  ;;  %v444_v29 = vmax.f32 %v380_v18, 0.0  ;;  %v445_v30 = vmax.f32 %v381_v19, 0.0 }
  0x28   : > { %v446_v31 = vmax.f32 %v382_v20, 0.0  ;;  %v386_v32 = vadd.f32 %v1159_v1, %v315_v21  ;;  %v447_v36 = vmax.f32 %v383_v22, 0.0  ;;  %v448_v37 = vmax.f32 %v384_v23, 0.0 }
  0x29   : > { %v449_v38 = vmax.f32 %v385_v24, 0.0  ;;  %v387_v39 = vadd.f32 %v1159_v1, %v316_v25  ;;  %508 = vst [vmem:[%s1195_s21 + $0x80] sm:$0xff] %v444_v29  ;;  %509 = vst [vmem:[%s1195_s21 + $0x88] sm:$0xff] %v445_v30  ;;  %v317_v42 = vmul.f32 %v1149_v0, %v246_v26  ;;  %v318_v43 = vmul.f32 %v1149_v0, %v247_v27  ;;  %v263_v29 = vld [vmem:[%s1154_s9 + $0x148] sm:$0xff]  ;;  %v264_v30 = vld [vmem:[%s1154_s9 + $0x150] sm:$0xff] }
  0x2a   : > { %510 = vst [vmem:[%s1195_s21 + $0x90] sm:$0xff] %v446_v31  ;;  %v450_v41 = vmax.f32 %v386_v32, 0.0  ;;  %v319_v44 = vmul.f32 %v1149_v0, %v248_v28  ;;  %511 = vst [vmem:[%s1195_s21 + $0x98] sm:$0xff] %v447_v36  ;;  %v320_v47 = vmul.f32 %v1149_v0, %v249_v33  ;;  %v321_v48 = vmul.f32 %v1149_v0, %v250_v34  ;;  %v262_v28 = vld [vmem:[%s1154_s9 + $0x140] sm:$0xff] }
  0x2b   : > { %512 = vst [vmem:[%s1195_s21 + $0xa0] sm:$0xff] %v448_v37  ;;  %513 = vst [vmem:[%s1195_s21 + $0xa8] sm:$0xff] %v449_v38  ;;  %v451_v46 = vmax.f32 %v387_v39, 0.0  ;;  %v322_v49 = vmul.f32 %v1149_v0, %v251_v35  ;;  %v388_v50 = vadd.f32 %v1159_v1, %v317_v42  ;;  %v389_v51 = vadd.f32 %v1159_v1, %v318_v43  ;;  %v265_v35 = vld [vmem:[%s1154_s9 + $0x158] sm:$0xff]  ;;  %v266_v36 = vld [vmem:[%s1154_s9 + $0x160] sm:$0xff] }
  0x2c   : > { %514 = vst [vmem:[%s1195_s21 + $0xb0] sm:$0xff] %v450_v41  ;;  %v390_v52 = vadd.f32 %v1159_v1, %v319_v44  ;;  %v323_v53 = vmul.f32 %v1149_v0, %v252_v40  ;;  %v391_v54 = vadd.f32 %v1159_v1, %v320_v47  ;;  %v392_v55 = vadd.f32 %v1159_v1, %v321_v48  ;;  %v267_v37 = vld [vmem:[%s1154_s9 + $0x168] sm:$0xff]  ;;  %v268_v42 = vld [vmem:[%s1154_s9 + $0x170] sm:$0xff]  ;;  %v269_v47 = vld [vmem:[%s1154_s9 + $0x178] sm:$0xff] }
  0x2d   : > { %515 = vst [vmem:[%s1195_s21 + $0xb8] sm:$0xff] %v451_v46  ;;  %v393_v56 = vadd.f32 %v1159_v1, %v322_v49  ;;  %v324_v57 = vmul.f32 %v1149_v0, %v253_v45  ;;  %v452_v61 = vmax.f32 %v388_v50, 0.0  ;;  %v453_v62 = vmax.f32 %v389_v51, 0.0 }
  0x2e   : > { %v454_v63 = vmax.f32 %v390_v52, 0.0  ;;  %v394_v2 = vadd.f32 %v1159_v1, %v323_v53  ;;  %v455_v6 = vmax.f32 %v391_v54, 0.0  ;;  %v456_v7 = vmax.f32 %v392_v55, 0.0 }
  0x2f   : > { %v457_v8 = vmax.f32 %v393_v56, 0.0  ;;  %v395_v9 = vadd.f32 %v1159_v1, %v324_v57  ;;  %516 = vst [vmem:[%s1195_s21 + $0xc0] sm:$0xff] %v452_v61  ;;  %517 = vst [vmem:[%s1195_s21 + $0xc8] sm:$0xff] %v453_v62  ;;  %v325_v12 = vmul.f32 %v1149_v0, %v254_v58  ;;  %v326_v13 = vmul.f32 %v1149_v0, %v255_v59  ;;  %v271_v61 = vld [vmem:[%s1154_s9 + $0x188] sm:$0xff]  ;;  %v272_v62 = vld [vmem:[%s1154_s9 + $0x190] sm:$0xff] }
  0x30   : > { %518 = vst [vmem:[%s1195_s21 + $0xd0] sm:$0xff] %v454_v63  ;;  %v458_v11 = vmax.f32 %v394_v2, 0.0  ;;  %v327_v14 = vmul.f32 %v1149_v0, %v256_v60  ;;  %519 = vst [vmem:[%s1195_s21 + $0xd8] sm:$0xff] %v455_v6  ;;  %v328_v17 = vmul.f32 %v1149_v0, %v257_v3  ;;  %v329_v18 = vmul.f32 %v1149_v0, %v258_v4  ;;  %v270_v60 = vld [vmem:[%s1154_s9 + $0x180] sm:$0xff] }
  0x31   : > { %520 = vst [vmem:[%s1195_s21 + $0xe0] sm:$0xff] %v456_v7  ;;  %521 = vst [vmem:[%s1195_s21 + $0xe8] sm:$0xff] %v457_v8  ;;  %v459_v16 = vmax.f32 %v395_v9, 0.0  ;;  %v330_v19 = vmul.f32 %v1149_v0, %v259_v5  ;;  %v396_v20 = vadd.f32 %v1159_v1, %v325_v12  ;;  %v397_v21 = vadd.f32 %v1159_v1, %v326_v13  ;;  %v273_v5 = vld [vmem:[%s1154_s9 + $0x198] sm:$0xff]  ;;  %v274_v6 = vld [vmem:[%s1154_s9 + $0x1a0] sm:$0xff] }
  0x32   : > { %522 = vst [vmem:[%s1195_s21 + $0xf0] sm:$0xff] %v458_v11  ;;  %v398_v22 = vadd.f32 %v1159_v1, %v327_v14  ;;  %v331_v23 = vmul.f32 %v1149_v0, %v260_v10  ;;  %v399_v24 = vadd.f32 %v1159_v1, %v328_v17  ;;  %v400_v25 = vadd.f32 %v1159_v1, %v329_v18  ;;  %v275_v7 = vld [vmem:[%s1154_s9 + $0x1a8] sm:$0xff]  ;;  %v276_v12 = vld [vmem:[%s1154_s9 + $0x1b0] sm:$0xff]  ;;  %v277_v17 = vld [vmem:[%s1154_s9 + $0x1b8] sm:$0xff] }
  0x33   : > { %523 = vst [vmem:[%s1195_s21 + $0xf8] sm:$0xff] %v459_v16  ;;  %v401_v26 = vadd.f32 %v1159_v1, %v330_v19  ;;  %v332_v27 = vmul.f32 %v1149_v0, %v261_v15  ;;  %v460_v31 = vmax.f32 %v396_v20, 0.0  ;;  %v461_v32 = vmax.f32 %v397_v21, 0.0 }
  0x34   : > { %v462_v33 = vmax.f32 %v398_v22, 0.0  ;;  %v402_v34 = vadd.f32 %v1159_v1, %v331_v23  ;;  %v463_v38 = vmax.f32 %v399_v24, 0.0  ;;  %v464_v39 = vmax.f32 %v400_v25, 0.0 }
  0x35   : > { %v465_v40 = vmax.f32 %v401_v26, 0.0  ;;  %v403_v41 = vadd.f32 %v1159_v1, %v332_v27  ;;  %524 = vst [vmem:[%s1195_s21 + $0x100] sm:$0xff] %v460_v31  ;;  %525 = vst [vmem:[%s1195_s21 + $0x108] sm:$0xff] %v461_v32  ;;  %v333_v44 = vmul.f32 %v1149_v0, %v262_v28  ;;  %v334_v45 = vmul.f32 %v1149_v0, %v263_v29  ;;  %v279_v31 = vld [vmem:[%s1154_s9 + $0x1c8] sm:$0xff]  ;;  %v280_v32 = vld [vmem:[%s1154_s9 + $0x1d0] sm:$0xff] }
  0x36   : > { %526 = vst [vmem:[%s1195_s21 + $0x110] sm:$0xff] %v462_v33  ;;  %v466_v43 = vmax.f32 %v402_v34, 0.0  ;;  %v335_v46 = vmul.f32 %v1149_v0, %v264_v30  ;;  %527 = vst [vmem:[%s1195_s21 + $0x118] sm:$0xff] %v463_v38  ;;  %v336_v49 = vmul.f32 %v1149_v0, %v265_v35  ;;  %v337_v50 = vmul.f32 %v1149_v0, %v266_v36  ;;  %v278_v30 = vld [vmem:[%s1154_s9 + $0x1c0] sm:$0xff] }
  0x37   : > { %528 = vst [vmem:[%s1195_s21 + $0x120] sm:$0xff] %v464_v39  ;;  %529 = vst [vmem:[%s1195_s21 + $0x128] sm:$0xff] %v465_v40  ;;  %v467_v48 = vmax.f32 %v403_v41, 0.0  ;;  %v338_v51 = vmul.f32 %v1149_v0, %v267_v37  ;;  %v404_v52 = vadd.f32 %v1159_v1, %v333_v44  ;;  %v405_v53 = vadd.f32 %v1159_v1, %v334_v45  ;;  %v281_v37 = vld [vmem:[%s1154_s9 + $0x1d8] sm:$0xff]  ;;  %v282_v38 = vld [vmem:[%s1154_s9 + $0x1e0] sm:$0xff] }
  0x38   : > { %530 = vst [vmem:[%s1195_s21 + $0x130] sm:$0xff] %v466_v43  ;;  %v406_v54 = vadd.f32 %v1159_v1, %v335_v46  ;;  %v339_v55 = vmul.f32 %v1149_v0, %v268_v42  ;;  %v407_v56 = vadd.f32 %v1159_v1, %v336_v49  ;;  %v408_v57 = vadd.f32 %v1159_v1, %v337_v50  ;;  %v283_v39 = vld [vmem:[%s1154_s9 + $0x1e8] sm:$0xff]  ;;  %v284_v44 = vld [vmem:[%s1154_s9 + $0x1f0] sm:$0xff]  ;;  %v285_v49 = vld [vmem:[%s1154_s9 + $0x1f8] sm:$0xff] }
  0x39   : > { %531 = vst [vmem:[%s1195_s21 + $0x138] sm:$0xff] %v467_v48  ;;  %v409_v58 = vadd.f32 %v1159_v1, %v338_v51  ;;  %v340_v59 = vmul.f32 %v1149_v0, %v269_v47  ;;  %v468_v63 = vmax.f32 %v404_v52, 0.0  ;;  %v469_v2 = vmax.f32 %v405_v53, 0.0 }
  0x3a   : > { %v470_v3 = vmax.f32 %v406_v54, 0.0  ;;  %v410_v4 = vadd.f32 %v1159_v1, %v339_v55  ;;  %v471_v8 = vmax.f32 %v407_v56, 0.0  ;;  %v472_v9 = vmax.f32 %v408_v57, 0.0 }
  0x3b   : > { %v473_v10 = vmax.f32 %v409_v58, 0.0  ;;  %v411_v11 = vadd.f32 %v1159_v1, %v340_v59  ;;  %532 = vst [vmem:[%s1195_s21 + $0x140] sm:$0xff] %v468_v63  ;;  %533 = vst [vmem:[%s1195_s21 + $0x148] sm:$0xff] %v469_v2  ;;  %v341_v14 = vmul.f32 %v1149_v0, %v270_v60  ;;  %v342_v15 = vmul.f32 %v1149_v0, %v271_v61 }
  0x3c   : > { %534 = vst [vmem:[%s1195_s21 + $0x150] sm:$0xff] %v470_v3  ;;  %v474_v13 = vmax.f32 %v410_v4, 0.0  ;;  %v343_v16 = vmul.f32 %v1149_v0, %v272_v62  ;;  %535 = vst [vmem:[%s1195_s21 + $0x158] sm:$0xff] %v471_v8  ;;  %v344_v19 = vmul.f32 %v1149_v0, %v273_v5  ;;  %v345_v20 = vmul.f32 %v1149_v0, %v274_v6 }
  0x3d   : > { %536 = vst [vmem:[%s1195_s21 + $0x160] sm:$0xff] %v472_v9  ;;  %537 = vst [vmem:[%s1195_s21 + $0x168] sm:$0xff] %v473_v10  ;;  %v475_v18 = vmax.f32 %v411_v11, 0.0  ;;  %v346_v21 = vmul.f32 %v1149_v0, %v275_v7  ;;  %v412_v22 = vadd.f32 %v1159_v1, %v341_v14  ;;  %v413_v23 = vadd.f32 %v1159_v1, %v342_v15  ;;  %v726_v9 = vld [vmem:[%s1195_s21 + $0x8] sm:$0xff] (%p1130_p5)  ;;  %v728_v10 = vld [vmem:[%s1195_s21 + $0x10] sm:$0xff] (%p1130_p5) }
  0x3e   : > { %538 = vst [vmem:[%s1195_s21 + $0x170] sm:$0xff] %v474_v13  ;;  %v414_v24 = vadd.f32 %v1159_v1, %v343_v16  ;;  %v347_v25 = vmul.f32 %v1149_v0, %v276_v12  ;;  %v415_v26 = vadd.f32 %v1159_v1, %v344_v19  ;;  %v416_v27 = vadd.f32 %v1159_v1, %v345_v20  ;;  %v730_v11 = vld [vmem:[%s1195_s21 + $0x18] sm:$0xff] (%p1130_p5)  ;;  %v732_v12 = vld [vmem:[%s1195_s21 + $0x20] sm:$0xff] (%p1130_p5)  ;;  %v734_v13 = vld [vmem:[%s1195_s21 + $0x28] sm:$0xff] (%p1130_p5) }
  0x3f   : > { %539 = vst [vmem:[%s1195_s21 + $0x178] sm:$0xff] %v475_v18  ;;  %v417_v28 = vadd.f32 %v1159_v1, %v346_v21  ;;  %v348_v29 = vmul.f32 %v1149_v0, %v277_v17  ;;  %v476_v33 = vmax.f32 %v412_v22, 0.0  ;;  %v477_v34 = vmax.f32 %v413_v23, 0.0  ;;  %v736_v14 = vld [vmem:[%s1195_s21 + $0x30] sm:$0xff] (%p1130_p5)  ;;  %v738_v15 = vld [vmem:[%s1195_s21 + $0x38] sm:$0xff] (%p1130_p5)  ;;  %v740_v16 = vld [vmem:[%s1195_s21 + $0x40] sm:$0xff] (%p1130_p5) }
  0x40   : > { %v478_v35 = vmax.f32 %v414_v24, 0.0  ;;  %v418_v36 = vadd.f32 %v1159_v1, %v347_v25  ;;  %v479_v40 = vmax.f32 %v415_v26, 0.0  ;;  %v480_v41 = vmax.f32 %v416_v27, 0.0  ;;  %v742_v17 = vld [vmem:[%s1195_s21 + $0x48] sm:$0xff] (%p1130_p5)  ;;  %v744_v18 = vld [vmem:[%s1195_s21 + $0x50] sm:$0xff] (%p1130_p5)  ;;  %v746_v19 = vld [vmem:[%s1195_s21 + $0x58] sm:$0xff] (%p1130_p5) }
  0x41   : > { %v481_v42 = vmax.f32 %v417_v28, 0.0  ;;  %v419_v43 = vadd.f32 %v1159_v1, %v348_v29  ;;  %540 = vst [vmem:[%s1195_s21 + $0x180] sm:$0xff] %v476_v33  ;;  %541 = vst [vmem:[%s1195_s21 + $0x188] sm:$0xff] %v477_v34  ;;  %v349_v46 = vmul.f32 %v1149_v0, %v278_v30  ;;  %v350_v47 = vmul.f32 %v1149_v0, %v279_v31  ;;  %v748_v20 = vld [vmem:[%s1195_s21 + $0x60] sm:$0xff] (%p1130_p5)  ;;  %v750_v21 = vld [vmem:[%s1195_s21 + $0x68] sm:$0xff] (%p1130_p5) }
  0x42   : > { %542 = vst [vmem:[%s1195_s21 + $0x190] sm:$0xff] %v478_v35  ;;  %v482_v45 = vmax.f32 %v418_v36, 0.0  ;;  %v351_v48 = vmul.f32 %v1149_v0, %v280_v32  ;;  %543 = vst [vmem:[%s1195_s21 + $0x198] sm:$0xff] %v479_v40  ;;  %v352_v51 = vmul.f32 %v1149_v0, %v281_v37  ;;  %v353_v52 = vmul.f32 %v1149_v0, %v282_v38  ;;  %v752_v22 = vld [vmem:[%s1195_s21 + $0x70] sm:$0xff] (%p1130_p5)  ;;  %v754_v23 = vld [vmem:[%s1195_s21 + $0x78] sm:$0xff] (%p1130_p5) }
  0x43   : > { %544 = vst [vmem:[%s1195_s21 + $0x1a0] sm:$0xff] %v480_v41  ;;  %545 = vst [vmem:[%s1195_s21 + $0x1a8] sm:$0xff] %v481_v42  ;;  %v483_v50 = vmax.f32 %v419_v43, 0.0  ;;  %v354_v53 = vmul.f32 %v1149_v0, %v283_v39  ;;  %v420_v54 = vadd.f32 %v1159_v1, %v349_v46  ;;  %v421_v55 = vadd.f32 %v1159_v1, %v350_v47  ;;  %v756_v24 = vld [vmem:[%s1195_s21 + $0x80] sm:$0xff] (%p1130_p5)  ;;  %v758_v25 = vld [vmem:[%s1195_s21 + $0x88] sm:$0xff] (%p1130_p5) }
  0x44   : > { %546 = vst [vmem:[%s1195_s21 + $0x1b0] sm:$0xff] %v482_v45  ;;  %v422_v56 = vadd.f32 %v1159_v1, %v351_v48  ;;  %v355_v57 = vmul.f32 %v1149_v0, %v284_v44  ;;  %v423_v58 = vadd.f32 %v1159_v1, %v352_v51  ;;  %v424_v59 = vadd.f32 %v1159_v1, %v353_v52  ;;  %v760_v26 = vld [vmem:[%s1195_s21 + $0x90] sm:$0xff] (%p1130_p5)  ;;  %v762_v27 = vld [vmem:[%s1195_s21 + $0x98] sm:$0xff] (%p1130_p5)  ;;  %v764_v28 = vld [vmem:[%s1195_s21 + $0xa0] sm:$0xff] (%p1130_p5) }
  0x45   : > { %547 = vst [vmem:[%s1195_s21 + $0x1b8] sm:$0xff] %v483_v50  ;;  %v425_v60 = vadd.f32 %v1159_v1, %v354_v53  ;;  %v356_v61 = vmul.f32 %v1149_v0, %v285_v49  ;;  %v484_v62 = vmax.f32 %v420_v54, 0.0  ;;  %v485_v63 = vmax.f32 %v421_v55, 0.0  ;;  %727 = vst [vmem:[%s1438_s28 + $0x10] sm:$0xff] (%p1130_p5), %v726_v9  ;;  %v766_v29 = vld [vmem:[%s1195_s21 + $0xa8] sm:$0xff] (%p1130_p5)  ;;  %v768_v30 = vld [vmem:[%s1195_s21 + $0xb0] sm:$0xff] (%p1130_p5) }
  0x46   : > { %v486_v2 = vmax.f32 %v422_v56, 0.0  ;;  %v426_v3 = vadd.f32 %v1159_v1, %v355_v57  ;;  %v487_v4 = vmax.f32 %v423_v58, 0.0  ;;  %v488_v5 = vmax.f32 %v424_v59, 0.0  ;;  %729 = vst [vmem:[%s1438_s28 + $0x40] sm:$0xff] (%p1130_p5), %v728_v10  ;;  %731 = vst [vmem:[%s1438_s28 + $0x50] sm:$0xff] (%p1130_p5), %v730_v11  ;;  %v770_v31 = vld [vmem:[%s1195_s21 + $0xb8] sm:$0xff] (%p1130_p5) }
  0x47   : > { %v489_v6 = vmax.f32 %v425_v60, 0.0  ;;  %v427_v7 = vadd.f32 %v1159_v1, %v356_v61  ;;  %548 = vst [vmem:[%s1195_s21 + $0x1c0] sm:$0xff] %v484_v62  ;;  %549 = vst [vmem:[%s1195_s21 + $0x1c8] sm:$0xff] %v485_v63  ;;  %562 = sbr.rel (!%p1130_p5) target bundleno = 106 (0x6a), region = 36  ;;  %v724_v1 = vld [vmem:[%s1195_s21] sm:$0xff] (%p1130_p5)  ;;  %v774_v33 = vld [vmem:[%s1195_s21 + $0xc8] sm:$0xff] (%p1130_p5) }
  0x48   : > { %550 = vst [vmem:[%s1195_s21 + $0x1d0] sm:$0xff] %v486_v2  ;;  %v490_v8 = vmax.f32 %v426_v3, 0.0  ;;  %551 = vst [vmem:[%s1195_s21 + $0x1d8] sm:$0xff] %v487_v4  ;;  %v772_v32 = vld [vmem:[%s1195_s21 + $0xc0] sm:$0xff] (%p1130_p5)  ;;  %v776_v34 = vld [vmem:[%s1195_s21 + $0xd0] sm:$0xff] (%p1130_p5) }
  0x49   : > { %552 = vst [vmem:[%s1195_s21 + $0x1e0] sm:$0xff] %v488_v5  ;;  %553 = vst [vmem:[%s1195_s21 + $0x1e8] sm:$0xff] %v489_v6  ;;  %v491_v0 = vmax.f32 %v427_v7, 0.0  ;;  %v778_v35 = vld [vmem:[%s1195_s21 + $0xd8] sm:$0xff] (%p1130_p5)  ;;  %v780_v36 = vld [vmem:[%s1195_s21 + $0xe0] sm:$0xff] (%p1130_p5) }
  0x4a   : > { %554 = vst [vmem:[%s1195_s21 + $0x1f0] sm:$0xff] %v490_v8  ;;  %725 = vst [vmem:[%s1438_s28] sm:$0xff] (%p1130_p5), %v724_v1  ;;  %v782_v37 = vld [vmem:[%s1195_s21 + $0xe8] sm:$0xff] (%p1130_p5)  ;;  %v784_v38 = vld [vmem:[%s1195_s21 + $0xf0] sm:$0xff] (%p1130_p5) }
  0x4b   : > { %555 = vst [vmem:[%s1195_s21 + $0x1f8] sm:$0xff] %v491_v0  ;;  %733 = vst [vmem:[%s1438_s28 + $0x80] sm:$0xff] (%p1130_p5), %v732_v12  ;;  %v786_v39 = vld [vmem:[%s1195_s21 + $0xf8] sm:$0xff] (%p1130_p5)  ;;  %v788_v40 = vld [vmem:[%s1195_s21 + $0x100] sm:$0xff] (%p1130_p5) }
  0x4c   : > { %735 = vst [vmem:[%s1438_s28 + $0x90] sm:$0xff] %v734_v13  ;;  %737 = vst [vmem:[%s1438_s28 + $0xc0] sm:$0xff] %v736_v14  ;;  %v790_v41 = vld [vmem:[%s1195_s21 + $0x108] sm:$0xff]  ;;  %v792_v42 = vld [vmem:[%s1195_s21 + $0x110] sm:$0xff] }
  0x4d   : > { %739 = vst [vmem:[%s1438_s28 + $0xd0] sm:$0xff] %v738_v15  ;;  %741 = vst [vmem:[%s1438_s28 + $0x100] sm:$0xff] %v740_v16  ;;  %v794_v43 = vld [vmem:[%s1195_s21 + $0x118] sm:$0xff]  ;;  %v796_v44 = vld [vmem:[%s1195_s21 + $0x120] sm:$0xff] }
  0x4e   : > { %743 = vst [vmem:[%s1438_s28 + $0x110] sm:$0xff] %v742_v17  ;;  %745 = vst [vmem:[%s1438_s28 + $0x140] sm:$0xff] %v744_v18  ;;  %v798_v45 = vld [vmem:[%s1195_s21 + $0x128] sm:$0xff]  ;;  %v800_v46 = vld [vmem:[%s1195_s21 + $0x130] sm:$0xff] }
  0x4f   : > { %747 = vst [vmem:[%s1438_s28 + $0x150] sm:$0xff] %v746_v19  ;;  %749 = vst [vmem:[%s1438_s28 + $0x180] sm:$0xff] %v748_v20  ;;  %v802_v47 = vld [vmem:[%s1195_s21 + $0x138] sm:$0xff]  ;;  %v804_v48 = vld [vmem:[%s1195_s21 + $0x140] sm:$0xff] }
  0x50   : > { %751 = vst [vmem:[%s1438_s28 + $0x190] sm:$0xff] %v750_v21  ;;  %753 = vst [vmem:[%s1438_s28 + $0x1c0] sm:$0xff] %v752_v22  ;;  %v806_v49 = vld [vmem:[%s1195_s21 + $0x148] sm:$0xff]  ;;  %v808_v50 = vld [vmem:[%s1195_s21 + $0x150] sm:$0xff] }
  0x51   : > { %755 = vst [vmem:[%s1438_s28 + $0x1d0] sm:$0xff] %v754_v23  ;;  %757 = vst [vmem:[%s1438_s28 + $0x200] sm:$0xff] %v756_v24  ;;  %v810_v51 = vld [vmem:[%s1195_s21 + $0x158] sm:$0xff]  ;;  %v812_v52 = vld [vmem:[%s1195_s21 + $0x160] sm:$0xff] }
  0x52   : > { %759 = vst [vmem:[%s1438_s28 + $0x210] sm:$0xff] %v758_v25  ;;  %761 = vst [vmem:[%s1438_s28 + $0x240] sm:$0xff] %v760_v26  ;;  %v814_v53 = vld [vmem:[%s1195_s21 + $0x168] sm:$0xff]  ;;  %v816_v54 = vld [vmem:[%s1195_s21 + $0x170] sm:$0xff] }
  0x53   : > { %763 = vst [vmem:[%s1438_s28 + $0x250] sm:$0xff] %v762_v27  ;;  %765 = vst [vmem:[%s1438_s28 + $0x280] sm:$0xff] %v764_v28  ;;  %v818_v55 = vld [vmem:[%s1195_s21 + $0x178] sm:$0xff]  ;;  %v820_v56 = vld [vmem:[%s1195_s21 + $0x180] sm:$0xff] }
  0x54   : > { %767 = vst [vmem:[%s1438_s28 + $0x290] sm:$0xff] %v766_v29  ;;  %769 = vst [vmem:[%s1438_s28 + $0x2c0] sm:$0xff] %v768_v30  ;;  %v822_v57 = vld [vmem:[%s1195_s21 + $0x188] sm:$0xff]  ;;  %v824_v58 = vld [vmem:[%s1195_s21 + $0x190] sm:$0xff] }
  0x55   : > { %771 = vst [vmem:[%s1438_s28 + $0x2d0] sm:$0xff] %v770_v31  ;;  %773 = vst [vmem:[%s1438_s28 + $0x300] sm:$0xff] %v772_v32  ;;  %v826_v59 = vld [vmem:[%s1195_s21 + $0x198] sm:$0xff]  ;;  %v828_v60 = vld [vmem:[%s1195_s21 + $0x1a0] sm:$0xff] }
  0x56   : > { %775 = vst [vmem:[%s1438_s28 + $0x310] sm:$0xff] %v774_v33  ;;  %777 = vst [vmem:[%s1438_s28 + $0x340] sm:$0xff] %v776_v34  ;;  %v830_v61 = vld [vmem:[%s1195_s21 + $0x1a8] sm:$0xff]  ;;  %v832_v62 = vld [vmem:[%s1195_s21 + $0x1b0] sm:$0xff] }
  0x57   : > { %779 = vst [vmem:[%s1438_s28 + $0x350] sm:$0xff] %v778_v35  ;;  %781 = vst [vmem:[%s1438_s28 + $0x380] sm:$0xff] %v780_v36  ;;  %v834_v63 = vld [vmem:[%s1195_s21 + $0x1b8] sm:$0xff]  ;;  %v836_v2 = vld [vmem:[%s1195_s21 + $0x1c0] sm:$0xff] }
  0x58   : > { %783 = vst [vmem:[%s1438_s28 + $0x390] sm:$0xff] %v782_v37  ;;  %785 = vst [vmem:[%s1438_s28 + $0x3c0] sm:$0xff] %v784_v38  ;;  %v838_v3 = vld [vmem:[%s1195_s21 + $0x1c8] sm:$0xff]  ;;  %v840_v4 = vld [vmem:[%s1195_s21 + $0x1d0] sm:$0xff] }
  0x59   : > { %787 = vst [vmem:[%s1438_s28 + $0x3d0] sm:$0xff] %v786_v39  ;;  %789 = vst [vmem:[%s1438_s28 + $0x400] sm:$0xff] %v788_v40  ;;  %v842_v5 = vld [vmem:[%s1195_s21 + $0x1d8] sm:$0xff]  ;;  %v844_v6 = vld [vmem:[%s1195_s21 + $0x1e0] sm:$0xff] }
  0x5a   : > { %791 = vst [vmem:[%s1438_s28 + $0x410] sm:$0xff] %v790_v41  ;;  %793 = vst [vmem:[%s1438_s28 + $0x440] sm:$0xff] %v792_v42  ;;  %v846_v7 = vld [vmem:[%s1195_s21 + $0x1e8] sm:$0xff]  ;;  %v848_v8 = vld [vmem:[%s1195_s21 + $0x1f0] sm:$0xff] }
  0x5b   : > { %795 = vst [vmem:[%s1438_s28 + $0x450] sm:$0xff] %v794_v43  ;;  %797 = vst [vmem:[%s1438_s28 + $0x480] sm:$0xff] %v796_v44  ;;  %v850_v0 = vld [vmem:[%s1195_s21 + $0x1f8] sm:$0xff] }
  0x5c   : > { %799 = vst [vmem:[%s1438_s28 + $0x490] sm:$0xff] %v798_v45  ;;  %801 = vst [vmem:[%s1438_s28 + $0x4c0] sm:$0xff] %v800_v46 }
  0x5d   : > { %803 = vst [vmem:[%s1438_s28 + $0x4d0] sm:$0xff] %v802_v47  ;;  %805 = vst [vmem:[%s1438_s28 + $0x500] sm:$0xff] %v804_v48 }
  0x5e   : > { %807 = vst [vmem:[%s1438_s28 + $0x510] sm:$0xff] %v806_v49  ;;  %809 = vst [vmem:[%s1438_s28 + $0x540] sm:$0xff] %v808_v50 }
  0x5f   : > { %811 = vst [vmem:[%s1438_s28 + $0x550] sm:$0xff] %v810_v51  ;;  %813 = vst [vmem:[%s1438_s28 + $0x580] sm:$0xff] %v812_v52 }
  0x60   : > { %815 = vst [vmem:[%s1438_s28 + $0x590] sm:$0xff] %v814_v53  ;;  %817 = vst [vmem:[%s1438_s28 + $0x5c0] sm:$0xff] %v816_v54 }
  0x61   : > { %819 = vst [vmem:[%s1438_s28 + $0x5d0] sm:$0xff] %v818_v55  ;;  %821 = vst [vmem:[%s1438_s28 + $0x600] sm:$0xff] %v820_v56 }
  0x62   : > { %823 = vst [vmem:[%s1438_s28 + $0x610] sm:$0xff] %v822_v57  ;;  %825 = vst [vmem:[%s1438_s28 + $0x640] sm:$0xff] %v824_v58 }
  0x63   : > { %827 = vst [vmem:[%s1438_s28 + $0x650] sm:$0xff] %v826_v59  ;;  %829 = vst [vmem:[%s1438_s28 + $0x680] sm:$0xff] %v828_v60 }
  0x64   : > { %831 = vst [vmem:[%s1438_s28 + $0x690] sm:$0xff] %v830_v61  ;;  %833 = vst [vmem:[%s1438_s28 + $0x6c0] sm:$0xff] %v832_v62 }
  0x65   : > { %835 = vst [vmem:[%s1438_s28 + $0x6d0] sm:$0xff] %v834_v63  ;;  %837 = vst [vmem:[%s1438_s28 + $0x700] sm:$0xff] %v836_v2 }
  0x66   : > { %839 = vst [vmem:[%s1438_s28 + $0x710] sm:$0xff] %v838_v3  ;;  %841 = vst [vmem:[%s1438_s28 + $0x740] sm:$0xff] %v840_v4 }
  0x67   : > { %843 = vst [vmem:[%s1438_s28 + $0x750] sm:$0xff] %v842_v5  ;;  %845 = vst [vmem:[%s1438_s28 + $0x780] sm:$0xff] %v844_v6 }
  0x68   : > { %847 = vst [vmem:[%s1438_s28 + $0x790] sm:$0xff] %v846_v7  ;;  %849 = vst [vmem:[%s1438_s28 + $0x7c0] sm:$0xff] %v848_v8 }
  0x69   : > { %851 = vst [vmem:[%s1438_s28 + $0x7d0] sm:$0xff] %v850_v0 }
  0x6a PF: > { %s13_s18 = sadd.s32 1, %s1062_s18   ;;  %s1585_s12 = smov %s1042_s13 }
  0x6b   : > { %p10_p10 = scmp.ge.s32.totalorder %s13_s18, 6   ;;  %s1586_s13 = smov %s1141_s27 }
  0x6c   : > { %s1587_s14 = smov %s1054_s16  ;;  %s1588_s15 = smov %s1058_s17 }
  0x6d   : > { %s1589_s16 = smov %s1592_s19  ;;  %s1590_s17 = smov %s1596_s20 }
  0x6e   :  { %12 = sbr.rel (!%p10_p10) target bundleno = 4 (0x4), region = 100 }

// kernel: pp2p_forward.17
= control target key start
LH: loop header
LB: loop body
LE: loop exit
PB: predicated region body
PF: predicated region fallthrough
CT: control target
= control target key end

     0   :  { %s1455_s9 = smov 0   ;;  %s1457_s10 = smov 0   ;;  %s1815_s0 = inlined_call_operand.vmem [shape: f32[4,2048,512], index: 0, kind: input, shape index: {}]   ;;  %s1816_s1 = inlined_call_operand.vmem [shape: f32[4,512,128], index: 1, kind: input, shape index: {}]   ;;  %s1817_s2 = inlined_call_operand.vmem [shape: f32[4,2048,128], index: 2, kind: output, shape index: {}]  }
   0x1   :  { %s1459_s11 = smov 0   ;;  %s1461_s12 = smov 0  }
   0x2   :  { %s1463_s13 = smov 0  }
   0x3 LB: > { %s34_s14 = sadd.s32 1, %s1429_s11  ;;  %s38_s15 = sadd.s32 1, %s1433_s12  ;;  %s1437_s13 = sphi %s1463_s13, %s12_s13   ;;  %s1433_s12 = sphi %s1461_s12, %s1821_s12   ;;  %s1429_s11 = sphi %s1459_s11, %s1820_s11   ;;  %s1425_s10 = sphi %s1457_s10, %s1819_s10   ;;  %s1421_s9 = sphi %s1455_s9, %s1818_s9  }
   0x4   : > { %p36_p0 = scmp.ge.s32.totalorder %s34_s14, 8  ;;  %p1281_p1 = scmp.ge.s32.totalorder %s1437_s13, 1 }
   0x5   : > { %p179_p2 = scmp.lt.s32.totalorder %s1437_s13, 33 }
   0x6   : > { %s1823_s14 = smov (%p36_p0, %s34_s14), 0  ;;  %s1825_s15 = smov (!%p36_p0, %s38_s15), %s1433_s12 }
   0x7   : > { %p180_p3 = pnand %p1281_p1, %p179_p2  ;;  %p40_p4 = scmp.ge.s32.totalorder %s1825_s15, 4 }
   0x8   : > { %p231_p5 = scmp.lt.s32.totalorder (!%p180_p3), %s1425_s10, 3  ;;  %s1282_s20 = sshll.u32 (!%p180_p3), %s1421_s9, 5 }
   0x9   : > { %s1827_s15 = smov (%p40_p4, %s1825_s15), 0  ;;  %183 = sbr.rel (%p180_p3) target bundleno = 417 (0x1a1), region = 28 }
   0xa   : > { %p233_p6 = scmp.lt.s32.totalorder (!%p180_p3), %s1282_s20, 255 }
   0xe   : > { %v1439_v0 = vmov 0.0   ;;  %s1829_s10 = smov (!%p231_p5, %s1425_s10), 3  ;;  %s1831_s20 = smov (!%p233_p6, %s1282_s20), 255 }
   0xf   : > { %531 = vmatprep.subr.mxu0 %v1439_v0  ;;  %756 = vmatprep.subr.mxu1 %v1439_v0  ;;  %s1293_s16 = sshll.u32 %s1829_s10, 9  ;;  %s1283_s21 = sshll.u32 %s1831_s20, 2 }
  0x10   : > { %s1495_s19 = scalar_lea.vmem %s1816_s1, %s1293_s16  ;;  %s1284_s22 = sshll.u32 %s1829_s10, 10 }
  0x11   : > { %v482_v1 = vld [vmem:[%s1495_s19 + $0x78] sm:$0xff]  ;;  %v481_v3 = vld [vmem:[%s1495_s19 + $0x70] sm:$0xff]  ;;  %v480_v5 = vld [vmem:[%s1495_s19 + $0x68] sm:$0xff]  ;;  %s240_s23 = sadd.s32 %s1284_s22, %s1283_s21  ;;  %s1289_s28 = sshll.u32 %s1829_s10, 8 }
  0x12   : > { %v514_v2 = vld [vmem:[%s1495_s19 + $0x178] sm:$0xff]  ;;  %532 = vmatpush1.msra.mxu0 %v482_v1  ;;  %v513_v4 = vld [vmem:[%s1495_s19 + $0x170] sm:$0xff]  ;;  %v512_v6 = vld [vmem:[%s1495_s19 + $0x168] sm:$0xff]  ;;  %s1285_s24 = sshll.u32 %s240_s23, 3  ;;  %s267_s29 = sadd.s32 %s1289_s28, %s1831_s20 }
  0x13   : > { %757 = vmatpush1.msra.mxu1 %v514_v2  ;;  %533 = vmatprep.subr.mxu0 %v1439_v0  ;;  %v479_v7 = vld [vmem:[%s1495_s19 + $0x60] sm:$0xff]  ;;  %v478_v9 = vld [vmem:[%s1495_s19 + $0x58] sm:$0xff]  ;;  %v477_v11 = vld [vmem:[%s1495_s19 + $0x50] sm:$0xff]  ;;  %s1621_s27 = scalar_lea.vmem %s1815_s0, %s1285_s24  ;;  %s1290_s30 = sshll.u32 %s267_s29, 3 }
  0x14   : > { %758 = vmatprep.subr.mxu1 %v1439_v0  ;;  %534 = vmatpush1.msra.mxu0 %v481_v3  ;;  %v511_v8 = vld [vmem:[%s1495_s19 + $0x160] sm:$0xff]  ;;  %v510_v10 = vld [vmem:[%s1495_s19 + $0x158] sm:$0xff]  ;;  %v509_v12 = vld [vmem:[%s1495_s19 + $0x150] sm:$0xff]  ;;  %s1766_s5 = scalar_lea.vmem %s1817_s2, %s1290_s30 }
  0x15   : > { %759 = vmatpush1.msra.mxu1 %v513_v4  ;;  %535 = vmatprep.subr.mxu0 %v1439_v0  ;;  %v476_v13 = vld [vmem:[%s1495_s19 + $0x48] sm:$0xff]  ;;  %v475_v15 = vld [vmem:[%s1495_s19 + $0x40] sm:$0xff]  ;;  %v474_v17 = vld [vmem:[%s1495_s19 + $0x38] sm:$0xff] }
  0x16   : > { %760 = vmatprep.subr.mxu1 %v1439_v0  ;;  %536 = vmatpush1.msra.mxu0 %v480_v5  ;;  %v508_v14 = vld [vmem:[%s1495_s19 + $0x148] sm:$0xff]  ;;  %v507_v16 = vld [vmem:[%s1495_s19 + $0x140] sm:$0xff]  ;;  %v506_v18 = vld [vmem:[%s1495_s19 + $0x138] sm:$0xff] }
  0x17   : > { %761 = vmatpush1.msra.mxu1 %v512_v6  ;;  %537 = vmatprep.subr.mxu0 %v1439_v0  ;;  %v473_v19 = vld [vmem:[%s1495_s19 + $0x30] sm:$0xff]  ;;  %v472_v21 = vld [vmem:[%s1495_s19 + $0x28] sm:$0xff]  ;;  %v471_v23 = vld [vmem:[%s1495_s19 + $0x20] sm:$0xff] }
  0x18   : > { %762 = vmatprep.subr.mxu1 %v1439_v0  ;;  %538 = vmatpush1.msra.mxu0 %v479_v7  ;;  %v505_v20 = vld [vmem:[%s1495_s19 + $0x130] sm:$0xff]  ;;  %v504_v22 = vld [vmem:[%s1495_s19 + $0x128] sm:$0xff]  ;;  %v503_v24 = vld [vmem:[%s1495_s19 + $0x120] sm:$0xff] }
  0x19   : > { %763 = vmatpush1.msra.mxu1 %v511_v8  ;;  %539 = vmatprep.subr.mxu0 %v1439_v0  ;;  %v470_v25 = vld [vmem:[%s1495_s19 + $0x18] sm:$0xff]  ;;  %v469_v27 = vld [vmem:[%s1495_s19 + $0x10] sm:$0xff]  ;;  %v468_v29 = vld [vmem:[%s1495_s19 + $0x8] sm:$0xff] }
  0x1a   : > { %764 = vmatprep.subr.mxu1 %v1439_v0  ;;  %540 = vmatpush1.msra.mxu0 %v478_v9  ;;  %v502_v26 = vld [vmem:[%s1495_s19 + $0x118] sm:$0xff]  ;;  %v501_v28 = vld [vmem:[%s1495_s19 + $0x110] sm:$0xff]  ;;  %v500_v30 = vld [vmem:[%s1495_s19 + $0x108] sm:$0xff] }
  0x1b   : > { %765 = vmatpush1.msra.mxu1 %v510_v10  ;;  %541 = vmatprep.subr.mxu0 %v1439_v0  ;;  %v467_v31 = vld [vmem:[%s1495_s19] sm:$0xff]  ;;  %v498_v33 = vld [vmem:[%s1495_s19 + $0xf8] sm:$0xff]  ;;  %v497_v35 = vld [vmem:[%s1495_s19 + $0xf0] sm:$0xff] }
  0x1c   : > { %766 = vmatprep.subr.mxu1 %v1439_v0  ;;  %542 = vmatpush1.msra.mxu0 %v477_v11  ;;  %v499_v32 = vld [vmem:[%s1495_s19 + $0x100] sm:$0xff]  ;;  %v530_v34 = vld [vmem:[%s1495_s19 + $0x1f8] sm:$0xff]  ;;  %v529_v36 = vld [vmem:[%s1495_s19 + $0x1f0] sm:$0xff] }
  0x1d   : > { %767 = vmatpush1.msra.mxu1 %v509_v12  ;;  %543 = vmatprep.subr.mxu0 %v1439_v0  ;;  %v496_v37 = vld [vmem:[%s1495_s19 + $0xe8] sm:$0xff]  ;;  %v495_v39 = vld [vmem:[%s1495_s19 + $0xe0] sm:$0xff]  ;;  %v494_v41 = vld [vmem:[%s1495_s19 + $0xd8] sm:$0xff] }
  0x1e   : > { %768 = vmatprep.subr.mxu1 %v1439_v0  ;;  %544 = vmatpush1.msra.mxu0 %v476_v13  ;;  %v528_v38 = vld [vmem:[%s1495_s19 + $0x1e8] sm:$0xff]  ;;  %v527_v40 = vld [vmem:[%s1495_s19 + $0x1e0] sm:$0xff]  ;;  %v526_v42 = vld [vmem:[%s1495_s19 + $0x1d8] sm:$0xff] }
  0x1f   : > { %769 = vmatpush1.msra.mxu1 %v508_v14  ;;  %545 = vmatprep.subr.mxu0 %v1439_v0  ;;  %v493_v43 = vld [vmem:[%s1495_s19 + $0xd0] sm:$0xff]  ;;  %v492_v45 = vld [vmem:[%s1495_s19 + $0xc8] sm:$0xff]  ;;  %v491_v47 = vld [vmem:[%s1495_s19 + $0xc0] sm:$0xff] }
  0x20   : > { %770 = vmatprep.subr.mxu1 %v1439_v0  ;;  %546 = vmatpush1.msra.mxu0 %v475_v15  ;;  %v525_v44 = vld [vmem:[%s1495_s19 + $0x1d0] sm:$0xff]  ;;  %v524_v46 = vld [vmem:[%s1495_s19 + $0x1c8] sm:$0xff]  ;;  %v523_v48 = vld [vmem:[%s1495_s19 + $0x1c0] sm:$0xff] }
  0x21   : > { %771 = vmatpush1.msra.mxu1 %v507_v16  ;;  %547 = vmatprep.subr.mxu0 %v1439_v0  ;;  %v490_v49 = vld [vmem:[%s1495_s19 + $0xb8] sm:$0xff]  ;;  %v489_v51 = vld [vmem:[%s1495_s19 + $0xb0] sm:$0xff]  ;;  %v488_v53 = vld [vmem:[%s1495_s19 + $0xa8] sm:$0xff] }
  0x22   : > { %772 = vmatprep.subr.mxu1 %v1439_v0  ;;  %548 = vmatpush1.msra.mxu0 %v474_v17  ;;  %v522_v50 = vld [vmem:[%s1495_s19 + $0x1b8] sm:$0xff]  ;;  %v521_v52 = vld [vmem:[%s1495_s19 + $0x1b0] sm:$0xff]  ;;  %v520_v54 = vld [vmem:[%s1495_s19 + $0x1a8] sm:$0xff] }
  0x23   : > { %773 = vmatpush1.msra.mxu1 %v506_v18  ;;  %549 = vmatprep.subr.mxu0 %v1439_v0  ;;  %v487_v55 = vld [vmem:[%s1495_s19 + $0xa0] sm:$0xff]  ;;  %v486_v57 = vld [vmem:[%s1495_s19 + $0x98] sm:$0xff]  ;;  %v485_v59 = vld [vmem:[%s1495_s19 + $0x90] sm:$0xff] }
  0x24   : > { %774 = vmatprep.subr.mxu1 %v1439_v0  ;;  %550 = vmatpush1.msra.mxu0 %v473_v19  ;;  %v519_v56 = vld [vmem:[%s1495_s19 + $0x1a0] sm:$0xff]  ;;  %v518_v58 = vld [vmem:[%s1495_s19 + $0x198] sm:$0xff]  ;;  %v517_v60 = vld [vmem:[%s1495_s19 + $0x190] sm:$0xff] }
  0x25   : > { %775 = vmatpush1.msra.mxu1 %v505_v20  ;;  %551 = vmatprep.subr.mxu0 %v1439_v0  ;;  %v484_v61 = vld [vmem:[%s1495_s19 + $0x88] sm:$0xff]  ;;  %v483_v63 = vld [vmem:[%s1495_s19 + $0x80] sm:$0xff]  ;;  %v342_v3 = vld [vmem:[%s1621_s27 + $0x18] sm:$0xff] }
  0x26   : > { %776 = vmatprep.subr.mxu1 %v1439_v0  ;;  %552 = vmatpush1.msra.mxu0 %v472_v21  ;;  %v516_v62 = vld [vmem:[%s1495_s19 + $0x188] sm:$0xff]  ;;  %v515_v2 = vld [vmem:[%s1495_s19 + $0x180] sm:$0xff]  ;;  %v341_v5 = vld [vmem:[%s1621_s27 + $0x10] sm:$0xff] }
  0x27   : > { %777 = vmatpush1.msra.mxu1 %v504_v22  ;;  %553 = vmatprep.subr.mxu0 %v1439_v0  ;;  %v340_v1 = vld [vmem:[%s1621_s27 + $0x8] sm:$0xff]  ;;  %v339_v4 = vld [vmem:[%s1621_s27] sm:$0xff]  ;;  %v346_v7 = vld [vmem:[%s1621_s27 + $0x38] sm:$0xff] }
  0x28   : > { %778 = vmatprep.subr.mxu1 %v1439_v0  ;;  %554 = vmatpush1.msra.mxu0 %v471_v23  ;;  %v344_v6 = vld [vmem:[%s1621_s27 + $0x28] sm:$0xff]  ;;  %v343_v8 = vld [vmem:[%s1621_s27 + $0x20] sm:$0xff]  ;;  %v350_v10 = vld [vmem:[%s1621_s27 + $0x58] sm:$0xff] }
  0x29   : > { %779 = vmatpush1.msra.mxu1 %v503_v24  ;;  %555 = vmatprep.subr.mxu0 %v1439_v0  ;;  %v348_v9 = vld [vmem:[%s1621_s27 + $0x48] sm:$0xff]  ;;  %v347_v11 = vld [vmem:[%s1621_s27 + $0x40] sm:$0xff]  ;;  %v349_v12 = vld [vmem:[%s1621_s27 + $0x50] sm:$0xff] }
  0x2a   : > { %780 = vmatprep.subr.mxu1 %v1439_v0  ;;  %556 = vmatpush1.msra.mxu0 %v470_v25  ;;  %v352_v13 = vld [vmem:[%s1621_s27 + $0x68] sm:$0xff]  ;;  %v354_v14 = vld [vmem:[%s1621_s27 + $0x78] sm:$0xff]  ;;  %v351_v15 = vld [vmem:[%s1621_s27 + $0x60] sm:$0xff] }
  0x2b   : > { %781 = vmatpush1.msra.mxu1 %v502_v26  ;;  %557 = vmatprep.subr.mxu0 %v1439_v0  ;;  %v353_v16 = vld [vmem:[%s1621_s27 + $0x70] sm:$0xff]  ;;  %v356_v17 = vld [vmem:[%s1621_s27 + $0x88] sm:$0xff]  ;;  %v358_v18 = vld [vmem:[%s1621_s27 + $0x98] sm:$0xff] }
  0x2c   : > { %782 = vmatprep.subr.mxu1 %v1439_v0  ;;  %558 = vmatpush1.msra.mxu0 %v469_v27  ;;  %v355_v19 = vld [vmem:[%s1621_s27 + $0x80] sm:$0xff]  ;;  %v357_v20 = vld [vmem:[%s1621_s27 + $0x90] sm:$0xff]  ;;  %v360_v21 = vld [vmem:[%s1621_s27 + $0xa8] sm:$0xff] }
  0x2d   : > { %783 = vmatpush1.msra.mxu1 %v501_v28  ;;  %559 = vmatprep.subr.mxu0 %v1439_v0  ;;  %v362_v22 = vld [vmem:[%s1621_s27 + $0xb8] sm:$0xff]  ;;  %v359_v23 = vld [vmem:[%s1621_s27 + $0xa0] sm:$0xff]  ;;  %v361_v24 = vld [vmem:[%s1621_s27 + $0xb0] sm:$0xff] }
  0x2e   : > { %784 = vmatprep.subr.mxu1 %v1439_v0  ;;  %560 = vmatpush1.msra.mxu0 %v468_v29  ;;  %v364_v25 = vld [vmem:[%s1621_s27 + $0xc8] sm:$0xff]  ;;  %v366_v26 = vld [vmem:[%s1621_s27 + $0xd8] sm:$0xff]  ;;  %v363_v27 = vld [vmem:[%s1621_s27 + $0xc0] sm:$0xff] }
  0x2f   : > { %785 = vmatpush1.msra.mxu1 %v500_v30  ;;  %561 = vmatprep.subr.mxu0 %v1439_v0  ;;  %v365_v28 = vld [vmem:[%s1621_s27 + $0xd0] sm:$0xff]  ;;  %v368_v29 = vld [vmem:[%s1621_s27 + $0xe8] sm:$0xff]  ;;  %v370_v30 = vld [vmem:[%s1621_s27 + $0xf8] sm:$0xff] }
  0x30   : > { %786 = vmatprep.subr.mxu1 %v1439_v0  ;;  %562 = vmatpush1.msra.mxu0 %v467_v31  ;;  %v367_v31 = vld [vmem:[%s1621_s27 + $0xe0] sm:$0xff] }
  0x31   : > { %787 = vmatpush1.msra.mxu1 %v499_v32  ;;  %563 = vmatprep.subr.mxu0 %v1439_v0  ;;  %v369_v32 = vld [vmem:[%s1621_s27 + $0xf0] sm:$0xff] }
  0x32   : > { %788 = vmatprep.subr.mxu1 %v1439_v0  ;;  %564 = vmatpush2.msra.mxu0 %v498_v33  ;;  %v372_v33 = vld [vmem:[%s1621_s27 + $0x108] sm:$0xff] }
  0x33   : > { %789 = vmatpush2.msra.mxu1 %v530_v34  ;;  %565 = vmatprep.subr.mxu0 %v1439_v0  ;;  %v374_v34 = vld [vmem:[%s1621_s27 + $0x118] sm:$0xff] }
  0x34   : > { %790 = vmatprep.subr.mxu1 %v1439_v0  ;;  %566 = vmatpush2.msra.mxu0 %v497_v35  ;;  %v371_v35 = vld [vmem:[%s1621_s27 + $0x100] sm:$0xff] }
  0x35   : > { %791 = vmatpush2.msra.mxu1 %v529_v36  ;;  %567 = vmatprep.subr.mxu0 %v1439_v0  ;;  %v373_v36 = vld [vmem:[%s1621_s27 + $0x110] sm:$0xff] }
  0x36   : > { %792 = vmatprep.subr.mxu1 %v1439_v0  ;;  %568 = vmatpush2.msra.mxu0 %v496_v37  ;;  %v376_v37 = vld [vmem:[%s1621_s27 + $0x128] sm:$0xff] }
  0x37   : > { %793 = vmatpush2.msra.mxu1 %v528_v38  ;;  %569 = vmatprep.subr.mxu0 %v1439_v0  ;;  %v378_v38 = vld [vmem:[%s1621_s27 + $0x138] sm:$0xff] }
  0x38   : > { %794 = vmatprep.subr.mxu1 %v1439_v0  ;;  %570 = vmatpush2.msra.mxu0 %v495_v39  ;;  %v375_v39 = vld [vmem:[%s1621_s27 + $0x120] sm:$0xff] }
  0x39   : > { %795 = vmatpush2.msra.mxu1 %v527_v40  ;;  %571 = vmatprep.subr.mxu0 %v1439_v0  ;;  %v377_v40 = vld [vmem:[%s1621_s27 + $0x130] sm:$0xff] }
  0x3a   : > { %796 = vmatprep.subr.mxu1 %v1439_v0  ;;  %572 = vmatpush2.msra.mxu0 %v494_v41  ;;  %v380_v41 = vld [vmem:[%s1621_s27 + $0x148] sm:$0xff] }
  0x3b   : > { %797 = vmatpush2.msra.mxu1 %v526_v42  ;;  %573 = vmatprep.subr.mxu0 %v1439_v0  ;;  %v382_v42 = vld [vmem:[%s1621_s27 + $0x158] sm:$0xff] }
  0x3c   : > { %798 = vmatprep.subr.mxu1 %v1439_v0  ;;  %574 = vmatpush2.msra.mxu0 %v493_v43  ;;  %v379_v43 = vld [vmem:[%s1621_s27 + $0x140] sm:$0xff] }
  0x3d   : > { %799 = vmatpush2.msra.mxu1 %v525_v44  ;;  %575 = vmatprep.subr.mxu0 %v1439_v0  ;;  %v381_v44 = vld [vmem:[%s1621_s27 + $0x150] sm:$0xff] }
  0x3e   : > { %800 = vmatprep.subr.mxu1 %v1439_v0  ;;  %576 = vmatpush2.msra.mxu0 %v492_v45  ;;  %v384_v45 = vld [vmem:[%s1621_s27 + $0x168] sm:$0xff] }
  0x3f   : > { %801 = vmatpush2.msra.mxu1 %v524_v46  ;;  %577 = vmatprep.subr.mxu0 %v1439_v0  ;;  %v386_v46 = vld [vmem:[%s1621_s27 + $0x178] sm:$0xff] }
  0x40   : > { %802 = vmatprep.subr.mxu1 %v1439_v0  ;;  %578 = vmatpush2.msra.mxu0 %v491_v47  ;;  %v383_v47 = vld [vmem:[%s1621_s27 + $0x160] sm:$0xff] }
  0x41   : > { %803 = vmatpush2.msra.mxu1 %v523_v48  ;;  %579 = vmatprep.subr.mxu0 %v1439_v0  ;;  %v385_v48 = vld [vmem:[%s1621_s27 + $0x170] sm:$0xff] }
  0x42   : > { %804 = vmatprep.subr.mxu1 %v1439_v0  ;;  %580 = vmatpush2.msra.mxu0 %v490_v49  ;;  %v388_v49 = vld [vmem:[%s1621_s27 + $0x188] sm:$0xff] }
  0x43   : > { %805 = vmatpush2.msra.mxu1 %v522_v50  ;;  %581 = vmatprep.subr.mxu0 %v1439_v0  ;;  %v390_v50 = vld [vmem:[%s1621_s27 + $0x198] sm:$0xff] }
  0x44   : > { %806 = vmatprep.subr.mxu1 %v1439_v0  ;;  %582 = vmatpush2.msra.mxu0 %v489_v51  ;;  %v387_v51 = vld [vmem:[%s1621_s27 + $0x180] sm:$0xff] }
  0x45   : > { %807 = vmatpush2.msra.mxu1 %v521_v52  ;;  %583 = vmatprep.subr.mxu0 %v1439_v0  ;;  %v389_v52 = vld [vmem:[%s1621_s27 + $0x190] sm:$0xff] }
  0x46   : > { %808 = vmatprep.subr.mxu1 %v1439_v0  ;;  %584 = vmatpush2.msra.mxu0 %v488_v53  ;;  %v392_v53 = vld [vmem:[%s1621_s27 + $0x1a8] sm:$0xff] }
  0x47   : > { %809 = vmatpush2.msra.mxu1 %v520_v54  ;;  %585 = vmatprep.subr.mxu0 %v1439_v0  ;;  %v394_v54 = vld [vmem:[%s1621_s27 + $0x1b8] sm:$0xff] }
  0x48   : > { %810 = vmatprep.subr.mxu1 %v1439_v0  ;;  %586 = vmatpush2.msra.mxu0 %v487_v55  ;;  %v391_v55 = vld [vmem:[%s1621_s27 + $0x1a0] sm:$0xff] }
  0x49   : > { %811 = vmatpush2.msra.mxu1 %v519_v56  ;;  %587 = vmatprep.subr.mxu0 %v1439_v0  ;;  %v393_v56 = vld [vmem:[%s1621_s27 + $0x1b0] sm:$0xff] }
  0x4a   : > { %812 = vmatprep.subr.mxu1 %v1439_v0  ;;  %588 = vmatpush2.msra.mxu0 %v486_v57  ;;  %v396_v57 = vld [vmem:[%s1621_s27 + $0x1c8] sm:$0xff] }
  0x4b   : > { %813 = vmatpush2.msra.mxu1 %v518_v58  ;;  %589 = vmatprep.subr.mxu0 %v1439_v0  ;;  %v398_v58 = vld [vmem:[%s1621_s27 + $0x1d8] sm:$0xff] }
  0x4c   : > { %814 = vmatprep.subr.mxu1 %v1439_v0  ;;  %590 = vmatpush2.msra.mxu0 %v485_v59  ;;  %v395_v59 = vld [vmem:[%s1621_s27 + $0x1c0] sm:$0xff] }
  0x4d   : > { %815 = vmatpush2.msra.mxu1 %v517_v60  ;;  %591 = vmatprep.subr.mxu0 %v1439_v0  ;;  %v397_v60 = vld [vmem:[%s1621_s27 + $0x1d0] sm:$0xff] }
  0x4e   : > { %816 = vmatprep.subr.mxu1 %v1439_v0  ;;  %592 = vmatpush2.msra.mxu0 %v484_v61  ;;  %v400_v61 = vld [vmem:[%s1621_s27 + $0x1e8] sm:$0xff] }
  0x4f   : > { %817 = vmatpush2.msra.mxu1 %v516_v62  ;;  %593 = vmatprep.subr.mxu0 %v1439_v0  ;;  %v402_v62 = vld [vmem:[%s1621_s27 + $0x1f8] sm:$0xff] }
  0x50   : > { %818 = vmatprep.subr.mxu1 %v1439_v0  ;;  %594 = vmatpush2.msra.mxu0 %v483_v63  ;;  %v345_v0 = vld [vmem:[%s1621_s27 + $0x30] sm:$0xff]  ;;  %v399_v63 = vld [vmem:[%s1621_s27 + $0x1e0] sm:$0xff] }
  0x51   : > { %595 = vmatprep.mubr.f32.mxu0 %v340_v1  ;;  %819 = vmatpush2.msra.mxu1 %v515_v2  ;;  %v401_v1 = vld [vmem:[%s1621_s27 + $0x1f0] sm:$0xff]  ;;  %v404_v2 = vld [vmem:[%s1621_s27 + $0x208] sm:$0xff] }
  0x52   : > { %820 = vmatprep.mubr.f32.mxu1 %v342_v3  ;;  %596 = vmatmul.mubr.f32.vlgmr.msra.gmra.mxu0 %v339_v4  ;;  %v406_v3 = vld [vmem:[%s1621_s27 + $0x218] sm:$0xff]  ;;  %v403_v4 = vld [vmem:[%s1621_s27 + $0x200] sm:$0xff] }
  0x53   : > { %821 = vmatmul.mubr.f32.vlgmr.msra.gmra.mxu1 %v341_v5  ;;  %600 = vmatprep.mubr.f32.mxu0 %v344_v6  ;;  %v405_v5 = vld [vmem:[%s1621_s27 + $0x210] sm:$0xff]  ;;  %v408_v6 = vld [vmem:[%s1621_s27 + $0x228] sm:$0xff] }
  0x54   : > { %825 = vmatprep.mubr.f32.mxu1 %v346_v7  ;;  %v410_v7 = vld [vmem:[%s1621_s27 + $0x238] sm:$0xff] }
  0x56   : > { %601 = vmatmul.mubr.f32.gmra.mxu0 %v343_v8  ;;  %v407_v8 = vld [vmem:[%s1621_s27 + $0x220] sm:$0xff] }
  0x57   : > { %826 = vmatmul.mubr.f32.gmra.mxu1 %v345_v0  ;;  %605 = vmatprep.mubr.f32.mxu0 %v348_v9  ;;  %v409_v0 = vld [vmem:[%s1621_s27 + $0x230] sm:$0xff]  ;;  %v412_v9 = vld [vmem:[%s1621_s27 + $0x248] sm:$0xff] }
  0x58   : > { %830 = vmatprep.mubr.f32.mxu1 %v350_v10  ;;  %v414_v10 = vld [vmem:[%s1621_s27 + $0x258] sm:$0xff] }
  0x5a   : > { %606 = vmatmul.mubr.f32.gmra.mxu0 %v347_v11  ;;  %v411_v11 = vld [vmem:[%s1621_s27 + $0x240] sm:$0xff] }
  0x5b   : > { %831 = vmatmul.mubr.f32.gmra.mxu1 %v349_v12  ;;  %610 = vmatprep.mubr.f32.mxu0 %v352_v13  ;;  %v413_v12 = vld [vmem:[%s1621_s27 + $0x250] sm:$0xff]  ;;  %v416_v13 = vld [vmem:[%s1621_s27 + $0x268] sm:$0xff] }
  0x5c   : > { %835 = vmatprep.mubr.f32.mxu1 %v354_v14  ;;  %v418_v14 = vld [vmem:[%s1621_s27 + $0x278] sm:$0xff] }
  0x5e   : > { %611 = vmatmul.mubr.f32.gmra.mxu0 %v351_v15  ;;  %v415_v15 = vld [vmem:[%s1621_s27 + $0x260] sm:$0xff] }
  0x5f   : > { %836 = vmatmul.mubr.f32.gmra.mxu1 %v353_v16  ;;  %615 = vmatprep.mubr.f32.mxu0 %v356_v17  ;;  %v417_v16 = vld [vmem:[%s1621_s27 + $0x270] sm:$0xff]  ;;  %v420_v17 = vld [vmem:[%s1621_s27 + $0x288] sm:$0xff] }
  0x60   : > { %840 = vmatprep.mubr.f32.mxu1 %v358_v18  ;;  %v422_v18 = vld [vmem:[%s1621_s27 + $0x298] sm:$0xff] }
  0x62   : > { %616 = vmatmul.mubr.f32.gmra.mxu0 %v355_v19  ;;  %v419_v19 = vld [vmem:[%s1621_s27 + $0x280] sm:$0xff] }
  0x63   : > { %841 = vmatmul.mubr.f32.gmra.mxu1 %v357_v20  ;;  %620 = vmatprep.mubr.f32.mxu0 %v360_v21  ;;  %v421_v20 = vld [vmem:[%s1621_s27 + $0x290] sm:$0xff]  ;;  %v424_v21 = vld [vmem:[%s1621_s27 + $0x2a8] sm:$0xff] }
  0x64   : > { %845 = vmatprep.mubr.f32.mxu1 %v362_v22  ;;  %v426_v22 = vld [vmem:[%s1621_s27 + $0x2b8] sm:$0xff] }
  0x66   : > { %621 = vmatmul.mubr.f32.gmra.mxu0 %v359_v23  ;;  %v423_v23 = vld [vmem:[%s1621_s27 + $0x2a0] sm:$0xff] }
  0x67   : > { %846 = vmatmul.mubr.f32.gmra.mxu1 %v361_v24  ;;  %625 = vmatprep.mubr.f32.mxu0 %v364_v25  ;;  %v425_v24 = vld [vmem:[%s1621_s27 + $0x2b0] sm:$0xff]  ;;  %v428_v25 = vld [vmem:[%s1621_s27 + $0x2c8] sm:$0xff] }
  0x68   : > { %850 = vmatprep.mubr.f32.mxu1 %v366_v26  ;;  %v430_v26 = vld [vmem:[%s1621_s27 + $0x2d8] sm:$0xff] }
  0x6a   : > { %626 = vmatmul.mubr.f32.gmra.mxu0 %v363_v27  ;;  %v427_v27 = vld [vmem:[%s1621_s27 + $0x2c0] sm:$0xff] }
  0x6b   : > { %851 = vmatmul.mubr.f32.gmra.mxu1 %v365_v28  ;;  %630 = vmatprep.mubr.f32.mxu0 %v368_v29  ;;  %v429_v28 = vld [vmem:[%s1621_s27 + $0x2d0] sm:$0xff]  ;;  %v432_v29 = vld [vmem:[%s1621_s27 + $0x2e8] sm:$0xff] }
  0x6c   : > { %855 = vmatprep.mubr.f32.mxu1 %v370_v30  ;;  %v434_v30 = vld [vmem:[%s1621_s27 + $0x2f8] sm:$0xff] }
  0x6e   : > { %631 = vmatmul.mubr.f32.gmra.mxu0 %v367_v31  ;;  %v431_v31 = vld [vmem:[%s1621_s27 + $0x2e0] sm:$0xff] }
  0x6f   : > { %856 = vmatmul.mubr.f32.gmra.mxu1 %v369_v32  ;;  %635 = vmatprep.mubr.f32.mxu0 %v372_v33  ;;  %v433_v32 = vld [vmem:[%s1621_s27 + $0x2f0] sm:$0xff]  ;;  %v436_v33 = vld [vmem:[%s1621_s27 + $0x308] sm:$0xff] }
  0x70   : > { %860 = vmatprep.mubr.f32.mxu1 %v374_v34  ;;  %v438_v34 = vld [vmem:[%s1621_s27 + $0x318] sm:$0xff] }
  0x72   : > { %636 = vmatmul.mubr.f32.gmra.mxu0 %v371_v35  ;;  %v435_v35 = vld [vmem:[%s1621_s27 + $0x300] sm:$0xff] }
  0x73   : > { %861 = vmatmul.mubr.f32.gmra.mxu1 %v373_v36  ;;  %640 = vmatprep.mubr.f32.mxu0 %v376_v37  ;;  %v437_v36 = vld [vmem:[%s1621_s27 + $0x310] sm:$0xff]  ;;  %v440_v37 = vld [vmem:[%s1621_s27 + $0x328] sm:$0xff] }
  0x74   : > { %865 = vmatprep.mubr.f32.mxu1 %v378_v38  ;;  %v442_v38 = vld [vmem:[%s1621_s27 + $0x338] sm:$0xff] }
  0x76   : > { %641 = vmatmul.mubr.f32.gmra.mxu0 %v375_v39  ;;  %v439_v39 = vld [vmem:[%s1621_s27 + $0x320] sm:$0xff] }
  0x77   : > { %866 = vmatmul.mubr.f32.gmra.mxu1 %v377_v40  ;;  %645 = vmatprep.mubr.f32.mxu0 %v380_v41  ;;  %v441_v40 = vld [vmem:[%s1621_s27 + $0x330] sm:$0xff]  ;;  %v444_v41 = vld [vmem:[%s1621_s27 + $0x348] sm:$0xff] }
  0x78   : > { %870 = vmatprep.mubr.f32.mxu1 %v382_v42  ;;  %v446_v42 = vld [vmem:[%s1621_s27 + $0x358] sm:$0xff] }
  0x7a   : > { %646 = vmatmul.mubr.f32.gmra.mxu0 %v379_v43  ;;  %v443_v43 = vld [vmem:[%s1621_s27 + $0x340] sm:$0xff] }
  0x7b   : > { %871 = vmatmul.mubr.f32.gmra.mxu1 %v381_v44  ;;  %650 = vmatprep.mubr.f32.mxu0 %v384_v45  ;;  %v445_v44 = vld [vmem:[%s1621_s27 + $0x350] sm:$0xff]  ;;  %v448_v45 = vld [vmem:[%s1621_s27 + $0x368] sm:$0xff] }
  0x7c   : > { %875 = vmatprep.mubr.f32.mxu1 %v386_v46  ;;  %v450_v46 = vld [vmem:[%s1621_s27 + $0x378] sm:$0xff] }
  0x7e   : > { %651 = vmatmul.mubr.f32.gmra.mxu0 %v383_v47  ;;  %v447_v47 = vld [vmem:[%s1621_s27 + $0x360] sm:$0xff] }
  0x7f   : > { %876 = vmatmul.mubr.f32.gmra.mxu1 %v385_v48  ;;  %655 = vmatprep.mubr.f32.mxu0 %v388_v49  ;;  %v449_v48 = vld [vmem:[%s1621_s27 + $0x370] sm:$0xff]  ;;  %v452_v49 = vld [vmem:[%s1621_s27 + $0x388] sm:$0xff] }
  0x80   : > { %880 = vmatprep.mubr.f32.mxu1 %v390_v50  ;;  %v454_v50 = vld [vmem:[%s1621_s27 + $0x398] sm:$0xff] }
  0x82   : > { %656 = vmatmul.mubr.f32.gmra.mxu0 %v387_v51  ;;  %v451_v51 = vld [vmem:[%s1621_s27 + $0x380] sm:$0xff] }
  0x83   : > { %881 = vmatmul.mubr.f32.gmra.mxu1 %v389_v52  ;;  %660 = vmatprep.mubr.f32.mxu0 %v392_v53  ;;  %v453_v52 = vld [vmem:[%s1621_s27 + $0x390] sm:$0xff]  ;;  %v456_v53 = vld [vmem:[%s1621_s27 + $0x3a8] sm:$0xff] }
  0x84   : > { %885 = vmatprep.mubr.f32.mxu1 %v394_v54  ;;  %v458_v54 = vld [vmem:[%s1621_s27 + $0x3b8] sm:$0xff] }
  0x86   : > { %661 = vmatmul.mubr.f32.gmra.mxu0 %v391_v55  ;;  %v455_v55 = vld [vmem:[%s1621_s27 + $0x3a0] sm:$0xff] }
  0x87   : > { %886 = vmatmul.mubr.f32.gmra.mxu1 %v393_v56  ;;  %665 = vmatprep.mubr.f32.mxu0 %v396_v57  ;;  %v457_v56 = vld [vmem:[%s1621_s27 + $0x3b0] sm:$0xff]  ;;  %v460_v57 = vld [vmem:[%s1621_s27 + $0x3c8] sm:$0xff] }
  0x88   : > { %890 = vmatprep.mubr.f32.mxu1 %v398_v58  ;;  %v462_v58 = vld [vmem:[%s1621_s27 + $0x3d8] sm:$0xff] }
  0x8a   : > { %666 = vmatmul.mubr.f32.gmra.mxu0 %v395_v59  ;;  %v459_v59 = vld [vmem:[%s1621_s27 + $0x3c0] sm:$0xff] }
  0x8b   : > { %891 = vmatmul.mubr.f32.gmra.mxu1 %v397_v60  ;;  %670 = vmatprep.mubr.f32.mxu0 %v400_v61  ;;  %v461_v60 = vld [vmem:[%s1621_s27 + $0x3d0] sm:$0xff]  ;;  %v464_v61 = vld [vmem:[%s1621_s27 + $0x3e8] sm:$0xff] }
  0x8c   : > { %895 = vmatprep.mubr.f32.mxu1 %v402_v62  ;;  %v466_v62 = vld [vmem:[%s1621_s27 + $0x3f8] sm:$0xff] }
  0x8e   : > { %671 = vmatmul.mubr.f32.gmra.mxu0 %v399_v63  ;;  %v463_v63 = vld [vmem:[%s1621_s27 + $0x3e0] sm:$0xff] }
  0x8f   : > { %896 = vmatmul.mubr.f32.gmra.mxu1 %v401_v1  ;;  %675 = vmatprep.mubr.f32.mxu0 %v404_v2  ;;  %v465_v1 = vld [vmem:[%s1621_s27 + $0x3f0] sm:$0xff] }
  0x90   : > { %900 = vmatprep.mubr.f32.mxu1 %v406_v3 }
  0x92   : > { %676 = vmatmul.mubr.f32.gmra.mxu0 %v403_v4 }
  0x93   : > { %901 = vmatmul.mubr.f32.gmra.mxu1 %v405_v5  ;;  %680 = vmatprep.mubr.f32.mxu0 %v408_v6 }
  0x94   : > { %905 = vmatprep.mubr.f32.mxu1 %v410_v7 }
  0x96   : > { %681 = vmatmul.mubr.f32.gmra.mxu0 %v407_v8 }
  0x97   : > { %906 = vmatmul.mubr.f32.gmra.mxu1 %v409_v0  ;;  %685 = vmatprep.mubr.f32.mxu0 %v412_v9 }
  0x98   : > { %910 = vmatprep.mubr.f32.mxu1 %v414_v10 }
  0x9a   : > { %686 = vmatmul.mubr.f32.gmra.mxu0 %v411_v11 }
  0x9b   : > { %911 = vmatmul.mubr.f32.gmra.mxu1 %v413_v12  ;;  %690 = vmatprep.mubr.f32.mxu0 %v416_v13 }
  0x9c   : > { %915 = vmatprep.mubr.f32.mxu1 %v418_v14 }
  0x9e   : > { %691 = vmatmul.mubr.f32.gmra.mxu0 %v415_v15 }
  0x9f   : > { %916 = vmatmul.mubr.f32.gmra.mxu1 %v417_v16  ;;  %695 = vmatprep.mubr.f32.mxu0 %v420_v17 }
  0xa0   : > { %920 = vmatprep.mubr.f32.mxu1 %v422_v18 }
  0xa2   : > { %696 = vmatmul.mubr.f32.gmra.mxu0 %v419_v19 }
  0xa3   : > { %921 = vmatmul.mubr.f32.gmra.mxu1 %v421_v20  ;;  %700 = vmatprep.mubr.f32.mxu0 %v424_v21 }
  0xa4   : > { %925 = vmatprep.mubr.f32.mxu1 %v426_v22 }
  0xa6   : > { %701 = vmatmul.mubr.f32.gmra.mxu0 %v423_v23 }
  0xa7   : > { %926 = vmatmul.mubr.f32.gmra.mxu1 %v425_v24  ;;  %705 = vmatprep.mubr.f32.mxu0 %v428_v25 }
  0xa8   : > { %930 = vmatprep.mubr.f32.mxu1 %v430_v26 }
  0xaa   : > { %706 = vmatmul.mubr.f32.gmra.mxu0 %v427_v27 }
  0xab   : > { %931 = vmatmul.mubr.f32.gmra.mxu1 %v429_v28  ;;  %710 = vmatprep.mubr.f32.mxu0 %v432_v29 }
  0xac   : > { %935 = vmatprep.mubr.f32.mxu1 %v434_v30 }
  0xae   : > { %711 = vmatmul.mubr.f32.gmra.mxu0 %v431_v31 }
  0xaf   : > { %936 = vmatmul.mubr.f32.gmra.mxu1 %v433_v32  ;;  %715 = vmatprep.mubr.f32.mxu0 %v436_v33 }
  0xb0   : > { %940 = vmatprep.mubr.f32.mxu1 %v438_v34 }
  0xb2   : > { %716 = vmatmul.mubr.f32.gmra.mxu0 %v435_v35 }
  0xb3   : > { %941 = vmatmul.mubr.f32.gmra.mxu1 %v437_v36  ;;  %720 = vmatprep.mubr.f32.mxu0 %v440_v37 }
  0xb4   : > { %945 = vmatprep.mubr.f32.mxu1 %v442_v38 }
  0xb6   : > { %721 = vmatmul.mubr.f32.gmra.mxu0 %v439_v39 }
  0xb7   : > { %946 = vmatmul.mubr.f32.gmra.mxu1 %v441_v40  ;;  %725 = vmatprep.mubr.f32.mxu0 %v444_v41 }
  0xb8   : > { %950 = vmatprep.mubr.f32.mxu1 %v446_v42 }
  0xba   : > { %726 = vmatmul.mubr.f32.gmra.mxu0 %v443_v43 }
  0xbb   : > { %951 = vmatmul.mubr.f32.gmra.mxu1 %v445_v44  ;;  %730 = vmatprep.mubr.f32.mxu0 %v448_v45 }
  0xbc   : > { %955 = vmatprep.mubr.f32.mxu1 %v450_v46 }
  0xbe   : > { %731 = vmatmul.mubr.f32.gmra.mxu0 %v447_v47 }
  0xbf   : > { %956 = vmatmul.mubr.f32.gmra.mxu1 %v449_v48  ;;  %735 = vmatprep.mubr.f32.mxu0 %v452_v49 }
  0xc0   : > { %960 = vmatprep.mubr.f32.mxu1 %v454_v50 }
  0xc2   : > { %736 = vmatmul.mubr.f32.gmra.mxu0 %v451_v51 }
  0xc3   : > { %961 = vmatmul.mubr.f32.gmra.mxu1 %v453_v52  ;;  %740 = vmatprep.mubr.f32.mxu0 %v456_v53 }
  0xc4   : > { %965 = vmatprep.mubr.f32.mxu1 %v458_v54 }
  0xc6   : > { %741 = vmatmul.mubr.f32.gmra.mxu0 %v455_v55 }
  0xc7   : > { %966 = vmatmul.mubr.f32.gmra.mxu1 %v457_v56  ;;  %745 = vmatprep.mubr.f32.mxu0 %v460_v57 }
  0xc8   : > { %970 = vmatprep.mubr.f32.mxu1 %v462_v58 }
  0xca   : > { %746 = vmatmul.mubr.f32.gmra.mxu0 %v459_v59 }
  0xcb   : > { %971 = vmatmul.mubr.f32.gmra.mxu1 %v461_v60  ;;  %750 = vmatprep.mubr.f32.mxu0 %v464_v61 }
  0xcc   : > { %975 = vmatprep.mubr.f32.mxu1 %v466_v62 }
  0xce   : > { %751 = vmatmul.mubr.f32.gmra.mxu0 %v463_v63 }
  0xcf   : > { %976 = vmatmul.mubr.f32.gmra.mxu1 %v465_v1 }
 0x112   : > { %v597_v2 = vpop.f32.mrf.mxu0 }
 0x113   : > { %v822_v3 = vpop.f32.mrf.mxu1 }
 0x114   : > { %v823_v4 = vadd.f32 %v822_v3, %v597_v2  ;;  %v599_v5 = vpop.f32.mrf.mxu0 }
 0x115   : > { %v824_v6 = vpop.f32.mrf.mxu1 }
 0x116   : > { %1335 = vtanh.f32 %v823_v4  ;;  %v602_v7 = vpop.f32.mrf.mxu0 }
 0x117   : > { %v827_v8 = vpop.f32.mrf.mxu1 }
 0x118   : > { %v828_v0 = vadd.f32 %v827_v8, %v602_v7  ;;  %v604_v9 = vpop.f32.mrf.mxu0 }
 0x119   : > { %v829_v10 = vpop.f32.mrf.mxu1 }
 0x11a   : > { %1337 = vtanh.f32 %v828_v0  ;;  %v607_v11 = vpop.f32.mrf.mxu0 }
 0x11b   : > { %v832_v12 = vpop.f32.mrf.mxu1 }
 0x11c   : > { %v833_v13 = vadd.f32 %v832_v12, %v607_v11  ;;  %v609_v14 = vpop.f32.mrf.mxu0 }
 0x11d   : > { %v834_v15 = vpop.f32.mrf.mxu1 }
 0x11e   : > { %1339 = vtanh.f32 %v833_v13  ;;  %v612_v16 = vpop.f32.mrf.mxu0 }
 0x11f   : > { %v837_v17 = vpop.f32.mrf.mxu1 }
 0x120   : > { %v838_v18 = vadd.f32 %v837_v17, %v612_v16  ;;  %v614_v19 = vpop.f32.mrf.mxu0 }
 0x121   : > { %v839_v20 = vpop.f32.mrf.mxu1 }
 0x122   : > { %1341 = vtanh.f32 %v838_v18  ;;  %v617_v22 = vpop.f32.mrf.mxu0 }
 0x123   : > { %v1336_v21 = vpop.eup %1335  ;;  %v842_v23 = vpop.f32.mrf.mxu1 }
 0x124   : > { %1112 = vst [vmem:[%s1766_s5] sm:$0xff] %v1336_v21  ;;  %v843_v24 = vadd.f32 %v842_v23, %v617_v22  ;;  %v619_v25 = vpop.f32.mrf.mxu0 }
 0x125   : > { %v844_v26 = vpop.f32.mrf.mxu1 }
 0x126   : > { %1343 = vtanh.f32 %v843_v24  ;;  %v622_v28 = vpop.f32.mrf.mxu0 }
 0x127   : > { %v1338_v27 = vpop.eup %1337  ;;  %v847_v29 = vpop.f32.mrf.mxu1 }
 0x128   : > { %1113 = vst [vmem:[%s1766_s5 + $0x8] sm:$0xff] %v1338_v27  ;;  %v848_v30 = vadd.f32 %v847_v29, %v622_v28  ;;  %v624_v31 = vpop.f32.mrf.mxu0 }
 0x129   : > { %v849_v32 = vpop.f32.mrf.mxu1 }
 0x12a   : > { %1345 = vtanh.f32 %v848_v30  ;;  %v627_v34 = vpop.f32.mrf.mxu0 }
 0x12b   : > { %v1340_v33 = vpop.eup %1339  ;;  %v852_v35 = vpop.f32.mrf.mxu1 }
 0x12c   : > { %1114 = vst [vmem:[%s1766_s5 + $0x10] sm:$0xff] %v1340_v33  ;;  %v853_v36 = vadd.f32 %v852_v35, %v627_v34  ;;  %v629_v37 = vpop.f32.mrf.mxu0 }
 0x12d   : > { %v854_v38 = vpop.f32.mrf.mxu1 }
 0x12e   : > { %1347 = vtanh.f32 %v853_v36  ;;  %v632_v40 = vpop.f32.mrf.mxu0 }
 0x12f   : > { %v1342_v39 = vpop.eup %1341  ;;  %v857_v41 = vpop.f32.mrf.mxu1 }
 0x130   : > { %1115 = vst [vmem:[%s1766_s5 + $0x18] sm:$0xff] %v1342_v39  ;;  %v858_v42 = vadd.f32 %v857_v41, %v632_v40  ;;  %v634_v43 = vpop.f32.mrf.mxu0 }
 0x131   : > { %v859_v44 = vpop.f32.mrf.mxu1 }
 0x132   : > { %1349 = vtanh.f32 %v858_v42  ;;  %v637_v46 = vpop.f32.mrf.mxu0 }
 0x133   : > { %v1344_v45 = vpop.eup %1343  ;;  %v862_v47 = vpop.f32.mrf.mxu1 }
 0x134   : > { %1116 = vst [vmem:[%s1766_s5 + $0x20] sm:$0xff] %v1344_v45  ;;  %v863_v48 = vadd.f32 %v862_v47, %v637_v46  ;;  %v639_v49 = vpop.f32.mrf.mxu0 }
 0x135   : > { %v864_v50 = vpop.f32.mrf.mxu1 }
 0x136   : > { %1351 = vtanh.f32 %v863_v48  ;;  %v642_v52 = vpop.f32.mrf.mxu0 }
 0x137   : > { %v1346_v51 = vpop.eup %1345  ;;  %v867_v53 = vpop.f32.mrf.mxu1 }
 0x138   : > { %1117 = vst [vmem:[%s1766_s5 + $0x28] sm:$0xff] %v1346_v51  ;;  %v868_v54 = vadd.f32 %v867_v53, %v642_v52  ;;  %v644_v55 = vpop.f32.mrf.mxu0 }
 0x139   : > { %v869_v56 = vpop.f32.mrf.mxu1 }
 0x13a   : > { %1353 = vtanh.f32 %v868_v54  ;;  %v647_v58 = vpop.f32.mrf.mxu0 }
 0x13b   : > { %v1348_v57 = vpop.eup %1347  ;;  %v872_v59 = vpop.f32.mrf.mxu1 }
 0x13c   : > { %1118 = vst [vmem:[%s1766_s5 + $0x30] sm:$0xff] %v1348_v57  ;;  %v873_v60 = vadd.f32 %v872_v59, %v647_v58  ;;  %v649_v61 = vpop.f32.mrf.mxu0 }
 0x13d   : > { %v874_v62 = vpop.f32.mrf.mxu1 }
 0x13e   : > { %1355 = vtanh.f32 %v873_v60  ;;  %v652_v1 = vpop.f32.mrf.mxu0 }
 0x13f   : > { %v1350_v63 = vpop.eup %1349  ;;  %v877_v2 = vpop.f32.mrf.mxu1 }
 0x140   : > { %1119 = vst [vmem:[%s1766_s5 + $0x38] sm:$0xff] %v1350_v63  ;;  %v878_v3 = vadd.f32 %v877_v2, %v652_v1  ;;  %v654_v4 = vpop.f32.mrf.mxu0 }
 0x141   : > { %v879_v5 = vpop.f32.mrf.mxu1 }
 0x142   : > { %1357 = vtanh.f32 %v878_v3  ;;  %v657_v7 = vpop.f32.mrf.mxu0 }
 0x143   : > { %v1352_v6 = vpop.eup %1351  ;;  %v882_v8 = vpop.f32.mrf.mxu1 }
 0x144   : > { %1120 = vst [vmem:[%s1766_s5 + $0x40] sm:$0xff] %v1352_v6  ;;  %v883_v0 = vadd.f32 %v882_v8, %v657_v7  ;;  %v659_v9 = vpop.f32.mrf.mxu0 }
 0x145   : > { %v884_v10 = vpop.f32.mrf.mxu1 }
 0x146   : > { %1359 = vtanh.f32 %v883_v0  ;;  %v662_v12 = vpop.f32.mrf.mxu0 }
 0x147   : > { %v1354_v11 = vpop.eup %1353  ;;  %v887_v13 = vpop.f32.mrf.mxu1 }
 0x148   : > { %1121 = vst [vmem:[%s1766_s5 + $0x48] sm:$0xff] %v1354_v11  ;;  %v888_v14 = vadd.f32 %v887_v13, %v662_v12  ;;  %v664_v15 = vpop.f32.mrf.mxu0 }
 0x149   : > { %v889_v16 = vpop.f32.mrf.mxu1 }
 0x14a   : > { %1361 = vtanh.f32 %v888_v14  ;;  %v667_v18 = vpop.f32.mrf.mxu0 }
 0x14b   : > { %v1356_v17 = vpop.eup %1355  ;;  %v892_v19 = vpop.f32.mrf.mxu1 }
 0x14c   : > { %1122 = vst [vmem:[%s1766_s5 + $0x50] sm:$0xff] %v1356_v17  ;;  %v893_v20 = vadd.f32 %v892_v19, %v667_v18  ;;  %v669_v21 = vpop.f32.mrf.mxu0 }
 0x14d   : > { %v894_v22 = vpop.f32.mrf.mxu1 }
 0x14e   : > { %1363 = vtanh.f32 %v893_v20  ;;  %v672_v24 = vpop.f32.mrf.mxu0 }
 0x14f   : > { %v1358_v23 = vpop.eup %1357  ;;  %v897_v25 = vpop.f32.mrf.mxu1 }
 0x150   : > { %1123 = vst [vmem:[%s1766_s5 + $0x58] sm:$0xff] %v1358_v23  ;;  %v898_v26 = vadd.f32 %v897_v25, %v672_v24  ;;  %v674_v27 = vpop.f32.mrf.mxu0 }
 0x151   : > { %v899_v28 = vpop.f32.mrf.mxu1 }
 0x152   : > { %1365 = vtanh.f32 %v898_v26  ;;  %v677_v30 = vpop.f32.mrf.mxu0 }
 0x153   : > { %v1360_v29 = vpop.eup %1359  ;;  %v902_v31 = vpop.f32.mrf.mxu1 }
 0x154   : > { %1124 = vst [vmem:[%s1766_s5 + $0x60] sm:$0xff] %v1360_v29  ;;  %v903_v32 = vadd.f32 %v902_v31, %v677_v30  ;;  %v679_v33 = vpop.f32.mrf.mxu0 }
 0x155   : > { %v904_v34 = vpop.f32.mrf.mxu1 }
 0x156   : > { %1367 = vtanh.f32 %v903_v32  ;;  %v682_v36 = vpop.f32.mrf.mxu0 }
 0x157   : > { %v1362_v35 = vpop.eup %1361  ;;  %v907_v37 = vpop.f32.mrf.mxu1 }
 0x158   : > { %1125 = vst [vmem:[%s1766_s5 + $0x68] sm:$0xff] %v1362_v35  ;;  %v908_v38 = vadd.f32 %v907_v37, %v682_v36  ;;  %v684_v39 = vpop.f32.mrf.mxu0 }
 0x159   : > { %v909_v40 = vpop.f32.mrf.mxu1 }
 0x15a   : > { %1369 = vtanh.f32 %v908_v38  ;;  %v687_v42 = vpop.f32.mrf.mxu0 }
 0x15b   : > { %v1364_v41 = vpop.eup %1363  ;;  %v912_v43 = vpop.f32.mrf.mxu1 }
 0x15c   : > { %1126 = vst [vmem:[%s1766_s5 + $0x70] sm:$0xff] %v1364_v41  ;;  %v913_v44 = vadd.f32 %v912_v43, %v687_v42  ;;  %v689_v45 = vpop.f32.mrf.mxu0 }
 0x15d   : > { %v914_v46 = vpop.f32.mrf.mxu1 }
 0x15e   : > { %1371 = vtanh.f32 %v913_v44  ;;  %v692_v48 = vpop.f32.mrf.mxu0 }
 0x15f   : > { %v1366_v47 = vpop.eup %1365  ;;  %v917_v49 = vpop.f32.mrf.mxu1 }
 0x160   : > { %1127 = vst [vmem:[%s1766_s5 + $0x78] sm:$0xff] %v1366_v47  ;;  %v918_v50 = vadd.f32 %v917_v49, %v692_v48  ;;  %v694_v51 = vpop.f32.mrf.mxu0 }
 0x161   : > { %v919_v52 = vpop.f32.mrf.mxu1 }
 0x162   : > { %1373 = vtanh.f32 %v918_v50  ;;  %v697_v54 = vpop.f32.mrf.mxu0 }
 0x163   : > { %v1368_v53 = vpop.eup %1367  ;;  %v922_v55 = vpop.f32.mrf.mxu1 }
 0x164   : > { %1128 = vst [vmem:[%s1766_s5 + $0x80] sm:$0xff] %v1368_v53  ;;  %v923_v56 = vadd.f32 %v922_v55, %v697_v54  ;;  %v699_v57 = vpop.f32.mrf.mxu0 }
 0x165   : > { %v924_v58 = vpop.f32.mrf.mxu1 }
 0x166   : > { %1375 = vtanh.f32 %v923_v56  ;;  %v702_v60 = vpop.f32.mrf.mxu0 }
 0x167   : > { %v1370_v59 = vpop.eup %1369  ;;  %v927_v61 = vpop.f32.mrf.mxu1 }
 0x168   : > { %1129 = vst [vmem:[%s1766_s5 + $0x88] sm:$0xff] %v1370_v59  ;;  %v928_v62 = vadd.f32 %v927_v61, %v702_v60  ;;  %v704_v63 = vpop.f32.mrf.mxu0 }
 0x169   : > { %v929_v1 = vpop.f32.mrf.mxu1 }
 0x16a   : > { %1377 = vtanh.f32 %v928_v62  ;;  %v707_v3 = vpop.f32.mrf.mxu0 }
 0x16b   : > { %v1372_v2 = vpop.eup %1371  ;;  %v932_v4 = vpop.f32.mrf.mxu1 }
 0x16c   : > { %1130 = vst [vmem:[%s1766_s5 + $0x90] sm:$0xff] %v1372_v2  ;;  %v933_v5 = vadd.f32 %v932_v4, %v707_v3  ;;  %v709_v6 = vpop.f32.mrf.mxu0 }
 0x16d   : > { %v934_v7 = vpop.f32.mrf.mxu1 }
 0x16e   : > { %1379 = vtanh.f32 %v933_v5  ;;  %v712_v0 = vpop.f32.mrf.mxu0 }
 0x16f   : > { %v1374_v8 = vpop.eup %1373  ;;  %v937_v9 = vpop.f32.mrf.mxu1 }
 0x170   : > { %1131 = vst [vmem:[%s1766_s5 + $0x98] sm:$0xff] %v1374_v8  ;;  %v938_v10 = vadd.f32 %v937_v9, %v712_v0  ;;  %v714_v11 = vpop.f32.mrf.mxu0 }
 0x171   : > { %v939_v12 = vpop.f32.mrf.mxu1 }
 0x172   : > { %1381 = vtanh.f32 %v938_v10  ;;  %v717_v14 = vpop.f32.mrf.mxu0 }
 0x173   : > { %v1376_v13 = vpop.eup %1375  ;;  %v942_v15 = vpop.f32.mrf.mxu1 }
 0x174   : > { %1132 = vst [vmem:[%s1766_s5 + $0xa0] sm:$0xff] %v1376_v13  ;;  %v943_v16 = vadd.f32 %v942_v15, %v717_v14  ;;  %v719_v17 = vpop.f32.mrf.mxu0 }
 0x175   : > { %v944_v18 = vpop.f32.mrf.mxu1 }
 0x176   : > { %1383 = vtanh.f32 %v943_v16  ;;  %v722_v20 = vpop.f32.mrf.mxu0 }
 0x177   : > { %v1378_v19 = vpop.eup %1377  ;;  %v947_v21 = vpop.f32.mrf.mxu1 }
 0x178   : > { %1133 = vst [vmem:[%s1766_s5 + $0xa8] sm:$0xff] %v1378_v19  ;;  %v948_v22 = vadd.f32 %v947_v21, %v722_v20  ;;  %v724_v23 = vpop.f32.mrf.mxu0 }
 0x179   : > { %v949_v24 = vpop.f32.mrf.mxu1 }
 0x17a   : > { %1385 = vtanh.f32 %v948_v22  ;;  %v727_v26 = vpop.f32.mrf.mxu0 }
 0x17b   : > { %v1380_v25 = vpop.eup %1379  ;;  %v952_v27 = vpop.f32.mrf.mxu1 }
 0x17c   : > { %1134 = vst [vmem:[%s1766_s5 + $0xb0] sm:$0xff] %v1380_v25  ;;  %v953_v28 = vadd.f32 %v952_v27, %v727_v26  ;;  %v729_v29 = vpop.f32.mrf.mxu0 }
 0x17d   : > { %v954_v30 = vpop.f32.mrf.mxu1 }
 0x17e   : > { %1387 = vtanh.f32 %v953_v28  ;;  %v732_v32 = vpop.f32.mrf.mxu0 }
 0x17f   : > { %v1382_v31 = vpop.eup %1381  ;;  %v957_v33 = vpop.f32.mrf.mxu1 }
 0x180   : > { %1135 = vst [vmem:[%s1766_s5 + $0xb8] sm:$0xff] %v1382_v31  ;;  %v958_v34 = vadd.f32 %v957_v33, %v732_v32  ;;  %v734_v35 = vpop.f32.mrf.mxu0 }
 0x181   : > { %v959_v36 = vpop.f32.mrf.mxu1 }
 0x182   : > { %1389 = vtanh.f32 %v958_v34  ;;  %v737_v38 = vpop.f32.mrf.mxu0 }
 0x183   : > { %v1384_v37 = vpop.eup %1383  ;;  %v962_v39 = vpop.f32.mrf.mxu1 }
 0x184   : > { %1136 = vst [vmem:[%s1766_s5 + $0xc0] sm:$0xff] %v1384_v37  ;;  %v963_v40 = vadd.f32 %v962_v39, %v737_v38  ;;  %v739_v41 = vpop.f32.mrf.mxu0 }
 0x185   : > { %v964_v42 = vpop.f32.mrf.mxu1 }
 0x186   : > { %1391 = vtanh.f32 %v963_v40  ;;  %v742_v44 = vpop.f32.mrf.mxu0 }
 0x187   : > { %v1386_v43 = vpop.eup %1385  ;;  %v967_v45 = vpop.f32.mrf.mxu1 }
 0x188   : > { %1137 = vst [vmem:[%s1766_s5 + $0xc8] sm:$0xff] %v1386_v43  ;;  %v968_v46 = vadd.f32 %v967_v45, %v742_v44  ;;  %v744_v47 = vpop.f32.mrf.mxu0 }
 0x189   : > { %v969_v48 = vpop.f32.mrf.mxu1 }
 0x18a   : > { %1393 = vtanh.f32 %v968_v46  ;;  %v747_v50 = vpop.f32.mrf.mxu0 }
 0x18b   : > { %v1388_v49 = vpop.eup %1387  ;;  %v972_v51 = vpop.f32.mrf.mxu1 }
 0x18c   : > { %1138 = vst [vmem:[%s1766_s5 + $0xd0] sm:$0xff] %v1388_v49  ;;  %v973_v52 = vadd.f32 %v972_v51, %v747_v50  ;;  %v749_v53 = vpop.f32.mrf.mxu0 }
 0x18d   : > { %v974_v54 = vpop.f32.mrf.mxu1 }
 0x18e   : > { %1395 = vtanh.f32 %v973_v52  ;;  %v752_v56 = vpop.f32.mrf.mxu0 }
 0x18f   : > { %v1390_v55 = vpop.eup %1389  ;;  %v977_v57 = vpop.f32.mrf.mxu1 }
 0x190   : > { %1139 = vst [vmem:[%s1766_s5 + $0xd8] sm:$0xff] %v1390_v55  ;;  %v978_v58 = vadd.f32 %v977_v57, %v752_v56  ;;  %v754_v59 = vpop.f32.mrf.mxu0 }
 0x191   : > { %v979_v60 = vpop.f32.mrf.mxu1 }
 0x192   : > { %1397 = vtanh.f32 %v978_v58 }
 0x193   : > { %v1392_v61 = vpop.eup %1391 }
 0x194   : > { %1140 = vst [vmem:[%s1766_s5 + $0xe0] sm:$0xff] %v1392_v61 }
 0x197   : > { %v1394_v62 = vpop.eup %1393 }
 0x198   : > { %1141 = vst [vmem:[%s1766_s5 + $0xe8] sm:$0xff] %v1394_v62 }
 0x19b   : > { %v1396_v63 = vpop.eup %1395 }
 0x19c   : > { %1142 = vst [vmem:[%s1766_s5 + $0xf0] sm:$0xff] %v1396_v63 }
 0x19f   : > { %v1398_v1 = vpop.eup %1397 }
 0x1a0   : > { %1143 = vst [vmem:[%s1766_s5 + $0xf8] sm:$0xff] %v1398_v1 }
 0x1a1 PF: > { %s12_s13 = sadd.s32 1, %s1437_s13   ;;  %s1818_s9 = smov %s1429_s11 }
 0x1a2   : > { %p9_p7 = scmp.ge.s32.totalorder %s12_s13, 34   ;;  %s1819_s10 = smov %s1433_s12 }
 0x1a3   : > { %s1820_s11 = smov %s1823_s14  ;;  %s1821_s12 = smov %s1827_s15 }
 0x1a4   :  { %11 = sbr.rel (!%p9_p7) target bundleno = 3 (0x3), region = 69 }

</bundles_post_ra>
